<compile_context>
chip_gen: v7x
topology: tpu7x:2x2x1
jax: 0.10.0
libtpu: 0.0.40
codegen_flags: <defaults>
</compile_context>

<pallas_src>
import functools
import math

import jax
import jax.numpy as jnp
from jax import lax
from jax.experimental import pallas as pl
from jax.experimental.pallas import tpu as pltpu


# =============================================================================
# Fused per-image Block kernel
# =============================================================================
def _block_kernel(
    x_ref, s_ref,
    n1s_ref, n1b_ref,
    mca_ref, mcb_ref, mcc_ref,
    cse1w_ref, cse1b_ref, cse2w_ref, cse2b_ref,
    fc1w_ref, fc1b_ref,
    fkw_ref, fkb_ref, fvw_ref, fvb_ref,
    msamw_ref, msamb_ref,
    qc3w_ref, qc3b_ref,
    fupw_ref, fupb_ref,
    fusew_ref, fuseb_ref,
    c1cw_ref, c1sw_ref, c1b_ref,
    w1_ref, b1_ref, w2_ref, b2_ref,
    o_ref,
    halo_ref,
    *, H, W, C, K, M, pad, scale, inv_hw):
  HW = H * W
  f32 = jnp.float32
  bf16 = jnp.bfloat16

  def relu6(v):
    return jnp.minimum(jnp.maximum(v, 0.0), 6.0)

  def sigmoid(v):
    return 1.0 / (1.0 + jnp.exp(-v))

  # Column-boundary masks for the dx = -1 / +1 taps, built once (hoisted).
  colid = lax.broadcasted_iota(jnp.int32, (H, W, C), 1).reshape(HW, C)
  mask_m = colid >= 1          # neighbour at w-1 exists
  mask_p = colid <= (W - 2)    # neighbour at w+1 exists

  # Zero the halo rows once; the interior is fully rewritten by every conv.
  halo_ref[0:pad, :] = jnp.zeros((pad, C), f32)
  halo_ref[pad + HW:2 * pad + HW, :] = jnp.zeros((pad, C), f32)

  def conv3x3(x_flat, w_ref, b_ref):
    """Same-padding 3x3 conv: stage once, 9 shifted reads -> bf16 MXU dots."""
    halo_ref[pad:pad + HW, :] = x_flat
    out = None
    tap = 0
    for dy in (-1, 0, 1):
      for dx in (-1, 0, 1):
        start = pad + dy * W + dx
        patch = halo_ref[start:start + HW, :]
        if dx == -1:
          patch = jnp.where(mask_m, patch, 0.0)
        elif dx == 1:
          patch = jnp.where(mask_p, patch, 0.0)
        d = jnp.dot(patch.astype(bf16), w_ref[tap * C:(tap + 1) * C, :],
                    preferred_element_type=f32)
        out = d if out is None else out + d
        tap += 1
    return out + b_ref[...]

  # ---------------- norm1(x) + norm1(skip)  (BN folded) ----------------
  x = x_ref[0]                                                  # (HW, C)
  z = (x + s_ref[0]) * n1s_ref[...] + n1b_ref[...]              # (HW, C)

  # ======================= MCAM (channel attention) =======================
  y_avg = jnp.sum(z, axis=0, keepdims=True) * inv_hw            # (1, C)
  y_max = jnp.max(z, axis=0, keepdims=True)                     # (1, C)
  # conv1d x4 (avg & max) + conv1d(k=3) + fc, all folded into A / B / c.
  y_lin = (jnp.dot(y_avg, mca_ref[...], preferred_element_type=f32)
           + jnp.dot(y_max, mcb_ref[...], preferred_element_type=f32)
           + mcc_ref[...])
  y_sig = sigmoid(y_lin)                                        # (1, C)

  h_cse = jnp.maximum(
      jnp.dot(y_sig, cse1w_ref[...], preferred_element_type=f32)
      + cse1b_ref[...], 0.0)
  y1 = sigmoid(jnp.dot(h_cse, cse2w_ref[...], preferred_element_type=f32)
               + cse2b_ref[...])                                # (1, M)
  t_lin = (jnp.dot(y_sig, fc1w_ref[...], preferred_element_type=f32)
           + fc1b_ref[...])
  t_e = jnp.exp(t_lin - jnp.max(t_lin, axis=-1, keepdims=True))
  t_sm = t_e / jnp.sum(t_e, axis=-1, keepdims=True)             # softmax over M
  class_feat = t_sm + y1                                        # (1, M)

  # cmT[m, c] = y_sig[c] * class_feat[m]   (class matrix, transposed).
  cf_b = jnp.broadcast_to(class_feat, (M, M))
  rid = lax.broadcasted_iota(jnp.int32, (M, M), 0)
  cid = lax.broadcasted_iota(jnp.int32, (M, M), 1)
  cf_col = jnp.sum(jnp.where(rid == cid, cf_b, 0.0),
                   axis=1, keepdims=True)                       # (M, 1)
  cmT = cf_col * y_sig                                          # (M, C)
  # torch: softmax over channels (dim=1) first, then over classes (dim=2).
  e1 = jnp.exp(cmT - jnp.max(cmT, axis=1, keepdims=True))
  cm1 = e1 * pl.reciprocal(jnp.sum(e1, axis=1, keepdims=True), approx=True)
  e2 = jnp.exp(cm1 - jnp.max(cm1, axis=0, keepdims=True))
  cm2 = e2 * pl.reciprocal(jnp.sum(e2, axis=0, keepdims=True), approx=True)

  key_mk = relu6(jnp.dot(cm2, fkw_ref[...], preferred_element_type=f32)
                 + fkb_ref[...])                                # (M, K)
  val_mk = relu6(jnp.dot(cm2, fvw_ref[...], preferred_element_type=f32)
                 + fvb_ref[...])                                # (M, K)

  # ======================= MSAM (spatial attention) =======================
  z3 = z.reshape(H, W, C)
  x_h = jnp.mean(z3, axis=0, keepdims=True)                     # (1, W, C)
  x_w = jnp.mean(z3, axis=1, keepdims=True)                     # (H, 1, C)
  qk = x_w * x_h                                                # (H, W, C)
  mmax = jnp.max(jnp.max(qk, axis=1, keepdims=True), axis=0, keepdims=True)
  eqk = jnp.exp(qk - mmax)
  den = jnp.sum(jnp.sum(eqk, axis=1, keepdims=True), axis=0, keepdims=True)
  zm = (z3 * (eqk * pl.reciprocal(den, approx=True)) + z3).reshape(HW, C)

  s_attn = relu6(conv3x3(zm, msamw_ref, msamb_ref))             # (HW, C)

  # ======================= CIAFM =======================
  # f_query and the conv3x3 (space) branch share staged patches (merged W).
  qs_act = relu6(conv3x3(s_attn, qc3w_ref, qc3b_ref))           # (HW, K+C)
  q = qs_act[:, :K]                                             # (HW, K)

  s_qk = lax.dot_general(q, key_mk, (((1,), (1,)), ((), ())),
                         preferred_element_type=f32) * scale    # (HW, M)
  e_a = jnp.exp(s_qk - jnp.max(s_qk, axis=0, keepdims=True))    # softmax over HW
  p_attn = e_a * pl.reciprocal(jnp.sum(e_a, axis=0, keepdims=True), approx=True)
  ctx = jnp.dot(p_attn, val_mk, preferred_element_type=f32)     # (HW, K)
  ctx = relu6(jnp.dot(ctx, fupw_ref[...], preferred_element_type=f32)
              + fupb_ref[...])                                  # (HW, C)

  fused = relu6(conv3x3(ctx + s_attn, fusew_ref, fuseb_ref))    # (HW, C)

  # conv1x1 on cat([context, space]): split weights, zero rows over the q part.
  attn_out = relu6(jnp.dot(fused, c1cw_ref[...], preferred_element_type=f32)
                   + jnp.dot(qs_act, c1sw_ref[...], preferred_element_type=f32)
                   + c1b_ref[...])                              # (HW, C)

  # ============ Block residuals + Mlp (norm2 folded into fc1) ============
  x2 = x + attn_out
  hmid = relu6(jnp.dot(x2, w1_ref[...], preferred_element_type=f32)
               + b1_ref[...])
  mlp = jnp.dot(hmid, w2_ref[...], preferred_element_type=f32) + b2_ref[...]
  o_ref[...] = (x2 + mlp).reshape(1, HW, C).astype(o_ref.dtype)


# =============================================================================
# Deterministic parameter construction (BN + MCAM conv1d chain folded, eval)
# =============================================================================
def make_params(key, C, classes):
  K = C // 2
  hidden = 4 * C
  keys = iter(jax.random.split(key, 48))
  nk = lambda: next(keys)

  def bn_affine(k, ch):
    k1, k2, k3, k4 = jax.random.split(k, 4)
    gamma = 1.0 + 0.1 * jax.random.normal(k1, (ch,), jnp.float32)
    beta = 0.1 * jax.random.normal(k2, (ch,), jnp.float32)
    mean = 0.05 * jax.random.normal(k3, (ch,), jnp.float32)
    var = 1.0 + 0.1 * jnp.abs(jax.random.normal(k4, (ch,), jnp.float32))
    scl = gamma / jnp.sqrt(var + 1e-5)
    return scl, beta - mean * scl

  def conv_bn(k, cin, cout, ksize):
    k1, k2 = jax.random.split(k)
    w = jax.random.normal(k1, (cout, cin, ksize, ksize), jnp.float32)
    w = w / math.sqrt(cin * ksize * ksize)
    scl, bias = bn_affine(k2, cout)
    wf = w * scl[:, None, None, None]
    if ksize == 1:
      wm = wf[:, :, 0, 0].T                                     # (cin, cout)
    else:  # rows ordered (ky, kx, cin) -- matches in-kernel tap ordering
      wm = jnp.transpose(wf, (2, 3, 1, 0)).reshape(ksize * ksize * cin, cout)
    return wm, bias

  def dense(k, cin, cout):
    k1, k2 = jax.random.split(k)
    w = jax.random.normal(k1, (cin, cout), jnp.float32) / math.sqrt(cin)
    b = 0.02 * jax.random.normal(k2, (cout,), jnp.float32)
    return w, b

  p = {}
  n1_scale, n1_bias = bn_affine(nk(), C)
  n2_scale, n2_bias = bn_affine(nk(), C)
  p["n1s"] = n1_scale.reshape(1, C)
  p["n1b2"] = (2.0 * n1_bias).reshape(1, C)

  # --- MCAM raw params ---
  t = int(abs((math.log(C, 2) + 1) / 2))
  kk = t if t % 2 else t + 1
  r = math.log(kk - 1, 2)
  ksizes = [int(2 ** (r + i) + 1) for i in range(4)]
  c1d_w, c1d_b = [], []
  for kz in ksizes:
    k1, k2 = jax.random.split(nk())
    c1d_w.append(jax.random.normal(k1, (kz,), jnp.float32) / math.sqrt(kz))
    c1d_b.append(0.02 * jax.random.normal(k2, (1,), jnp.float32))
  k1, k2 = jax.random.split(nk())
  cv_w = jax.random.normal(k1, (3,), jnp.float32) / math.sqrt(3)
  cv_b = 0.02 * jax.random.normal(k2, (1,), jnp.float32)
  fc_w, fc_b = dense(nk(), 8 * C, C)

  # Fold the (linear) conv1d x4 -> concat -> conv1d(k=3) -> fc chain:
  #   y = y_avg @ A + y_max @ B + c
  def toeplitz(w, n):
    pd = (w.shape[0] - 1) // 2
    T = jnp.zeros((n, n), jnp.float32)
    for j in range(w.shape[0]):
      T = T + w[j] * jnp.eye(n, k=-(j - pd), dtype=jnp.float32)
    return T

  Ts = [toeplitz(w, C) for w in c1d_w]
  G = toeplitz(cv_w, 8 * C) @ fc_w                              # (8C, C)
  A = sum(Ts[i] @ G[i * C:(i + 1) * C] for i in range(4))
  Bm = sum(Ts[i] @ G[(4 + i) * C:(5 + i) * C] for i in range(4))
  ones_c = jnp.ones((1, C), jnp.float32)
  cvec = sum(c1d_b[i][0] * (ones_c @ (G[i * C:(i + 1) * C]
                                      + G[(4 + i) * C:(5 + i) * C]))
             for i in range(4))
  cvec = cvec + cv_b[0] * (jnp.ones((1, 8 * C), jnp.float32) @ fc_w) \
              + fc_b.reshape(1, C)
  p["mcam_A"], p["mcam_B"], p["mcam_c"] = A, Bm, cvec

  cse1_w, cse1_b = dense(nk(), C, C // 4)
  cse2_w, cse2_b = dense(nk(), C // 4, classes)
  fc1_w, fc1_b = conv_bn(nk(), C, classes, 1)
  p["cse1_w"], p["cse1_b"] = cse1_w, cse1_b.reshape(1, C // 4)
  p["cse2_w"], p["cse2_b"] = cse2_w, cse2_b.reshape(1, classes)
  p["fc1_w"], p["fc1_b"] = fc1_w, fc1_b.reshape(1, classes)

  # --- MSAM ---
  msam_w, msam_b = conv_bn(nk(), C, C, 3)
  p["msam_w"] = msam_w.astype(jnp.bfloat16)
  p["msam_b"] = msam_b.reshape(1, C)

  # --- CIAFM ---
  fq_w, fq_b = conv_bn(nk(), C, K, 3)
  fk_w, fk_b = conv_bn(nk(), C, K, 1)
  fv_w, fv_b = conv_bn(nk(), C, K, 1)
  fup_w, fup_b = conv_bn(nk(), K, C, 1)
  fuse_w, fuse_b = conv_bn(nk(), C, C, 3)
  c3_w, c3_b = conv_bn(nk(), C, C, 3)
  c1_w, c1_b = conv_bn(nk(), 2 * C, C, 1)
  p["qc3_w"] = jnp.concatenate([fq_w, c3_w], axis=1).astype(jnp.bfloat16)
  p["qc3_b"] = jnp.concatenate([fq_b, c3_b]).reshape(1, K + C)
  p["fk_w"], p["fk_b"] = fk_w, fk_b.reshape(1, K)
  p["fv_w"], p["fv_b"] = fv_w, fv_b.reshape(1, K)
  p["fup_w"], p["fup_b"] = fup_w, fup_b.reshape(1, C)
  p["fuse_w"] = fuse_w.astype(jnp.bfloat16)
  p["fuse_b"] = fuse_b.reshape(1, C)
  p["c1_ctx_w"] = c1_w[:C]
  p["c1_space_w"] = jnp.concatenate(
      [jnp.zeros((K, C), jnp.float32), c1_w[C:]], axis=0)       # (K+C, C)
  p["c1_b"] = c1_b.reshape(1, C)

  # --- Mlp (norm2 folded into fc1) ---
  w1, b1 = dense(nk(), C, hidden)
  p["mlp_w1"] = n2_scale[:, None] * w1
  p["mlp_b1"] = (n2_bias @ w1 + b1).reshape(1, hidden)
  w2, b2 = dense(nk(), hidden, C)
  p["mlp_w2"], p["mlp_b2"] = w2, b2.reshape(1, C)
  return p


# =============================================================================
# Block forward (NCHW in/out, flattened channels-last internally)
# =============================================================================
def block_forward(p, x_nchw, skip_nchw):
  B, C, H, W = x_nchw.shape
  HW = H * W
  K = C // 2
  M = p["cse2_w"].shape[-1]
  pad = max(8, -(-(W + 1) // 8) * 8)          # halo rows (>= W+1, multiple of 8)

  xf = jnp.transpose(x_nchw, (0, 2, 3, 1)).reshape(B, HW, C).astype(jnp.float32)
  sf = jnp.transpose(skip_nchw, (0, 2, 3, 1)).reshape(B, HW, C).astype(jnp.float32)

  consts = [
      p["n1s"], p["n1b2"],
      p["mcam_A"], p["mcam_B"], p["mcam_c"],
      p["cse1_w"], p["cse1_b"], p["cse2_w"], p["cse2_b"],
      p["fc1_w"], p["fc1_b"],
      p["fk_w"], p["fk_b"], p["fv_w"], p["fv_b"],
      p["msam_w"], p["msam_b"],
      p["qc3_w"], p["qc3_b"],
      p["fup_w"], p["fup_b"],
      p["fuse_w"], p["fuse_b"],
      p["c1_ctx_w"], p["c1_space_w"], p["c1_b"],
      p["mlp_w1"], p["mlp_b1"], p["mlp_w2"], p["mlp_b2"],
  ]

  batch3 = pl.BlockSpec((1, HW, C), lambda b: (b, 0, 0))
  in_specs = [batch3, batch3] + [pl.BlockSpec(c.shape, lambda b: (0, 0))
                                 for c in consts]

  out = pl.pallas_call(
      functools.partial(_block_kernel, H=H, W=W, C=C, K=K, M=M, pad=pad,
                        scale=1.0 / math.sqrt(K), inv_hw=1.0 / HW),
      grid=(B,),
      in_specs=in_specs,
      out_specs=batch3,
      out_shape=jax.ShapeDtypeStruct((B, HW, C), jnp.float32),
      scratch_shapes=[pltpu.VMEM((HW + 2 * pad, C), jnp.float32)],
      compiler_params=pltpu.CompilerParams(dimension_semantics=("parallel",)),
  )(xf, sf, *consts)

  return jnp.transpose(out.reshape(B, H, W, C), (0, 3, 1, 2))   # back to NCHW


# =============================================================================
if __name__ == "__main__":
  B, C, H, W = 2, 32, 16, 16   # Block(dim=32, classes_dim=6, size=16)
  classes = 6
  key = jax.random.PRNGKey(0)
  kx, ks, kp = jax.random.split(key, 3)
  x = jax.random.normal(kx, (B, C, H, W), jnp.float32)
  skip = jax.random.normal(ks, (B, C, H, W), jnp.float32)
  params = make_params(kp, C, classes)

  fwd = jax.jit(block_forward)
  out = jax.block_until_ready(fwd(params, x, skip))
  assert out.shape == (B, C, H, W)
  assert bool(jnp.all(jnp.isfinite(out)))
  print("KERNEL_OK")
</pallas_src>

<mosaic_0001>
module attributes {stable_mosaic.version = 11 : i64} {
  func.func @_block_kernel(%arg0: i32, %arg1: memref<1x256x32xf32, #tpu.memory_space<vmem>>, %arg2: memref<1x256x32xf32, #tpu.memory_space<vmem>>, %arg3: memref<1x32xf32, #tpu.memory_space<vmem>>, %arg4: memref<1x32xf32, #tpu.memory_space<vmem>>, %arg5: memref<32x32xf32, #tpu.memory_space<vmem>>, %arg6: memref<32x32xf32, #tpu.memory_space<vmem>>, %arg7: memref<1x32xf32, #tpu.memory_space<vmem>>, %arg8: memref<32x8xf32, #tpu.memory_space<vmem>>, %arg9: memref<1x8xf32, #tpu.memory_space<vmem>>, %arg10: memref<8x6xf32, #tpu.memory_space<vmem>>, %arg11: memref<1x6xf32, #tpu.memory_space<vmem>>, %arg12: memref<32x6xf32, #tpu.memory_space<vmem>>, %arg13: memref<1x6xf32, #tpu.memory_space<vmem>>, %arg14: memref<32x16xf32, #tpu.memory_space<vmem>>, %arg15: memref<1x16xf32, #tpu.memory_space<vmem>>, %arg16: memref<32x16xf32, #tpu.memory_space<vmem>>, %arg17: memref<1x16xf32, #tpu.memory_space<vmem>>, %arg18: memref<288x32xbf16, #tpu.memory_space<vmem>>, %arg19: memref<1x32xf32, #tpu.memory_space<vmem>>, %arg20: memref<288x48xbf16, #tpu.memory_space<vmem>>, %arg21: memref<1x48xf32, #tpu.memory_space<vmem>>, %arg22: memref<16x32xf32, #tpu.memory_space<vmem>>, %arg23: memref<1x32xf32, #tpu.memory_space<vmem>>, %arg24: memref<288x32xbf16, #tpu.memory_space<vmem>>, %arg25: memref<1x32xf32, #tpu.memory_space<vmem>>, %arg26: memref<32x32xf32, #tpu.memory_space<vmem>>, %arg27: memref<48x32xf32, #tpu.memory_space<vmem>>, %arg28: memref<1x32xf32, #tpu.memory_space<vmem>>, %arg29: memref<32x128xf32, #tpu.memory_space<vmem>>, %arg30: memref<1x128xf32, #tpu.memory_space<vmem>>, %arg31: memref<128x32xf32, #tpu.memory_space<vmem>>, %arg32: memref<1x32xf32, #tpu.memory_space<vmem>>, %arg33: memref<1x256x32xf32, #tpu.memory_space<vmem>>, %arg34: memref<304x32xf32, #tpu.memory_space<vmem>>) attributes {dimension_semantics = [#tpu.dimension_semantics<parallel>], iteration_bounds = array<i64: 2>, scalar_prefetch = 0 : i64, scratch_operands = 1 : i64, tpu.core_type = #tpu.core_type<tc>, window_params = [{transform_indices = @transform_0, window_bounds = array<i64: 1, 256, 32>}, {transform_indices = @transform_1, window_bounds = array<i64: 1, 256, 32>}, {pipeline_mode = #tpu.pipeline_mode<synchronous>, transform_indices = @transform_2, window_bounds = array<i64: 1, 32>}, {pipeline_mode = #tpu.pipeline_mode<synchronous>, transform_indices = @transform_3, window_bounds = array<i64: 1, 32>}, {pipeline_mode = #tpu.pipeline_mode<synchronous>, transform_indices = @transform_4, window_bounds = array<i64: 32, 32>}, {pipeline_mode = #tpu.pipeline_mode<synchronous>, transform_indices = @transform_5, window_bounds = array<i64: 32, 32>}, {pipeline_mode = #tpu.pipeline_mode<synchronous>, transform_indices = @transform_6, window_bounds = array<i64: 1, 32>}, {pipeline_mode = #tpu.pipeline_mode<synchronous>, transform_indices = @transform_7, window_bounds = array<i64: 32, 8>}, {pipeline_mode = #tpu.pipeline_mode<synchronous>, transform_indices = @transform_8, window_bounds = array<i64: 1, 8>}, {pipeline_mode = #tpu.pipeline_mode<synchronous>, transform_indices = @transform_9, window_bounds = array<i64: 8, 6>}, {pipeline_mode = #tpu.pipeline_mode<synchronous>, transform_indices = @transform_10, window_bounds = array<i64: 1, 6>}, {pipeline_mode = #tpu.pipeline_mode<synchronous>, transform_indices = @transform_11, window_bounds = array<i64: 32, 6>}, {pipeline_mode = #tpu.pipeline_mode<synchronous>, transform_indices = @transform_12, window_bounds = array<i64: 1, 6>}, {pipeline_mode = #tpu.pipeline_mode<synchronous>, transform_indices = @transform_13, window_bounds = array<i64: 32, 16>}, {pipeline_mode = #tpu.pipeline_mode<synchronous>, transform_indices = @transform_14, window_bounds = array<i64: 1, 16>}, {pipeline_mode = #tpu.pipeline_mode<synchronous>, transform_indices = @transform_15, window_bounds = array<i64: 32, 16>}, {pipeline_mode = #tpu.pipeline_mode<synchronous>, transform_indices = @transform_16, window_bounds = array<i64: 1, 16>}, {pipeline_mode = #tpu.pipeline_mode<synchronous>, transform_indices = @transform_17, window_bounds = array<i64: 288, 32>}, {pipeline_mode = #tpu.pipeline_mode<synchronous>, transform_indices = @transform_18, window_bounds = array<i64: 1, 32>}, {pipeline_mode = #tpu.pipeline_mode<synchronous>, transform_indices = @transform_19, window_bounds = array<i64: 288, 48>}, {pipeline_mode = #tpu.pipeline_mode<synchronous>, transform_indices = @transform_20, window_bounds = array<i64: 1, 48>}, {pipeline_mode = #tpu.pipeline_mode<synchronous>, transform_indices = @transform_21, window_bounds = array<i64: 16, 32>}, {pipeline_mode = #tpu.pipeline_mode<synchronous>, transform_indices = @transform_22, window_bounds = array<i64: 1, 32>}, {pipeline_mode = #tpu.pipeline_mode<synchronous>, transform_indices = @transform_23, window_bounds = array<i64: 288, 32>}, {pipeline_mode = #tpu.pipeline_mode<synchronous>, transform_indices = @transform_24, window_bounds = array<i64: 1, 32>}, {pipeline_mode = #tpu.pipeline_mode<synchronous>, transform_indices = @transform_25, window_bounds = array<i64: 32, 32>}, {pipeline_mode = #tpu.pipeline_mode<synchronous>, transform_indices = @transform_26, window_bounds = array<i64: 48, 32>}, {pipeline_mode = #tpu.pipeline_mode<synchronous>, transform_indices = @transform_27, window_bounds = array<i64: 1, 32>}, {pipeline_mode = #tpu.pipeline_mode<synchronous>, transform_indices = @transform_28, window_bounds = array<i64: 32, 128>}, {pipeline_mode = #tpu.pipeline_mode<synchronous>, transform_indices = @transform_29, window_bounds = array<i64: 1, 128>}, {pipeline_mode = #tpu.pipeline_mode<synchronous>, transform_indices = @transform_30, window_bounds = array<i64: 128, 32>}, {pipeline_mode = #tpu.pipeline_mode<synchronous>, transform_indices = @transform_31, window_bounds = array<i64: 1, 32>}, {transform_indices = @transform_32, window_bounds = array<i64: 1, 256, 32>}]} {
    %0 = tpu.iota {dimensions = array<i32: 1>} : vector<16x16x32xi32>
    %1 = vector.shape_cast %0 : vector<16x16x32xi32> to vector<256x32xi32>
    %c1_i32 = arith.constant 1 : i32
    %2 = vector.broadcast %c1_i32 : i32 to vector<256x32xi32>
    %3 = arith.cmpi sge, %1, %2 : vector<256x32xi32>
    %c14_i32 = arith.constant 14 : i32
    %4 = vector.broadcast %c14_i32 : i32 to vector<256x32xi32>
    %5 = arith.cmpi sle, %1, %4 : vector<256x32xi32>
    %cst = arith.constant 0.000000e+00 : f32
    %6 = vector.broadcast %cst : f32 to vector<24x32xf32>
    %c0 = arith.constant 0 : index
    %c0_0 = arith.constant 0 : index
    %7 = vector.load %arg34[%c0, %c0_0] : memref<304x32xf32, #tpu.memory_space<vmem>>, vector<24x32xf32>
    tpu.vector_store %arg34[%c0, %c0_0], %6 {strides = array<i32>} : memref<304x32xf32, #tpu.memory_space<vmem>>, vector<24x32xf32>,
    %cst_1 = arith.constant 0.000000e+00 : f32
    %8 = vector.broadcast %cst_1 : f32 to vector<24x32xf32>
    %c280 = arith.constant 280 : index
    %c0_2 = arith.constant 0 : index
    %9 = vector.load %arg34[%c280, %c0_2] : memref<304x32xf32, #tpu.memory_space<vmem>>, vector<24x32xf32>
    tpu.vector_store %arg34[%c280, %c0_2], %8 {strides = array<i32>} : memref<304x32xf32, #tpu.memory_space<vmem>>, vector<24x32xf32>,
    %c0_3 = arith.constant 0 : index
    %c0_4 = arith.constant 0 : index
    %c0_5 = arith.constant 0 : index
    %10 = vector.load %arg1[%c0_3, %c0_4, %c0_5] : memref<1x256x32xf32, #tpu.memory_space<vmem>>, vector<1x256x32xf32>
    %11 = vector.shape_cast %10 : vector<1x256x32xf32> to vector<256x32xf32>
    %c0_6 = arith.constant 0 : index
    %c0_7 = arith.constant 0 : index
    %c0_8 = arith.constant 0 : index
    %12 = vector.load %arg2[%c0_6, %c0_7, %c0_8] : memref<1x256x32xf32, #tpu.memory_space<vmem>>, vector<1x256x32xf32>
    %13 = vector.shape_cast %12 : vector<1x256x32xf32> to vector<256x32xf32>
    %14 = arith.addf %11, %13 : vector<256x32xf32>
    %c0_9 = arith.constant 0 : index
    %c0_10 = arith.constant 0 : index
    %15 = vector.load %arg3[%c0_9, %c0_10] : memref<1x32xf32, #tpu.memory_space<vmem>>, vector<1x32xf32>
    %16 = vector.broadcast %15 : vector<1x32xf32> to vector<256x32xf32>
    %17 = arith.mulf %14, %16 : vector<256x32xf32>
    %c0_11 = arith.constant 0 : index
    %c0_12 = arith.constant 0 : index
    %18 = vector.load %arg4[%c0_11, %c0_12] : memref<1x32xf32, #tpu.memory_space<vmem>>, vector<1x32xf32>
    %19 = vector.broadcast %18 : vector<1x32xf32> to vector<256x32xf32>
    %20 = arith.addf %17, %19 : vector<256x32xf32>
    %cst_13 = arith.constant dense<0.000000e+00> : vector<32xf32>
    %21 = vector.multi_reduction <add>, %20, %cst_13 [0] : vector<256x32xf32> to vector<32xf32>
    %22 = vector.shape_cast %21 : vector<32xf32> to vector<1x32xf32>
    %cst_14 = arith.constant 3.906250e-03 : f32
    %23 = vector.broadcast %cst_14 : f32 to vector<1x32xf32>
    %24 = arith.mulf %22, %23 : vector<1x32xf32>
    %cst_15 = arith.constant dense<0xFF800000> : vector<32xf32>
    %25 = vector.multi_reduction <maximumf>, %20, %cst_15 [0] : vector<256x32xf32> to vector<32xf32>
    %26 = vector.shape_cast %25 : vector<32xf32> to vector<1x32xf32>
    %c0_16 = arith.constant 0 : index
    %c0_17 = arith.constant 0 : index
    %27 = vector.load %arg5[%c0_16, %c0_17] : memref<32x32xf32, #tpu.memory_space<vmem>>, vector<32x32xf32>
    %cst_18 = arith.constant dense<0.000000e+00> : vector<1x32xf32>
    %28 = tpu.matmul %24, %27, %cst_18 {dimension_numbers = #tpu.dot_dimension_numbers<[1], [0], [0], [1], [0, 0, 1, 1], [], []>} : vector<1x32xf32>, vector<32x32xf32>, vector<1x32xf32> -> vector<1x32xf32>
    %c0_19 = arith.constant 0 : index
    %c0_20 = arith.constant 0 : index
    %29 = vector.load %arg6[%c0_19, %c0_20] : memref<32x32xf32, #tpu.memory_space<vmem>>, vector<32x32xf32>
    %cst_21 = arith.constant dense<0.000000e+00> : vector<1x32xf32>
    %30 = tpu.matmul %26, %29, %cst_21 {dimension_numbers = #tpu.dot_dimension_numbers<[1], [0], [0], [1], [0, 0, 1, 1], [], []>} : vector<1x32xf32>, vector<32x32xf32>, vector<1x32xf32> -> vector<1x32xf32>
    %31 = arith.addf %28, %30 : vector<1x32xf32>
    %c0_22 = arith.constant 0 : index
    %c0_23 = arith.constant 0 : index
    %32 = vector.load %arg7[%c0_22, %c0_23] : memref<1x32xf32, #tpu.memory_space<vmem>>, vector<1x32xf32>
    %33 = arith.addf %31, %32 : vector<1x32xf32>
    %cst_24 = arith.constant 0.000000e+00 : f32
    %34 = vector.broadcast %cst_24 : f32 to vector<1x32xf32>
    %35 = arith.subf %34, %33 : vector<1x32xf32>
    %36 = math.exp %35 : vector<1x32xf32>
    %cst_25 = arith.constant 1.000000e+00 : f32
    %37 = vector.broadcast %cst_25 : f32 to vector<1x32xf32>
    %38 = arith.addf %37, %36 : vector<1x32xf32>
    %cst_26 = arith.constant 1.000000e+00 : f32
    %39 = vector.broadcast %cst_26 : f32 to vector<1x32xf32>
    %40 = arith.divf %39, %38 : vector<1x32xf32>
    %c0_27 = arith.constant 0 : index
    %c0_28 = arith.constant 0 : index
    %41 = vector.load %arg8[%c0_27, %c0_28] : memref<32x8xf32, #tpu.memory_space<vmem>>, vector<32x8xf32>
    %cst_29 = arith.constant dense<0.000000e+00> : vector<1x8xf32>
    %42 = tpu.matmul %40, %41, %cst_29 {dimension_numbers = #tpu.dot_dimension_numbers<[1], [0], [0], [1], [0, 0, 1, 1], [], []>} : vector<1x32xf32>, vector<32x8xf32>, vector<1x8xf32> -> vector<1x8xf32>
    %c0_30 = arith.constant 0 : index
    %c0_31 = arith.constant 0 : index
    %43 = vector.load %arg9[%c0_30, %c0_31] : memref<1x8xf32, #tpu.memory_space<vmem>>, vector<1x8xf32>
    %44 = arith.addf %42, %43 : vector<1x8xf32>
    %cst_32 = arith.constant 0.000000e+00 : f32
    %45 = vector.broadcast %cst_32 : f32 to vector<1x8xf32>
    %46 = arith.maximumf %44, %45 : vector<1x8xf32>
    %c0_33 = arith.constant 0 : index
    %c0_34 = arith.constant 0 : index
    %47 = vector.load %arg10[%c0_33, %c0_34] : memref<8x6xf32, #tpu.memory_space<vmem>>, vector<8x6xf32>
    %cst_35 = arith.constant dense<0.000000e+00> : vector<1x6xf32>
    %48 = tpu.matmul %46, %47, %cst_35 {dimension_numbers = #tpu.dot_dimension_numbers<[1], [0], [0], [1], [0, 0, 1, 1], [], []>} : vector<1x8xf32>, vector<8x6xf32>, vector<1x6xf32> -> vector<1x6xf32>
    %c0_36 = arith.constant 0 : index
    %c0_37 = arith.constant 0 : index
    %49 = vector.load %arg11[%c0_36, %c0_37] : memref<1x6xf32, #tpu.memory_space<vmem>>, vector<1x6xf32>
    %50 = arith.addf %48, %49 : vector<1x6xf32>
    %cst_38 = arith.constant 0.000000e+00 : f32
    %51 = vector.broadcast %cst_38 : f32 to vector<1x6xf32>
    %52 = arith.subf %51, %50 : vector<1x6xf32>
    %53 = math.exp %52 : vector<1x6xf32>
    %cst_39 = arith.constant 1.000000e+00 : f32
    %54 = vector.broadcast %cst_39 : f32 to vector<1x6xf32>
    %55 = arith.addf %54, %53 : vector<1x6xf32>
    %cst_40 = arith.constant 1.000000e+00 : f32
    %56 = vector.broadcast %cst_40 : f32 to vector<1x6xf32>
    %57 = arith.divf %56, %55 : vector<1x6xf32>
    %c0_41 = arith.constant 0 : index
    %c0_42 = arith.constant 0 : index
    %58 = vector.load %arg12[%c0_41, %c0_42] : memref<32x6xf32, #tpu.memory_space<vmem>>, vector<32x6xf32>
    %cst_43 = arith.constant dense<0.000000e+00> : vector<1x6xf32>
    %59 = tpu.matmul %40, %58, %cst_43 {dimension_numbers = #tpu.dot_dimension_numbers<[1], [0], [0], [1], [0, 0, 1, 1], [], []>} : vector<1x32xf32>, vector<32x6xf32>, vector<1x6xf32> -> vector<1x6xf32>
    %c0_44 = arith.constant 0 : index
    %c0_45 = arith.constant 0 : index
    %60 = vector.load %arg13[%c0_44, %c0_45] : memref<1x6xf32, #tpu.memory_space<vmem>>, vector<1x6xf32>
    %61 = arith.addf %59, %60 : vector<1x6xf32>
    %cst_46 = arith.constant dense<0xFF800000> : vector<1xf32>
    %62 = vector.multi_reduction <maximumf>, %61, %cst_46 [1] : vector<1x6xf32> to vector<1xf32>
    %63 = vector.shape_cast %62 : vector<1xf32> to vector<1x1xf32>
    %64 = vector.broadcast %63 : vector<1x1xf32> to vector<1x6xf32>
    %65 = arith.subf %61, %64 : vector<1x6xf32>
    %66 = math.exp %65 : vector<1x6xf32>
    %cst_47 = arith.constant dense<0.000000e+00> : vector<1xf32>
    %67 = vector.multi_reduction <add>, %66, %cst_47 [1] : vector<1x6xf32> to vector<1xf32>
    %68 = vector.shape_cast %67 : vector<1xf32> to vector<1x1xf32>
    %69 = vector.broadcast %68 : vector<1x1xf32> to vector<1x6xf32>
    %70 = arith.divf %66, %69 : vector<1x6xf32>
    %71 = arith.addf %70, %57 : vector<1x6xf32>
    %72 = vector.shape_cast %71 : vector<1x6xf32> to vector<1x6xf32>
    %73 = vector.broadcast %72 : vector<1x6xf32> to vector<6x6xf32>
    %74 = tpu.iota {dimensions = array<i32: 0>} : vector<6x6xi32>
    %75 = tpu.iota {dimensions = array<i32: 1>} : vector<6x6xi32>
    %76 = arith.cmpi eq, %74, %75 : vector<6x6xi32>
    %cst_48 = arith.constant 0.000000e+00 : f32
    %77 = vector.broadcast %cst_48 : f32 to vector<6x6xf32>
    %78 = arith.select %76, %73, %77 : vector<6x6xi1>, vector<6x6xf32>
    %cst_49 = arith.constant dense<0.000000e+00> : vector<6xf32>
    %79 = vector.multi_reduction <add>, %78, %cst_49 [1] : vector<6x6xf32> to vector<6xf32>
    %80 = vector.shape_cast %79 : vector<6xf32> to vector<6x1xf32>
    %81 = vector.broadcast %80 : vector<6x1xf32> to vector<6x32xf32>
    %82 = vector.broadcast %40 : vector<1x32xf32> to vector<6x32xf32>
    %83 = arith.mulf %81, %82 : vector<6x32xf32>
    %cst_50 = arith.constant dense<0xFF800000> : vector<6xf32>
    %84 = vector.multi_reduction <maximumf>, %83, %cst_50 [1] : vector<6x32xf32> to vector<6xf32>
    %85 = vector.shape_cast %84 : vector<6xf32> to vector<6x1xf32>
    %86 = vector.broadcast %85 : vector<6x1xf32> to vector<6x32xf32>
    %87 = arith.subf %83, %86 : vector<6x32xf32>
    %88 = math.exp %87 : vector<6x32xf32>
    %cst_51 = arith.constant dense<0.000000e+00> : vector<6xf32>
    %89 = vector.multi_reduction <add>, %88, %cst_51 [1] : vector<6x32xf32> to vector<6xf32>
    %90 = vector.shape_cast %89 : vector<6xf32> to vector<6x1xf32>
    %91 = tpu.reciprocal %90 {approx = true} : vector<6x1xf32> -> vector<6x1xf32>
    %92 = vector.broadcast %91 : vector<6x1xf32> to vector<6x32xf32>
    %93 = arith.mulf %88, %92 : vector<6x32xf32>
    %cst_52 = arith.constant dense<0xFF800000> : vector<32xf32>
    %94 = vector.multi_reduction <maximumf>, %93, %cst_52 [0] : vector<6x32xf32> to vector<32xf32>
    %95 = vector.shape_cast %94 : vector<32xf32> to vector<1x32xf32>
    %96 = vector.broadcast %95 : vector<1x32xf32> to vector<6x32xf32>
    %97 = arith.subf %93, %96 : vector<6x32xf32>
    %98 = math.exp %97 : vector<6x32xf32>
    %cst_53 = arith.constant dense<0.000000e+00> : vector<32xf32>
    %99 = vector.multi_reduction <add>, %98, %cst_53 [0] : vector<6x32xf32> to vector<32xf32>
    %100 = vector.shape_cast %99 : vector<32xf32> to vector<1x32xf32>
    %101 = tpu.reciprocal %100 {approx = true} : vector<1x32xf32> -> vector<1x32xf32>
    %102 = vector.broadcast %101 : vector<1x32xf32> to vector<6x32xf32>
    %103 = arith.mulf %98, %102 : vector<6x32xf32>
    %c0_54 = arith.constant 0 : index
    %c0_55 = arith.constant 0 : index
    %104 = vector.load %arg14[%c0_54, %c0_55] : memref<32x16xf32, #tpu.memory_space<vmem>>, vector<32x16xf32>
    %cst_56 = arith.constant dense<0.000000e+00> : vector<6x16xf32>
    %105 = tpu.matmul %103, %104, %cst_56 {dimension_numbers = #tpu.dot_dimension_numbers<[1], [0], [0], [1], [0, 0, 1, 1], [], []>} : vector<6x32xf32>, vector<32x16xf32>, vector<6x16xf32> -> vector<6x16xf32>
    %c0_57 = arith.constant 0 : index
    %c0_58 = arith.constant 0 : index
    %106 = vector.load %arg15[%c0_57, %c0_58] : memref<1x16xf32, #tpu.memory_space<vmem>>, vector<1x16xf32>
    %107 = vector.broadcast %106 : vector<1x16xf32> to vector<6x16xf32>
    %108 = arith.addf %105, %107 : vector<6x16xf32>
    %cst_59 = arith.constant 0.000000e+00 : f32
    %109 = vector.broadcast %cst_59 : f32 to vector<6x16xf32>
    %110 = arith.maximumf %108, %109 : vector<6x16xf32>
    %cst_60 = arith.constant 6.000000e+00 : f32
    %111 = vector.broadcast %cst_60 : f32 to vector<6x16xf32>
    %112 = arith.minimumf %110, %111 : vector<6x16xf32>
    %c0_61 = arith.constant 0 : index
    %c0_62 = arith.constant 0 : index
    %113 = vector.load %arg16[%c0_61, %c0_62] : memref<32x16xf32, #tpu.memory_space<vmem>>, vector<32x16xf32>
    %cst_63 = arith.constant dense<0.000000e+00> : vector<6x16xf32>
    %114 = tpu.matmul %103, %113, %cst_63 {dimension_numbers = #tpu.dot_dimension_numbers<[1], [0], [0], [1], [0, 0, 1, 1], [], []>} : vector<6x32xf32>, vector<32x16xf32>, vector<6x16xf32> -> vector<6x16xf32>
    %c0_64 = arith.constant 0 : index
    %c0_65 = arith.constant 0 : index
    %115 = vector.load %arg17[%c0_64, %c0_65] : memref<1x16xf32, #tpu.memory_space<vmem>>, vector<1x16xf32>
    %116 = vector.broadcast %115 : vector<1x16xf32> to vector<6x16xf32>
    %117 = arith.addf %114, %116 : vector<6x16xf32>
    %cst_66 = arith.constant 0.000000e+00 : f32
    %118 = vector.broadcast %cst_66 : f32 to vector<6x16xf32>
    %119 = arith.maximumf %117, %118 : vector<6x16xf32>
    %cst_67 = arith.constant 6.000000e+00 : f32
    %120 = vector.broadcast %cst_67 : f32 to vector<6x16xf32>
    %121 = arith.minimumf %119, %120 : vector<6x16xf32>
    %122 = vector.shape_cast %20 : vector<256x32xf32> to vector<16x16x32xf32>
    %cst_68 = arith.constant dense<0.000000e+00> : vector<16x32xf32>
    %123 = vector.multi_reduction <add>, %122, %cst_68 [0] : vector<16x16x32xf32> to vector<16x32xf32>
    %124 = vector.shape_cast %123 : vector<16x32xf32> to vector<1x16x32xf32>
    %cst_69 = arith.constant 1.600000e+01 : f32
    %125 = vector.broadcast %cst_69 : f32 to vector<1x16x32xf32>
    %126 = arith.divf %124, %125 : vector<1x16x32xf32>
    %cst_70 = arith.constant dense<0.000000e+00> : vector<16x32xf32>
    %127 = vector.multi_reduction <add>, %122, %cst_70 [1] : vector<16x16x32xf32> to vector<16x32xf32>
    %128 = vector.shape_cast %127 : vector<16x32xf32> to vector<16x1x32xf32>
    %cst_71 = arith.constant 1.600000e+01 : f32
    %129 = vector.broadcast %cst_71 : f32 to vector<16x1x32xf32>
    %130 = arith.divf %128, %129 : vector<16x1x32xf32>
    %131 = vector.broadcast %130 : vector<16x1x32xf32> to vector<16x16x32xf32>
    %132 = vector.broadcast %126 : vector<1x16x32xf32> to vector<16x16x32xf32>
    %133 = arith.mulf %131, %132 : vector<16x16x32xf32>
    %cst_72 = arith.constant dense<0xFF800000> : vector<16x32xf32>
    %134 = vector.multi_reduction <maximumf>, %133, %cst_72 [1] : vector<16x16x32xf32> to vector<16x32xf32>
    %135 = vector.shape_cast %134 : vector<16x32xf32> to vector<16x1x32xf32>
    %cst_73 = arith.constant dense<0xFF800000> : vector<1x32xf32>
    %136 = vector.multi_reduction <maximumf>, %135, %cst_73 [0] : vector<16x1x32xf32> to vector<1x32xf32>
    %137 = vector.shape_cast %136 : vector<1x32xf32> to vector<1x1x32xf32>
    %138 = vector.broadcast %137 : vector<1x1x32xf32> to vector<16x16x32xf32>
    %139 = arith.subf %133, %138 : vector<16x16x32xf32>
    %140 = math.exp %139 : vector<16x16x32xf32>
    %cst_74 = arith.constant dense<0.000000e+00> : vector<16x32xf32>
    %141 = vector.multi_reduction <add>, %140, %cst_74 [1] : vector<16x16x32xf32> to vector<16x32xf32>
    %142 = vector.shape_cast %141 : vector<16x32xf32> to vector<16x1x32xf32>
    %cst_75 = arith.constant dense<0.000000e+00> : vector<1x32xf32>
    %143 = vector.multi_reduction <add>, %142, %cst_75 [0] : vector<16x1x32xf32> to vector<1x32xf32>
    %144 = vector.shape_cast %143 : vector<1x32xf32> to vector<1x1x32xf32>
    %145 = tpu.reciprocal %144 {approx = true} : vector<1x1x32xf32> -> vector<1x1x32xf32>
    %146 = vector.broadcast %145 : vector<1x1x32xf32> to vector<16x16x32xf32>
    %147 = arith.mulf %140, %146 : vector<16x16x32xf32>
    %148 = arith.mulf %122, %147 : vector<16x16x32xf32>
    %149 = arith.addf %148, %122 : vector<16x16x32xf32>
    %150 = vector.shape_cast %149 : vector<16x16x32xf32> to vector<256x32xf32>
    %c24 = arith.constant 24 : index
    %c0_76 = arith.constant 0 : index
    %151 = vector.load %arg34[%c24, %c0_76] : memref<304x32xf32, #tpu.memory_space<vmem>>, vector<256x32xf32>
    tpu.vector_store %arg34[%c24, %c0_76], %150 {strides = array<i32>} : memref<304x32xf32, #tpu.memory_space<vmem>>, vector<256x32xf32>,
    %c7 = arith.constant 7 : index
    %c0_77 = arith.constant 0 : index
    %152 = vector.load %arg34[%c7, %c0_77] : memref<304x32xf32, #tpu.memory_space<vmem>>, vector<256x32xf32>
    %cst_78 = arith.constant 0.000000e+00 : f32
    %153 = vector.broadcast %cst_78 : f32 to vector<256x32xf32>
    %154 = arith.select %3, %152, %153 : vector<256x32xi1>, vector<256x32xf32>
    %155 = arith.truncf %154 : vector<256x32xf32> to vector<256x32xbf16>
    %c0_79 = arith.constant 0 : index
    %c0_80 = arith.constant 0 : index
    %156 = vector.load %arg18[%c0_79, %c0_80] : memref<288x32xbf16, #tpu.memory_space<vmem>>, vector<32x32xbf16>
    %cst_81 = arith.constant dense<0.000000e+00> : vector<256x32xf32>
    %157 = tpu.matmul %155, %156, %cst_81 {dimension_numbers = #tpu.dot_dimension_numbers<[1], [0], [0], [1], [0, 0, 1, 1], [], []>} : vector<256x32xbf16>, vector<32x32xbf16>, vector<256x32xf32> -> vector<256x32xf32>
    %c8 = arith.constant 8 : index
    %c0_82 = arith.constant 0 : index
    %158 = vector.load %arg34[%c8, %c0_82] : memref<304x32xf32, #tpu.memory_space<vmem>>, vector<256x32xf32>
    %159 = arith.truncf %158 : vector<256x32xf32> to vector<256x32xbf16>
    %c32 = arith.constant 32 : index
    %c0_83 = arith.constant 0 : index
    %160 = vector.load %arg18[%c32, %c0_83] : memref<288x32xbf16, #tpu.memory_space<vmem>>, vector<32x32xbf16>
    %cst_84 = arith.constant dense<0.000000e+00> : vector<256x32xf32>
    %161 = tpu.matmul %159, %160, %cst_84 {dimension_numbers = #tpu.dot_dimension_numbers<[1], [0], [0], [1], [0, 0, 1, 1], [], []>} : vector<256x32xbf16>, vector<32x32xbf16>, vector<256x32xf32> -> vector<256x32xf32>
    %162 = arith.addf %157, %161 : vector<256x32xf32>
    %c9 = arith.constant 9 : index
    %c0_85 = arith.constant 0 : index
    %163 = vector.load %arg34[%c9, %c0_85] : memref<304x32xf32, #tpu.memory_space<vmem>>, vector<256x32xf32>
    %cst_86 = arith.constant 0.000000e+00 : f32
    %164 = vector.broadcast %cst_86 : f32 to vector<256x32xf32>
    %165 = arith.select %5, %163, %164 : vector<256x32xi1>, vector<256x32xf32>
    %166 = arith.truncf %165 : vector<256x32xf32> to vector<256x32xbf16>
    %c64 = arith.constant 64 : index
    %c0_87 = arith.constant 0 : index
    %167 = vector.load %arg18[%c64, %c0_87] : memref<288x32xbf16, #tpu.memory_space<vmem>>, vector<32x32xbf16>
    %cst_88 = arith.constant dense<0.000000e+00> : vector<256x32xf32>
    %168 = tpu.matmul %166, %167, %cst_88 {dimension_numbers = #tpu.dot_dimension_numbers<[1], [0], [0], [1], [0, 0, 1, 1], [], []>} : vector<256x32xbf16>, vector<32x32xbf16>, vector<256x32xf32> -> vector<256x32xf32>
    %169 = arith.addf %162, %168 : vector<256x32xf32>
    %c23 = arith.constant 23 : index
    %c0_89 = arith.constant 0 : index
    %170 = vector.load %arg34[%c23, %c0_89] : memref<304x32xf32, #tpu.memory_space<vmem>>, vector<256x32xf32>
    %cst_90 = arith.constant 0.000000e+00 : f32
    %171 = vector.broadcast %cst_90 : f32 to vector<256x32xf32>
    %172 = arith.select %3, %170, %171 : vector<256x32xi1>, vector<256x32xf32>
    %173 = arith.truncf %172 : vector<256x32xf32> to vector<256x32xbf16>
    %c96 = arith.constant 96 : index
    %c0_91 = arith.constant 0 : index
    %174 = vector.load %arg18[%c96, %c0_91] : memref<288x32xbf16, #tpu.memory_space<vmem>>, vector<32x32xbf16>
    %cst_92 = arith.constant dense<0.000000e+00> : vector<256x32xf32>
    %175 = tpu.matmul %173, %174, %cst_92 {dimension_numbers = #tpu.dot_dimension_numbers<[1], [0], [0], [1], [0, 0, 1, 1], [], []>} : vector<256x32xbf16>, vector<32x32xbf16>, vector<256x32xf32> -> vector<256x32xf32>
    %176 = arith.addf %169, %175 : vector<256x32xf32>
    %c24_93 = arith.constant 24 : index
    %c0_94 = arith.constant 0 : index
    %177 = vector.load %arg34[%c24_93, %c0_94] : memref<304x32xf32, #tpu.memory_space<vmem>>, vector<256x32xf32>
    %178 = arith.truncf %177 : vector<256x32xf32> to vector<256x32xbf16>
    %c128 = arith.constant 128 : index
    %c0_95 = arith.constant 0 : index
    %179 = vector.load %arg18[%c128, %c0_95] : memref<288x32xbf16, #tpu.memory_space<vmem>>, vector<32x32xbf16>
    %cst_96 = arith.constant dense<0.000000e+00> : vector<256x32xf32>
    %180 = tpu.matmul %178, %179, %cst_96 {dimension_numbers = #tpu.dot_dimension_numbers<[1], [0], [0], [1], [0, 0, 1, 1], [], []>} : vector<256x32xbf16>, vector<32x32xbf16>, vector<256x32xf32> -> vector<256x32xf32>
    %181 = arith.addf %176, %180 : vector<256x32xf32>
    %c25 = arith.constant 25 : index
    %c0_97 = arith.constant 0 : index
    %182 = vector.load %arg34[%c25, %c0_97] : memref<304x32xf32, #tpu.memory_space<vmem>>, vector<256x32xf32>
    %cst_98 = arith.constant 0.000000e+00 : f32
    %183 = vector.broadcast %cst_98 : f32 to vector<256x32xf32>
    %184 = arith.select %5, %182, %183 : vector<256x32xi1>, vector<256x32xf32>
    %185 = arith.truncf %184 : vector<256x32xf32> to vector<256x32xbf16>
    %c160 = arith.constant 160 : index
    %c0_99 = arith.constant 0 : index
    %186 = vector.load %arg18[%c160, %c0_99] : memref<288x32xbf16, #tpu.memory_space<vmem>>, vector<32x32xbf16>
    %cst_100 = arith.constant dense<0.000000e+00> : vector<256x32xf32>
    %187 = tpu.matmul %185, %186, %cst_100 {dimension_numbers = #tpu.dot_dimension_numbers<[1], [0], [0], [1], [0, 0, 1, 1], [], []>} : vector<256x32xbf16>, vector<32x32xbf16>, vector<256x32xf32> -> vector<256x32xf32>
    %188 = arith.addf %181, %187 : vector<256x32xf32>
    %c39 = arith.constant 39 : index
    %c0_101 = arith.constant 0 : index
    %189 = vector.load %arg34[%c39, %c0_101] : memref<304x32xf32, #tpu.memory_space<vmem>>, vector<256x32xf32>
    %cst_102 = arith.constant 0.000000e+00 : f32
    %190 = vector.broadcast %cst_102 : f32 to vector<256x32xf32>
    %191 = arith.select %3, %189, %190 : vector<256x32xi1>, vector<256x32xf32>
    %192 = arith.truncf %191 : vector<256x32xf32> to vector<256x32xbf16>
    %c192 = arith.constant 192 : index
    %c0_103 = arith.constant 0 : index
    %193 = vector.load %arg18[%c192, %c0_103] : memref<288x32xbf16, #tpu.memory_space<vmem>>, vector<32x32xbf16>
    %cst_104 = arith.constant dense<0.000000e+00> : vector<256x32xf32>
    %194 = tpu.matmul %192, %193, %cst_104 {dimension_numbers = #tpu.dot_dimension_numbers<[1], [0], [0], [1], [0, 0, 1, 1], [], []>} : vector<256x32xbf16>, vector<32x32xbf16>, vector<256x32xf32> -> vector<256x32xf32>
    %195 = arith.addf %188, %194 : vector<256x32xf32>
    %c40 = arith.constant 40 : index
    %c0_105 = arith.constant 0 : index
    %196 = vector.load %arg34[%c40, %c0_105] : memref<304x32xf32, #tpu.memory_space<vmem>>, vector<256x32xf32>
    %197 = arith.truncf %196 : vector<256x32xf32> to vector<256x32xbf16>
    %c224 = arith.constant 224 : index
    %c0_106 = arith.constant 0 : index
    %198 = vector.load %arg18[%c224, %c0_106] : memref<288x32xbf16, #tpu.memory_space<vmem>>, vector<32x32xbf16>
    %cst_107 = arith.constant dense<0.000000e+00> : vector<256x32xf32>
    %199 = tpu.matmul %197, %198, %cst_107 {dimension_numbers = #tpu.dot_dimension_numbers<[1], [0], [0], [1], [0, 0, 1, 1], [], []>} : vector<256x32xbf16>, vector<32x32xbf16>, vector<256x32xf32> -> vector<256x32xf32>
    %200 = arith.addf %195, %199 : vector<256x32xf32>
    %c41 = arith.constant 41 : index
    %c0_108 = arith.constant 0 : index
    %201 = vector.load %arg34[%c41, %c0_108] : memref<304x32xf32, #tpu.memory_space<vmem>>, vector<256x32xf32>
    %cst_109 = arith.constant 0.000000e+00 : f32
    %202 = vector.broadcast %cst_109 : f32 to vector<256x32xf32>
    %203 = arith.select %5, %201, %202 : vector<256x32xi1>, vector<256x32xf32>
    %204 = arith.truncf %203 : vector<256x32xf32> to vector<256x32xbf16>
    %c256 = arith.constant 256 : index
    %c0_110 = arith.constant 0 : index
    %205 = vector.load %arg18[%c256, %c0_110] : memref<288x32xbf16, #tpu.memory_space<vmem>>, vector<32x32xbf16>
    %cst_111 = arith.constant dense<0.000000e+00> : vector<256x32xf32>
    %206 = tpu.matmul %204, %205, %cst_111 {dimension_numbers = #tpu.dot_dimension_numbers<[1], [0], [0], [1], [0, 0, 1, 1], [], []>} : vector<256x32xbf16>, vector<32x32xbf16>, vector<256x32xf32> -> vector<256x32xf32>
    %207 = arith.addf %200, %206 : vector<256x32xf32>
    %c0_112 = arith.constant 0 : index
    %c0_113 = arith.constant 0 : index
    %208 = vector.load %arg19[%c0_112, %c0_113] : memref<1x32xf32, #tpu.memory_space<vmem>>, vector<1x32xf32>
    %209 = vector.broadcast %208 : vector<1x32xf32> to vector<256x32xf32>
    %210 = arith.addf %207, %209 : vector<256x32xf32>
    %cst_114 = arith.constant 0.000000e+00 : f32
    %211 = vector.broadcast %cst_114 : f32 to vector<256x32xf32>
    %212 = arith.maximumf %210, %211 : vector<256x32xf32>
    %cst_115 = arith.constant 6.000000e+00 : f32
    %213 = vector.broadcast %cst_115 : f32 to vector<256x32xf32>
    %214 = arith.minimumf %212, %213 : vector<256x32xf32>
    %c24_116 = arith.constant 24 : index
    %c0_117 = arith.constant 0 : index
    %215 = vector.load %arg34[%c24_116, %c0_117] : memref<304x32xf32, #tpu.memory_space<vmem>>, vector<256x32xf32>
    tpu.vector_store %arg34[%c24_116, %c0_117], %214 {strides = array<i32>} : memref<304x32xf32, #tpu.memory_space<vmem>>, vector<256x32xf32>,
    %c7_118 = arith.constant 7 : index
    %c0_119 = arith.constant 0 : index
    %216 = vector.load %arg34[%c7_118, %c0_119] : memref<304x32xf32, #tpu.memory_space<vmem>>, vector<256x32xf32>
    %cst_120 = arith.constant 0.000000e+00 : f32
    %217 = vector.broadcast %cst_120 : f32 to vector<256x32xf32>
    %218 = arith.select %3, %216, %217 : vector<256x32xi1>, vector<256x32xf32>
    %219 = arith.truncf %218 : vector<256x32xf32> to vector<256x32xbf16>
    %c0_121 = arith.constant 0 : index
    %c0_122 = arith.constant 0 : index
    %220 = vector.load %arg20[%c0_121, %c0_122] : memref<288x48xbf16, #tpu.memory_space<vmem>>, vector<32x48xbf16>
    %cst_123 = arith.constant dense<0.000000e+00> : vector<256x48xf32>
    %221 = tpu.matmul %219, %220, %cst_123 {dimension_numbers = #tpu.dot_dimension_numbers<[1], [0], [0], [1], [0, 0, 1, 1], [], []>} : vector<256x32xbf16>, vector<32x48xbf16>, vector<256x48xf32> -> vector<256x48xf32>
    %c8_124 = arith.constant 8 : index
    %c0_125 = arith.constant 0 : index
    %222 = vector.load %arg34[%c8_124, %c0_125] : memref<304x32xf32, #tpu.memory_space<vmem>>, vector<256x32xf32>
    %223 = arith.truncf %222 : vector<256x32xf32> to vector<256x32xbf16>
    %c32_126 = arith.constant 32 : index
    %c0_127 = arith.constant 0 : index
    %224 = vector.load %arg20[%c32_126, %c0_127] : memref<288x48xbf16, #tpu.memory_space<vmem>>, vector<32x48xbf16>
    %cst_128 = arith.constant dense<0.000000e+00> : vector<256x48xf32>
    %225 = tpu.matmul %223, %224, %cst_128 {dimension_numbers = #tpu.dot_dimension_numbers<[1], [0], [0], [1], [0, 0, 1, 1], [], []>} : vector<256x32xbf16>, vector<32x48xbf16>, vector<256x48xf32> -> vector<256x48xf32>
    %226 = arith.addf %221, %225 : vector<256x48xf32>
    %c9_129 = arith.constant 9 : index
    %c0_130 = arith.constant 0 : index
    %227 = vector.load %arg34[%c9_129, %c0_130] : memref<304x32xf32, #tpu.memory_space<vmem>>, vector<256x32xf32>
    %cst_131 = arith.constant 0.000000e+00 : f32
    %228 = vector.broadcast %cst_131 : f32 to vector<256x32xf32>
    %229 = arith.select %5, %227, %228 : vector<256x32xi1>, vector<256x32xf32>
    %230 = arith.truncf %229 : vector<256x32xf32> to vector<256x32xbf16>
    %c64_132 = arith.constant 64 : index
    %c0_133 = arith.constant 0 : index
    %231 = vector.load %arg20[%c64_132, %c0_133] : memref<288x48xbf16, #tpu.memory_space<vmem>>, vector<32x48xbf16>
    %cst_134 = arith.constant dense<0.000000e+00> : vector<256x48xf32>
    %232 = tpu.matmul %230, %231, %cst_134 {dimension_numbers = #tpu.dot_dimension_numbers<[1], [0], [0], [1], [0, 0, 1, 1], [], []>} : vector<256x32xbf16>, vector<32x48xbf16>, vector<256x48xf32> -> vector<256x48xf32>
    %233 = arith.addf %226, %232 : vector<256x48xf32>
    %c23_135 = arith.constant 23 : index
    %c0_136 = arith.constant 0 : index
    %234 = vector.load %arg34[%c23_135, %c0_136] : memref<304x32xf32, #tpu.memory_space<vmem>>, vector<256x32xf32>
    %cst_137 = arith.constant 0.000000e+00 : f32
    %235 = vector.broadcast %cst_137 : f32 to vector<256x32xf32>
    %236 = arith.select %3, %234, %235 : vector<256x32xi1>, vector<256x32xf32>
    %237 = arith.truncf %236 : vector<256x32xf32> to vector<256x32xbf16>
    %c96_138 = arith.constant 96 : index
    %c0_139 = arith.constant 0 : index
    %238 = vector.load %arg20[%c96_138, %c0_139] : memref<288x48xbf16, #tpu.memory_space<vmem>>, vector<32x48xbf16>
    %cst_140 = arith.constant dense<0.000000e+00> : vector<256x48xf32>
    %239 = tpu.matmul %237, %238, %cst_140 {dimension_numbers = #tpu.dot_dimension_numbers<[1], [0], [0], [1], [0, 0, 1, 1], [], []>} : vector<256x32xbf16>, vector<32x48xbf16>, vector<256x48xf32> -> vector<256x48xf32>
    %240 = arith.addf %233, %239 : vector<256x48xf32>
    %c24_141 = arith.constant 24 : index
    %c0_142 = arith.constant 0 : index
    %241 = vector.load %arg34[%c24_141, %c0_142] : memref<304x32xf32, #tpu.memory_space<vmem>>, vector<256x32xf32>
    %242 = arith.truncf %241 : vector<256x32xf32> to vector<256x32xbf16>
    %c128_143 = arith.constant 128 : index
    %c0_144 = arith.constant 0 : index
    %243 = vector.load %arg20[%c128_143, %c0_144] : memref<288x48xbf16, #tpu.memory_space<vmem>>, vector<32x48xbf16>
    %cst_145 = arith.constant dense<0.000000e+00> : vector<256x48xf32>
    %244 = tpu.matmul %242, %243, %cst_145 {dimension_numbers = #tpu.dot_dimension_numbers<[1], [0], [0], [1], [0, 0, 1, 1], [], []>} : vector<256x32xbf16>, vector<32x48xbf16>, vector<256x48xf32> -> vector<256x48xf32>
    %245 = arith.addf %240, %244 : vector<256x48xf32>
    %c25_146 = arith.constant 25 : index
    %c0_147 = arith.constant 0 : index
    %246 = vector.load %arg34[%c25_146, %c0_147] : memref<304x32xf32, #tpu.memory_space<vmem>>, vector<256x32xf32>
    %cst_148 = arith.constant 0.000000e+00 : f32
    %247 = vector.broadcast %cst_148 : f32 to vector<256x32xf32>
    %248 = arith.select %5, %246, %247 : vector<256x32xi1>, vector<256x32xf32>
    %249 = arith.truncf %248 : vector<256x32xf32> to vector<256x32xbf16>
    %c160_149 = arith.constant 160 : index
    %c0_150 = arith.constant 0 : index
    %250 = vector.load %arg20[%c160_149, %c0_150] : memref<288x48xbf16, #tpu.memory_space<vmem>>, vector<32x48xbf16>
    %cst_151 = arith.constant dense<0.000000e+00> : vector<256x48xf32>
    %251 = tpu.matmul %249, %250, %cst_151 {dimension_numbers = #tpu.dot_dimension_numbers<[1], [0], [0], [1], [0, 0, 1, 1], [], []>} : vector<256x32xbf16>, vector<32x48xbf16>, vector<256x48xf32> -> vector<256x48xf32>
    %252 = arith.addf %245, %251 : vector<256x48xf32>
    %c39_152 = arith.constant 39 : index
    %c0_153 = arith.constant 0 : index
    %253 = vector.load %arg34[%c39_152, %c0_153] : memref<304x32xf32, #tpu.memory_space<vmem>>, vector<256x32xf32>
    %cst_154 = arith.constant 0.000000e+00 : f32
    %254 = vector.broadcast %cst_154 : f32 to vector<256x32xf32>
    %255 = arith.select %3, %253, %254 : vector<256x32xi1>, vector<256x32xf32>
    %256 = arith.truncf %255 : vector<256x32xf32> to vector<256x32xbf16>
    %c192_155 = arith.constant 192 : index
    %c0_156 = arith.constant 0 : index
    %257 = vector.load %arg20[%c192_155, %c0_156] : memref<288x48xbf16, #tpu.memory_space<vmem>>, vector<32x48xbf16>
    %cst_157 = arith.constant dense<0.000000e+00> : vector<256x48xf32>
    %258 = tpu.matmul %256, %257, %cst_157 {dimension_numbers = #tpu.dot_dimension_numbers<[1], [0], [0], [1], [0, 0, 1, 1], [], []>} : vector<256x32xbf16>, vector<32x48xbf16>, vector<256x48xf32> -> vector<256x48xf32>
    %259 = arith.addf %252, %258 : vector<256x48xf32>
    %c40_158 = arith.constant 40 : index
    %c0_159 = arith.constant 0 : index
    %260 = vector.load %arg34[%c40_158, %c0_159] : memref<304x32xf32, #tpu.memory_space<vmem>>, vector<256x32xf32>
    %261 = arith.truncf %260 : vector<256x32xf32> to vector<256x32xbf16>
    %c224_160 = arith.constant 224 : index
    %c0_161 = arith.constant 0 : index
    %262 = vector.load %arg20[%c224_160, %c0_161] : memref<288x48xbf16, #tpu.memory_space<vmem>>, vector<32x48xbf16>
    %cst_162 = arith.constant dense<0.000000e+00> : vector<256x48xf32>
    %263 = tpu.matmul %261, %262, %cst_162 {dimension_numbers = #tpu.dot_dimension_numbers<[1], [0], [0], [1], [0, 0, 1, 1], [], []>} : vector<256x32xbf16>, vector<32x48xbf16>, vector<256x48xf32> -> vector<256x48xf32>
    %264 = arith.addf %259, %263 : vector<256x48xf32>
    %c41_163 = arith.constant 41 : index
    %c0_164 = arith.constant 0 : index
    %265 = vector.load %arg34[%c41_163, %c0_164] : memref<304x32xf32, #tpu.memory_space<vmem>>, vector<256x32xf32>
    %cst_165 = arith.constant 0.000000e+00 : f32
    %266 = vector.broadcast %cst_165 : f32 to vector<256x32xf32>
    %267 = arith.select %5, %265, %266 : vector<256x32xi1>, vector<256x32xf32>
    %268 = arith.truncf %267 : vector<256x32xf32> to vector<256x32xbf16>
    %c256_166 = arith.constant 256 : index
    %c0_167 = arith.constant 0 : index
    %269 = vector.load %arg20[%c256_166, %c0_167] : memref<288x48xbf16, #tpu.memory_space<vmem>>, vector<32x48xbf16>
    %cst_168 = arith.constant dense<0.000000e+00> : vector<256x48xf32>
    %270 = tpu.matmul %268, %269, %cst_168 {dimension_numbers = #tpu.dot_dimension_numbers<[1], [0], [0], [1], [0, 0, 1, 1], [], []>} : vector<256x32xbf16>, vector<32x48xbf16>, vector<256x48xf32> -> vector<256x48xf32>
    %271 = arith.addf %264, %270 : vector<256x48xf32>
    %c0_169 = arith.constant 0 : index
    %c0_170 = arith.constant 0 : index
    %272 = vector.load %arg21[%c0_169, %c0_170] : memref<1x48xf32, #tpu.memory_space<vmem>>, vector<1x48xf32>
    %273 = vector.broadcast %272 : vector<1x48xf32> to vector<256x48xf32>
    %274 = arith.addf %271, %273 : vector<256x48xf32>
    %cst_171 = arith.constant 0.000000e+00 : f32
    %275 = vector.broadcast %cst_171 : f32 to vector<256x48xf32>
    %276 = arith.maximumf %274, %275 : vector<256x48xf32>
    %cst_172 = arith.constant 6.000000e+00 : f32
    %277 = vector.broadcast %cst_172 : f32 to vector<256x48xf32>
    %278 = arith.minimumf %276, %277 : vector<256x48xf32>
    %279 = vector.extract_strided_slice %278 {offsets = [0, 0], sizes = [256, 16], strides = [1, 1]} : vector<256x48xf32> to vector<256x16xf32>
    %cst_173 = arith.constant dense<0.000000e+00> : vector<256x6xf32>
    %280 = tpu.matmul %279, %112, %cst_173 {dimension_numbers = #tpu.dot_dimension_numbers<[1], [1], [0], [0], [0, 0, 1, 0], [], []>} : vector<256x16xf32>, vector<6x16xf32>, vector<256x6xf32> -> vector<256x6xf32>
    %cst_174 = arith.constant 2.500000e-01 : f32
    %281 = vector.broadcast %cst_174 : f32 to vector<256x6xf32>
    %282 = arith.mulf %280, %281 : vector<256x6xf32>
    %cst_175 = arith.constant dense<0xFF800000> : vector<6xf32>
    %283 = vector.multi_reduction <maximumf>, %282, %cst_175 [0] : vector<256x6xf32> to vector<6xf32>
    %284 = vector.shape_cast %283 : vector<6xf32> to vector<1x6xf32>
    %285 = vector.broadcast %284 : vector<1x6xf32> to vector<256x6xf32>
    %286 = arith.subf %282, %285 : vector<256x6xf32>
    %287 = math.exp %286 : vector<256x6xf32>
    %cst_176 = arith.constant dense<0.000000e+00> : vector<6xf32>
    %288 = vector.multi_reduction <add>, %287, %cst_176 [0] : vector<256x6xf32> to vector<6xf32>
    %289 = vector.shape_cast %288 : vector<6xf32> to vector<1x6xf32>
    %290 = tpu.reciprocal %289 {approx = true} : vector<1x6xf32> -> vector<1x6xf32>
    %291 = vector.broadcast %290 : vector<1x6xf32> to vector<256x6xf32>
    %292 = arith.mulf %287, %291 : vector<256x6xf32>
    %cst_177 = arith.constant dense<0.000000e+00> : vector<256x16xf32>
    %293 = tpu.matmul %292, %121, %cst_177 {dimension_numbers = #tpu.dot_dimension_numbers<[1], [0], [0], [1], [0, 0, 1, 1], [], []>} : vector<256x6xf32>, vector<6x16xf32>, vector<256x16xf32> -> vector<256x16xf32>
    %c0_178 = arith.constant 0 : index
    %c0_179 = arith.constant 0 : index
    %294 = vector.load %arg22[%c0_178, %c0_179] : memref<16x32xf32, #tpu.memory_space<vmem>>, vector<16x32xf32>
    %cst_180 = arith.constant dense<0.000000e+00> : vector<256x32xf32>
    %295 = tpu.matmul %293, %294, %cst_180 {dimension_numbers = #tpu.dot_dimension_numbers<[1], [0], [0], [1], [0, 0, 1, 1], [], []>} : vector<256x16xf32>, vector<16x32xf32>, vector<256x32xf32> -> vector<256x32xf32>
    %c0_181 = arith.constant 0 : index
    %c0_182 = arith.constant 0 : index
    %296 = vector.load %arg23[%c0_181, %c0_182] : memref<1x32xf32, #tpu.memory_space<vmem>>, vector<1x32xf32>
    %297 = vector.broadcast %296 : vector<1x32xf32> to vector<256x32xf32>
    %298 = arith.addf %295, %297 : vector<256x32xf32>
    %cst_183 = arith.constant 0.000000e+00 : f32
    %299 = vector.broadcast %cst_183 : f32 to vector<256x32xf32>
    %300 = arith.maximumf %298, %299 : vector<256x32xf32>
    %cst_184 = arith.constant 6.000000e+00 : f32
    %301 = vector.broadcast %cst_184 : f32 to vector<256x32xf32>
    %302 = arith.minimumf %300, %301 : vector<256x32xf32>
    %303 = arith.addf %302, %214 : vector<256x32xf32>
    %c24_185 = arith.constant 24 : index
    %c0_186 = arith.constant 0 : index
    %304 = vector.load %arg34[%c24_185, %c0_186] : memref<304x32xf32, #tpu.memory_space<vmem>>, vector<256x32xf32>
    tpu.vector_store %arg34[%c24_185, %c0_186], %303 {strides = array<i32>} : memref<304x32xf32, #tpu.memory_space<vmem>>, vector<256x32xf32>,
    %c7_187 = arith.constant 7 : index
    %c0_188 = arith.constant 0 : index
    %305 = vector.load %arg34[%c7_187, %c0_188] : memref<304x32xf32, #tpu.memory_space<vmem>>, vector<256x32xf32>
    %cst_189 = arith.constant 0.000000e+00 : f32
    %306 = vector.broadcast %cst_189 : f32 to vector<256x32xf32>
    %307 = arith.select %3, %305, %306 : vector<256x32xi1>, vector<256x32xf32>
    %308 = arith.truncf %307 : vector<256x32xf32> to vector<256x32xbf16>
    %c0_190 = arith.constant 0 : index
    %c0_191 = arith.constant 0 : index
    %309 = vector.load %arg24[%c0_190, %c0_191] : memref<288x32xbf16, #tpu.memory_space<vmem>>, vector<32x32xbf16>
    %cst_192 = arith.constant dense<0.000000e+00> : vector<256x32xf32>
    %310 = tpu.matmul %308, %309, %cst_192 {dimension_numbers = #tpu.dot_dimension_numbers<[1], [0], [0], [1], [0, 0, 1, 1], [], []>} : vector<256x32xbf16>, vector<32x32xbf16>, vector<256x32xf32> -> vector<256x32xf32>
    %c8_193 = arith.constant 8 : index
    %c0_194 = arith.constant 0 : index
    %311 = vector.load %arg34[%c8_193, %c0_194] : memref<304x32xf32, #tpu.memory_space<vmem>>, vector<256x32xf32>
    %312 = arith.truncf %311 : vector<256x32xf32> to vector<256x32xbf16>
    %c32_195 = arith.constant 32 : index
    %c0_196 = arith.constant 0 : index
    %313 = vector.load %arg24[%c32_195, %c0_196] : memref<288x32xbf16, #tpu.memory_space<vmem>>, vector<32x32xbf16>
    %cst_197 = arith.constant dense<0.000000e+00> : vector<256x32xf32>
    %314 = tpu.matmul %312, %313, %cst_197 {dimension_numbers = #tpu.dot_dimension_numbers<[1], [0], [0], [1], [0, 0, 1, 1], [], []>} : vector<256x32xbf16>, vector<32x32xbf16>, vector<256x32xf32> -> vector<256x32xf32>
    %315 = arith.addf %310, %314 : vector<256x32xf32>
    %c9_198 = arith.constant 9 : index
    %c0_199 = arith.constant 0 : index
    %316 = vector.load %arg34[%c9_198, %c0_199] : memref<304x32xf32, #tpu.memory_space<vmem>>, vector<256x32xf32>
    %cst_200 = arith.constant 0.000000e+00 : f32
    %317 = vector.broadcast %cst_200 : f32 to vector<256x32xf32>
    %318 = arith.select %5, %316, %317 : vector<256x32xi1>, vector<256x32xf32>
    %319 = arith.truncf %318 : vector<256x32xf32> to vector<256x32xbf16>
    %c64_201 = arith.constant 64 : index
    %c0_202 = arith.constant 0 : index
    %320 = vector.load %arg24[%c64_201, %c0_202] : memref<288x32xbf16, #tpu.memory_space<vmem>>, vector<32x32xbf16>
    %cst_203 = arith.constant dense<0.000000e+00> : vector<256x32xf32>
    %321 = tpu.matmul %319, %320, %cst_203 {dimension_numbers = #tpu.dot_dimension_numbers<[1], [0], [0], [1], [0, 0, 1, 1], [], []>} : vector<256x32xbf16>, vector<32x32xbf16>, vector<256x32xf32> -> vector<256x32xf32>
    %322 = arith.addf %315, %321 : vector<256x32xf32>
    %c23_204 = arith.constant 23 : index
    %c0_205 = arith.constant 0 : index
    %323 = vector.load %arg34[%c23_204, %c0_205] : memref<304x32xf32, #tpu.memory_space<vmem>>, vector<256x32xf32>
    %cst_206 = arith.constant 0.000000e+00 : f32
    %324 = vector.broadcast %cst_206 : f32 to vector<256x32xf32>
    %325 = arith.select %3, %323, %324 : vector<256x32xi1>, vector<256x32xf32>
    %326 = arith.truncf %325 : vector<256x32xf32> to vector<256x32xbf16>
    %c96_207 = arith.constant 96 : index
    %c0_208 = arith.constant 0 : index
    %327 = vector.load %arg24[%c96_207, %c0_208] : memref<288x32xbf16, #tpu.memory_space<vmem>>, vector<32x32xbf16>
    %cst_209 = arith.constant dense<0.000000e+00> : vector<256x32xf32>
    %328 = tpu.matmul %326, %327, %cst_209 {dimension_numbers = #tpu.dot_dimension_numbers<[1], [0], [0], [1], [0, 0, 1, 1], [], []>} : vector<256x32xbf16>, vector<32x32xbf16>, vector<256x32xf32> -> vector<256x32xf32>
    %329 = arith.addf %322, %328 : vector<256x32xf32>
    %c24_210 = arith.constant 24 : index
    %c0_211 = arith.constant 0 : index
    %330 = vector.load %arg34[%c24_210, %c0_211] : memref<304x32xf32, #tpu.memory_space<vmem>>, vector<256x32xf32>
    %331 = arith.truncf %330 : vector<256x32xf32> to vector<256x32xbf16>
    %c128_212 = arith.constant 128 : index
    %c0_213 = arith.constant 0 : index
    %332 = vector.load %arg24[%c128_212, %c0_213] : memref<288x32xbf16, #tpu.memory_space<vmem>>, vector<32x32xbf16>
    %cst_214 = arith.constant dense<0.000000e+00> : vector<256x32xf32>
    %333 = tpu.matmul %331, %332, %cst_214 {dimension_numbers = #tpu.dot_dimension_numbers<[1], [0], [0], [1], [0, 0, 1, 1], [], []>} : vector<256x32xbf16>, vector<32x32xbf16>, vector<256x32xf32> -> vector<256x32xf32>
    %334 = arith.addf %329, %333 : vector<256x32xf32>
    %c25_215 = arith.constant 25 : index
    %c0_216 = arith.constant 0 : index
    %335 = vector.load %arg34[%c25_215, %c0_216] : memref<304x32xf32, #tpu.memory_space<vmem>>, vector<256x32xf32>
    %cst_217 = arith.constant 0.000000e+00 : f32
    %336 = vector.broadcast %cst_217 : f32 to vector<256x32xf32>
    %337 = arith.select %5, %335, %336 : vector<256x32xi1>, vector<256x32xf32>
    %338 = arith.truncf %337 : vector<256x32xf32> to vector<256x32xbf16>
    %c160_218 = arith.constant 160 : index
    %c0_219 = arith.constant 0 : index
    %339 = vector.load %arg24[%c160_218, %c0_219] : memref<288x32xbf16, #tpu.memory_space<vmem>>, vector<32x32xbf16>
    %cst_220 = arith.constant dense<0.000000e+00> : vector<256x32xf32>
    %340 = tpu.matmul %338, %339, %cst_220 {dimension_numbers = #tpu.dot_dimension_numbers<[1], [0], [0], [1], [0, 0, 1, 1], [], []>} : vector<256x32xbf16>, vector<32x32xbf16>, vector<256x32xf32> -> vector<256x32xf32>
    %341 = arith.addf %334, %340 : vector<256x32xf32>
    %c39_221 = arith.constant 39 : index
    %c0_222 = arith.constant 0 : index
    %342 = vector.load %arg34[%c39_221, %c0_222] : memref<304x32xf32, #tpu.memory_space<vmem>>, vector<256x32xf32>
    %cst_223 = arith.constant 0.000000e+00 : f32
    %343 = vector.broadcast %cst_223 : f32 to vector<256x32xf32>
    %344 = arith.select %3, %342, %343 : vector<256x32xi1>, vector<256x32xf32>
    %345 = arith.truncf %344 : vector<256x32xf32> to vector<256x32xbf16>
    %c192_224 = arith.constant 192 : index
    %c0_225 = arith.constant 0 : index
    %346 = vector.load %arg24[%c192_224, %c0_225] : memref<288x32xbf16, #tpu.memory_space<vmem>>, vector<32x32xbf16>
    %cst_226 = arith.constant dense<0.000000e+00> : vector<256x32xf32>
    %347 = tpu.matmul %345, %346, %cst_226 {dimension_numbers = #tpu.dot_dimension_numbers<[1], [0], [0], [1], [0, 0, 1, 1], [], []>} : vector<256x32xbf16>, vector<32x32xbf16>, vector<256x32xf32> -> vector<256x32xf32>
    %348 = arith.addf %341, %347 : vector<256x32xf32>
    %c40_227 = arith.constant 40 : index
    %c0_228 = arith.constant 0 : index
    %349 = vector.load %arg34[%c40_227, %c0_228] : memref<304x32xf32, #tpu.memory_space<vmem>>, vector<256x32xf32>
    %350 = arith.truncf %349 : vector<256x32xf32> to vector<256x32xbf16>
    %c224_229 = arith.constant 224 : index
    %c0_230 = arith.constant 0 : index
    %351 = vector.load %arg24[%c224_229, %c0_230] : memref<288x32xbf16, #tpu.memory_space<vmem>>, vector<32x32xbf16>
    %cst_231 = arith.constant dense<0.000000e+00> : vector<256x32xf32>
    %352 = tpu.matmul %350, %351, %cst_231 {dimension_numbers = #tpu.dot_dimension_numbers<[1], [0], [0], [1], [0, 0, 1, 1], [], []>} : vector<256x32xbf16>, vector<32x32xbf16>, vector<256x32xf32> -> vector<256x32xf32>
    %353 = arith.addf %348, %352 : vector<256x32xf32>
    %c41_232 = arith.constant 41 : index
    %c0_233 = arith.constant 0 : index
    %354 = vector.load %arg34[%c41_232, %c0_233] : memref<304x32xf32, #tpu.memory_space<vmem>>, vector<256x32xf32>
    %cst_234 = arith.constant 0.000000e+00 : f32
    %355 = vector.broadcast %cst_234 : f32 to vector<256x32xf32>
    %356 = arith.select %5, %354, %355 : vector<256x32xi1>, vector<256x32xf32>
    %357 = arith.truncf %356 : vector<256x32xf32> to vector<256x32xbf16>
    %c256_235 = arith.constant 256 : index
    %c0_236 = arith.constant 0 : index
    %358 = vector.load %arg24[%c256_235, %c0_236] : memref<288x32xbf16, #tpu.memory_space<vmem>>, vector<32x32xbf16>
    %cst_237 = arith.constant dense<0.000000e+00> : vector<256x32xf32>
    %359 = tpu.matmul %357, %358, %cst_237 {dimension_numbers = #tpu.dot_dimension_numbers<[1], [0], [0], [1], [0, 0, 1, 1], [], []>} : vector<256x32xbf16>, vector<32x32xbf16>, vector<256x32xf32> -> vector<256x32xf32>
    %360 = arith.addf %353, %359 : vector<256x32xf32>
    %c0_238 = arith.constant 0 : index
    %c0_239 = arith.constant 0 : index
    %361 = vector.load %arg25[%c0_238, %c0_239] : memref<1x32xf32, #tpu.memory_space<vmem>>, vector<1x32xf32>
    %362 = vector.broadcast %361 : vector<1x32xf32> to vector<256x32xf32>
    %363 = arith.addf %360, %362 : vector<256x32xf32>
    %cst_240 = arith.constant 0.000000e+00 : f32
    %364 = vector.broadcast %cst_240 : f32 to vector<256x32xf32>
    %365 = arith.maximumf %363, %364 : vector<256x32xf32>
    %cst_241 = arith.constant 6.000000e+00 : f32
    %366 = vector.broadcast %cst_241 : f32 to vector<256x32xf32>
    %367 = arith.minimumf %365, %366 : vector<256x32xf32>
    %c0_242 = arith.constant 0 : index
    %c0_243 = arith.constant 0 : index
    %368 = vector.load %arg26[%c0_242, %c0_243] : memref<32x32xf32, #tpu.memory_space<vmem>>, vector<32x32xf32>
    %cst_244 = arith.constant dense<0.000000e+00> : vector<256x32xf32>
    %369 = tpu.matmul %367, %368, %cst_244 {dimension_numbers = #tpu.dot_dimension_numbers<[1], [0], [0], [1], [0, 0, 1, 1], [], []>} : vector<256x32xf32>, vector<32x32xf32>, vector<256x32xf32> -> vector<256x32xf32>
    %c0_245 = arith.constant 0 : index
    %c0_246 = arith.constant 0 : index
    %370 = vector.load %arg27[%c0_245, %c0_246] : memref<48x32xf32, #tpu.memory_space<vmem>>, vector<48x32xf32>
    %cst_247 = arith.constant dense<0.000000e+00> : vector<256x32xf32>
    %371 = tpu.matmul %278, %370, %cst_247 {dimension_numbers = #tpu.dot_dimension_numbers<[1], [0], [0], [1], [0, 0, 1, 1], [], []>} : vector<256x48xf32>, vector<48x32xf32>, vector<256x32xf32> -> vector<256x32xf32>
    %372 = arith.addf %369, %371 : vector<256x32xf32>
    %c0_248 = arith.constant 0 : index
    %c0_249 = arith.constant 0 : index
    %373 = vector.load %arg28[%c0_248, %c0_249] : memref<1x32xf32, #tpu.memory_space<vmem>>, vector<1x32xf32>
    %374 = vector.broadcast %373 : vector<1x32xf32> to vector<256x32xf32>
    %375 = arith.addf %372, %374 : vector<256x32xf32>
    %cst_250 = arith.constant 0.000000e+00 : f32
    %376 = vector.broadcast %cst_250 : f32 to vector<256x32xf32>
    %377 = arith.maximumf %375, %376 : vector<256x32xf32>
    %cst_251 = arith.constant 6.000000e+00 : f32
    %378 = vector.broadcast %cst_251 : f32 to vector<256x32xf32>
    %379 = arith.minimumf %377, %378 : vector<256x32xf32>
    %380 = arith.addf %11, %379 : vector<256x32xf32>
    %c0_252 = arith.constant 0 : index
    %c0_253 = arith.constant 0 : index
    %381 = vector.load %arg29[%c0_252, %c0_253] : memref<32x128xf32, #tpu.memory_space<vmem>>, vector<32x128xf32>
    %cst_254 = arith.constant dense<0.000000e+00> : vector<256x128xf32>
    %382 = tpu.matmul %380, %381, %cst_254 {dimension_numbers = #tpu.dot_dimension_numbers<[1], [0], [0], [1], [0, 0, 1, 1], [], []>} : vector<256x32xf32>, vector<32x128xf32>, vector<256x128xf32> -> vector<256x128xf32>
    %c0_255 = arith.constant 0 : index
    %c0_256 = arith.constant 0 : index
    %383 = vector.load %arg30[%c0_255, %c0_256] : memref<1x128xf32, #tpu.memory_space<vmem>>, vector<1x128xf32>
    %384 = vector.broadcast %383 : vector<1x128xf32> to vector<256x128xf32>
    %385 = arith.addf %382, %384 : vector<256x128xf32>
    %cst_257 = arith.constant 0.000000e+00 : f32
    %386 = vector.broadcast %cst_257 : f32 to vector<256x128xf32>
    %387 = arith.maximumf %385, %386 : vector<256x128xf32>
    %cst_258 = arith.constant 6.000000e+00 : f32
    %388 = vector.broadcast %cst_258 : f32 to vector<256x128xf32>
    %389 = arith.minimumf %387, %388 : vector<256x128xf32>
    %c0_259 = arith.constant 0 : index
    %c0_260 = arith.constant 0 : index
    %390 = vector.load %arg31[%c0_259, %c0_260] : memref<128x32xf32, #tpu.memory_space<vmem>>, vector<128x32xf32>
    %cst_261 = arith.constant dense<0.000000e+00> : vector<256x32xf32>
    %391 = tpu.matmul %389, %390, %cst_261 {dimension_numbers = #tpu.dot_dimension_numbers<[1], [0], [0], [1], [0, 0, 1, 1], [], []>} : vector<256x128xf32>, vector<128x32xf32>, vector<256x32xf32> -> vector<256x32xf32>
    %c0_262 = arith.constant 0 : index
    %c0_263 = arith.constant 0 : index
    %392 = vector.load %arg32[%c0_262, %c0_263] : memref<1x32xf32, #tpu.memory_space<vmem>>, vector<1x32xf32>
    %393 = vector.broadcast %392 : vector<1x32xf32> to vector<256x32xf32>
    %394 = arith.addf %391, %393 : vector<256x32xf32>
    %395 = arith.addf %380, %394 : vector<256x32xf32>
    %396 = vector.shape_cast %395 : vector<256x32xf32> to vector<1x256x32xf32>
    %c0_264 = arith.constant 0 : index
    %c0_265 = arith.constant 0 : index
    %c0_266 = arith.constant 0 : index
    %397 = vector.load %arg33[%c0_264, %c0_265, %c0_266] : memref<1x256x32xf32, #tpu.memory_space<vmem>>, vector<1x256x32xf32>
    tpu.vector_store %arg33[%c0_264, %c0_265, %c0_266], %396 {strides = array<i32>} : memref<1x256x32xf32, #tpu.memory_space<vmem>>, vector<1x256x32xf32>,
    return
  }
  func.func @transform_0(%arg0: i32) -> (i32, i32, i32) {
    %c0_i32 = arith.constant 0 : i32
    %c0_i32_0 = arith.constant 0 : i32
    %c0_i32_1 = arith.constant 0 : i32
    return %arg0, %c0_i32, %c0_i32_0 : i32, i32, i32
  }
  func.func @transform_1(%arg0: i32) -> (i32, i32, i32) {
    %c0_i32 = arith.constant 0 : i32
    %c0_i32_0 = arith.constant 0 : i32
    %c0_i32_1 = arith.constant 0 : i32
    return %arg0, %c0_i32, %c0_i32_0 : i32, i32, i32
  }
  func.func @transform_2(%arg0: i32) -> (i32, i32) {
    %c0_i32 = arith.constant 0 : i32
    %c0_i32_0 = arith.constant 0 : i32
    %c0_i32_1 = arith.constant 0 : i32
    return %c0_i32, %c0_i32_0 : i32, i32
  }
  func.func @transform_3(%arg0: i32) -> (i32, i32) {
    %c0_i32 = arith.constant 0 : i32
    %c0_i32_0 = arith.constant 0 : i32
    %c0_i32_1 = arith.constant 0 : i32
    return %c0_i32, %c0_i32_0 : i32, i32
  }
  func.func @transform_4(%arg0: i32) -> (i32, i32) {
    %c0_i32 = arith.constant 0 : i32
    %c0_i32_0 = arith.constant 0 : i32
    %c0_i32_1 = arith.constant 0 : i32
    return %c0_i32, %c0_i32_0 : i32, i32
  }
  func.func @transform_5(%arg0: i32) -> (i32, i32) {
    %c0_i32 = arith.constant 0 : i32
    %c0_i32_0 = arith.constant 0 : i32
    %c0_i32_1 = arith.constant 0 : i32
    return %c0_i32, %c0_i32_0 : i32, i32
  }
  func.func @transform_6(%arg0: i32) -> (i32, i32) {
    %c0_i32 = arith.constant 0 : i32
    %c0_i32_0 = arith.constant 0 : i32
    %c0_i32_1 = arith.constant 0 : i32
    return %c0_i32, %c0_i32_0 : i32, i32
  }
  func.func @transform_7(%arg0: i32) -> (i32, i32) {
    %c0_i32 = arith.constant 0 : i32
    %c0_i32_0 = arith.constant 0 : i32
    %c0_i32_1 = arith.constant 0 : i32
    return %c0_i32, %c0_i32_0 : i32, i32
  }
  func.func @transform_8(%arg0: i32) -> (i32, i32) {
    %c0_i32 = arith.constant 0 : i32
    %c0_i32_0 = arith.constant 0 : i32
    %c0_i32_1 = arith.constant 0 : i32
    return %c0_i32, %c0_i32_0 : i32, i32
  }
  func.func @transform_9(%arg0: i32) -> (i32, i32) {
    %c0_i32 = arith.constant 0 : i32
    %c0_i32_0 = arith.constant 0 : i32
    %c0_i32_1 = arith.constant 0 : i32
    return %c0_i32, %c0_i32_0 : i32, i32
  }
  func.func @transform_10(%arg0: i32) -> (i32, i32) {
    %c0_i32 = arith.constant 0 : i32
    %c0_i32_0 = arith.constant 0 : i32
    %c0_i32_1 = arith.constant 0 : i32
    return %c0_i32, %c0_i32_0 : i32, i32
  }
  func.func @transform_11(%arg0: i32) -> (i32, i32) {
    %c0_i32 = arith.constant 0 : i32
    %c0_i32_0 = arith.constant 0 : i32
    %c0_i32_1 = arith.constant 0 : i32
    return %c0_i32, %c0_i32_0 : i32, i32
  }
  func.func @transform_12(%arg0: i32) -> (i32, i32) {
    %c0_i32 = arith.constant 0 : i32
    %c0_i32_0 = arith.constant 0 : i32
    %c0_i32_1 = arith.constant 0 : i32
    return %c0_i32, %c0_i32_0 : i32, i32
  }
  func.func @transform_13(%arg0: i32) -> (i32, i32) {
    %c0_i32 = arith.constant 0 : i32
    %c0_i32_0 = arith.constant 0 : i32
    %c0_i32_1 = arith.constant 0 : i32
    return %c0_i32, %c0_i32_0 : i32, i32
  }
  func.func @transform_14(%arg0: i32) -> (i32, i32) {
    %c0_i32 = arith.constant 0 : i32
    %c0_i32_0 = arith.constant 0 : i32
    %c0_i32_1 = arith.constant 0 : i32
    return %c0_i32, %c0_i32_0 : i32, i32
  }
  func.func @transform_15(%arg0: i32) -> (i32, i32) {
    %c0_i32 = arith.constant 0 : i32
    %c0_i32_0 = arith.constant 0 : i32
    %c0_i32_1 = arith.constant 0 : i32
    return %c0_i32, %c0_i32_0 : i32, i32
  }
  func.func @transform_16(%arg0: i32) -> (i32, i32) {
    %c0_i32 = arith.constant 0 : i32
    %c0_i32_0 = arith.constant 0 : i32
    %c0_i32_1 = arith.constant 0 : i32
    return %c0_i32, %c0_i32_0 : i32, i32
  }
  func.func @transform_17(%arg0: i32) -> (i32, i32) {
    %c0_i32 = arith.constant 0 : i32
    %c0_i32_0 = arith.constant 0 : i32
    %c0_i32_1 = arith.constant 0 : i32
    return %c0_i32, %c0_i32_0 : i32, i32
  }
  func.func @transform_18(%arg0: i32) -> (i32, i32) {
    %c0_i32 = arith.constant 0 : i32
    %c0_i32_0 = arith.constant 0 : i32
    %c0_i32_1 = arith.constant 0 : i32
    return %c0_i32, %c0_i32_0 : i32, i32
  }
  func.func @transform_19(%arg0: i32) -> (i32, i32) {
    %c0_i32 = arith.constant 0 : i32
    %c0_i32_0 = arith.constant 0 : i32
    %c0_i32_1 = arith.constant 0 : i32
    return %c0_i32, %c0_i32_0 : i32, i32
  }
  func.func @transform_20(%arg0: i32) -> (i32, i32) {
    %c0_i32 = arith.constant 0 : i32
    %c0_i32_0 = arith.constant 0 : i32
    %c0_i32_1 = arith.constant 0 : i32
    return %c0_i32, %c0_i32_0 : i32, i32
  }
  func.func @transform_21(%arg0: i32) -> (i32, i32) {
    %c0_i32 = arith.constant 0 : i32
    %c0_i32_0 = arith.constant 0 : i32
    %c0_i32_1 = arith.constant 0 : i32
    return %c0_i32, %c0_i32_0 : i32, i32
  }
  func.func @transform_22(%arg0: i32) -> (i32, i32) {
    %c0_i32 = arith.constant 0 : i32
    %c0_i32_0 = arith.constant 0 : i32
    %c0_i32_1 = arith.constant 0 : i32
    return %c0_i32, %c0_i32_0 : i32, i32
  }
  func.func @transform_23(%arg0: i32) -> (i32, i32) {
    %c0_i32 = arith.constant 0 : i32
    %c0_i32_0 = arith.constant 0 : i32
    %c0_i32_1 = arith.constant 0 : i32
    return %c0_i32, %c0_i32_0 : i32, i32
  }
  func.func @transform_24(%arg0: i32) -> (i32, i32) {
    %c0_i32 = arith.constant 0 : i32
    %c0_i32_0 = arith.constant 0 : i32
    %c0_i32_1 = arith.constant 0 : i32
    return %c0_i32, %c0_i32_0 : i32, i32
  }
  func.func @transform_25(%arg0: i32) -> (i32, i32) {
    %c0_i32 = arith.constant 0 : i32
    %c0_i32_0 = arith.constant 0 : i32
    %c0_i32_1 = arith.constant 0 : i32
    return %c0_i32, %c0_i32_0 : i32, i32
  }
  func.func @transform_26(%arg0: i32) -> (i32, i32) {
    %c0_i32 = arith.constant 0 : i32
    %c0_i32_0 = arith.constant 0 : i32
    %c0_i32_1 = arith.constant 0 : i32
    return %c0_i32, %c0_i32_0 : i32, i32
  }
  func.func @transform_27(%arg0: i32) -> (i32, i32) {
    %c0_i32 = arith.constant 0 : i32
    %c0_i32_0 = arith.constant 0 : i32
    %c0_i32_1 = arith.constant 0 : i32
    return %c0_i32, %c0_i32_0 : i32, i32
  }
  func.func @transform_28(%arg0: i32) -> (i32, i32) {
    %c0_i32 = arith.constant 0 : i32
    %c0_i32_0 = arith.constant 0 : i32
    %c0_i32_1 = arith.constant 0 : i32
    return %c0_i32, %c0_i32_0 : i32, i32
  }
  func.func @transform_29(%arg0: i32) -> (i32, i32) {
    %c0_i32 = arith.constant 0 : i32
    %c0_i32_0 = arith.constant 0 : i32
    %c0_i32_1 = arith.constant 0 : i32
    return %c0_i32, %c0_i32_0 : i32, i32
  }
  func.func @transform_30(%arg0: i32) -> (i32, i32) {
    %c0_i32 = arith.constant 0 : i32
    %c0_i32_0 = arith.constant 0 : i32
    %c0_i32_1 = arith.constant 0 : i32
    return %c0_i32, %c0_i32_0 : i32, i32
  }
  func.func @transform_31(%arg0: i32) -> (i32, i32) {
    %c0_i32 = arith.constant 0 : i32
    %c0_i32_0 = arith.constant 0 : i32
    %c0_i32_1 = arith.constant 0 : i32
    return %c0_i32, %c0_i32_0 : i32, i32
  }
  func.func @transform_32(%arg0: i32) -> (i32, i32, i32) {
    %c0_i32 = arith.constant 0 : i32
    %c0_i32_0 = arith.constant 0 : i32
    %c0_i32_1 = arith.constant 0 : i32
    return %arg0, %c0_i32, %c0_i32_0 : i32, i32, i32
  }
}

</mosaic_0001>

<bundles_post_ra>
// kernel: block_forward.1
= control target key start
LH: loop header
LB: loop body
LE: loop exit
PB: predicated region body
PF: predicated region fallthrough
CT: control target
= control target key end

     0   :  { %s20002_s6 = smov 1   ;;  %s20003_s10 = smov 2   ;;  %s24665_s0 = inlined_call_operand.smem [shape: u32[33], index: -1, kind: input, shape index: {}] }
   0x1   :  { %s20067_s5 = sld [smem:[%s24665_s0]]   ;;  %s20004_s14 = smov 3  }
   0x2   :  { %s20072_s9 = sld [smem:[%s24665_s0 + %s20002_s6]]   ;;  %s20005_s18 = smov 4  }
   0x3   :  { %s20077_s13 = sld [smem:[%s24665_s0 + %s20003_s10]]   ;;  %s20006_s22 = smov 5  }
   0x4   :  { %s20082_s17 = sld [smem:[%s24665_s0 + %s20004_s14]]   ;;  %s20007_s26 = smov 6  }
   0x5   :  { %s20087_s21 = sld [smem:[%s24665_s0 + %s20005_s18]]   ;;  %s20008_s30 = smov 7  }
   0x6   :  { %s20092_s25 = sld [smem:[%s24665_s0 + %s20006_s22]]   ;;  %s20009_s4 = smov 8  }
   0x7   :  { %24837 = sst [smem:[#allocation41_spill]] %s20067_s5  ;;  %s20010_s10 = smov 9  }
   0x8   :  { %24838 = sst [smem:[#allocation42_spill]] %s20072_s9  ;;  %s20011_s15 = smov 10  }
   0x9   :  { %24839 = sst [smem:[#allocation43_spill]] %s20077_s13  ;;  %s20012_s20 = smov 11  }
   0xa   :  { %24840 = sst [smem:[#allocation44_spill]] %s20082_s17  ;;  %s20014_s1 = smov 13  }
   0xb   :  { %s20097_s29 = sld [smem:[%s24665_s0 + %s20007_s26]]   ;;  %s20013_s26 = smov 12  }
   0xc   :  { %s20102_s3 = sld [smem:[%s24665_s0 + %s20008_s30]]   ;;  %s20015_s7 = smov 14  }
   0xd   :  { %s20107_s8 = sld [smem:[%s24665_s0 + %s20009_s4]]   ;;  %s20017_s22 = smov 16  }
   0xe   :  { %s20112_s14 = sld [smem:[%s24665_s0 + %s20010_s10]]   ;;  %s20018_s28 = smov 17  }
   0xf   :  { %s20117_s19 = sld [smem:[%s24665_s0 + %s20011_s15]]   ;;  %s20016_s15 = smov 15  }
  0x10   :  { %s20122_s24 = sld [smem:[%s24665_s0 + %s20012_s20]]  }
  0x11   :  { %s20127_s30 = sld [smem:[%s24665_s0 + %s20013_s26]]  }
  0x12   :  { %24841 = sst [smem:[#allocation45_spill]] %s20102_s3 }
  0x13   :  { %24842 = sst [smem:[#allocation46_spill]] %s20107_s8 }
  0x14   :  { %24843 = sst [smem:[#allocation47_spill]] %s20112_s14 }
  0x15   :  { %s20132_s6 = sld [smem:[%s24665_s0 + %s20014_s1]]  }
  0x16   :  { %24844 = sst [smem:[#allocation48_spill]] %s20122_s24 }
  0x17   :  { %s20137_s12 = sld [smem:[%s24665_s0 + %s20015_s7]]   ;;  %s20019_s7 = smov 18  }
  0x18   :  { %s20142_s20 = sld [smem:[%s24665_s0 + %s20016_s15]]   ;;  %s20020_s15 = smov 19  }
  0x19   :  { %s20147_s27 = sld [smem:[%s24665_s0 + %s20017_s22]]   ;;  %s20021_s22 = smov 20  }
  0x1a   :  { %s20152_s4 = sld [smem:[%s24665_s0 + %s20018_s28]]   ;;  %s20022_s28 = smov 21  }
  0x1b   :  { %24845 = sst [smem:[#allocation49_spill]] %s20132_s6 }
  0x1c   :  { %s20157_s6 = sld [smem:[%s24665_s0 + %s20019_s7]]   ;;  %s20023_s7 = smov 22  }
  0x1d   :  { %s20167_s24 = sld [smem:[%s24665_s0 + %s20021_s22]]   ;;  %s20025_s22 = smov 24  }
  0x1e   :  { %24846 = sst [smem:[#allocation50_spill]] %s20142_s20 }
  0x1f   :  { %s20162_s20 = sld [smem:[%s24665_s0 + %s20020_s15]]   ;;  %s20024_s15 = smov 23  }
  0x20   :  { %24847 = sst [smem:[#allocation51_spill]] %s20152_s4 }
  0x21   :  { %s20172_s4 = sld [smem:[%s24665_s0 + %s20022_s28]]   ;;  %s20026_s28 = smov 25  }
  0x22   :  { %24848 = sst [smem:[#allocation52_spill]] %s20157_s6 }
  0x23   :  { %24850 = sst [smem:[#allocation54_spill]] %s20167_s24 }
  0x24   :  { %s20177_s14 = sld [smem:[%s24665_s0 + %s20023_s7]]   ;;  %s20027_s7 = smov 26  }
  0x25   :  { %24849 = sst [smem:[#allocation53_spill]] %s20162_s20 }
  0x26   :  { %s20182_s20 = sld [smem:[%s24665_s0 + %s20024_s15]]   ;;  %s20028_s15 = smov 27  }
  0x27   :  { %24851 = sst [smem:[#allocation55_spill]] %s20172_s4 }
  0x28   :  { %s20187_s24 = sld [smem:[%s24665_s0 + %s20025_s22]]   ;;  %s20029_s22 = smov 28  }
  0x29   :  { %s20192_s3 = sld [smem:[%s24665_s0 + %s20026_s28]]   ;;  %s20030_s28 = smov 29  }
  0x2a   :  { %s20197_s17 = sld [smem:[%s24665_s0 + %s20027_s7]]   ;;  %s20031_s7 = smov 30  }
  0x2b   :  { %s20207_s13 = sld [smem:[%s24665_s0 + %s20029_s22]]   ;;  %s20033_s22 = smov 32  }
  0x2c   :  { %24852 = sst [smem:[#allocation56_spill]] %s20182_s20 }
  0x2d   :  { %s20202_s20 = sld [smem:[%s24665_s0 + %s20028_s15]]   ;;  %s20032_s15 = smov 31  }
  0x2e   :  { %s20212_s9 = sld [smem:[%s24665_s0 + %s20030_s28]]  }
  0x2f   :  { %24853 = sst [smem:[#allocation57_spill]] %s20192_s3 }
  0x30   :  { %24854 = sst [smem:[#allocation58_spill]] %s20197_s17 }
  0x31   :  { %24855 = sst [smem:[#allocation59_spill]] %s20207_s13 }
  0x32   :  { %s20217_s17 = sld [smem:[%s24665_s0 + %s20031_s7]]  }
  0x33   :  { %s20222_s5 = sld [smem:[%s24665_s0 + %s20032_s15]]  }
  0x34   :  { %24856 = sst [smem:[#allocation60_spill]] %s20212_s9 }
  0x35   :  { %s20227_s13 = sld [smem:[%s24665_s0 + %s20033_s22]]  }
  0x39   :  { %24857 = sst [smem:[#allocation61_spill]] %s20222_s5 }
  0x3a   :  { %70 = vsyncpa [#allocation4], 0 }
  0x3b   :  { %71 = vsyncpa [#allocation7], 0 }
  0x3c   :  { %72 = vsyncpa [#allocation10], 0 }
  0x3d   :  { %73 = vsyncpa [#allocation13], 0 }
  0x3e   :  { %74 = vsyncpa [#allocation16], 0 }
  0x3f   :  { %75 = vsyncpa [#allocation19], 0 }
  0x40   :  { %76 = vsyncpa [#allocation22], 0 }
  0x41   :  { %77 = vsyncpa [#allocation25], 0 }
  0x42   :  { %78 = vsyncpa [#allocation28], 0 }
  0x43   :  { %79 = vsyncpa [#allocation5], 0 }
  0x44   :  { %81 = vsyncpa [#allocation5 + $0x1], 0  ;;  %s20229_s28 = smov 0   ;;  %s20231_s1 = smov 0  }
  0x45   :  { %s20233_s2 = smov 0   ;;  %s20235_s7 = smov 0  }
  0x46 LB: > { %s24858_s9 = sld [smem:[#allocation60_spill]]  ;;  %s24860_s5 = sld [smem:[#allocation61_spill]]  ;;  %s19992_s1 = sphi %s20231_s1, %s25129_s1   ;;  %s19988_s28 = sphi %s20229_s28, %s25128_s28   ;;  %s20000_s7 = sphi %s20235_s7, %s25125_s7   ;;  %s19996_s2 = sphi %s20233_s2, %s25127_s2  }
  0x47   : > { %s24859_s6 = sld [smem:[#allocation52_spill]]  ;;  %s24861_s3 = sld [smem:[#allocation57_spill]] }
  0x48   : > { %s24862_s4 = sld [smem:[#allocation55_spill]]  ;;  %s24863_s8 = sld [smem:[#allocation46_spill]] }
  0x49   : > { %24864 = sst [smem:[#allocation62_spill]] %s19988_s28  ;;  %s20250_s0 = sadd.s32 4294967295, %s20000_s7  }
  0x4a   : > { %24865 = sst [smem:[#allocation63_spill]] %s19996_s2  ;;  %s15067_s10 = sadd.s32 4294967294, %s20000_s7  }
  0x4b   : > { %24866 = sst [smem:[#allocation64_spill]] %s20000_s7  ;;  %s20254_s11 = sadd.s32 1, %s20000_s7  }
  0x4c   : > { %24867 = sst [smem:[#allocation65_spill]] %s20254_s11  ;;  %s776_s15 = sadd.s32 1, %s19996_s2 }
  0x4d   : > { %s773_s16 = ssub.s32 %s20000_s7, %s20254_s11  ;;  %p786_p0 = scmp.ne.s32.totalorder %s19996_s2, %s19992_s1 }
  0x4e   : > { %p774_p1 = scmp.eq.s32.totalorder %s773_s16, 0  ;;  %p787_p2 = scmp.eq.s32.totalorder %s20250_s0, 1 }
  0x4f   : > { %p792_p3 = scmp.ne.s32.totalorder %s19992_s1, %s19988_s28  ;;  %p793_p4 = scmp.eq.s32.totalorder %s15067_s10, 1 }
  0x50   : > { %s20265_s18 = scalar_select %p774_p1, %s19996_s2, %s776_s15  }
  0x51   : > { %p20267_p5 = por %p787_p2, %p786_p0  ;;  %p20271_p6 = por %p793_p4, %p792_p3 }
  0x52   : > { %24868 = sst [smem:[#allocation66_spill]] %s20265_s18  ;;  %p15068_p7 = scmp.ge.s32.totalorder %s20000_s7, 1 }
  0x53   : > { %s24869_s22 = scalar_select %p20267_p5, 1, 0 }
  0x54   : > { %s24871_s23 = scalar_select %p20271_p6, 1, 0 }
  0x55   : > { %24870 = sst [smem:[#allocation67_spill]] %s24869_s22  ;;  %p800_p8 = scmp.lt.s32.totalorder %s20000_s7, 3 }
  0x56   : > { %24872 = sst [smem:[#allocation68_spill]] %s24871_s23  ;;  %p24680_p9 = scmp.eq.s32.totalorder %s20250_s0, 0 }
  0x57   : > { %p20278_p10 = pnand %p15068_p7, %p800_p8  ;;  %s20034_s10 = smov [#allocation6]  }
  0x58   : > { %s831_s15 = sshll.u32 %s20034_s10, 4  ;;  %s20035_s18 = smov [#allocation9]   ;;  %s20284_s15 = int_to_ptr.vmem [resolvable:$true] %s831_s15 }
  0x59   : > { %s24873_s26 = scalar_select %p20278_p10, 1, 0 }
  0x5a   : > { %p19009_p11 = pneg %p20278_p10  ;;  %s859_s2 = sshll.u32 %s20035_s18, 4  ;;  %s20292_s2 = int_to_ptr.vmem [resolvable:$true] %s859_s2 }
  0x5b   : > { %s20036_s11 = smov [#allocation12]   ;;  %s19426_s28 = scalar_lea.hbm %s20092_s25, 512 }
  0x5c   : > { %p20288_p12 = pnand %p24680_p9, %p19009_p11  ;;  %s20294_s23 = sshll.u32 %s20036_s11, 4  ;;  %s888_s23 = int_to_ptr.vmem [resolvable:$true] %s20294_s23 }
  0x5d   : > { %p19427_p13 = scmp.ne.s32.totalorder %s20092_s25, %s19426_s28  ;;  %p19433_p3 = scmp.lt.u32.totalorder %s19426_s28, %s20092_s25 }
  0x5e   : > { %p20300_p0 = pneg %p20288_p12 }
  0x60   : > { %p19429_p1 = pnand %p20300_p0, %p19427_p13 }
  0x62   : > { %p19430_p2 = pneg %p19429_p1 }
  0x64   : > { %p19435_p4 = pnand %p19433_p3, %p19430_p2 }
  0x66   : > { %19438 = shalt.err (!%p19435_p4)
}
  0x67   : > { %s19439_s11 = scalar_lea.vmem %s20284_s15, 512  ;;  %p19447_p9 = scmp.lt.s32.totalorder %s20284_s15, %s20284_s15 }
  0x68   : > { %p19440_p7 = scmp.ne.s32.totalorder %s20284_s15, %s19439_s11  ;;  %p19448_p6 = scmp.lt.s32.totalorder %s19439_s11, %s19439_s11 }
  0x6a   : > { %p19442_p8 = pnand %p19440_p7, %p20300_p0  ;;  %p19449_p5 = por %p19448_p6, %p19447_p9 }
  0x6c   : > { %p19443_p11 = pneg %p19442_p8 }
  0x6e   : > { %p19450_p10 = pnand %p19449_p5, %p19443_p11 }
  0x70   : > { %19453 = shalt.err (!%p19450_p10)
}
  0x71   : > { %s24686_s18 = smov 128   ;;  %s24688_s28 = smov 8  }
  0x72   : > { %19015 = dma.hbm_to_vmem [thread:$0]  (!%p20288_p12), %s20092_s25, 512, %s20284_s15, [#allocation7], %s24686_s18, %s24686_s18, %s24688_s28  }
  0x73   : > { %s19454_s7 = scalar_lea.hbm %s24863_s8, 16 }
  0x74   : > { %p19455_p13 = scmp.ne.s32.totalorder %s24863_s8, %s19454_s7  ;;  %p19461_p9 = scmp.lt.u32.totalorder %s19454_s7, %s24863_s8 }
  0x76   : > { %p19457_p6 = pnand %p19455_p13, %p20300_p0 }
  0x78   : > { %p19458_p5 = pneg %p19457_p6 }
  0x7a   : > { %p19463_p10 = pnand %p19461_p9, %p19458_p5 }
  0x7c   : > { %19466 = shalt.err (!%p19463_p10)
}
  0x7d   : > { %s19467_s11 = scalar_lea.vmem %s20292_s2, 16  ;;  %s19474_s22 = scalar_lea.vmem %s20292_s2, 32 }
  0x7e   : > { %p19468_p1 = scmp.ne.s32.totalorder %s20292_s2, %s19467_s11  ;;  %p19475_p4 = scmp.lt.s32.totalorder %s20292_s2, %s20292_s2 }
  0x7f   : > { %p19476_p7 = scmp.lt.s32.totalorder %s19474_s22, %s19467_s11 }
  0x80   : > { %p19470_p2 = pnand %p19468_p1, %p20300_p0 }
  0x81   : > { %p19477_p8 = por %p19476_p7, %p19475_p4 }
  0x82   : > { %p19471_p3 = pneg %p19470_p2 }
  0x84   : > { %p19478_p11 = pnand %p19477_p8, %p19471_p3 }
  0x86   : > { %19481 = shalt.err (!%p19478_p11)
}
  0x87   : > { %19021 = dma.hbm_to_vmem [thread:$0]  (!%p20288_p12), %s24863_s8, 16, %s20292_s2, [#allocation10]  }
  0x88   : > { %s19482_s7 = scalar_lea.hbm %s20127_s30, 16 }
  0x89   : > { %p19483_p13 = scmp.ne.s32.totalorder %s20127_s30, %s19482_s7  ;;  %p19489_p9 = scmp.lt.u32.totalorder %s19482_s7, %s20127_s30 }
  0x8b   : > { %p19485_p6 = pnand %p19483_p13, %p20300_p0 }
  0x8d   : > { %p19486_p5 = pneg %p19485_p6 }
  0x8f   : > { %p19491_p10 = pnand %p19489_p9, %p19486_p5 }
  0x91   : > { %19494 = shalt.err (!%p19491_p10)
}
  0x92   : > { %s19495_s22 = scalar_lea.vmem %s888_s23, 16  ;;  %s19502_s15 = scalar_lea.vmem %s888_s23, 32 }
  0x93   : > { %p19496_p1 = scmp.ne.s32.totalorder %s888_s23, %s19495_s22  ;;  %p19503_p4 = scmp.lt.s32.totalorder %s888_s23, %s888_s23 }
  0x94   : > { %p19504_p7 = scmp.lt.s32.totalorder %s19502_s15, %s19495_s22 }
  0x95   : > { %p19498_p2 = pnand %p19496_p1, %p20300_p0 }
  0x96   : > { %p19505_p8 = por %p19504_p7, %p19503_p4 }
  0x97   : > { %p19499_p3 = pneg %p19498_p2 }
  0x99   : > { %p19506_p11 = pnand %p19505_p8, %p19499_p3 }
  0x9b   : > { %19509 = shalt.err (!%p19506_p11)
}
  0x9c   : > { %19027 = dma.hbm_to_vmem [thread:$0]  (!%p20288_p12), %s20127_s30, 16, %s888_s23, [#allocation13]  }
  0x9d   : > { %s20039_s2 = smov [#allocation15]   ;;  %s20040_s7 = smov [#allocation18]  }
  0x9e   : > { %s915_s11 = sshll.u32 %s20039_s2, 4  ;;  %s945_s18 = sshll.u32 %s20040_s7, 4  ;;  %s916_s11 = int_to_ptr.vmem [resolvable:$true] %s915_s11  ;;  %s946_s18 = int_to_ptr.vmem [resolvable:$true] %s945_s18 }
  0x9f   : > { %s19510_s28 = scalar_lea.hbm %s20147_s27, 16 }
  0xa0   : > { %p19511_p13 = scmp.ne.s32.totalorder %s20147_s27, %s19510_s28  ;;  %p19517_p9 = scmp.lt.u32.totalorder %s19510_s28, %s20147_s27 }
  0xa2   : > { %p19513_p6 = pnand %p19511_p13, %p20300_p0 }
  0xa4   : > { %p19514_p5 = pneg %p19513_p6 }
  0xa6   : > { %p19519_p10 = pnand %p19517_p9, %p19514_p5 }
  0xa8   : > { %19522 = shalt.err (!%p19519_p10)
}
  0xa9   : > { %s19523_s22 = scalar_lea.vmem %s916_s11, 16  ;;  %s19530_s23 = scalar_lea.vmem %s916_s11, 32 }
  0xaa   : > { %p19524_p1 = scmp.ne.s32.totalorder %s916_s11, %s19523_s22  ;;  %p19531_p4 = scmp.lt.s32.totalorder %s916_s11, %s916_s11 }
  0xab   : > { %p19532_p7 = scmp.lt.s32.totalorder %s19530_s23, %s19523_s22 }
  0xac   : > { %p19526_p2 = pnand %p19524_p1, %p20300_p0 }
  0xad   : > { %p19533_p8 = por %p19532_p7, %p19531_p4 }
  0xae   : > { %p19527_p3 = pneg %p19526_p2 }
  0xb0   : > { %p19534_p11 = pnand %p19533_p8, %p19527_p3 }
  0xb2   : > { %19537 = shalt.err (!%p19534_p11)
}
  0xb3   : > { %19033 = dma.hbm_to_vmem [thread:$0]  (!%p20288_p12), %s20147_s27, 16, %s916_s11, [#allocation16]  }
  0xb4   : > { %s19538_s28 = scalar_lea.hbm %s24862_s4, 256 }
  0xb5   : > { %p19539_p13 = scmp.ne.s32.totalorder %s24862_s4, %s19538_s28  ;;  %p19545_p9 = scmp.lt.u32.totalorder %s19538_s28, %s24862_s4 }
  0xb7   : > { %p19541_p6 = pnand %p19539_p13, %p20300_p0 }
  0xb9   : > { %p19542_p5 = pneg %p19541_p6 }
  0xbb   : > { %p19547_p10 = pnand %p19545_p9, %p19542_p5 }
  0xbd   : > { %19550 = shalt.err (!%p19547_p10)
}
  0xbe   : > { %s19551_s15 = scalar_lea.vmem %s946_s18, 256  ;;  %p19559_p4 = scmp.lt.s32.totalorder %s946_s18, %s946_s18 }
  0xbf   : > { %p19552_p1 = scmp.ne.s32.totalorder %s946_s18, %s19551_s15  ;;  %p19560_p7 = scmp.lt.s32.totalorder %s19551_s15, %s19551_s15 }
  0xc1   : > { %p19554_p2 = pnand %p19552_p1, %p20300_p0  ;;  %p19561_p8 = por %p19560_p7, %p19559_p4 }
  0xc3   : > { %p19555_p3 = pneg %p19554_p2 }
  0xc5   : > { %p19562_p11 = pnand %p19561_p8, %p19555_p3 }
  0xc7   : > { %19565 = shalt.err (!%p19562_p11)
}
  0xc8   : > { %s24876_s2 = smov 8   ;;  %s24877_s11 = smov 128  }
  0xc9   : > { %19039 = dma.hbm_to_vmem [thread:$0]  (!%p20288_p12), %s24862_s4, 256, %s946_s18, [#allocation19], %s24877_s11, %s24877_s11, %s24876_s2  }
  0xca   : > { %s20041_s7 = smov [#allocation21]   ;;  %s20042_s23 = smov [#allocation24]  }
  0xcb   : > { %s973_s22 = sshll.u32 %s20041_s7, 4  ;;  %s1000_s28 = sshll.u32 %s20042_s23, 4  ;;  %s974_s22 = int_to_ptr.vmem [resolvable:$true] %s973_s22  ;;  %s1001_s28 = int_to_ptr.vmem [resolvable:$true] %s1000_s28 }
  0xcc   : > { %s19566_s15 = scalar_lea.hbm %s20187_s24, 16 }
  0xcd   : > { %p19567_p13 = scmp.ne.s32.totalorder %s20187_s24, %s19566_s15  ;;  %p19573_p9 = scmp.lt.u32.totalorder %s19566_s15, %s20187_s24 }
  0xcf   : > { %p19569_p6 = pnand %p19567_p13, %p20300_p0 }
  0xd1   : > { %p19570_p5 = pneg %p19569_p6 }
  0xd3   : > { %p19575_p10 = pnand %p19573_p9, %p19570_p5 }
  0xd5   : > { %19578 = shalt.err (!%p19575_p10)
}
  0xd6   : > { %s19579_s8 = scalar_lea.vmem %s974_s22, 16  ;;  %s19586_s18 = scalar_lea.vmem %s974_s22, 32 }
  0xd7   : > { %p19580_p1 = scmp.ne.s32.totalorder %s974_s22, %s19579_s8  ;;  %p19587_p4 = scmp.lt.s32.totalorder %s974_s22, %s974_s22 }
  0xd8   : > { %p19588_p7 = scmp.lt.s32.totalorder %s19586_s18, %s19579_s8 }
  0xd9   : > { %p19582_p2 = pnand %p19580_p1, %p20300_p0 }
  0xda   : > { %p19589_p8 = por %p19588_p7, %p19587_p4 }
  0xdb   : > { %p19583_p3 = pneg %p19582_p2 }
  0xdd   : > { %p19590_p11 = pnand %p19589_p8, %p19583_p3 }
  0xdf   : > { %19593 = shalt.err (!%p19590_p11)
}
  0xe0   : > { %19045 = dma.hbm_to_vmem [thread:$0]  (!%p20288_p12), %s20187_s24, 16, %s974_s22, [#allocation22]  }
  0xe1   : > { %s19594_s7 = scalar_lea.hbm %s20202_s20, 16 }
  0xe2   : > { %p19595_p13 = scmp.ne.s32.totalorder %s20202_s20, %s19594_s7  ;;  %p19601_p9 = scmp.lt.u32.totalorder %s19594_s7, %s20202_s20 }
  0xe4   : > { %p19597_p6 = pnand %p19595_p13, %p20300_p0 }
  0xe6   : > { %p19598_p5 = pneg %p19597_p6 }
  0xe8   : > { %p19603_p10 = pnand %p19601_p9, %p19598_p5 }
  0xea   : > { %19606 = shalt.err (!%p19603_p10)
}
  0xeb   : > { %s19607_s8 = scalar_lea.vmem %s1001_s28, 16  ;;  %s19614_s23 = scalar_lea.vmem %s1001_s28, 32 }
  0xec   : > { %p19608_p1 = scmp.ne.s32.totalorder %s1001_s28, %s19607_s8  ;;  %p19615_p4 = scmp.lt.s32.totalorder %s1001_s28, %s1001_s28 }
  0xed   : > { %p19616_p7 = scmp.lt.s32.totalorder %s19614_s23, %s19607_s8 }
  0xee   : > { %p19610_p2 = pnand %p19608_p1, %p20300_p0 }
  0xef   : > { %p19617_p8 = por %p19616_p7, %p19615_p4 }
  0xf0   : > { %p19611_p3 = pneg %p19610_p2 }
  0xf2   : > { %p19618_p11 = pnand %p19617_p8, %p19611_p3 }
  0xf4   : > { %19621 = shalt.err (!%p19618_p11)
}
  0xf5   : > { %19051 = dma.hbm_to_vmem [thread:$0]  (!%p20288_p12), %s20202_s20, 16, %s1001_s28, [#allocation25]  }
  0xf6   : > { %s20043_s22 = smov [#allocation27]   ;;  %s20044_s18 = smov [#allocation3]  }
  0xf7   : > { %s1024_s15 = sshll.u32 %s20043_s22, 4  ;;  %s818_s7 = sshll.u32 %s20044_s18, 4  ;;  %s1025_s15 = int_to_ptr.vmem [resolvable:$true] %s1024_s15  ;;  %s819_s7 = int_to_ptr.vmem [resolvable:$true] %s818_s7 }
  0xf8   : > { %s19622_s4 = scalar_lea.hbm %s24858_s9, 16 }
  0xf9   : > { %p19623_p13 = scmp.ne.s32.totalorder %s24858_s9, %s19622_s4  ;;  %p19629_p9 = scmp.lt.u32.totalorder %s19622_s4, %s24858_s9 }
  0xfb   : > { %p19625_p6 = pnand %p19623_p13, %p20300_p0 }
  0xfd   : > { %p19626_p5 = pneg %p19625_p6 }
  0xff   : > { %p19631_p10 = pnand %p19629_p9, %p19626_p5 }
 0x101   : > { %19634 = shalt.err (!%p19631_p10)
}
 0x102   : > { %s19635_s8 = scalar_lea.vmem %s1025_s15, 16  ;;  %s19642_s28 = scalar_lea.vmem %s1025_s15, 32 }
 0x103   : > { %p19636_p1 = scmp.ne.s32.totalorder %s1025_s15, %s19635_s8  ;;  %p19643_p4 = scmp.lt.s32.totalorder %s1025_s15, %s1025_s15 }
 0x104   : > { %p19644_p7 = scmp.lt.s32.totalorder %s19642_s28, %s19635_s8 }
 0x105   : > { %p19638_p2 = pnand %p19636_p1, %p20300_p0 }
 0x106   : > { %p19645_p8 = por %p19644_p7, %p19643_p4 }
 0x107   : > { %p19639_p3 = pneg %p19638_p2 }
 0x109   : > { %p19646_p11 = pnand %p19645_p8, %p19639_p3 }
 0x10b   : > { %19649 = shalt.err (!%p19646_p11)
}
 0x10c   : > { %19057 = dma.hbm_to_vmem [thread:$0]  (!%p20288_p12), %s24858_s9, 16, %s1025_s15, [#allocation28]  }
 0x10d   : > { %s19650_s4 = scalar_lea.hbm %s20087_s21, 512 }
 0x10e   : > { %p19651_p13 = scmp.ne.s32.totalorder %s20087_s21, %s19650_s4  ;;  %p19657_p9 = scmp.lt.u32.totalorder %s19650_s4, %s20087_s21 }
 0x110   : > { %p19653_p6 = pnand %p19651_p13, %p20300_p0 }
 0x112   : > { %p19654_p5 = pneg %p19653_p6 }
 0x114   : > { %p19659_p10 = pnand %p19657_p9, %p19654_p5 }
 0x116   : > { %19662 = shalt.err (!%p19659_p10)
}
 0x117   : > { %s19663_s23 = scalar_lea.vmem %s819_s7, 512  ;;  %p19671_p4 = scmp.lt.s32.totalorder %s819_s7, %s819_s7 }
 0x118   : > { %p19664_p1 = scmp.ne.s32.totalorder %s819_s7, %s19663_s23  ;;  %p19672_p7 = scmp.lt.s32.totalorder %s19663_s23, %s19663_s23 }
 0x11a   : > { %p19666_p2 = pnand %p19664_p1, %p20300_p0  ;;  %p19673_p8 = por %p19672_p7, %p19671_p4 }
 0x11c   : > { %p19667_p3 = pneg %p19666_p2 }
 0x11e   : > { %p19674_p11 = pnand %p19673_p8, %p19667_p3 }
 0x120   : > { %19677 = shalt.err (!%p19674_p11)
}
 0x121   : > { %19012 = dma.hbm_to_vmem [thread:$0]  (!%p20288_p12), %s20087_s21, 512, %s819_s7, [#allocation4], %s24877_s11, %s24877_s11, %s24876_s2  }
 0x122   : > { %s20045_s22 = smov [#allocation8]   ;;  %s20046_s18 = smov [#allocation11]  }
 0x123   : > { %s845_s15 = sshll.u32 %s20045_s22, 4  ;;  %s873_s8 = sshll.u32 %s20046_s18, 4  ;;  %s846_s15 = int_to_ptr.vmem [resolvable:$true] %s845_s15  ;;  %s874_s8 = int_to_ptr.vmem [resolvable:$true] %s873_s8 }
 0x124   : > { %s19678_s28 = scalar_lea.hbm %s20097_s29, 16 }
 0x125   : > { %p19679_p13 = scmp.ne.s32.totalorder %s20097_s29, %s19678_s28  ;;  %p19685_p9 = scmp.lt.u32.totalorder %s19678_s28, %s20097_s29 }
 0x127   : > { %p19681_p6 = pnand %p19679_p13, %p20300_p0 }
 0x129   : > { %p19682_p5 = pneg %p19681_p6 }
 0x12b   : > { %p19687_p10 = pnand %p19685_p9, %p19682_p5 }
 0x12d   : > { %19690 = shalt.err (!%p19687_p10)
}
 0x12e   : > { %s19691_s4 = scalar_lea.vmem %s846_s15, 16  ;;  %s19698_s7 = scalar_lea.vmem %s846_s15, 32 }
 0x12f   : > { %p19692_p1 = scmp.ne.s32.totalorder %s846_s15, %s19691_s4  ;;  %p19699_p4 = scmp.lt.s32.totalorder %s846_s15, %s846_s15 }
 0x130   : > { %p19700_p7 = scmp.lt.s32.totalorder %s19698_s7, %s19691_s4 }
 0x131   : > { %p19694_p2 = pnand %p19692_p1, %p20300_p0 }
 0x132   : > { %p19701_p8 = por %p19700_p7, %p19699_p4 }
 0x133   : > { %p19695_p3 = pneg %p19694_p2 }
 0x135   : > { %p19702_p11 = pnand %p19701_p8, %p19695_p3 }
 0x137   : > { %19705 = shalt.err (!%p19702_p11)
}
 0x138   : > { %19018 = dma.hbm_to_vmem [thread:$0]  (!%p20288_p12), %s20097_s29, 16, %s846_s15, [#allocation7]  }
 0x139   : > { %s19706_s23 = scalar_lea.hbm %s20117_s19, 16 }
 0x13a   : > { %p19707_p13 = scmp.ne.s32.totalorder %s20117_s19, %s19706_s23  ;;  %p19713_p9 = scmp.lt.u32.totalorder %s19706_s23, %s20117_s19 }
 0x13c   : > { %p19709_p6 = pnand %p19707_p13, %p20300_p0 }
 0x13e   : > { %p19710_p5 = pneg %p19709_p6 }
 0x140   : > { %p19715_p10 = pnand %p19713_p9, %p19710_p5 }
 0x142   : > { %19718 = shalt.err (!%p19715_p10)
}
 0x143   : > { %s19719_s22 = scalar_lea.vmem %s874_s8, 16  ;;  %s19726_s18 = scalar_lea.vmem %s874_s8, 32 }
 0x144   : > { %p19720_p1 = scmp.ne.s32.totalorder %s874_s8, %s19719_s22  ;;  %p19727_p4 = scmp.lt.s32.totalorder %s874_s8, %s874_s8 }
 0x145   : > { %p19728_p7 = scmp.lt.s32.totalorder %s19726_s18, %s19719_s22 }
 0x146   : > { %p19722_p2 = pnand %p19720_p1, %p20300_p0 }
 0x147   : > { %p19729_p8 = por %p19728_p7, %p19727_p4 }
 0x148   : > { %p19723_p3 = pneg %p19722_p2 }
 0x14a   : > { %p19730_p11 = pnand %p19729_p8, %p19723_p3 }
 0x14c   : > { %19733 = shalt.err (!%p19730_p11)
}
 0x14d   : > { %19024 = dma.hbm_to_vmem [thread:$0]  (!%p20288_p12), %s20117_s19, 16, %s874_s8, [#allocation10]  }
 0x14e   : > { %s20047_s15 = smov [#allocation14]   ;;  %s20048_s4 = smov [#allocation17]  }
 0x14f   : > { %s901_s28 = sshll.u32 %s20047_s15, 4  ;;  %s929_s7 = sshll.u32 %s20048_s4, 4  ;;  %s902_s28 = int_to_ptr.vmem [resolvable:$true] %s901_s28  ;;  %s930_s7 = int_to_ptr.vmem [resolvable:$true] %s929_s7 }
 0x150   : > { %s19734_s23 = scalar_lea.hbm %s20137_s12, 16 }
 0x151   : > { %p19735_p13 = scmp.ne.s32.totalorder %s20137_s12, %s19734_s23  ;;  %p19741_p9 = scmp.lt.u32.totalorder %s19734_s23, %s20137_s12 }
 0x153   : > { %p19737_p6 = pnand %p19735_p13, %p20300_p0 }
 0x155   : > { %p19738_p5 = pneg %p19737_p6 }
 0x157   : > { %p19743_p10 = pnand %p19741_p9, %p19738_p5 }
 0x159   : > { %19746 = shalt.err (!%p19743_p10)
}
 0x15a   : > { %s19747_s22 = scalar_lea.vmem %s902_s28, 16  ;;  %s19754_s8 = scalar_lea.vmem %s902_s28, 32 }
 0x15b   : > { %p19748_p1 = scmp.ne.s32.totalorder %s902_s28, %s19747_s22  ;;  %p19755_p4 = scmp.lt.s32.totalorder %s902_s28, %s902_s28 }
 0x15c   : > { %p19756_p7 = scmp.lt.s32.totalorder %s19754_s8, %s19747_s22 }
 0x15d   : > { %p19750_p2 = pnand %p19748_p1, %p20300_p0 }
 0x15e   : > { %p19757_p8 = por %p19756_p7, %p19755_p4 }
 0x15f   : > { %p19751_p3 = pneg %p19750_p2 }
 0x161   : > { %p19758_p11 = pnand %p19757_p8, %p19751_p3 }
 0x163   : > { %19761 = shalt.err (!%p19758_p11)
}
 0x164   : > { %19030 = dma.hbm_to_vmem [thread:$0]  (!%p20288_p12), %s20137_s12, 16, %s902_s28, [#allocation13]  }
 0x165   : > { %s19762_s18 = scalar_lea.hbm %s24859_s6, 16 }
 0x166   : > { %p19763_p13 = scmp.ne.s32.totalorder %s24859_s6, %s19762_s18  ;;  %p19769_p9 = scmp.lt.u32.totalorder %s19762_s18, %s24859_s6 }
 0x168   : > { %p19765_p6 = pnand %p19763_p13, %p20300_p0 }
 0x16a   : > { %p19766_p5 = pneg %p19765_p6 }
 0x16c   : > { %p19771_p10 = pnand %p19769_p9, %p19766_p5 }
 0x16e   : > { %19774 = shalt.err (!%p19771_p10)
}
 0x16f   : > { %s19775_s15 = scalar_lea.vmem %s930_s7, 16  ;;  %s19782_s4 = scalar_lea.vmem %s930_s7, 32 }
 0x170   : > { %p19776_p1 = scmp.ne.s32.totalorder %s930_s7, %s19775_s15  ;;  %p19783_p4 = scmp.lt.s32.totalorder %s930_s7, %s930_s7 }
 0x171   : > { %p19784_p7 = scmp.lt.s32.totalorder %s19782_s4, %s19775_s15 }
 0x172   : > { %p19778_p2 = pnand %p19776_p1, %p20300_p0 }
 0x173   : > { %p19785_p8 = por %p19784_p7, %p19783_p4 }
 0x174   : > { %p19779_p3 = pneg %p19778_p2 }
 0x176   : > { %p19786_p11 = pnand %p19785_p8, %p19779_p3 }
 0x178   : > { %19789 = shalt.err (!%p19786_p11)
}
 0x179   : > { %19036 = dma.hbm_to_vmem [thread:$0]  (!%p20288_p12), %s24859_s6, 16, %s930_s7, [#allocation16]  }
 0x17a   : > { %s20049_s28 = smov [#allocation20]   ;;  %s20050_s22 = smov [#allocation23]  }
 0x17b   : > { %s959_s23 = sshll.u32 %s20049_s28, 4  ;;  %s983_s8 = sshll.u32 %s20050_s22, 4  ;;  %s960_s23 = int_to_ptr.vmem [resolvable:$true] %s959_s23  ;;  %s984_s8 = int_to_ptr.vmem [resolvable:$true] %s983_s8 }
 0x17c   : > { %s19790_s18 = scalar_lea.hbm %s20177_s14, 16 }
 0x17d   : > { %p19791_p13 = scmp.ne.s32.totalorder %s20177_s14, %s19790_s18  ;;  %p19797_p9 = scmp.lt.u32.totalorder %s19790_s18, %s20177_s14 }
 0x17f   : > { %p19793_p6 = pnand %p19791_p13, %p20300_p0 }
 0x181   : > { %p19794_p5 = pneg %p19793_p6 }
 0x183   : > { %p19799_p10 = pnand %p19797_p9, %p19794_p5 }
 0x185   : > { %19802 = shalt.err (!%p19799_p10)
}
 0x186   : > { %s19803_s15 = scalar_lea.vmem %s960_s23, 16  ;;  %s19810_s7 = scalar_lea.vmem %s960_s23, 32 }
 0x187   : > { %p19804_p1 = scmp.ne.s32.totalorder %s960_s23, %s19803_s15  ;;  %p19811_p4 = scmp.lt.s32.totalorder %s960_s23, %s960_s23 }
 0x188   : > { %p19812_p7 = scmp.lt.s32.totalorder %s19810_s7, %s19803_s15 }
 0x189   : > { %p19806_p2 = pnand %p19804_p1, %p20300_p0 }
 0x18a   : > { %p19813_p8 = por %p19812_p7, %p19811_p4 }
 0x18b   : > { %p19807_p3 = pneg %p19806_p2 }
 0x18d   : > { %p19814_p11 = pnand %p19813_p8, %p19807_p3 }
 0x18f   : > { %19817 = shalt.err (!%p19814_p11)
}
 0x190   : > { %19042 = dma.hbm_to_vmem [thread:$0]  (!%p20288_p12), %s20177_s14, 16, %s960_s23, [#allocation19]  }
 0x191   : > { %s19818_s4 = scalar_lea.hbm %s24861_s3, 512 }
 0x192   : > { %p19819_p13 = scmp.ne.s32.totalorder %s24861_s3, %s19818_s4  ;;  %p19825_p9 = scmp.lt.u32.totalorder %s19818_s4, %s24861_s3 }
 0x194   : > { %p19821_p6 = pnand %p19819_p13, %p20300_p0 }
 0x196   : > { %p19822_p5 = pneg %p19821_p6 }
 0x198   : > { %p19827_p10 = pnand %p19825_p9, %p19822_p5 }
 0x19a   : > { %19830 = shalt.err (!%p19827_p10)
}
 0x19b   : > { %s19831_s28 = scalar_lea.vmem %s984_s8, 512  ;;  %p19839_p4 = scmp.lt.s32.totalorder %s984_s8, %s984_s8 }
 0x19c   : > { %p19832_p1 = scmp.ne.s32.totalorder %s984_s8, %s19831_s28  ;;  %p19840_p7 = scmp.lt.s32.totalorder %s19831_s28, %s19831_s28 }
 0x19e   : > { %p19834_p2 = pnand %p19832_p1, %p20300_p0  ;;  %p19841_p8 = por %p19840_p7, %p19839_p4 }
 0x1a0   : > { %p19835_p3 = pneg %p19834_p2 }
 0x1a2   : > { %p19842_p11 = pnand %p19841_p8, %p19835_p3 }
 0x1a4   : > { %19845 = shalt.err (!%p19842_p11)
}
 0x1a5   : > { %s24878_s23 = sld [smem:[#allocation59_spill]]  ;;  %s20051_s22 = smov [#allocation26]  }
 0x1a6   : > { %19048 = dma.hbm_to_vmem [thread:$0]  (!%p20288_p12), %s24861_s3, 512, %s984_s8, [#allocation22], %s24877_s11, %s24877_s11, %s24876_s2  }
 0x1a7   : > { %s1010_s18 = sshll.u32 %s20051_s22, 4  ;;  %s20052_s15 = smov [#allocation29]   ;;  %s1011_s18 = int_to_ptr.vmem [resolvable:$true] %s1010_s18 }
 0x1a8   : > { %s1038_s7 = sshll.u32 %s20052_s15, 4  ;;  %s1039_s7 = int_to_ptr.vmem [resolvable:$true] %s1038_s7 }
 0x1ab   : > { %s19846_s4 = scalar_lea.hbm %s24878_s23, 512 }
 0x1ac   : > { %p19847_p13 = scmp.ne.s32.totalorder %s24878_s23, %s19846_s4  ;;  %p19853_p9 = scmp.lt.u32.totalorder %s19846_s4, %s24878_s23 }
 0x1ae   : > { %p19849_p6 = pnand %p19847_p13, %p20300_p0 }
 0x1b0   : > { %p19850_p5 = pneg %p19849_p6 }
 0x1b2   : > { %p19855_p10 = pnand %p19853_p9, %p19850_p5 }
 0x1b4   : > { %19858 = shalt.err (!%p19855_p10)
}
 0x1b5   : > { %s19859_s28 = scalar_lea.vmem %s1011_s18, 512  ;;  %p19867_p4 = scmp.lt.s32.totalorder %s1011_s18, %s1011_s18 }
 0x1b6   : > { %p19860_p1 = scmp.ne.s32.totalorder %s1011_s18, %s19859_s28  ;;  %p19868_p7 = scmp.lt.s32.totalorder %s19859_s28, %s19859_s28 }
 0x1b8   : > { %p19862_p2 = pnand %p19860_p1, %p20300_p0  ;;  %p19869_p8 = por %p19868_p7, %p19867_p4 }
 0x1ba   : > { %p19863_p3 = pneg %p19862_p2 }
 0x1bc   : > { %p19870_p11 = pnand %p19869_p8, %p19863_p3 }
 0x1be   : > { %19873 = shalt.err (!%p19870_p11)
}
 0x1bf   : > { %19054 = dma.hbm_to_vmem [thread:$0]  (!%p20288_p12), %s24878_s23, 512, %s1011_s18, [#allocation25], %s24877_s11, %s24877_s11, %s24876_s2  }
 0x1c0   : > { %s19874_s8 = scalar_lea.hbm %s24860_s5, 16 }
 0x1c1   : > { %p19875_p13 = scmp.ne.s32.totalorder %s24860_s5, %s19874_s8  ;;  %p19881_p9 = scmp.lt.u32.totalorder %s19874_s8, %s24860_s5 }
 0x1c3   : > { %p19877_p6 = pnand %p19875_p13, %p20300_p0 }
 0x1c5   : > { %p19878_p5 = pneg %p19877_p6 }
 0x1c7   : > { %p19883_p10 = pnand %p19881_p9, %p19878_p5 }
 0x1c9   : > { %19886 = shalt.err (!%p19883_p10)
}
 0x1ca   : > { %s19887_s22 = scalar_lea.vmem %s1039_s7, 16  ;;  %s19894_s15 = scalar_lea.vmem %s1039_s7, 32 }
 0x1cb   : > { %p19888_p1 = scmp.ne.s32.totalorder %s1039_s7, %s19887_s22  ;;  %p19895_p4 = scmp.lt.s32.totalorder %s1039_s7, %s1039_s7 }
 0x1cc   : > { %p19896_p7 = scmp.lt.s32.totalorder %s19894_s15, %s19887_s22 }
 0x1cd   : > { %p19890_p2 = pnand %p19888_p1, %p20300_p0 }
 0x1ce   : > { %p19897_p8 = por %p19896_p7, %p19895_p4 }
 0x1cf   : > { %p19891_p3 = pneg %p19890_p2 }
 0x1d1   : > { %p19898_p11 = pnand %p19897_p8, %p19891_p3 }
 0x1d3   : > { %19901 = shalt.err (!%p19898_p11)
}
 0x1d4   : > { %19060 = dma.hbm_to_vmem [thread:$0]  (!%p20288_p12), %s24860_s5, 16, %s1039_s7, [#allocation28]  }
 0x1d5   : > { %p24879_p13 = scmp.ne.s32.totalorder %s24873_s26, 0 }
 0x1d7   : > { %1067 = sbr.rel (%p24879_p13) target bundleno = 5825 (0x16c1), region = 148 }
 0x1de   : > { %p24880_p6 = scmp.eq.s32.totalorder %s20250_s0, 0 }
 0x1e0   : > { %19947 = dma.done.wait (%p24880_p6), [#allocation4], 512   ;;  %p24881_p5 = pmov %p24880_p6 }
 0x1e2   : > { %19949 = vsyncadd (%p24881_p5), [#allocation4], 4294966784  ;;  %p24882_p0 = pmov %p24881_p5 }
 0x1e4   : > { %19951 = dma.done.wait (%p24882_p0), [#allocation7], 528   ;;  %p24883_p9 = pmov %p24882_p0 }
 0x1e5   : > { %p24884_p10 = pmov %p24882_p0 }
 0x1e6   : > { %19953 = vsyncadd (%p24883_p9), [#allocation7], 4294966768 }
 0x1e7   : > { %19955 = dma.done.wait (%p24884_p10), [#allocation10], 32   ;;  %p24885_p12 = pmov %p24882_p0 }
 0x1e8   : > { %p24886_p1 = pmov %p24882_p0 }
 0x1e9   : > { %19957 = vsyncadd (%p24885_p12), [#allocation10], 4294967264 }
 0x1ea   : > { %19959 = dma.done.wait (%p24886_p1), [#allocation13], 32   ;;  %p24887_p2 = pmov %p24882_p0 }
 0x1eb   : > { %p24888_p3 = pmov %p24882_p0 }
 0x1ec   : > { %19961 = vsyncadd (%p24887_p2), [#allocation13], 4294967264 }
 0x1ed   : > { %19963 = dma.done.wait (%p24888_p3), [#allocation16], 32   ;;  %p24889_p4 = pmov %p24882_p0 }
 0x1ee   : > { %p24890_p7 = pmov %p24882_p0 }
 0x1ef   : > { %19965 = vsyncadd (%p24889_p4), [#allocation16], 4294967264 }
 0x1f0   : > { %19967 = dma.done.wait (%p24890_p7), [#allocation19], 272   ;;  %p24891_p8 = pmov %p24882_p0 }
 0x1f1   : > { %p24892_p11 = pmov %p24882_p0 }
 0x1f2   : > { %19969 = vsyncadd (%p24891_p8), [#allocation19], 4294967024 }
 0x1f3   : > { %19971 = dma.done.wait (%p24892_p11), [#allocation22], 528   ;;  %p24893_p13 = pmov %p24882_p0 }
 0x1f4   : > { %p24894_p6 = pmov %p24882_p0 }
 0x1f5   : > { %19973 = vsyncadd (%p24893_p13), [#allocation22], 4294966768 }
 0x1f6   : > { %19975 = dma.done.wait (%p24894_p6), [#allocation25], 528   ;;  %p24895_p5 = pmov %p24882_p0 }
 0x1f8   : > { %19977 = vsyncadd (%p24895_p5), [#allocation25], 4294966768 }
 0x1f9   : > { %19979 = dma.done.wait (%p24882_p0), [#allocation28], 32   ;;  %p24896_p9 = pmov %p24882_p0 }
 0x1fa   : > { %v24692_v0 = vmov 0.0|0.0   ;;  %vm1236_vm0 = vcmask 261120   ;;  %vm20054_vm1 = vmmov 0   ;;  %v24694_v1 = vmov 0.0   ;;  %p1218_p10 = scmp.lt.s32.totalorder %s20250_s0, 1  ;;  %v1560_v2 = vld [vmem:[#allocation6] sm:$0xff] }
 0x1fb   : > { %19981 = vsyncadd (%p24896_p9), [#allocation28], 4294967264  ;;  %18039 = vmatprep.subr.bf16.mxu0 %v24692_v0  ;;  %18045 = vmatprep.subr.bf16.mxu1 %v24692_v0  ;;  %1237 = vst.msk [vmem:[#allocation2] sm:$0xff] %vm1236_vm0, %v24694_v1  ;;  %v1561_v3 = vld [vmem:[#allocation6 + $0x8] sm:$0xff]  ;;  %v1556_v4 = vld [vmem:[#allocation3] sm:$0xff]  ;;  %s24897_s26 = sld [smem:[#allocation41_spill]] }
 0x1fc   : > { %16600 = vmatprep.mubr.msk.f32.mxu0 %vm20054_vm1, %v24694_v1  ;;  %1238 = vst.msk [vmem:[#allocation2 + $0x8] sm:$0xff] %vm1236_vm0, %v24694_v1  ;;  %1239 = vst.msk [vmem:[#allocation2 + $0x10] sm:$0xff] %vm1236_vm0, %v24694_v1  ;;  %16611 = vmatprep.mubr.msk.f32.mxu1 %vm20054_vm1, %v24694_v1  ;;  %v18040_v5 = vpack.c.bf16 %v1561_v3, %v1560_v2  ;;  %v1557_v6 = vld [vmem:[#allocation3 + $0x8] sm:$0xff]  ;;  %v1562_v7 = vld [vmem:[#allocation6 + $0x10] sm:$0xff]  ;;  %s24898_s16 = sld [smem:[#allocation42_spill]]  ;;  %s24899_s7 = sld [smem:[#allocation43_spill]] }
 0x1fd   : > { %1240 = vst.msk [vmem:[#allocation2 + $0x118] sm:$0xff] %vm1236_vm0, %v24694_v1  ;;  %1241 = vst.msk [vmem:[#allocation2 + $0x120] sm:$0xff] %vm1236_vm0, %v24694_v1  ;;  %v1563_v8 = vld [vmem:[#allocation6 + $0x18] sm:$0xff]  ;;  %v18046_v9 = vpack.c.bf16 %v1557_v6, %v1556_v4  ;;  %v1558_v10 = vld [vmem:[#allocation3 + $0x10] sm:$0xff]  ;;  %s1219_s10 = scalar_select %p1218_p10, %s20250_s0, 1  ;;  %vm1799_vm2 = vcmask 64512  }
 0x1fe   : > { %1242 = vst.msk [vmem:[#allocation2 + $0x128] sm:$0xff] %vm1236_vm0, %v24694_v1  ;;  %v1559_v11 = vld [vmem:[#allocation3 + $0x18] sm:$0xff]  ;;  %18041 = vmatpush3.bf16.msra.mxu0 %v18040_v5  ;;  %v18043_v12 = vpack.c.bf16 %v1563_v8, %v1562_v7  ;;  %s24900_s4 = sld [smem:[#allocation44_spill]]  ;;  %s24948_s28 = sld [smem:[#allocation45_spill]]  ;;  %vm1954_vm3 = vcmask 40960   ;;  %vm1975_vm5 = vcmask 46080  }
 0x1ff   : > { %18047 = vmatpush3.bf16.msra.mxu1 %v18046_v9  ;;  %18042 = vmatprep.subr.bf16.mxu0 %v24692_v0  ;;  %v18049_v13 = vpack.c.bf16 %v1559_v11, %v1558_v10  ;;  %s15813_s2 = sshll.u32 %s1219_s10, 8  ;;  %s24953_s22 = sld [smem:[#allocation47_spill]]  ;;  %vm1984_vm6 = vcmask 259072   ;;  %vm8935_vm9 = vcmask 130048   ;;  %vm9656_vm10 = vcmask 1045504  }
 0x200   : > { %18048 = vmatprep.subr.bf16.mxu1 %v24692_v0  ;;  %s24954_s15 = sld [smem:[#allocation48_spill]]  ;;  %s24959_s10 = sld [smem:[#allocation51_spill]]  ;;  %vm9292_vm11 = vcmask 48128   ;;  %vm13329_vm12 = vcmask 392192  }
 0x201   : > { %s20561_s11 = scalar_lea.vmem %s24897_s26, %s15813_s2  ;;  %s24957_s26 = sld [smem:[#allocation49_spill]] }
 0x202   : > { %18044 = vmatpush3.bf16.msra.mxu0 %v18043_v12  ;;  %s20565_s18 = scalar_lea.vmem %s24898_s16, %s15813_s2  ;;  %v1243_v14 = vld [vmem:[%s20561_s11] sm:$0xff]  ;;  %v1244_v15 = vld [vmem:[%s20561_s11 + $0x8] sm:$0xff]  ;;  %v1245_v16 = vld [vmem:[%s20561_s11 + $0x10] sm:$0xff]  ;;  %s24958_s16 = sld [smem:[#allocation50_spill]] }
 0x203   : > { %18050 = vmatpush3.bf16.msra.mxu1 %v18049_v13  ;;  %18051 = vmatprep.subr.bf16.mxu0 %v24692_v0  ;;  %v1246_v17 = vld [vmem:[%s20561_s11 + $0x18] sm:$0xff]  ;;  %v1247_v18 = vld [vmem:[%s20561_s11 + $0x20] sm:$0xff]  ;;  %v1248_v19 = vld [vmem:[%s20561_s11 + $0x28] sm:$0xff]  ;;  %s24999_s2 = sld [smem:[#allocation53_spill]] }
 0x204   : > { %16625 = vmatprep.subr.mxu1 %v24694_v1  ;;  %v1249_v20 = vld [vmem:[%s20561_s11 + $0x30] sm:$0xff]  ;;  %v1250_v21 = vld [vmem:[%s20561_s11 + $0x38] sm:$0xff]  ;;  %v1275_v22 = vld [vmem:[%s20565_s18] sm:$0xff]  ;;  %s24949_s8 = smov %s24948_s28 }
 0x205   : > { %v1276_v23 = vld [vmem:[%s20565_s18 + $0x8] sm:$0xff]  ;;  %v1251_v24 = vld [vmem:[%s20561_s11 + $0x40] sm:$0xff]  ;;  %v1253_v26 = vld [vmem:[%s20561_s11 + $0x50] sm:$0xff]  ;;  %v1307_v52 = vadd.f32 %v1275_v22, %v1243_v14 }
 0x206   : > { %v1252_v25 = vld [vmem:[%s20561_s11 + $0x48] sm:$0xff]  ;;  %v1254_v27 = vld [vmem:[%s20561_s11 + $0x58] sm:$0xff]  ;;  %v1277_v28 = vld [vmem:[%s20565_s18 + $0x10] sm:$0xff]  ;;  %v1308_v53 = vadd.f32 %v1276_v23, %v1244_v15 }
 0x207   : > { %v1278_v29 = vld [vmem:[%s20565_s18 + $0x18] sm:$0xff]  ;;  %v1279_v30 = vld [vmem:[%s20565_s18 + $0x20] sm:$0xff]  ;;  %v1256_v32 = vld [vmem:[%s20561_s11 + $0x68] sm:$0xff]  ;;  %v1309_v54 = vadd.f32 %v1277_v28, %v1245_v16 }
 0x208   : > { %v1255_v31 = vld [vmem:[%s20561_s11 + $0x60] sm:$0xff]  ;;  %v1257_v33 = vld [vmem:[%s20561_s11 + $0x70] sm:$0xff]  ;;  %v1258_v34 = vld [vmem:[%s20561_s11 + $0x78] sm:$0xff]  ;;  %v1310_v55 = vadd.f32 %v1278_v29, %v1246_v17  ;;  %v1311_v63 = vadd.f32 %v1279_v30, %v1247_v18 }
 0x209   : > { %v1280_v35 = vld [vmem:[%s20565_s18 + $0x28] sm:$0xff]  ;;  %v1281_v36 = vld [vmem:[%s20565_s18 + $0x30] sm:$0xff]  ;;  %v1282_v37 = vld [vmem:[%s20565_s18 + $0x38] sm:$0xff] }
 0x20a   : > { %v1259_v38 = vld [vmem:[%s20561_s11 + $0x80] sm:$0xff]  ;;  %v1260_v39 = vld [vmem:[%s20561_s11 + $0x88] sm:$0xff]  ;;  %v1261_v40 = vld [vmem:[%s20561_s11 + $0x90] sm:$0xff]  ;;  %v1312_v2 = vadd.f32 %v1280_v35, %v1248_v19  ;;  %v1313_v3 = vadd.f32 %v1281_v36, %v1249_v20  ;;  %v1314_v4 = vadd.f32 %v1282_v37, %v1250_v21 }
 0x20b   : > { %v1262_v41 = vld [vmem:[%s20561_s11 + $0x98] sm:$0xff]  ;;  %v1283_v42 = vld [vmem:[%s20565_s18 + $0x40] sm:$0xff]  ;;  %v1284_v43 = vld [vmem:[%s20565_s18 + $0x48] sm:$0xff] }
 0x20c   : > { %v1285_v44 = vld [vmem:[%s20565_s18 + $0x50] sm:$0xff]  ;;  %v1263_v45 = vld [vmem:[%s20561_s11 + $0xa0] sm:$0xff]  ;;  %v1264_v46 = vld [vmem:[%s20561_s11 + $0xa8] sm:$0xff]  ;;  %v1315_v12 = vadd.f32 %v1283_v42, %v1251_v24  ;;  %v1316_v13 = vadd.f32 %v1284_v43, %v1252_v25 }
 0x20d   : > { %v1265_v47 = vld [vmem:[%s20561_s11 + $0xb0] sm:$0xff]  ;;  %v1266_v48 = vld [vmem:[%s20561_s11 + $0xb8] sm:$0xff]  ;;  %v1287_v50 = vld [vmem:[%s20565_s18 + $0x60] sm:$0xff]  ;;  %v1317_v14 = vadd.f32 %v1285_v44, %v1253_v26 }
 0x20e   : > { %v1286_v49 = vld [vmem:[%s20565_s18 + $0x58] sm:$0xff]  ;;  %v1288_v51 = vld [vmem:[%s20565_s18 + $0x68] sm:$0xff]  ;;  %v1267_v56 = vld [vmem:[%s20561_s11 + $0xc0] sm:$0xff]  ;;  %v1319_v19 = vadd.f32 %v1287_v50, %v1255_v31 }
 0x20f   : > { %v1268_v57 = vld [vmem:[%s20561_s11 + $0xc8] sm:$0xff]  ;;  %v1269_v58 = vld [vmem:[%s20561_s11 + $0xd0] sm:$0xff]  ;;  %v1270_v59 = vld [vmem:[%s20561_s11 + $0xd8] sm:$0xff]  ;;  %v1318_v15 = vadd.f32 %v1286_v49, %v1254_v27  ;;  %v1320_v20 = vadd.f32 %v1288_v51, %v1256_v32 }
 0x210   : > { %v1289_v60 = vld [vmem:[%s20565_s18 + $0x70] sm:$0xff]  ;;  %v1290_v61 = vld [vmem:[%s20565_s18 + $0x78] sm:$0xff]  ;;  %v1291_v62 = vld [vmem:[%s20565_s18 + $0x80] sm:$0xff] }
 0x211   : > { %v1271_v5 = vld [vmem:[%s20561_s11 + $0xe0] sm:$0xff]  ;;  %v1272_v6 = vld [vmem:[%s20561_s11 + $0xe8] sm:$0xff]  ;;  %v1273_v7 = vld [vmem:[%s20561_s11 + $0xf0] sm:$0xff]  ;;  %v1321_v21 = vadd.f32 %v1289_v60, %v1257_v33  ;;  %v1322_v22 = vadd.f32 %v1290_v61, %v1258_v34  ;;  %v1323_v24 = vadd.f32 %v1291_v62, %v1259_v38 }
 0x212   : > { %v1274_v8 = vld [vmem:[%s20561_s11 + $0xf8] sm:$0xff]  ;;  %v1292_v9 = vld [vmem:[%s20565_s18 + $0x88] sm:$0xff]  ;;  %v1293_v10 = vld [vmem:[%s20565_s18 + $0x90] sm:$0xff] }
 0x213   : > { %v1294_v11 = vld [vmem:[%s20565_s18 + $0x98] sm:$0xff]  ;;  %v1295_v16 = vld [vmem:[%s20565_s18 + $0xa0] sm:$0xff]  ;;  %v1296_v17 = vld [vmem:[%s20565_s18 + $0xa8] sm:$0xff]  ;;  %v1324_v25 = vadd.f32 %v1292_v9, %v1260_v39  ;;  %v1325_v26 = vadd.f32 %v1293_v10, %v1261_v40 }
 0x214   : > { %v1297_v18 = vld [vmem:[%s20565_s18 + $0xb0] sm:$0xff]  ;;  %v1298_v23 = vld [vmem:[%s20565_s18 + $0xb8] sm:$0xff]  ;;  %v1299_v28 = vld [vmem:[%s20565_s18 + $0xc0] sm:$0xff]  ;;  %v1326_v30 = vadd.f32 %v1294_v11, %v1262_v41  ;;  %v1327_v37 = vadd.f32 %v1295_v16, %v1263_v45  ;;  %v1328_v42 = vadd.f32 %v1296_v17, %v1264_v46 }
 0x215   : > { %v1300_v29 = vld [vmem:[%s20565_s18 + $0xc8] sm:$0xff]  ;;  %v1301_v27 = vld [vmem:[%s20565_s18 + $0xd0] sm:$0xff]  ;;  %v1302_v35 = vld [vmem:[%s20565_s18 + $0xd8] sm:$0xff]  ;;  %v1329_v31 = vadd.f32 %v1297_v18, %v1265_v47  ;;  %v1330_v32 = vadd.f32 %v1298_v23, %v1266_v48  ;;  %v1331_v44 = vadd.f32 %v1299_v28, %v1267_v56 }
 0x216   : > { %v1303_v36 = vld [vmem:[%s20565_s18 + $0xe0] sm:$0xff]  ;;  %v1304_v33 = vld [vmem:[%s20565_s18 + $0xe8] sm:$0xff]  ;;  %v1305_v43 = vld [vmem:[%s20565_s18 + $0xf0] sm:$0xff]  ;;  %v1332_v49 = vadd.f32 %v1300_v29, %v1268_v57  ;;  %v1333_v50 = vadd.f32 %v1301_v27, %v1269_v58  ;;  %v1334_v51 = vadd.f32 %v1302_v35, %v1270_v59 }
 0x217   : > { %v1306_v34 = vld [vmem:[%s20565_s18 + $0xf8] sm:$0xff]  ;;  %v1335_v60 = vadd.f32 %v1303_v36, %v1271_v5  ;;  %v1336_v38 = vadd.f32 %v1304_v33, %v1272_v6  ;;  %v1337_v39 = vadd.f32 %v1305_v43, %v1273_v7  ;;  %v15110_v41 = vld [vmem:[%s24899_s7] ss:$0 sm:$0xff]  ;;  %s25000_s18 = smov %s24999_s2  ;;  %s25033_s7 = sld [smem:[#allocation54_spill]] }
 0x218   : > { %v1338_v40 = vadd.f32 %v1306_v34, %v1274_v8  ;;  %v1346_v61 = vmul.f32 %v15110_v41, %v1307_v52  ;;  %v1347_v62 = vmul.f32 %v15110_v41, %v1308_v53  ;;  %v1348_v9 = vmul.f32 %v15110_v41, %v1309_v54  ;;  %v15111_v7 = vld [vmem:[%s24900_s4] ss:$0 sm:$0xff]  ;;  %s25063_s4 = sld [smem:[#allocation58_spill]] }
 0x219   : > { %v1349_v45 = vmul.f32 %v15110_v41, %v1310_v55  ;;  %v1350_v46 = vmul.f32 %v15110_v41, %v1311_v63  ;;  %v1351_v47 = vmul.f32 %v15110_v41, %v1312_v2  ;;  %v1352_v48 = vmul.f32 %v15110_v41, %v1313_v3 }
 0x21a   : > { %v1353_v10 = vmul.f32 %v15110_v41, %v1314_v4  ;;  %v1354_v11 = vmul.f32 %v15110_v41, %v1315_v12  ;;  %v1355_v16 = vmul.f32 %v15110_v41, %v1316_v13  ;;  %v1356_v56 = vmul.f32 %v15110_v41, %v1317_v14 }
 0x21b   : > { %v1357_v57 = vmul.f32 %v15110_v41, %v1318_v15  ;;  %v1358_v58 = vmul.f32 %v15110_v41, %v1319_v19  ;;  %v1359_v59 = vmul.f32 %v15110_v41, %v1320_v20  ;;  %v1360_v5 = vmul.f32 %v15110_v41, %v1321_v21 }
 0x21c   : > { %v1361_v6 = vmul.f32 %v15110_v41, %v1322_v22  ;;  %v1362_v8 = vmul.f32 %v15110_v41, %v1323_v24  ;;  %v1363_v17 = vmul.f32 %v15110_v41, %v1324_v25  ;;  %v1364_v52 = vmul.f32 %v15110_v41, %v1325_v26 }
 0x21d   : > { %v1365_v18 = vmul.f32 %v15110_v41, %v1326_v30  ;;  %v1366_v53 = vmul.f32 %v15110_v41, %v1327_v37  ;;  %v1367_v54 = vmul.f32 %v15110_v41, %v1328_v42  ;;  %v1368_v55 = vmul.f32 %v15110_v41, %v1329_v31 }
 0x21e   : > { %v1369_v63 = vmul.f32 %v15110_v41, %v1330_v32  ;;  %v1370_v2 = vmul.f32 %v15110_v41, %v1331_v44  ;;  %v1371_v3 = vmul.f32 %v15110_v41, %v1332_v49  ;;  %v1372_v4 = vmul.f32 %v15110_v41, %v1333_v50 }
 0x21f   : > { %v1373_v12 = vmul.f32 %v15110_v41, %v1334_v51  ;;  %v1374_v13 = vmul.f32 %v15110_v41, %v1335_v60  ;;  %v1375_v14 = vmul.f32 %v15110_v41, %v1336_v38  ;;  %v1376_v15 = vmul.f32 %v15110_v41, %v1337_v39 }
 0x220   : > { %v1377_v19 = vmul.f32 %v15110_v41, %v1338_v40  ;;  %v20633_v20 = vadd.f32 %v15111_v7, %v1346_v61  ;;  %v20635_v21 = vadd.f32 %v15111_v7, %v1347_v62  ;;  %v20637_v22 = vadd.f32 %v15111_v7, %v1348_v9 }
 0x221   : > { %v20639_v23 = vadd.f32 %v15111_v7, %v1349_v45  ;;  %v20641_v28 = vadd.f32 %v15111_v7, %v1350_v46  ;;  %v20643_v29 = vadd.f32 %v15111_v7, %v1351_v47  ;;  %v20645_v24 = vadd.f32 %v15111_v7, %v1352_v48 }
 0x222   : > { %24901 = vst [vmem:[#allocation69_spill] sm:$0xff] %v20633_v20  ;;  %24902 = vst [vmem:[#allocation70_spill] sm:$0xff] %v20635_v21  ;;  %v20647_v25 = vadd.f32 %v15111_v7, %v1353_v10  ;;  %v20649_v26 = vadd.f32 %v15111_v7, %v1354_v11  ;;  %v20651_v30 = vadd.f32 %v15111_v7, %v1355_v16  ;;  %v20699_v45 = vsel %vm1236_vm0, %v20633_v20, 0.0 }
 0x223   : > { %24903 = vst [vmem:[#allocation71_spill] sm:$0xff] %v20637_v22  ;;  %24904 = vst [vmem:[#allocation72_spill] sm:$0xff] %v20639_v23  ;;  %v20653_v27 = vadd.f32 %v15111_v7, %v1356_v56  ;;  %v20655_v35 = vadd.f32 %v15111_v7, %v1357_v57  ;;  %v20657_v36 = vadd.f32 %v15111_v7, %v1358_v58  ;;  %v20703_v46 = vsel %vm1236_vm0, %v20635_v21, 0.0 }
 0x224   : > { %24905 = vst [vmem:[#allocation73_spill] sm:$0xff] %v20641_v28  ;;  %24906 = vst [vmem:[#allocation74_spill] sm:$0xff] %v20643_v29  ;;  %v20659_v37 = vadd.f32 %v15111_v7, %v1359_v59  ;;  %v20661_v42 = vadd.f32 %v15111_v7, %v1360_v5  ;;  %v20663_v31 = vadd.f32 %v15111_v7, %v1361_v6  ;;  %v20707_v47 = vsel %vm1236_vm0, %v20637_v22, 0.0 }
 0x225   : > { %24907 = vst [vmem:[#allocation75_spill] sm:$0xff] %v20645_v24  ;;  %24908 = vst [vmem:[#allocation76_spill] sm:$0xff] %v20647_v25  ;;  %v20665_v32 = vadd.f32 %v15111_v7, %v1362_v8  ;;  %v20667_v33 = vadd.f32 %v15111_v7, %v1363_v17  ;;  %v20669_v43 = vadd.f32 %v15111_v7, %v1364_v52  ;;  %v20711_v48 = vsel %vm1236_vm0, %v20639_v23, 0.0 }
 0x226   : > { %24909 = vst [vmem:[#allocation77_spill] sm:$0xff] %v20649_v26  ;;  %24910 = vst [vmem:[#allocation78_spill] sm:$0xff] %v20651_v30  ;;  %v20671_v34 = vadd.f32 %v15111_v7, %v1365_v18  ;;  %v20673_v44 = vadd.f32 %v15111_v7, %v1366_v53  ;;  %v20675_v49 = vadd.f32 %v15111_v7, %v1367_v54  ;;  %v20719_v11 = vsel %vm1236_vm0, %v20641_v28, 0.0 }
 0x227   : > { %24911 = vst [vmem:[#allocation79_spill] sm:$0xff] %v20653_v27  ;;  %24912 = vst [vmem:[#allocation80_spill] sm:$0xff] %v20655_v35  ;;  %v20677_v50 = vadd.f32 %v15111_v7, %v1368_v55  ;;  %v20679_v51 = vadd.f32 %v15111_v7, %v1369_v63  ;;  %v20681_v60 = vadd.f32 %v15111_v7, %v1370_v2  ;;  %v20723_v16 = vsel %vm1236_vm0, %v20643_v29, 0.0 }
 0x228   : > { %24913 = vst [vmem:[#allocation81_spill] sm:$0xff] %v20657_v36  ;;  %24914 = vst [vmem:[#allocation82_spill] sm:$0xff] %v20659_v37  ;;  %v20683_v38 = vadd.f32 %v15111_v7, %v1371_v3  ;;  %v20685_v39 = vadd.f32 %v15111_v7, %v1372_v4  ;;  %v20687_v40 = vadd.f32 %v15111_v7, %v1373_v12  ;;  %v20727_v56 = vsel %vm1236_vm0, %v20645_v24, 0.0 }
 0x229   : > { %24915 = vst [vmem:[#allocation83_spill] sm:$0xff] %v20661_v42  ;;  %24916 = vst [vmem:[#allocation84_spill] sm:$0xff] %v20663_v31  ;;  %v20689_v41 = vadd.f32 %v15111_v7, %v1374_v13  ;;  %v20691_v61 = vadd.f32 %v15111_v7, %v1375_v14  ;;  %v20693_v62 = vadd.f32 %v15111_v7, %v1376_v15  ;;  %v20731_v57 = vsel %vm1236_vm0, %v20649_v26, 0.0 }
 0x22a   : > { %24917 = vst [vmem:[#allocation85_spill] sm:$0xff] %v20665_v32  ;;  %24918 = vst [vmem:[#allocation86_spill] sm:$0xff] %v20667_v33  ;;  %v20695_v9 = vadd.f32 %v15111_v7, %v1377_v19  ;;  %v20715_v10 = vadd.f32 %v20703_v46, %v20699_v45  ;;  %v1487_v58 = vsel %vm1236_vm0, %v20633_v20, -inf  ;;  %v1488_v59 = vsel %vm1236_vm0, %v20635_v21, -inf }
 0x22b   : > { %24919 = vst [vmem:[#allocation87_spill] sm:$0xff] %v20669_v43  ;;  %24920 = vst [vmem:[#allocation88_spill] sm:$0xff] %v20671_v34  ;;  %v1489_v5 = vsel %vm1236_vm0, %v20637_v22, -inf  ;;  %v1490_v7 = vsel %vm1236_vm0, %v20639_v23, -inf  ;;  %v1491_v8 = vsel %vm1236_vm0, %v20641_v28, -inf  ;;  %v1493_v17 = vsel %vm1236_vm0, %v20643_v29, -inf }
 0x22c   : > { %24921 = vst [vmem:[#allocation89_spill] sm:$0xff] %v20673_v44  ;;  %24922 = vst [vmem:[#allocation90_spill] sm:$0xff] %v20675_v49  ;;  %v1421_v6 = vadd.f32 %v20707_v47, %v20715_v10  ;;  %v1492_v52 = vmax.f32 %v1487_v58, %v1491_v8  ;;  %v1494_v18 = vmax.f32 %v1488_v59, %v1493_v17  ;;  %v1495_v53 = vsel %vm1236_vm0, %v20645_v24, -inf }
 0x22d   : > { %24923 = vst [vmem:[#allocation91_spill] sm:$0xff] %v20677_v50  ;;  %24924 = vst [vmem:[#allocation92_spill] sm:$0xff] %v20679_v51  ;;  %v1497_v54 = vsel %vm1236_vm0, %v20647_v25, -inf  ;;  %v1496_v63 = vmax.f32 %v1489_v5, %v1495_v53  ;;  %v1499_v3 = vsel %vm1236_vm0, %v20649_v26, -inf  ;;  %v1501_v12 = vsel %vm1236_vm0, %v20651_v30, -inf }
 0x22e   : > { %24925 = vst [vmem:[#allocation93_spill] sm:$0xff] %v20681_v60  ;;  %24926 = vst [vmem:[#allocation94_spill] sm:$0xff] %v20683_v38  ;;  %v1423_v55 = vadd.f32 %v20711_v48, %v1421_v6  ;;  %v1498_v2 = vmax.f32 %v1490_v7, %v1497_v54  ;;  %v1500_v4 = vmax.f32 %v1492_v52, %v1499_v3  ;;  %v1503_v13 = vsel %vm1236_vm0, %v20653_v27, -inf }
 0x22f   : > { %24927 = vst [vmem:[#allocation95_spill] sm:$0xff] %v20685_v39  ;;  %24928 = vst [vmem:[#allocation96_spill] sm:$0xff] %v20687_v40  ;;  %v1505_v14 = vsel %vm1236_vm0, %v20655_v35, -inf  ;;  %v1502_v19 = vmax.f32 %v1494_v18, %v1501_v12  ;;  %v1504_v58 = vmax.f32 %v1496_v63, %v1503_v13  ;;  %v1507_v5 = vsel %vm1236_vm0, %v20657_v36, -inf }
 0x230   : > { %24929 = vst [vmem:[#allocation97_spill] sm:$0xff] %v20689_v41  ;;  %24930 = vst [vmem:[#allocation98_spill] sm:$0xff] %v20691_v61  ;;  %v1425_v15 = vadd.f32 %v20719_v11, %v1423_v55  ;;  %v1506_v59 = vmax.f32 %v1498_v2, %v1505_v14  ;;  %v1509_v6 = vsel %vm1236_vm0, %v20659_v37, -inf  ;;  %v1511_v7 = vsel %vm1236_vm0, %v20661_v42, -inf }
 0x231   : > { %24931 = vst [vmem:[#allocation99_spill] sm:$0xff] %v20693_v62  ;;  %24932 = vst [vmem:[#allocation100_spill] sm:$0xff] %v20695_v9  ;;  %v1513_v8 = vsel %vm1236_vm0, %v20663_v31, -inf  ;;  %v1508_v52 = vmax.f32 %v1500_v4, %v1507_v5  ;;  %v1510_v53 = vmax.f32 %v1502_v19, %v1509_v6  ;;  %v1512_v54 = vmax.f32 %v1504_v58, %v1511_v7 }
 0x232   : > { %v1427_v17 = vadd.f32 %v20723_v16, %v1425_v15  ;;  %v1514_v18 = vmax.f32 %v1506_v59, %v1513_v8  ;;  %v1515_v55 = vsel %vm1236_vm0, %v20665_v32, -inf  ;;  %v1517_v63 = vsel %vm1236_vm0, %v20667_v33, -inf }
 0x233   : > { %v1519_v2 = vsel %vm1236_vm0, %v20669_v43, -inf  ;;  %v1516_v12 = vmax.f32 %v1508_v52, %v1515_v55  ;;  %v1518_v13 = vmax.f32 %v1510_v53, %v1517_v63  ;;  %v1521_v4 = vsel %vm1236_vm0, %v20671_v34, -inf }
 0x234   : > { %v1429_v3 = vadd.f32 %v20727_v56, %v1427_v17  ;;  %v1520_v14 = vmax.f32 %v1512_v54, %v1519_v2  ;;  %v1523_v15 = vsel %vm1236_vm0, %v20673_v44, -inf  ;;  %v1525_v19 = vsel %vm1236_vm0, %v20675_v49, -inf }
 0x235   : > { %v1527_v58 = vsel %vm1236_vm0, %v20677_v50, -inf  ;;  %v1522_v59 = vmax.f32 %v1514_v18, %v1521_v4  ;;  %v1524_v5 = vmax.f32 %v1516_v12, %v1523_v15  ;;  %v1526_v6 = vmax.f32 %v1518_v13, %v1525_v19 }
 0x236   : > { %v1528_v7 = vmax.f32 %v1520_v14, %v1527_v58  ;;  %v1529_v8 = vsel %vm1236_vm0, %v20679_v51, -inf  ;;  %v1531_v17 = vsel %vm1236_vm0, %v20681_v60, -inf  ;;  %v1533_v52 = vsel %vm1236_vm0, %v20683_v38, -inf }
 0x237   : > { %v1535_v53 = vsel %vm1236_vm0, %v20685_v39, -inf  ;;  %v1530_v54 = vmax.f32 %v1522_v59, %v1529_v8  ;;  %v1532_v55 = vmax.f32 %v1524_v5, %v1531_v17  ;;  %v1534_v63 = vmax.f32 %v1526_v6, %v1533_v52 }
 0x238   : > { %v1536_v2 = vmax.f32 %v1528_v7, %v1535_v53  ;;  %v1537_v18 = vsel %vm1236_vm0, %v20687_v40, -inf  ;;  %v1539_v12 = vsel %vm1236_vm0, %v20689_v41, -inf  ;;  %v1541_v13 = vsel %vm1236_vm0, %v20691_v61, -inf }
 0x239   : > { %v1543_v14 = vsel %vm1236_vm0, %v20693_v62, -inf  ;;  %v1538_v4 = vmax.f32 %v1530_v54, %v1537_v18  ;;  %v1540_v15 = vmax.f32 %v1532_v55, %v1539_v12  ;;  %v1542_v19 = vmax.f32 %v1534_v63, %v1541_v13 }
 0x23a   : > { %v1544_v58 = vmax.f32 %v1536_v2, %v1543_v14  ;;  %v1545_v59 = vsel %vm1236_vm0, %v20695_v9, -inf  ;;  %v20805_v5 = vadd.f32 %v20707_v47, %v20699_v45  ;;  %v2217_v6 = vrot.slane %v20715_v10, 4 }
 0x23b   : > { %v2223_v7 = vadd.f32 %v20711_v48, %v20707_v47  ;;  %v1546_v8 = vmax.f32 %v1538_v4, %v1545_v59  ;;  %v1547_v17 = vmax.f32 %v1540_v15, %v1542_v19  ;;  %v2230_v52 = vadd.f32 %v20723_v16, %v20719_v11 }
 0x23c   : > { %v20814_v53 = vsel %vm1236_vm0, %v20647_v25, 0.0  ;;  %v2218_v54 = vadd.f32 %v2217_v6, %v20715_v10  ;;  %v20820_v63 = vsel %vm1236_vm0, %v20651_v30, 0.0  ;;  %v20824_v18 = vsel %vm1236_vm0, %v20653_v27, 0.0 }
 0x23d   : > { %v2224_v55 = vrot.slane %v2223_v7, 4  ;;  %v1431_v45 = vadd.f32 %v20814_v53, %v1429_v3  ;;  %v1548_v2 = vmax.f32 %v1544_v58, %v1546_v8  ;;  %v2231_v47 = vrot.slane %v2230_v52, 4 }
 0x23e   : > { %v20828_v12 = vsel %vm1236_vm0, %v20655_v35, 0.0  ;;  %v2219_v13 = vrot.slane %v2218_v54, 2  ;;  %v20833_v3 = vsel %vm1236_vm0, %v20657_v36, 0.0  ;;  %v20837_v19 = vsel %vm1236_vm0, %v20659_v37, 0.0 }
 0x23f   : > { %v2225_v14 = vadd.f32 %v2224_v55, %v2223_v7  ;;  %v1433_v10 = vadd.f32 %v20731_v57, %v1431_v45  ;;  %v1549_v4 = vmax.f32 %v1547_v17, %v1548_v2  ;;  %v2232_v15 = vadd.f32 %v2231_v47, %v2230_v52 }
 0x240   : > { %v20841_v58 = vsel %vm1236_vm0, %v20661_v42, 0.0  ;;  %v2220_v59 = vadd.f32 %v2219_v13, %v2218_v54  ;;  %v20846_v8 = vsel %vm1236_vm0, %v20663_v31, 0.0  ;;  %v20850_v17 = vsel %vm1236_vm0, %v20665_v32, 0.0 }
 0x241   : > { %v2226_v6 = vrot.slane %v2225_v14, 2  ;;  %v1435_v7 = vadd.f32 %v20820_v63, %v1433_v10  ;;  %v1550_v55 = vrot.slane %v1549_v4, 4  ;;  %v2233_v45 = vrot.slane %v2232_v15, 2 }
 0x242   : > { %v20854_v52 = vsel %vm1236_vm0, %v20667_v33, 0.0  ;;  %v2221_v2 = vrot.slane %v2220_v59, 1  ;;  %v20859_v13 = vsel %vm1236_vm0, %v20669_v43, 0.0  ;;  %v20863_v1 = vsel %vm1236_vm0, %v20671_v34, 0.0 }
 0x243   : > { %v2227_v47 = vadd.f32 %v2226_v6, %v2225_v14  ;;  %v1437_v54 = vadd.f32 %v20824_v18, %v1435_v7  ;;  %v1551_v10 = vmax.f32 %v1549_v4, %v1550_v55  ;;  %v2234_v0 = vadd.f32 %v2233_v45, %v2232_v15 }
 0x244   : > { %v20867_v32 = vsel %vm1236_vm0, %v20673_v44, 0.0  ;;  %v2222_v33 = vadd.f32 %v2221_v2, %v2220_v59  ;;  %v20872_v6 = vsel %vm1236_vm0, %v20675_v49, 0.0  ;;  %v20876_v4 = vsel %vm1236_vm0, %v20677_v50, 0.0 }
 0x245   : > { %v2228_v31 = vrot.slane %v2227_v47, 1  ;;  %v1439_v14 = vadd.f32 %v20828_v12, %v1437_v54  ;;  %v1552_v7 = vrot.slane %v1551_v10, 2  ;;  %v2235_v43 = vrot.slane %v2234_v0, 1 }
 0x246   : > { %v20880_v15 = vsel %vm1236_vm0, %v20679_v51, 0.0  ;;  %v20882_v45 = vmul.f32 0.0625, %v2222_v33  ;;  %v20887_v2 = vsel %vm1236_vm0, %v20681_v60, 0.0  ;;  %v20891_v44 = vsel %vm1236_vm0, %v20683_v38, 0.0 }
 0x247   : > { %v2229_v55 = vadd.f32 %v2228_v31, %v2227_v47  ;;  %v1441_v59 = vadd.f32 %v20833_v3, %v1439_v14  ;;  %v1553_v54 = vmax.f32 %v1551_v10, %v1552_v7  ;;  %v2236_v49 = vadd.f32 %v2235_v43, %v2234_v0 }
 0x248   : > { %v20895_v50 = vsel %vm1236_vm0, %v20685_v39, 0.0  ;;  %v20902_v33 = vsel %vm1236_vm0, %v20687_v40, 0.0  ;;  %v20906_v47 = vsel %vm1236_vm0, %v20689_v41, 0.0  ;;  %v20912_v10 = vsel %vm1236_vm0, %v20691_v61, 0.0 }
 0x249   : > { %v20897_v51 = vmul.f32 0.0625, %v2229_v55  ;;  %v1443_v31 = vadd.f32 %v20837_v19, %v1441_v59  ;;  %v1554_v0 = vrot.slane %v1553_v54, 1  ;;  %v20908_v43 = vmul.f32 0.0625, %v2236_v49 }
 0x24a   : > { %v20916_v14 = vsel %vm1236_vm0, %v20693_v62, 0.0  ;;  %v20921_v55 = vsel %vm1236_vm0, %v20695_v9, 0.0  ;;  %v2185_v59 = vadd.f32 %v20805_v5, %v20719_v11  ;;  %v2199_v49 = vadd.f32 %v20711_v48, %v20703_v46 }
 0x24b   : > { %v1445_v7 = vadd.f32 %v20841_v58, %v1443_v31  ;;  %v1555_v41 = vmax.f32 %v1553_v54, %v1554_v0  ;;  %v2237_v61 = vadd.f32 %v20814_v53, %v20727_v56  ;;  %v2244_v40 = vadd.f32 %v20820_v63, %v20731_v57 }
 0x24c   : > { %v2251_v31 = vadd.f32 %v20828_v12, %v20824_v18  ;;  %v2186_v38 = vadd.f32 %v2185_v59, %v20727_v56  ;;  %v2200_v60 = vadd.f32 %v2199_v49, %v20723_v16  ;;  %v2258_v11 = vadd.f32 %v20837_v19, %v20833_v3 }
 0x24d   : > { %v1447_v39 = vadd.f32 %v20846_v8, %v1445_v7  ;;  %16601 = vmatmul.mubr.msk.f32.vlgmr.msra.gmra.mrb[0].mxu0 %vm1236_vm0, %v1555_v41  ;;  %v2238_v46 = vrot.slane %v2237_v61, 4  ;;  %v2245_v48 = vrot.slane %v2244_v40, 4  ;;  %v2265_v54 = vadd.f32 %v20846_v8, %v20841_v58 }
 0x24e   : > { %v2252_v5 = vrot.slane %v2251_v31, 4  ;;  %v2187_v34 = vadd.f32 %v2186_v38, %v20731_v57  ;;  %v2201_v7 = vadd.f32 %v2200_v60, %v20814_v53  ;;  %v2259_v56 = vrot.slane %v2258_v11, 4 }
 0x24f   : > { %v1449_v0 = vadd.f32 %v20850_v17, %v1447_v39  ;;  %v24933_v59 = vmov 0.0   ;;  %v2239_v16 = vadd.f32 %v2238_v46, %v2237_v61  ;;  %v2246_v49 = vadd.f32 %v2245_v48, %v2244_v40 }
 0x250   : > { %16622 = vmatprep.mubr.msk.f32.mxu0 %vm20054_vm1, %v24933_v59  ;;  %v2253_v42 = vadd.f32 %v2252_v5, %v2251_v31  ;;  %v2266_v41 = vrot.slane %v2265_v54, 4  ;;  %v2188_v36 = vadd.f32 %v2187_v34, %v20824_v18  ;;  %v2202_v35 = vadd.f32 %v2201_v7, %v20820_v63 }
 0x251   : > { %v1451_v37 = vadd.f32 %v20854_v52, %v1449_v0  ;;  %v2260_v27 = vadd.f32 %v2259_v56, %v2258_v11  ;;  %v2240_v39 = vrot.slane %v2239_v16, 2  ;;  %v2247_v30 = vrot.slane %v2246_v49, 2 }
 0x252   : > { %v2254_v38 = vrot.slane %v2253_v42, 2  ;;  %v2267_v57 = vadd.f32 %v2266_v41, %v2265_v54  ;;  %v2189_v53 = vadd.f32 %v2188_v36, %v20833_v3  ;;  %v2203_v61 = vadd.f32 %v2202_v35, %v20828_v12 }
 0x253   : > { %v1453_v60 = vadd.f32 %v20859_v13, %v1451_v37  ;;  %v2261_v40 = vrot.slane %v2260_v27, 2  ;;  %v2241_v31 = vadd.f32 %v2240_v39, %v2239_v16  ;;  %v2248_v46 = vadd.f32 %v2247_v30, %v2246_v49 }
 0x254   : > { %v2255_v48 = vadd.f32 %v2254_v38, %v2253_v42  ;;  %v2268_v5 = vrot.slane %v2267_v57, 2  ;;  %v2190_v63 = vadd.f32 %v2189_v53, %v20841_v58  ;;  %v2204_v18 = vadd.f32 %v2203_v61, %v20837_v19 }
 0x255   : > { %v1455_v34 = vadd.f32 %v20863_v1, %v1453_v60  ;;  %v2262_v11 = vadd.f32 %v2261_v40, %v2260_v27  ;;  %v2242_v0 = vrot.slane %v2241_v31, 1  ;;  %v2249_v54 = vrot.slane %v2248_v46, 1 }
 0x256   : > { %v2256_v7 = vrot.slane %v2255_v48, 1  ;;  %v2269_v37 = vadd.f32 %v2268_v5, %v2267_v57  ;;  %v2191_v35 = vadd.f32 %v2190_v63, %v20850_v17  ;;  %v2205_v12 = vadd.f32 %v2204_v18, %v20846_v8 }
 0x257   : > { %v1457_v36 = vadd.f32 %v20867_v32, %v1455_v34  ;;  %v2263_v30 = vrot.slane %v2262_v11, 1  ;;  %v20958_v42 = vadd.f32 %v2242_v0, %v2241_v31  ;;  %v20960_v3 = vadd.f32 %v2249_v54, %v2248_v46 }
 0x258   : > { %v20962_v56 = vadd.f32 %v2256_v7, %v2255_v48  ;;  %v2270_v58 = vrot.slane %v2269_v37, 1  ;;  %v2192_v19 = vadd.f32 %v2191_v35, %v20859_v13  ;;  %v2206_v16 = vadd.f32 %v2205_v12, %v20854_v52 }
 0x259   : > { %v1459_v27 = vadd.f32 %v20872_v6, %v1457_v36  ;;  %v20967_v49 = vadd.f32 %v2263_v30, %v2262_v11  ;;  %v2272_v8 = vadd.f32 %v20854_v52, %v20850_v17  ;;  %v2279_v39 = vadd.f32 %v20863_v1, %v20859_v13 }
 0x25a   : > { %v20969_v41 = vadd.f32 %v2270_v58, %v2269_v37  ;;  %v2286_v38 = vadd.f32 %v20872_v6, %v20867_v32  ;;  %v2193_v60 = vadd.f32 %v2192_v19, %v20867_v32  ;;  %v2207_v53 = vadd.f32 %v2206_v16, %v20863_v1 }
 0x25b   : > { %v1461_v57 = vadd.f32 %v20876_v4, %v1459_v27  ;;  %v2293_v61 = vadd.f32 %v20880_v15, %v20876_v4  ;;  %v2273_v40 = vrot.slane %v2272_v8, 4  ;;  %v2280_v31 = vrot.slane %v2279_v39, 4 }
 0x25c   : > { %v2287_v46 = vrot.slane %v2286_v38, 4  ;;  %v2300_v17 = vadd.f32 %v20891_v44, %v20887_v2  ;;  %v2194_v13 = vadd.f32 %v2193_v60, %v20876_v4  ;;  %v2208_v48 = vadd.f32 %v2207_v53, %v20872_v6 }
 0x25d   : > { %v1463_v52 = vadd.f32 %v20880_v15, %v1461_v57  ;;  %v2294_v5 = vrot.slane %v2293_v61, 4  ;;  %v2274_v34 = vadd.f32 %v2273_v40, %v2272_v8  ;;  %v2281_v32 = vadd.f32 %v2280_v31, %v2279_v39 }
 0x25e   : > { %v2288_v63 = vadd.f32 %v2287_v46, %v2286_v38  ;;  %v2301_v1 = vrot.slane %v2300_v17, 4  ;;  %v2195_v11 = vadd.f32 %v2194_v13, %v20887_v2  ;;  %v2209_v0 = vadd.f32 %v2208_v48, %v20880_v15 }
 0x25f   : > { %v1465_v18 = vadd.f32 %v20887_v2, %v1463_v52  ;;  %v2295_v54 = vadd.f32 %v2294_v5, %v2293_v61  ;;  %v2275_v7 = vrot.slane %v2274_v34, 2  ;;  %v2282_v37 = vrot.slane %v2281_v32, 2 }
 0x260   : > { %v2289_v36 = vrot.slane %v2288_v63, 2  ;;  %v2302_v35 = vadd.f32 %v2301_v1, %v2300_v17  ;;  %v2196_v6 = vadd.f32 %v2195_v11, %v20895_v50  ;;  %v2210_v12 = vadd.f32 %v2209_v0, %v20891_v44 }
 0x261   : > { %v1467_v4 = vadd.f32 %v20891_v44, %v1465_v18  ;;  %v2296_v30 = vrot.slane %v2295_v54, 2  ;;  %v2276_v58 = vadd.f32 %v2275_v7, %v2274_v34  ;;  %v2283_v27 = vadd.f32 %v2282_v37, %v2281_v32 }
 0x262   : > { %v2290_v19 = vadd.f32 %v2289_v36, %v2288_v63  ;;  %v2303_v16 = vrot.slane %v2302_v35, 2  ;;  %v2197_v15 = vadd.f32 %v2196_v6, %v20906_v47  ;;  %v2211_v8 = vadd.f32 %v2210_v12, %v20902_v33 }
 0x263   : > { %v1469_v2 = vadd.f32 %v20895_v50, %v1467_v4  ;;  %v2297_v39 = vadd.f32 %v2296_v30, %v2295_v54  ;;  %v2277_v38 = vrot.slane %v2276_v58, 1  ;;  %v2284_v57 = vrot.slane %v2283_v27, 1 }
 0x264   : > { %v2291_v60 = vrot.slane %v2290_v19, 1  ;;  %v2304_v53 = vadd.f32 %v2303_v16, %v2302_v35  ;;  %v2198_v44 = vadd.f32 %v2197_v15, %v20916_v14  ;;  %v2212_v40 = vadd.f32 %v2211_v8, %v20912_v10 }
 0x265   : > { %v1471_v61 = vadd.f32 %v20902_v33, %v1469_v2  ;;  %v2298_v31 = vrot.slane %v2297_v39, 1  ;;  %v2278_v46 = vadd.f32 %v2277_v38, %v2276_v58  ;;  %v2285_v17 = vadd.f32 %v2284_v57, %v2283_v27 }
 0x266   : > { %v2292_v52 = vadd.f32 %v2291_v60, %v2290_v19  ;;  %v2305_v13 = vrot.slane %v2304_v53, 1  ;;  %v2213_v5 = vadd.f32 %v2212_v40, %v20921_v55  ;;  %v21001_v34 = vmul.f32 0.0625, %v2198_v44 }
 0x267   : > { %v1473_v48 = vadd.f32 %v20906_v47, %v1471_v61  ;;  %v2299_v32 = vadd.f32 %v2298_v31, %v2297_v39  ;;  %v2307_v1 = vadd.f32 %v20902_v33, %v20895_v50  ;;  %v2314_v18 = vadd.f32 %v20912_v10, %v20906_v47 }
 0x268   : > { %v2306_v63 = vadd.f32 %v2305_v13, %v2304_v53  ;;  %v2321_v11 = vadd.f32 %v20921_v55, %v20916_v14  ;;  %v21010_v54 = vmul.f32 0.0625, %v2213_v5  ;;  %v2331_v7 = vmul.f32 0.0625, %v20958_v42 }
 0x269   : > { %v1475_v0 = vadd.f32 %v20912_v10, %v1473_v48  ;;  %v2332_v37 = vmul.f32 0.0625, %v20960_v3  ;;  %v2308_v36 = vrot.slane %v2307_v1, 4  ;;  %v2315_v35 = vrot.slane %v2314_v18, 4 }
 0x26a   : > { %v2322_v4 = vrot.slane %v2321_v11, 4  ;;  %v2333_v6 = vmul.f32 0.0625, %v20962_v56  ;;  %v2334_v33 = vmul.f32 0.0625, %v20967_v49  ;;  %v2335_v47 = vmul.f32 0.0625, %v20969_v41 }
 0x26b   : > { %v1477_v50 = vadd.f32 %v20916_v14, %v1475_v0  ;;  %v2336_v12 = vmul.f32 0.0625, %v2278_v46  ;;  %v2309_v30 = vadd.f32 %v2308_v36, %v2307_v1  ;;  %v2316_v10 = vadd.f32 %v2315_v35, %v2314_v18 }
 0x26c   : > { %v2323_v58 = vadd.f32 %v2322_v4, %v2321_v11  ;;  %v2337_v27 = vmul.f32 0.0625, %v2285_v17  ;;  %v2338_v19 = vmul.f32 0.0625, %v2292_v52  ;;  %v2339_v3 = vmul.f32 0.0625, %v2299_v32 }
 0x26d   : > { %v1479_v42 = vadd.f32 %v20921_v55, %v1477_v50  ;;  %v2340_v16 = vmul.f32 0.0625, %v2306_v63  ;;  %v2310_v2 = vrot.slane %v2309_v30, 2  ;;  %v2317_v15 = vrot.slane %v2316_v10, 2 }
 0x26e   : > { %v2324_v8 = vrot.slane %v2323_v58, 2  ;;  %v21021_v14 = vmul.f32 %v20882_v45, %v21001_v34  ;;  %v21025_v49 = vmul.f32 %v20882_v45, %v21010_v54  ;;  %v21029_v41 = vmul.f32 %v20897_v51, %v21001_v34 }
 0x26f   : > { %v1480_v56 = vrot.slane %v1479_v42, 4  ;;  %v21033_v55 = vmul.f32 %v20897_v51, %v21010_v54  ;;  %v2311_v39 = vadd.f32 %v2310_v2, %v2309_v30  ;;  %v2318_v38 = vadd.f32 %v2317_v15, %v2316_v10 }
 0x270   : > { %v2325_v57 = vadd.f32 %v2324_v8, %v2323_v58  ;;  %v21037_v60 = vmul.f32 %v20908_v43, %v21001_v34  ;;  %v21041_v45 = vmul.f32 %v20908_v43, %v21010_v54  ;;  %v21044_v61 = vmul.f32 %v2331_v7, %v21001_v34 }
 0x271   : > { %v1481_v53 = vadd.f32 %v1480_v56, %v1479_v42  ;;  %v21047_v44 = vmul.f32 %v2331_v7, %v21010_v54  ;;  %v2312_v51 = vrot.slane %v2311_v39, 1  ;;  %v2319_v40 = vrot.slane %v2318_v38, 1 }
 0x272   : > { %v2326_v31 = vrot.slane %v2325_v57, 1  ;;  %v21050_v46 = vmul.f32 %v2332_v37, %v21001_v34  ;;  %v21053_v52 = vmul.f32 %v2332_v37, %v21010_v54  ;;  %v21056_v13 = vmul.f32 %v2333_v6, %v21001_v34 }
 0x273   : > { %v1482_v17 = vrot.slane %v1481_v53, 2  ;;  %v21059_v43 = vmul.f32 %v2333_v6, %v21010_v54  ;;  %v2313_v48 = vadd.f32 %v2312_v51, %v2311_v39  ;;  %v2320_v5 = vadd.f32 %v2319_v40, %v2318_v38 }
 0x274   : > { %v2327_v32 = vadd.f32 %v2326_v31, %v2325_v57  ;;  %v21062_v63 = vmul.f32 %v2334_v33, %v21001_v34  ;;  %v21065_v18 = vmul.f32 %v2334_v33, %v21010_v54  ;;  %v21068_v11 = vmul.f32 %v2335_v47, %v21001_v34 }
 0x275   : > { %v1483_v1 = vadd.f32 %v1482_v17, %v1481_v53  ;;  %v21071_v0 = vmul.f32 %v2335_v47, %v21010_v54  ;;  %v2341_v7 = vmul.f32 0.0625, %v2313_v48  ;;  %v2342_v37 = vmul.f32 0.0625, %v2320_v5 }
 0x276   : > { %v2343_v36 = vmul.f32 0.0625, %v2327_v32  ;;  %v21074_v35 = vmul.f32 %v2336_v12, %v21001_v34  ;;  %v21077_v6 = vmul.f32 %v2336_v12, %v21010_v54  ;;  %v21080_v50 = vmul.f32 %v2337_v27, %v21001_v34 }
 0x277   : > { %v1484_v4 = vrot.slane %v1483_v1, 1  ;;  %v21083_v33 = vmul.f32 %v2337_v27, %v21010_v54  ;;  %v21086_v30 = vmul.f32 %v2338_v19, %v21001_v34  ;;  %v21089_v47 = vmul.f32 %v2338_v19, %v21010_v54 }
 0x278   : > { %v21092_v10 = vmul.f32 %v2339_v3, %v21001_v34  ;;  %v21095_v58 = vmul.f32 %v2339_v3, %v21010_v54  ;;  %v21098_v42 = vmul.f32 %v2340_v16, %v21001_v34  ;;  %v21101_v2 = vmul.f32 %v2340_v16, %v21010_v54 }
 0x279   : > { %v1485_v12 = vadd.f32 %v1484_v4, %v1483_v1  ;;  %v21104_v27 = vmul.f32 %v2341_v7, %v21001_v34  ;;  %v21107_v15 = vmul.f32 %v2341_v7, %v21010_v54  ;;  %v21110_v19 = vmul.f32 %v2342_v37, %v21001_v34 }
 0x27a   : > { %v21113_v8 = vmul.f32 %v2342_v37, %v21010_v54  ;;  %v21116_v3 = vmul.f32 %v2343_v36, %v21001_v34  ;;  %v21119_v39 = vmul.f32 %v2343_v36, %v21010_v54  ;;  %v2376_v16 = vsel %vm1236_vm0, %v21021_v14, -inf }
 0x27b   : > { %24934 = vst [vmem:[#allocation101_spill] sm:$0xff] %v21104_v27  ;;  %24935 = vst [vmem:[#allocation102_spill] sm:$0xff] %v21107_v15  ;;  %v1486_v56 = vmul.f32 0.00390625, %v1485_v12  ;;  %v2377_v38 = vsel %vm1236_vm0, %v21025_v49, -inf  ;;  %v2385_v53 = vsel %vm1236_vm0, %v21029_v41, -inf  ;;  %v2386_v51 = vsel %vm1236_vm0, %v21033_v55, -inf }
 0x27c   : > { %24936 = vst [vmem:[#allocation103_spill] sm:$0xff] %v21113_v8  ;;  %v2378_v57 = vmax.f32 %v2376_v16, %v2377_v38  ;;  %v2394_v34 = vsel %vm1236_vm0, %v21037_v60, -inf  ;;  %v2387_v54 = vmax.f32 %v2385_v53, %v2386_v51  ;;  %v2395_v40 = vsel %vm1236_vm0, %v21041_v45, -inf }
 0x27d   : > { %16612 = vmatmul.mubr.msk.f32.vlgmr.msra.gmra.mrb[0].mxu1 %vm1236_vm0, %v1486_v56  ;;  %v2403_v31 = vsel %vm1236_vm0, %v21044_v61, -inf  ;;  %v2404_v17 = vsel %vm1236_vm0, %v21047_v44, -inf  ;;  %v2396_v5 = vmax.f32 %v2394_v34, %v2395_v40  ;;  %v2412_v1 = vsel %vm1236_vm0, %v21050_v46, -inf }
 0x27e   : > { %v2379_v48 = vrot.slane %v2378_v57, 4  ;;  %v2405_v32 = vmax.f32 %v2403_v31, %v2404_v17  ;;  %16627 = vmatprep.mubr.msk.f32.mxu1 %vm20054_vm1, %v24933_v59  ;;  %v2388_v7 = vrot.slane %v2387_v54, 4  ;;  %v2413_v37 = vsel %vm1236_vm0, %v21053_v52, -inf }
 0x27f   : > { %v2421_v36 = vsel %vm1236_vm0, %v21056_v13, -inf  ;;  %v2422_v4 = vsel %vm1236_vm0, %v21059_v43, -inf  ;;  %v2397_v56 = vrot.slane %v2396_v5, 4  ;;  %v2414_v38 = vmax.f32 %v2412_v1, %v2413_v37 }
 0x280   : > { %v2380_v12 = vmax.f32 %v2378_v57, %v2379_v48  ;;  %v2406_v16 = vrot.slane %v2405_v32, 4  ;;  %v2389_v53 = vmax.f32 %v2387_v54, %v2388_v7  ;;  %v2423_v51 = vmax.f32 %v2421_v36, %v2422_v4 }
 0x281   : > { %v2430_v34 = vsel %vm1236_vm0, %v21062_v63, -inf  ;;  %v2431_v40 = vsel %vm1236_vm0, %v21065_v18, -inf  ;;  %v2398_v17 = vmax.f32 %v2396_v5, %v2397_v56  ;;  %v2415_v25 = vrot.slane %v2414_v38, 4 }
 0x282   : > { %v2381_v31 = vrot.slane %v2380_v12, 2  ;;  %v2407_v26 = vmax.f32 %v2405_v32, %v2406_v16  ;;  %v2390_v24 = vrot.slane %v2389_v53, 2  ;;  %v2424_v29 = vrot.slane %v2423_v51, 4 }
 0x283   : > { %v2432_v28 = vmax.f32 %v2430_v34, %v2431_v40  ;;  %v2439_v57 = vsel %vm1236_vm0, %v21068_v11, -inf  ;;  %v2399_v1 = vrot.slane %v2398_v17, 2  ;;  %v2416_v7 = vmax.f32 %v2414_v38, %v2415_v25 }
 0x284   : > { %v2382_v48 = vmax.f32 %v2380_v12, %v2381_v31  ;;  %v2408_v54 = vrot.slane %v2407_v26, 2  ;;  %v2391_v37 = vmax.f32 %v2389_v53, %v2390_v24  ;;  %v2425_v36 = vmax.f32 %v2423_v51, %v2424_v29 }
 0x285   : > { %v2433_v4 = vrot.slane %v2432_v28, 4  ;;  %v2440_v23 = vsel %vm1236_vm0, %v21071_v0, -inf  ;;  %v2400_v5 = vmax.f32 %v2398_v17, %v2399_v1  ;;  %v2417_v56 = vrot.slane %v2416_v7, 2 }
 0x286   : > { %v2383_v22 = vrot.slane %v2382_v48, 1  ;;  %v2409_v32 = vmax.f32 %v2407_v26, %v2408_v54  ;;  %v2392_v16 = vrot.slane %v2391_v37, 1  ;;  %v2426_v21 = vrot.slane %v2425_v36, 2 }
 0x287   : > { %v2434_v34 = vmax.f32 %v2432_v28, %v2433_v4  ;;  %v2441_v40 = vmax.f32 %v2439_v57, %v2440_v23  ;;  %v2401_v12 = vrot.slane %v2400_v5, 1  ;;  %v2418_v59 = vmax.f32 %v2416_v7, %v2417_v56 }
 0x288   : > { %v21156_v20 = vmax.f32 %v2382_v48, %v2383_v22  ;;  %v2410_v31 = vrot.slane %v2409_v32, 1  ;;  %v21158_v25 = vmax.f32 %v2391_v37, %v2392_v16  ;;  %v2427_v29 = vmax.f32 %v2425_v36, %v2426_v21 }
 0x289   : > { %v2435_v24 = vrot.slane %v2434_v34, 2  ;;  %v2442_v38 = vrot.slane %v2441_v40, 4  ;;  %v21160_v53 = vmax.f32 %v2400_v5, %v2401_v12  ;;  %v2419_v26 = vrot.slane %v2418_v59, 1 }
 0x28a   : > { %v21162_v51 = vmax.f32 %v2409_v32, %v2410_v31  ;;  %v2448_v17 = vsel %vm1236_vm0, %v21074_v35, -inf  ;;  %v2428_v28 = vrot.slane %v2427_v29, 1  ;;  %v2449_v57 = vsel %vm1236_vm0, %v21077_v6, -inf }
 0x28b   : > { %v2436_v23 = vmax.f32 %v2434_v34, %v2435_v24  ;;  %v2443_v22 = vmax.f32 %v2441_v40, %v2442_v38  ;;  %v21168_v48 = vmax.f32 %v2418_v59, %v2419_v26  ;;  %v2450_v1 = vmax.f32 %v2448_v17, %v2449_v57 }
 0x28c   : > { %v2457_v21 = vsel %vm1236_vm0, %v21080_v50, -inf  ;;  %v2458_v54 = vsel %vm1236_vm0, %v21083_v33, -inf  ;;  %v21174_v7 = vmax.f32 %v2427_v29, %v2428_v28  ;;  %v2466_v32 = vsel %vm1236_vm0, %v21086_v30, -inf }
 0x28d   : > { %v2437_v37 = vrot.slane %v2436_v23, 1  ;;  %v2444_v36 = vrot.slane %v2443_v22, 2  ;;  %v2459_v4 = vmax.f32 %v2457_v21, %v2458_v54  ;;  %v2451_v5 = vrot.slane %v2450_v1, 4 }
 0x28e   : > { %v2467_v59 = vsel %vm1236_vm0, %v21089_v47, -inf  ;;  %v2475_v56 = vsel %vm1236_vm0, %v21092_v10, -inf  ;;  %v2476_v29 = vsel %vm1236_vm0, %v21095_v58, -inf  ;;  %v2484_v24 = vsel %vm1236_vm0, %v21098_v42, -inf }
 0x28f   : > { %v21182_v16 = vmax.f32 %v2436_v23, %v2437_v37  ;;  %v2445_v34 = vmax.f32 %v2443_v22, %v2444_v36  ;;  %v2460_v40 = vrot.slane %v2459_v4, 4  ;;  %v2468_v12 = vmax.f32 %v2466_v32, %v2467_v59 }
 0x290   : > { %v2452_v31 = vmax.f32 %v2450_v1, %v2451_v5  ;;  %v2485_v38 = vsel %vm1236_vm0, %v21101_v2, -inf  ;;  %v2477_v57 = vmax.f32 %v2475_v56, %v2476_v29  ;;  %v2493_v22 = vsel %vm1236_vm0, %v21104_v27, -inf }
 0x291   : > { %v2446_v26 = vrot.slane %v2445_v34, 1  ;;  %v2461_v17 = vmax.f32 %v2459_v4, %v2460_v40  ;;  %v2469_v28 = vrot.slane %v2468_v12, 4  ;;  %v2486_v23 = vmax.f32 %v2484_v24, %v2485_v38 }
 0x292   : > { %v2453_v21 = vrot.slane %v2452_v31, 2  ;;  %v2494_v1 = vsel %vm1236_vm0, %v21107_v15, -inf  ;;  %v2478_v5 = vrot.slane %v2477_v57, 4  ;;  %v2502_v4 = vsel %vm1236_vm0, %v21110_v19, -inf }
 0x293   : > { %v2447_v54 = vmax.f32 %v2445_v34, %v2446_v26  ;;  %v2462_v37 = vrot.slane %v2461_v17, 2  ;;  %v2470_v36 = vmax.f32 %v2468_v12, %v2469_v28  ;;  %v2487_v59 = vrot.slane %v2486_v23, 4 }
 0x294   : > { %v2454_v32 = vmax.f32 %v2452_v31, %v2453_v21  ;;  %v2495_v9 = vmax.f32 %v2493_v22, %v2494_v1  ;;  %v2479_v29 = vmax.f32 %v2477_v57, %v2478_v5  ;;  %v2503_v24 = vsel %vm1236_vm0, %v21113_v8, -inf }
 0x295   : > { %v2463_v40 = vmax.f32 %v2461_v17, %v2462_v37  ;;  %v2471_v56 = vrot.slane %v2470_v36, 2  ;;  %v2488_v62 = vmax.f32 %v2486_v23, %v2487_v59  ;;  %v2504_v15 = vmax.f32 %v2502_v4, %v2503_v24 }
 0x296   : > { %v2455_v38 = vrot.slane %v2454_v32, 1  ;;  %v2496_v27 = vrot.slane %v2495_v9, 4  ;;  %v2480_v12 = vrot.slane %v2479_v29, 2  ;;  %v2511_v31 = vsel %vm1236_vm0, %v21116_v3, -inf }
 0x297   : > { %v2464_v34 = vrot.slane %v2463_v40, 1  ;;  %v2472_v26 = vmax.f32 %v2470_v36, %v2471_v56  ;;  %v2489_v21 = vrot.slane %v2488_v62, 2  ;;  %v2505_v1 = vrot.slane %v2504_v15, 4 }
 0x298   : > { %v2456_v28 = vmax.f32 %v2454_v32, %v2455_v38  ;;  %v2497_v22 = vmax.f32 %v2495_v9, %v2496_v27  ;;  %v2481_v57 = vmax.f32 %v2479_v29, %v2480_v12  ;;  %v2512_v5 = vsel %vm1236_vm0, %v21119_v39, -inf }
 0x299   : > { %v2465_v17 = vmax.f32 %v2463_v40, %v2464_v34  ;;  %v2473_v37 = vrot.slane %v2472_v26, 1  ;;  %v2490_v8 = vmax.f32 %v2488_v62, %v2489_v21  ;;  %v2506_v59 = vmax.f32 %v2504_v15, %v2505_v1 }
 0x29a   : > { %v2498_v23 = vrot.slane %v2497_v22, 2  ;;  %v2513_v4 = vmax.f32 %v2511_v31, %v2512_v5  ;;  %v2482_v36 = vrot.slane %v2481_v57, 1  ;;  %v2520_v56 = vsel %vm1236_vm0, %v21156_v20, -inf }
 0x29b   : > { %v2474_v24 = vmax.f32 %v2472_v26, %v2473_v37  ;;  %v2521_v32 = vsel %vm1236_vm0, %v21158_v25, -inf  ;;  %v2491_v9 = vrot.slane %v2490_v8, 1  ;;  %v2507_v40 = vrot.slane %v2506_v59, 2 }
 0x29c   : > { %v2499_v27 = vmax.f32 %v2497_v22, %v2498_v23  ;;  %v2514_v38 = vrot.slane %v2513_v4, 4  ;;  %v2483_v29 = vmax.f32 %v2481_v57, %v2482_v36  ;;  %v2522_v34 = vsel %vm1236_vm0, %v21160_v53, -inf }
 0x29d   : > { %v2523_v62 = vsel %vm1236_vm0, %v21162_v51, -inf  ;;  %v2524_v15 = vsel %vm1236_vm0, %v21168_v48, -inf  ;;  %v2492_v26 = vmax.f32 %v2490_v8, %v2491_v9  ;;  %v2508_v20 = vmax.f32 %v2506_v59, %v2507_v40 }
 0x29e   : > { %v2500_v12 = vrot.slane %v2499_v27, 1  ;;  %v2515_v31 = vmax.f32 %v2513_v4, %v2514_v38  ;;  %v2525_v21 = vmax.f32 %v2520_v56, %v2524_v15  ;;  %v2526_v25 = vsel %vm1236_vm0, %v21174_v7, -inf }
 0x29f   : > { %v2528_v22 = vsel %vm1236_vm0, %v21182_v16, -inf  ;;  %v2530_v1 = vsel %vm1236_vm0, %v2447_v54, -inf  ;;  %v2509_v37 = vrot.slane %v2508_v20, 1  ;;  %v2527_v51 = vmax.f32 %v2521_v32, %v2526_v25 }
 0x2a0   : > { %v2501_v53 = vmax.f32 %v2499_v27, %v2500_v12  ;;  %v2516_v57 = vrot.slane %v2515_v31, 2  ;;  %v2529_v5 = vmax.f32 %v2522_v34, %v2528_v22  ;;  %v2531_v23 = vmax.f32 %v2523_v62, %v2530_v1 }
 0x2a1   : > { %v2532_v8 = vsel %vm1236_vm0, %v2456_v28, -inf  ;;  %v2534_v48 = vsel %vm1236_vm0, %v2465_v17, -inf  ;;  %v2510_v59 = vmax.f32 %v2508_v20, %v2509_v37  ;;  %v2536_v7 = vsel %vm1236_vm0, %v2474_v24, -inf }
 0x2a2   : > { %v2517_v4 = vmax.f32 %v2515_v31, %v2516_v57  ;;  %v2533_v36 = vmax.f32 %v2525_v21, %v2532_v8  ;;  %v2535_v56 = vmax.f32 %v2527_v51, %v2534_v48  ;;  %v2538_v16 = vsel %vm1236_vm0, %v2483_v29, -inf }
 0x2a3   : > { %v2540_v54 = vsel %vm1236_vm0, %v2492_v26, -inf  ;;  %v2542_v9 = vsel %vm1236_vm0, %v2501_v53, -inf  ;;  %v2537_v32 = vmax.f32 %v2529_v5, %v2536_v7  ;;  %v2539_v40 = vmax.f32 %v2531_v23, %v2538_v16  ;;  %v24939_v5 = vld [vmem:[#allocation103_spill] sm:$0xff] }
 0x2a4   : > { %v2518_v27 = vrot.slane %v2517_v4, 1  ;;  %v2541_v38 = vmax.f32 %v2533_v36, %v2540_v54  ;;  %v2543_v34 = vmax.f32 %v2535_v56, %v2542_v9  ;;  %v2544_v28 = vsel %vm1236_vm0, %v2510_v59, -inf }
 0x2a5   : > { %v2545_v62 = vmax.f32 %v2537_v32, %v2544_v28 }
 0x2a6   : > { %v2519_v17 = vmax.f32 %v2517_v4, %v2518_v27  ;;  %v2548_v15 = vmax.f32 %v2541_v38, %v2543_v34 }
 0x2a8   : > { %v2546_v12 = vsel %vm1236_vm0, %v2519_v17, -inf }
 0x2a9   : > { %v2547_v20 = vmax.f32 %v2539_v40, %v2546_v12 }
 0x2ab   : > { %v2549_v24 = vmax.f32 %v2545_v62, %v2547_v20 }
 0x2ad   : > { %v21225_v31 = vmax.f32 %v2548_v15, %v2549_v24 }
 0x2af   : > { %v2551_v29 = vsub.f32 %v21021_v14, %v21225_v31  ;;  %v2552_v26 = vsub.f32 %v21025_v49, %v21225_v31  ;;  %v2553_v21 = vsub.f32 %v21029_v41, %v21225_v31  ;;  %v2554_v25 = vsub.f32 %v21033_v55, %v21225_v31 }
 0x2b0   : > { %v2555_v22 = vsub.f32 %v21037_v60, %v21225_v31  ;;  %v2556_v1 = vsub.f32 %v21041_v45, %v21225_v31  ;;  %v2557_v53 = vsub.f32 %v21044_v61, %v21225_v31  ;;  %v2558_v14 = vsub.f32 %v21047_v44, %v21225_v31 }
 0x2b1   : > { %v2559_v49 = vsub.f32 %v21050_v46, %v21225_v31  ;;  %v2560_v41 = vsub.f32 %v21053_v52, %v21225_v31  ;;  %v2561_v55 = vsub.f32 %v21056_v13, %v21225_v31  ;;  %v2562_v60 = vsub.f32 %v21059_v43, %v21225_v31 }
 0x2b2   : > { %v2563_v45 = vsub.f32 %v21062_v63, %v21225_v31  ;;  %v2564_v61 = vsub.f32 %v21065_v18, %v21225_v31  ;;  %v2565_v44 = vsub.f32 %v21068_v11, %v21225_v31  ;;  %v2566_v46 = vsub.f32 %v21071_v0, %v21225_v31 }
 0x2b3   : > { %v2567_v52 = vsub.f32 %v21074_v35, %v21225_v31  ;;  %v2568_v13 = vsub.f32 %v21077_v6, %v21225_v31  ;;  %v2569_v43 = vsub.f32 %v21080_v50, %v21225_v31  ;;  %v2570_v63 = vsub.f32 %v21083_v33, %v21225_v31  ;;  %v24937_v33 = vld [vmem:[#allocation101_spill] sm:$0xff] }
 0x2b4   : > { %v2571_v18 = vsub.f32 %v21086_v30, %v21225_v31  ;;  %v2572_v11 = vsub.f32 %v21089_v47, %v21225_v31  ;;  %v2573_v0 = vsub.f32 %v21092_v10, %v21225_v31  ;;  %v2574_v35 = vsub.f32 %v21095_v58, %v21225_v31  ;;  %v24938_v30 = vld [vmem:[#allocation102_spill] sm:$0xff] }
 0x2b5   : > { %v2575_v6 = vsub.f32 %v21098_v42, %v21225_v31  ;;  %v2576_v50 = vsub.f32 %v21101_v2, %v21225_v31  ;;  %v2577_v37 = vsub.f32 %v24937_v33, %v21225_v31  ;;  %v2578_v57 = vsub.f32 %v24938_v30, %v21225_v31 }
 0x2b6   : > { %v2579_v51 = vsub.f32 %v21110_v19, %v21225_v31  ;;  %v2580_v23 = vsub.f32 %v24939_v5, %v21225_v31  ;;  %v2581_v8 = vsub.f32 %v21116_v3, %v21225_v31  ;;  %v2582_v48 = vsub.f32 %v21119_v39, %v21225_v31 }
 0x2b7   : > { %v2583_v59 = vmul.f32 1.442695, %v2551_v29  ;;  %v2585_v4 = vmul.f32 1.442695, %v2552_v26  ;;  %v2587_v36 = vmul.f32 1.442695, %v2553_v21 }
 0x2b8   : > { %v2589_v56 = vmul.f32 1.442695, %v2554_v25  ;;  %v2591_v7 = vmul.f32 1.442695, %v2555_v22  ;;  %v2593_v16 = vmul.f32 1.442695, %v2556_v1 }
 0x2b9   : > { %19242 = vpow2.f32 %v2583_v59  ;;  %v2595_v54 = vmul.f32 1.442695, %v2557_v53  ;;  %v2597_v9 = vmul.f32 1.442695, %v2558_v14  ;;  %v2599_v27 = vmul.f32 1.442695, %v2559_v49 }
 0x2ba   : > { %19244 = vpow2.f32 %v2585_v4  ;;  %v2601_v32 = vmul.f32 1.442695, %v2560_v41  ;;  %v2603_v40 = vmul.f32 1.442695, %v2561_v55  ;;  %v2605_v38 = vmul.f32 1.442695, %v2562_v60 }
 0x2bb   : > { %19246 = vpow2.f32 %v2587_v36  ;;  %v2607_v34 = vmul.f32 1.442695, %v2563_v45  ;;  %v2609_v17 = vmul.f32 1.442695, %v2564_v61  ;;  %v2611_v15 = vmul.f32 1.442695, %v2565_v44 }
 0x2bc   : > { %19248 = vpow2.f32 %v2589_v56  ;;  %v2613_v24 = vmul.f32 1.442695, %v2566_v46  ;;  %v2615_v21 = vmul.f32 1.442695, %v2567_v52  ;;  %v2617_v1 = vmul.f32 1.442695, %v2568_v13 }
 0x2bd   : > { %19250 = vpow2.f32 %v2591_v7  ;;  %v2619_v41 = vmul.f32 1.442695, %v2569_v43  ;;  %v2621_v45 = vmul.f32 1.442695, %v2570_v63  ;;  %v2623_v61 = vmul.f32 1.442695, %v2571_v18 }
 0x2be   : > { %19252 = vpow2.f32 %v2593_v16  ;;  %v2625_v52 = vmul.f32 1.442695, %v2572_v11  ;;  %v2627_v47 = vmul.f32 1.442695, %v2573_v0  ;;  %v2629_v11 = vmul.f32 1.442695, %v2574_v35 }
 0x2bf   : > { %19254 = vpow2.f32 %v2595_v54  ;;  %v2631_v56 = vmul.f32 1.442695, %v2575_v6  ;;  %v2633_v42 = vmul.f32 1.442695, %v2576_v50  ;;  %v2639_v30 = vmul.f32 1.442695, %v2579_v51 }
 0x2c0   : > { %19256 = vpow2.f32 %v2597_v9 }
 0x2c1   : > { %19258 = vpow2.f32 %v2599_v27 }
 0x2c2   : > { %19260 = vpow2.f32 %v2601_v32 }
 0x2c3   : > { %v21291_v28 = vpop.eup %19242  ;;  %19262 = vpow2.f32 %v2603_v40  ;;  %v2635_v40 = vmul.f32 1.442695, %v2577_v37 }
 0x2c4   : > { %v21293_v62 = vpop.eup %19244  ;;  %v2647_v12 = vsel %vm1236_vm0, %v21291_v28, 0.0  ;;  %19264 = vpow2.f32 %v2605_v38 }
 0x2c5   : > { %v21297_v20 = vpop.eup %19246  ;;  %v2648_v29 = vsel %vm1236_vm0, %v21293_v62, 0.0  ;;  %19266 = vpow2.f32 %v2607_v34 }
 0x2c6   : > { %v21301_v26 = vpop.eup %19248  ;;  %v2649_v25 = vadd.f32 %v2648_v29, %v2647_v12  ;;  %19268 = vpow2.f32 %v2609_v17  ;;  %v2656_v53 = vsel %vm1236_vm0, %v21297_v20, 0.0  ;;  %v2637_v17 = vmul.f32 1.442695, %v2578_v57 }
 0x2c7   : > { %v21303_v22 = vpop.eup %19250  ;;  %v2657_v14 = vsel %vm1236_vm0, %v21301_v26, 0.0  ;;  %19270 = vpow2.f32 %v2611_v15  ;;  %v2641_v57 = vmul.f32 1.442695, %v2580_v23 }
 0x2c8   : > { %v21309_v49 = vpop.eup %19252  ;;  %v2665_v55 = vsel %vm1236_vm0, %v21303_v22, 0.0  ;;  %19272 = vpow2.f32 %v2613_v24  ;;  %v2650_v13 = vrot.slane %v2649_v25, 4  ;;  %v2658_v43 = vadd.f32 %v2657_v14, %v2656_v53 }
 0x2c9   : > { %v21313_v60 = vpop.eup %19254  ;;  %v2666_v44 = vsel %vm1236_vm0, %v21309_v49, 0.0  ;;  %19274 = vpow2.f32 %v2615_v21  ;;  %v2643_v21 = vmul.f32 1.442695, %v2581_v8 }
 0x2ca   : > { %v21317_v46 = vpop.eup %19256  ;;  %19276 = vpow2.f32 %v2617_v1  ;;  %v2667_v4 = vadd.f32 %v2666_v44, %v2665_v55  ;;  %v2674_v63 = vsel %vm1236_vm0, %v21313_v60, 0.0  ;;  %v2651_v54 = vadd.f32 %v2650_v13, %v2649_v25 }
 0x2cb   : > { %v21322_v59 = vpop.eup %19258  ;;  %v2675_v18 = vsel %vm1236_vm0, %v21317_v46, 0.0  ;;  %19278 = vpow2.f32 %v2619_v41  ;;  %v2659_v58 = vrot.slane %v2658_v43, 4  ;;  %v2645_v1 = vmul.f32 1.442695, %v2582_v48 }
 0x2cc   : > { %v21328_v36 = vpop.eup %19260  ;;  %19280 = vpow2.f32 %v2621_v45  ;;  %v2676_v7 = vadd.f32 %v2675_v18, %v2674_v63  ;;  %v2683_v9 = vsel %vm1236_vm0, %v21322_v59, 0.0  ;;  %v2668_v35 = vrot.slane %v2667_v4, 4 }
 0x2cd   : > { %v21339_v16 = vpop.eup %19262  ;;  %19282 = vpow2.f32 %v2623_v61  ;;  %v2684_v10 = vsel %vm1236_vm0, %v21328_v36, 0.0  ;;  %v2652_v15 = vrot.slane %v2651_v54, 2  ;;  %v2660_v24 = vadd.f32 %v2659_v58, %v2658_v43 }
 0x2ce   : > { %v21345_v0 = vpop.eup %19264  ;;  %19284 = vpow2.f32 %v2625_v52  ;;  %v2677_v27 = vrot.slane %v2676_v7, 4  ;;  %v2685_v38 = vadd.f32 %v2684_v10, %v2683_v9  ;;  %v2692_v12 = vsel %vm1236_vm0, %v21339_v16, 0.0 }
 0x2cf   : > { %v21347_v32 = vpop.eup %19266  ;;  %19286 = vpow2.f32 %v2627_v47  ;;  %v2693_v2 = vsel %vm1236_vm0, %v21345_v0, 0.0  ;;  %v2669_v33 = vadd.f32 %v2668_v35, %v2667_v4  ;;  %v2653_v5 = vadd.f32 %v2652_v15, %v2651_v54 }
 0x2d0   : > { %v21352_v6 = vpop.eup %19268  ;;  %19288 = vpow2.f32 %v2629_v11  ;;  %v2678_v37 = vadd.f32 %v2677_v27, %v2676_v7  ;;  %v2686_v53 = vrot.slane %v2685_v38, 4  ;;  %v2694_v14 = vadd.f32 %v2693_v2, %v2692_v12 }
 0x2d1   : > { %v21357_v34 = vpop.eup %19270  ;;  %19290 = vpow2.f32 %v2631_v56  ;;  %v2701_v19 = vsel %vm1236_vm0, %v21347_v32, 0.0  ;;  %v2702_v23 = vsel %vm1236_vm0, %v21352_v6, 0.0  ;;  %v2661_v39 = vrot.slane %v2660_v24, 2 }
 0x2d2   : > { %v21366_v50 = vpop.eup %19272  ;;  %19292 = vpow2.f32 %v2633_v42  ;;  %v2710_v3 = vsel %vm1236_vm0, %v21357_v34, 0.0  ;;  %v2670_v31 = vrot.slane %v2669_v33, 2  ;;  %v2679_v48 = vrot.slane %v2678_v37, 2 }
 0x2d3   : > { %v21368_v29 = vpop.eup %19274  ;;  %19294 = vpow2.f32 %v2635_v40  ;;  %v2703_v55 = vadd.f32 %v2702_v23, %v2701_v19  ;;  %v2711_v45 = vsel %vm1236_vm0, %v21366_v50, 0.0  ;;  %v2687_v52 = vadd.f32 %v2686_v53, %v2685_v38 }
 0x2d4   : > { %v21379_v25 = vpop.eup %19276  ;;  %19296 = vpow2.f32 %v2637_v17  ;;  %v2719_v61 = vsel %vm1236_vm0, %v21368_v29, 0.0  ;;  %v2695_v13 = vrot.slane %v2694_v14, 4  ;;  %v2712_v43 = vadd.f32 %v2711_v45, %v2710_v3 }
 0x2d5   : > { %v21386_v51 = vpop.eup %19278  ;;  %19298 = vpow2.f32 %v2639_v30  ;;  %v2720_v63 = vsel %vm1236_vm0, %v21379_v25, 0.0  ;;  %v2662_v56 = vadd.f32 %v2661_v39, %v2660_v24  ;;  %v2704_v7 = vrot.slane %v2703_v55, 4 }
 0x2d6   : > { %v21392_v8 = vpop.eup %19280  ;;  %19300 = vpow2.f32 %v2641_v57  ;;  %v2728_v18 = vsel %vm1236_vm0, %v21386_v51, 0.0  ;;  %v2721_v54 = vadd.f32 %v2720_v63, %v2719_v61  ;;  %v2713_v9 = vrot.slane %v2712_v43, 4 }
 0x2d7   : > { %v21394_v41 = vpop.eup %19282  ;;  %19302 = vpow2.f32 %v2643_v21  ;;  %v2729_v47 = vsel %vm1236_vm0, %v21392_v8, 0.0  ;;  %v2671_v42 = vadd.f32 %v2670_v31, %v2669_v33  ;;  %v2680_v40 = vadd.f32 %v2679_v48, %v2678_v37 }
 0x2d8   : > { %v21400_v44 = vpop.eup %19284  ;;  %19304 = vpow2.f32 %v2645_v1  ;;  %v2730_v10 = vadd.f32 %v2729_v47, %v2728_v18  ;;  %v2737_v58 = vsel %vm1236_vm0, %v21394_v41, 0.0  ;;  %v2688_v17 = vrot.slane %v2687_v52, 2 }
 0x2d9   : > { %v21402_v4 = vpop.eup %19286  ;;  %v2738_v35 = vsel %vm1236_vm0, %v21400_v44, 0.0  ;;  %v2696_v15 = vadd.f32 %v2695_v13, %v2694_v14  ;;  %v2654_v24 = vrot.slane %v2653_v5, 1  ;;  %v2722_v30 = vrot.slane %v2721_v54, 4 }
 0x2da   : > { %24940 = vst [vmem:[#allocation101_spill] sm:$0xff] %v21402_v4  ;;  %v21410_v11 = vpop.eup %19288  ;;  %v2746_v12 = vsel %vm1236_vm0, %v21402_v4, 0.0  ;;  %v2739_v57 = vadd.f32 %v2738_v35, %v2737_v58  ;;  %v2663_v1 = vrot.slane %v2662_v56, 1  ;;  %v2705_v53 = vadd.f32 %v2704_v7, %v2703_v55 }
 0x2db   : > { %24941 = vst [vmem:[#allocation102_spill] sm:$0xff] %v21410_v11  ;;  %v21416_v27 = vpop.eup %19290  ;;  %v2747_v2 = vsel %vm1236_vm0, %v21410_v11, 0.0  ;;  %v2714_v19 = vadd.f32 %v2713_v9, %v2712_v43  ;;  %v2731_v33 = vrot.slane %v2730_v10, 4  ;;  %v2672_v23 = vrot.slane %v2671_v42, 1 }
 0x2dc   : > { %24942 = vst [vmem:[#allocation103_spill] sm:$0xff] %v21416_v27  ;;  %v21418_v38 = vpop.eup %19292  ;;  %v2748_v3 = vadd.f32 %v2747_v2, %v2746_v12  ;;  %v2755_v14 = vsel %vm1236_vm0, %v21416_v27, 0.0  ;;  %v2681_v48 = vrot.slane %v2680_v40, 1  ;;  %v2689_v45 = vadd.f32 %v2688_v17, %v2687_v52 }
 0x2dd   : > { %24943 = vst [vmem:[#allocation104_spill] sm:$0xff] %v21418_v38  ;;  %v21424_v21 = vpop.eup %19294  ;;  %v2756_v39 = vsel %vm1236_vm0, %v21418_v38, 0.0  ;;  %v2697_v61 = vrot.slane %v2696_v15, 2  ;;  %v2655_v55 = vadd.f32 %v2654_v24, %v2653_v5  ;;  %v2723_v43 = vadd.f32 %v2722_v30, %v2721_v54 }
 0x2de   : > { %24944 = vst [vmem:[#allocation105_spill] sm:$0xff] %v21424_v21  ;;  %v21426_v37 = vpop.eup %19296  ;;  %v2740_v63 = vrot.slane %v2739_v57, 4  ;;  %v2764_v18 = vsel %vm1236_vm0, %v21424_v21, 0.0  ;;  %v2706_v7 = vrot.slane %v2705_v53, 2  ;;  %v2715_v9 = vrot.slane %v2714_v19, 2 }
 0x2df   : > { %24945 = vst [vmem:[#allocation106_spill] sm:$0xff] %v21426_v37  ;;  %v21432_v31 = vpop.eup %19298  ;;  %v2732_v58 = vadd.f32 %v2731_v33, %v2730_v10  ;;  %v2757_v35 = vadd.f32 %v2756_v39, %v2755_v14  ;;  %v2664_v2 = vadd.f32 %v2663_v1, %v2662_v56  ;;  %v2673_v38 = vadd.f32 %v2672_v23, %v2671_v42 }
 0x2e0   : > { %24946 = vst [vmem:[#allocation107_spill] sm:$0xff] %v21432_v31  ;;  %v21434_v13 = vpop.eup %19300  ;;  %v2749_v52 = vrot.slane %v2748_v3, 4  ;;  %v2765_v17 = vsel %vm1236_vm0, %v21426_v37, 0.0  ;;  %v2682_v5 = vadd.f32 %v2681_v48, %v2680_v40  ;;  %v2690_v54 = vrot.slane %v2689_v45, 1 }
 0x2e1   : > { %24947 = vst [vmem:[#allocation108_spill] sm:$0xff] %v21434_v13  ;;  %v21438_v47 = vpop.eup %19302  ;;  %v2698_v24 = vadd.f32 %v2697_v61, %v2696_v15  ;;  %v2766_v30 = vadd.f32 %v2765_v17, %v2764_v18  ;;  %v2724_v27 = vrot.slane %v2723_v43, 2  ;;  %v2741_v21 = vadd.f32 %v2740_v63, %v2739_v57 }
 0x2e2   : > { %v21440_v12 = vpop.eup %19304  ;;  %v2773_v11 = vsel %vm1236_vm0, %v21432_v31, 0.0  ;;  %v2774_v10 = vsel %vm1236_vm0, %v21434_v13, 0.0  ;;  %v2707_v33 = vadd.f32 %v2706_v7, %v2705_v53  ;;  %v2716_v14 = vadd.f32 %v2715_v9, %v2714_v19  ;;  %v1719_v13 = vld [vmem:[%s24949_s8 + $0x8] sm:$0xff] }
 0x2e3   : > { %v2733_v56 = vrot.slane %v2732_v58, 2  ;;  %v2758_v42 = vrot.slane %v2757_v35, 4  ;;  %v2750_v1 = vadd.f32 %v2749_v52, %v2748_v3  ;;  %v2775_v23 = vadd.f32 %v2774_v10, %v2773_v11 }
 0x2e4   : > { %v2782_v40 = vsel %vm1236_vm0, %v21438_v47, 0.0  ;;  %v2783_v15 = vsel %vm1236_vm0, %v21440_v12, 0.0  ;;  %v2691_v39 = vadd.f32 %v2690_v54, %v2689_v45  ;;  %v2699_v57 = vrot.slane %v2698_v24, 1 }
 0x2e5   : > { %v2767_v48 = vrot.slane %v2766_v30, 4  ;;  %v2784_v61 = vadd.f32 %v2783_v15, %v2782_v40  ;;  %v2725_v63 = vadd.f32 %v2724_v27, %v2723_v43  ;;  %v2742_v18 = vrot.slane %v2741_v21, 2  ;;  %v1718_v15 = vld [vmem:[%s24948_s28] sm:$0xff]  ;;  %s25064_s28 = sld [smem:[#allocation56_spill]] }
 0x2e6   : > { %v2791_v17 = vsel %vm1236_vm0, %v2655_v55, 0.0  ;;  %v2792_v53 = vsel %vm1236_vm0, %v2664_v2, 0.0  ;;  %v2708_v19 = vrot.slane %v2707_v33, 1  ;;  %v2759_v11 = vadd.f32 %v2758_v42, %v2757_v35 }
 0x2e7   : > { %v2776_v3 = vrot.slane %v2775_v23, 4  ;;  %v2794_v7 = vsel %vm1236_vm0, %v2673_v38, 0.0  ;;  %v2717_v9 = vrot.slane %v2716_v14, 1  ;;  %v2734_v52 = vadd.f32 %v2733_v56, %v2732_v58 }
 0x2e8   : > { %v2751_v10 = vrot.slane %v2750_v1, 2  ;;  %v2793_v45 = vadd.f32 %v2792_v53, %v2791_v17  ;;  %v2700_v54 = vadd.f32 %v2699_v57, %v2698_v24  ;;  %v2768_v37 = vadd.f32 %v2767_v48, %v2766_v30  ;;  %v1720_v30 = vld [vmem:[%s24949_s8 + $0x10] sm:$0xff]  ;;  %v1721_v57 = vld [vmem:[%s24949_s8 + $0x18] sm:$0xff] }
 0x2e9   : > { %v2785_v27 = vrot.slane %v2784_v61, 4  ;;  %v2796_v55 = vsel %vm1236_vm0, %v2682_v5, 0.0  ;;  %v2726_v43 = vrot.slane %v2725_v63, 1  ;;  %v2743_v2 = vadd.f32 %v2742_v18, %v2741_v21 }
 0x2ea   : > { %v2795_v40 = vadd.f32 %v2794_v7, %v2793_v45  ;;  %v2709_v35 = vadd.f32 %v2708_v19, %v2707_v33  ;;  %v2760_v42 = vrot.slane %v2759_v11, 2  ;;  %v2777_v31 = vadd.f32 %v2776_v3, %v2775_v23 }
 0x2eb   : > { %v2798_v38 = vsel %vm1236_vm0, %v2691_v39, 0.0  ;;  %v2718_v58 = vadd.f32 %v2717_v9, %v2716_v14  ;;  %v2735_v56 = vrot.slane %v2734_v52, 1  ;;  %v2752_v17 = vadd.f32 %v2751_v10, %v2750_v1 }
 0x2ec   : > { %v2797_v24 = vadd.f32 %v2796_v55, %v2795_v40  ;;  %v2769_v48 = vrot.slane %v2768_v37, 2  ;;  %v2786_v53 = vadd.f32 %v2785_v27, %v2784_v61  ;;  %v2800_v5 = vsel %vm1236_vm0, %v2700_v54, 0.0 }
 0x2ed   : > { %v18052_v4 = vpack.c.bf16 %v1719_v13, %v1718_v15  ;;  %v2727_v21 = vadd.f32 %v2726_v43, %v2725_v63  ;;  %v2744_v18 = vrot.slane %v2743_v2, 1  ;;  %v2761_v45 = vadd.f32 %v2760_v42, %v2759_v11 }
 0x2ee   : > { %v2799_v7 = vadd.f32 %v2798_v38, %v2797_v24  ;;  %v2778_v33 = vrot.slane %v2777_v31, 2  ;;  %v2802_v23 = vsel %vm1236_vm0, %v2709_v35, 0.0  ;;  %v18055_v39 = vpack.c.bf16 %v1721_v57, %v1720_v30 }
 0x2ef   : > { %18053 = vmatpush3.bf16.msra.mxu0 %v18052_v4  ;;  %v2736_v14 = vadd.f32 %v2735_v56, %v2734_v52  ;;  %v24950_v1 = vmov 0.0|0.0   ;;  %v2753_v3 = vrot.slane %v2752_v17, 1  ;;  %v2770_v9 = vadd.f32 %v2769_v48, %v2768_v37 }
 0x2f0   : > { %v2801_v19 = vadd.f32 %v2800_v5, %v2799_v7  ;;  %18054 = vmatprep.subr.bf16.mxu0 %v24950_v1  ;;  %v2787_v10 = vrot.slane %v2786_v53, 2  ;;  %v2804_v61 = vsel %vm1236_vm0, %v2718_v58, 0.0  ;;  %v2745_v13 = vadd.f32 %v2744_v18, %v2743_v2 }
 0x2f1   : > { %v2762_v63 = vrot.slane %v2761_v45, 1  ;;  %v2779_v27 = vadd.f32 %v2778_v33, %v2777_v31  ;;  %v2806_v11 = vsel %vm1236_vm0, %v2727_v21, 0.0  ;;  %v2754_v4 = vadd.f32 %v2753_v3, %v2752_v17  ;;  %v24952_v3 = vld [vmem:[#allocation100_spill] sm:$0xff] }
 0x2f2   : > { %v2803_v54 = vadd.f32 %v2802_v23, %v2801_v19  ;;  %v2771_v52 = vrot.slane %v2770_v9, 1  ;;  %v2788_v43 = vadd.f32 %v2787_v10, %v2786_v53  ;;  %v2808_v40 = vsel %vm1236_vm0, %v2736_v14, 0.0  ;;  %v24951_v14 = vld [vmem:[#allocation99_spill] sm:$0xff] }
 0x2f3   : > { %18056 = vmatpush3.bf16.msra.mxu0 %v18055_v39  ;;  %v2763_v37 = vadd.f32 %v2762_v63, %v2761_v45  ;;  %v2780_v35 = vrot.slane %v2779_v27, 1  ;;  %v2810_v42 = vsel %vm1236_vm0, %v2745_v13, 0.0  ;;  %v2812_v31 = vsel %vm1236_vm0, %v2754_v4, 0.0 }
 0x2f4   : > { %v2805_v55 = vadd.f32 %v2804_v61, %v2803_v54  ;;  %18063 = vmatprep.subr.bf16.mxu0 %v24950_v1  ;;  %v2772_v2 = vadd.f32 %v2771_v52, %v2770_v9  ;;  %v2789_v58 = vrot.slane %v2788_v43, 1 }
 0x2f5   : > { %v2781_v24 = vadd.f32 %v2780_v35, %v2779_v27  ;;  %v2814_v30 = vsel %vm1236_vm0, %v2763_v37, 0.0  ;;  %v1797_v37 = vld [vmem:[%s24953_s22] sm:$0xff]  ;;  %v1722_v35 = vld [vmem:[#allocation9] sm:$0x1]  ;;  %s25065_s22 = smov %s25064_s28 }
 0x2f6   : > { %v2807_v15 = vadd.f32 %v2806_v11, %v2805_v55  ;;  %v2790_v17 = vadd.f32 %v2789_v58, %v2788_v43  ;;  %v2816_v48 = vsel %vm1236_vm0, %v2772_v2, 0.0  ;;  %16626 = vmatpush3.msra.mxu1 %v1797_v37 }
 0x2f7   : > { %v2818_v5 = vsel %vm1236_vm0, %v2781_v24, 0.0  ;;  %18057 = vmatprep.subr.bf16.mxu1 %v24950_v1 }
 0x2f8   : > { %v2809_v38 = vadd.f32 %v2808_v40, %v2807_v15  ;;  %v2820_v18 = vsel %vm1236_vm0, %v2790_v17, 0.0  ;;  %v24955_v15 = vmov 0.0  }
 0x2fa   : > { %v2811_v56 = vadd.f32 %v2810_v42, %v2809_v38  ;;  %v1879_v42 = vld [vmem:[%s24954_s15] sm:$0xff]  ;;  %v1880_v38 = vld [vmem:[%s24954_s15 + $0x8] sm:$0xff] }
 0x2fc   : > { %v2813_v57 = vadd.f32 %v2812_v31, %v2811_v56  ;;  %v18058_v56 = vpack.c.bf16 %v1880_v38, %v1879_v42 }
 0x2fe   : > { %v2815_v53 = vadd.f32 %v2814_v30, %v2813_v57  ;;  %v1881_v30 = vld [vmem:[%s24954_s15 + $0x10] sm:$0xff]  ;;  %v1882_v57 = vld [vmem:[%s24954_s15 + $0x18] sm:$0xff] }
 0x2ff   : > { %v18061_v17 = vpack.c.bf16 %v1882_v57, %v1881_v30 }
 0x300   : > { %v2817_v21 = vadd.f32 %v2816_v48, %v2815_v53 }
 0x302   : > { %v2819_v7 = vadd.f32 %v2818_v5, %v2817_v21  ;;  %v1883_v5 = vld [vmem:[#allocation12] sm:$0x1] }
 0x304   : > { %v2821_v45 = vadd.f32 %v2820_v18, %v2819_v7 }
 0x306   : > { %19306 = vrcp.f32 %v2821_v45 }
 0x310   : > { %v21474_v33 = vpop.eup %19306 }
 0x311   : > { %v2853_v23 = vmul.f32 %v21474_v33, %v21438_v47  ;;  %v2854_v39 = vmul.f32 %v21474_v33, %v21440_v12  ;;  %v1710_v47 = vld [vmem:[#allocation8] sm:$0x1] }
 0x313   : > { %v2885_v19 = vmul.f32 %v2853_v23, %v24951_v14  ;;  %v2886_v9 = vmul.f32 %v2854_v39, %v24952_v3 }
 0x315   : > { %v2917_v10 = vadd.f32 %v2885_v19, %v24951_v14  ;;  %v2918_v61 = vadd.f32 %v2886_v9, %v24952_v3  ;;  %v1798_v9 = vld [vmem:[#allocation11] sm:$0x1] }
 0x317   : > { %2949 = vst.msk [vmem:[#allocation2 + $0x108] sm:$0xff] %vm1236_vm0, %v2917_v10  ;;  %2950 = vst.msk [vmem:[#allocation2 + $0x110] sm:$0xff] %vm1236_vm0, %v2918_v61 }
 0x320   : > { %v1633_v54 = vpop.f32.mrb[0].mxu0 }
 0x321   : > { %v16602_v13 = vpop.f32.mrb[1].mxu0 }
 0x350   : > { %v1706_v63 = vpop.f32.mrb[0].mxu1 }
 0x351   : > { %v1707_v27 = vadd.f32 %v1706_v63, %v1633_v54  ;;  %v16613_v12 = vpop.f32.mrb[1].mxu1 }
 0x353   : > { %v1711_v11 = vadd.f32 %v1710_v47, %v1707_v27  ;;  %v1229_v27 = vlaneseq }
 0x355   : > { %v1712_v55 = vsub.f32 0.0, %v1711_v11  ;;  %v21506_v12 = vshrl.u32 %v1229_v27, 7 }
 0x357   : > { %v1713_v4 = vmul.f32 1.442695, %v1712_v55  ;;  %24956 = vst [vmem:[#allocation99_spill] sm:$0xff] %v21506_v12  ;;  %v1972_v55 = vand.u32 127, %v1229_v27  ;;  %vm1232_vm7 = vcmp.ge.s32.totalorder %v21506_v12, 1 }
 0x359   : > { %19308 = vpow2.f32 %v1713_v4  ;;  %vm1973_vm4 = vcmp.eq.s32.totalorder %v21506_v12, %v1972_v55  ;;  %v24962_v55 = vld [vmem:[#allocation71_spill] sm:$0xff] }
 0x363   : > { %v19309_v52 = vpop.eup %19308 }
 0x364   : > { %v1715_v43 = vadd.f32 1.0, %v19309_v52 }
 0x366   : > { %19310 = vrcp.f32 %v1715_v43 }
 0x370   : > { %v21486_v40 = vpop.eup %19310 }
 0x371   : > { %16623 = vmatmul.mubr.msk.f32.vlgmr.msra.gmra.mrb[2].mxu0 %vm1236_vm0, %v21486_v40 }
 0x372   : > { %16649 = vmatprep.mubr.msk.f32.mxu0 %vm20054_vm1, %v24955_v15 }
 0x444   : > { %v1792_v2 = vpop.f32.mrb[2].mxu0 }
 0x445   : > { %v1793_v58 = vadd.f32 %v1792_v2, %v1722_v35  ;;  %v16624_v31 = vpop.f32.mrb[3].mxu0 }
 0x447   : > { %v1796_v24 = vmax.f32 %v1793_v58, 0.0 }
 0x449   : > { %16628 = vmatmul.mubr.msk.f32.vlgmr.msra.gmra.mrb[2].mxu1 %vm1799_vm2, %v1796_v24 }
 0x44a   : > { %18059 = vmatpush3.bf16.msra.mxu1 %v18058_v56  ;;  %16638 = vmatprep.mubr.msk.f32.mxu1 %vm20054_vm1, %v24955_v15 }
 0x44b   : > { %18060 = vmatprep.subr.bf16.mxu1 %v24950_v1 }
 0x44e   : > { %18062 = vmatpush3.bf16.msra.mxu1 %v18061_v17  ;;  %v2015_v17 = vld [vmem:[%s24957_s26] sm:$0xff] }
 0x44f   : > { %18069 = vmatprep.subr.bf16.mxu1 %v24950_v1 }
 0x451   : > { %16639 = vmatmul.mubr.msk.f32.vlgmr.msra.gmra.mrb[4].mxu1 %vm1236_vm0, %v21486_v40 }
 0x452   : > { %16660 = vmatprep.mubr.msk.f32.mxu1 %vm20054_vm1, %v24955_v15  ;;  %v1969_v15 = vsub.s32 0, %v21506_v12 }
 0x454   : > { %v1982_v38 = vrot.slane %v21486_v40, %v1969_v15 }
 0x51c   : > { %v1869_v48 = vpop.f32.mrb[2].mxu1 }
 0x51d   : > { %v16629_v53 = vpop.f32.mrb[3].mxu1  ;;  %v1870_v10 = vadd.f32 %v1869_v48, %v1798_v9  ;;  %v2016_v48 = vld [vmem:[%s24957_s26 + $0x8] sm:$0xff]  ;;  %v2823_v9 = vmul.f32 %v21474_v33, %v21291_v28  ;;  %v2826_v28 = vmul.f32 %v21474_v33, %v21301_v26 }
 0x51e   : > { %v2101_v53 = vld [vmem:[%s24958_s16] sm:$0xff] }
 0x51f   : > { %v1873_v61 = vsub.f32 0.0, %v1870_v10  ;;  %v2824_v10 = vmul.f32 %v21474_v33, %v21293_v62  ;;  %v2827_v62 = vmul.f32 %v21474_v33, %v21303_v22  ;;  %v2829_v22 = vmul.f32 %v21474_v33, %v21313_v60 }
 0x521   : > { %v1874_v54 = vmul.f32 1.442695, %v1873_v61  ;;  %v24960_v61 = vld [vmem:[#allocation69_spill] sm:$0xff] }
 0x524   : > { %v1950_v21 = vpop.f32.mrb[4].mxu1 }
 0x525   : > { %v1951_v18 = vadd.f32 %v1950_v21, %v1883_v5  ;;  %v16640_v7 = vpop.f32.mrb[5].mxu1  ;;  %v18064_v5 = vpack.c.bf16 %v2016_v48, %v2015_v17  ;;  %v2102_v21 = vld [vmem:[%s24958_s16 + $0x8] sm:$0xff]  ;;  %v24968_v17 = vld [vmem:[#allocation77_spill] sm:$0xff] }
 0x526   : > { %v2018_v7 = vld [vmem:[%s24957_s26 + $0x18] sm:$0xff] }
 0x527   : > { %v1955_v45 = vsel %vm1954_vm3, %v1951_v18, -inf  ;;  %18065 = vmatpush3.bf16.msra.mxu0 %v18064_v5 }
 0x528   : > { %1956 = vmax.xlane.f32.xlu0 %v1955_v45  ;;  %v18070_v45 = vpack.c.bf16 %v2102_v21, %v2101_v53  ;;  %18066 = vmatprep.subr.bf16.mxu0 %v24950_v1  ;;  %v24969_v53 = vld [vmem:[#allocation78_spill] sm:$0xff] }
 0x52a   : > { %18071 = vmatpush3.bf16.msra.mxu1 %v18070_v45  ;;  %v2836_v45 = vmul.f32 %v21474_v33, %v21352_v6  ;;  %v2838_v6 = vmul.f32 %v21474_v33, %v21366_v50 }
 0x52b   : > { %18072 = vmatprep.subr.bf16.mxu1 %v24950_v1  ;;  %v2825_v1 = vmul.f32 %v21474_v33, %v21297_v20 }
 0x5b5   : > { %v1957_v23 = vpop.xlane.xlu0 %1956 }
 0x5b6   : > { %v1958_v39 = vsub.f32 %v1951_v18, %v1957_v23  ;;  %v2017_v18 = vld [vmem:[%s24957_s26 + $0x10] sm:$0xff] }
 0x5b7   : > { %v2103_v23 = vld [vmem:[%s24958_s16 + $0x10] sm:$0xff] }
 0x5b8   : > { %v1959_v14 = vmul.f32 1.442695, %v1958_v39  ;;  %v2104_v39 = vld [vmem:[%s24958_s16 + $0x18] sm:$0xff] }
 0x5ba   : > { %19312 = vpow2.f32 %v1959_v14  ;;  %v18067_v14 = vpack.c.bf16 %v2018_v7, %v2017_v18  ;;  %v2835_v7 = vmul.f32 %v21474_v33, %v21347_v32  ;;  %v2837_v32 = vmul.f32 %v21474_v33, %v21357_v34 }
 0x5bb   : > { %19314 = vpow2.f32 %v1874_v54  ;;  %v2855_v54 = vmul.f32 %v2823_v9, %v24960_v61  ;;  %v24972_v9 = vld [vmem:[#allocation81_spill] sm:$0xff] }
 0x5bc   : > { %18068 = vmatpush3.bf16.msra.mxu0 %v18067_v14  ;;  %v24971_v14 = vld [vmem:[#allocation80_spill] sm:$0xff] }
 0x5c4   : > { %v19313_v19 = vpop.eup %19312 }
 0x5c5   : > { %v1961_v3 = vsel %vm1954_vm3, %v19313_v19, 0.0  ;;  %v19315_v13 = vpop.eup %19314 }
 0x5c6   : > { %1962 = vadd.xlane.f32.xlu0 %v1961_v3  ;;  %v1876_v63 = vadd.f32 1.0, %v19315_v13  ;;  %v21526_v3 = vld [vmem:[%s24959_s10 + $0x10] sm:$0xff]   ;;  %v24961_v13 = vld [vmem:[#allocation70_spill] sm:$0xff] }
 0x5c7   : > { %16663 = vmatprep.subr.bf16.mxu0 %v21526_v3 }
 0x653   : > { %v1963_v47 = vpop.xlane.xlu0 %1962 }
 0x654   : > { %19316 = vrcp.f32 %v1963_v47  ;;  %v2887_v47 = vadd.f32 %v2855_v54, %v24960_v61  ;;  %v24973_v61 = vld [vmem:[#allocation82_spill] sm:$0xff] }
 0x655   : > { %19318 = vrcp.f32 %v1876_v63  ;;  %v2856_v63 = vmul.f32 %v2824_v10, %v24961_v13  ;;  %v2867_v10 = vmul.f32 %v2835_v7, %v24972_v9  ;;  %v2868_v54 = vmul.f32 %v2836_v45, %v24973_v61  ;;  %v24989_v7 = vld [vmem:[#allocation94_spill] sm:$0xff] }
 0x656   : > { %2919 = vst.msk [vmem:[#allocation2 + $0x18] sm:$0xff] %vm1236_vm0, %v2887_v47  ;;  %v2839_v47 = vmul.f32 %v21474_v33, %v21368_v29  ;;  %v2841_v29 = vmul.f32 %v21474_v33, %v21386_v51 }
 0x657   : > { %v2888_v27 = vadd.f32 %v2856_v63, %v24961_v13  ;;  %v2900_v63 = vadd.f32 %v2868_v54, %v24973_v61  ;;  %v24991_v61 = vld [vmem:[#allocation108_spill] sm:$0xff] }
 0x658   : > { %v2852_v54 = vmul.f32 %v21474_v33, %v24991_v61 }
 0x659   : > { %2920 = vst.msk [vmem:[#allocation2 + $0x20] sm:$0xff] %vm1236_vm0, %v2888_v27  ;;  %2932 = vst.msk [vmem:[#allocation2 + $0x80] sm:$0xff] %vm1236_vm0, %v2900_v63  ;;  %v2840_v27 = vmul.f32 %v21474_v33, %v21379_v25  ;;  %v2842_v25 = vmul.f32 %v21474_v33, %v21392_v8 }
 0x65e   : > { %v19317_v11 = vpop.eup %19316 }
 0x65f   : > { %v1965_v4 = vmul.f32 %v19317_v11, %v19313_v19  ;;  %v19319_v52 = vpop.eup %19318  ;;  %v18073_v19 = vpack.c.bf16 %v2104_v39, %v2103_v23  ;;  %v2828_v11 = vmul.f32 %v21474_v33, %v21309_v49  ;;  %v2830_v49 = vmul.f32 %v21474_v33, %v21317_v46  ;;  %v24970_v23 = vld [vmem:[#allocation79_spill] sm:$0xff] }
 0x661   : > { %v1966_v43 = vadd.f32 %v19319_v52, %v1965_v4  ;;  %18074 = vmatpush3.bf16.msra.mxu1 %v18073_v19  ;;  %v2857_v4 = vmul.f32 %v2825_v1, %v24962_v55  ;;  %v24963_v52 = vld [vmem:[#allocation72_spill] sm:$0xff]  ;;  %v24974_v1 = vld [vmem:[#allocation83_spill] sm:$0xff] }
 0x663   : > { %v1970_v37 = vrot.slane %v1966_v43, %v1969_v15  ;;  %v2858_v43 = vmul.f32 %v2826_v28, %v24963_v52  ;;  %v24964_v15 = vld [vmem:[#allocation73_spill] sm:$0xff]  ;;  %v2869_v28 = vmul.f32 %v2837_v32, %v24974_v1  ;;  %v24994_v32 = vld [vmem:[#allocation95_spill] sm:$0xff] }
 0x665   : > { %v1974_v35 = vsel %vm1973_vm4, %v1970_v37, 0.0  ;;  %v2859_v37 = vmul.f32 %v2827_v62, %v24964_v15  ;;  %v2890_v20 = vadd.f32 %v2858_v43, %v24963_v52  ;;  %v24975_v62 = vld [vmem:[#allocation84_spill] sm:$0xff]  ;;  %v24977_v52 = vld [vmem:[#allocation86_spill] sm:$0xff] }
 0x666   : > { %v1976_v42 = vsel %vm1975_vm5, %v1974_v35, 0.0  ;;  %v24965_v35 = vld [vmem:[#allocation74_spill] sm:$0xff]  ;;  %v2872_v43 = vmul.f32 %v2840_v27, %v24977_v52 }
 0x667   : > { %1977 = vadd.xlane.f32.xlu1 %v1976_v42  ;;  %v2860_v42 = vmul.f32 %v2828_v11, %v24965_v35  ;;  %v2891_v26 = vadd.f32 %v2859_v37, %v24964_v15  ;;  %2922 = vst.msk [vmem:[#allocation2 + $0x30] sm:$0xff] %vm1236_vm0, %v2890_v20  ;;  %v2870_v11 = vmul.f32 %v2838_v6, %v24975_v62 }
 0x668   : > { %v2901_v15 = vadd.f32 %v2869_v28, %v24974_v1  ;;  %v2904_v37 = vadd.f32 %v2872_v43, %v24977_v52  ;;  %v24996_v1 = vld [vmem:[#allocation97_spill] sm:$0xff] }
 0x669   : > { %2923 = vst.msk [vmem:[#allocation2 + $0x38] sm:$0xff] %vm1236_vm0, %v2891_v26  ;;  %v2902_v34 = vadd.f32 %v2870_v11, %v24975_v62  ;;  %v24979_v26 = vld [vmem:[#allocation88_spill] sm:$0xff]  ;;  %v24997_v62 = vld [vmem:[#allocation98_spill] sm:$0xff] }
 0x66a   : > { %2933 = vst.msk [vmem:[#allocation2 + $0x88] sm:$0xff] %vm1236_vm0, %v2901_v15  ;;  %2936 = vst.msk [vmem:[#allocation2 + $0xa0] sm:$0xff] %vm1236_vm0, %v2904_v37  ;;  %v2884_v11 = vmul.f32 %v2852_v54, %v24997_v62 }
 0x66b   : > { %2934 = vst.msk [vmem:[#allocation2 + $0x90] sm:$0xff] %vm1236_vm0, %v2902_v34 }
 0x66c   : > { %v2916_v43 = vadd.f32 %v2884_v11, %v24997_v62 }
 0x66e   : > { %2948 = vst.msk [vmem:[#allocation2 + $0x100] sm:$0xff] %vm1236_vm0, %v2916_v43 }
 0x6f4   : > { %v1978_v2 = vpop.xlane.xlu1 %1977 }
 0x6f5   : > { %v1983_v58 = vmul.f32 %v1982_v38, %v1978_v2  ;;  %v2889_v38 = vadd.f32 %v2857_v4, %v24962_v55  ;;  %v2892_v2 = vadd.f32 %v2860_v42, %v24965_v35  ;;  %v24976_v55 = vld [vmem:[#allocation85_spill] sm:$0xff]  ;;  %v2843_v35 = vmul.f32 %v21474_v33, %v21394_v41 }
 0x6f6   : > { %v2871_v4 = vmul.f32 %v2839_v47, %v24976_v55  ;;  %v2844_v42 = vmul.f32 %v21474_v33, %v21400_v44  ;;  %v24982_v41 = vld [vmem:[#allocation101_spill] sm:$0xff]  ;;  %v24995_v47 = vld [vmem:[#allocation96_spill] sm:$0xff] }
 0x6f7   : > { %v1985_v31 = vsel %vm1984_vm6, %v1983_v58, -inf  ;;  %2921 = vst.msk [vmem:[#allocation2 + $0x28] sm:$0xff] %vm1236_vm0, %v2889_v38  ;;  %2924 = vst.msk [vmem:[#allocation2 + $0x40] sm:$0xff] %vm1236_vm0, %v2892_v2  ;;  %v24978_v38 = vld [vmem:[#allocation87_spill] sm:$0xff]  ;;  %v2874_v2 = vmul.f32 %v2842_v25, %v24979_v26  ;;  %v2845_v44 = vmul.f32 %v21474_v33, %v24982_v41 }
 0x6f8   : > { %1986 = vmax.xlane.f32.xlu1 %v1985_v31  ;;  %v2832_v31 = vmul.f32 %v21474_v33, %v21328_v36  ;;  %v2834_v36 = vmul.f32 %v21474_v33, %v21345_v0  ;;  %v2899_v0 = vadd.f32 %v2867_v10, %v24972_v9  ;;  %v2903_v50 = vadd.f32 %v2871_v4, %v24976_v55  ;;  %v24990_v9 = vld [vmem:[#allocation107_spill] sm:$0xff] }
 0x6f9   : > { %v2873_v20 = vmul.f32 %v2841_v29, %v24978_v38  ;;  %v2906_v51 = vadd.f32 %v2874_v2, %v24979_v26  ;;  %v2851_v10 = vmul.f32 %v21474_v33, %v24990_v9 }
 0x6fa   : > { %v2864_v5 = vmul.f32 %v2832_v31, %v24969_v53  ;;  %v2866_v19 = vmul.f32 %v2834_v36, %v24971_v14  ;;  %2931 = vst.msk [vmem:[#allocation2 + $0x78] sm:$0xff] %vm1236_vm0, %v2899_v0  ;;  %2935 = vst.msk [vmem:[#allocation2 + $0x98] sm:$0xff] %vm1236_vm0, %v2903_v50  ;;  %v24993_v0 = vld [vmem:[#allocation106_spill] sm:$0xff] }
 0x6fb   : > { %2938 = vst.msk [vmem:[#allocation2 + $0xb0] sm:$0xff] %vm1236_vm0, %v2906_v51  ;;  %v2850_v63 = vmul.f32 %v21474_v33, %v24993_v0  ;;  %v2883_v28 = vmul.f32 %v2851_v10, %v24996_v1  ;;  %v3051_v0 = vld [vmem:[#allocation2 + $0x88] sm:$0xff] }
 0x6fc   : > { %v2896_v18 = vadd.f32 %v2864_v5, %v24969_v53  ;;  %v24985_v53 = vld [vmem:[#allocation104_spill] sm:$0xff] }
 0x6fd   : > { %v2848_v5 = vmul.f32 %v21474_v33, %v24985_v53  ;;  %v2882_v27 = vmul.f32 %v2850_v63, %v24995_v47  ;;  %v2915_v52 = vadd.f32 %v2883_v28, %v24996_v1  ;;  %v19190_v53 = vld [vmem:[%s24959_s10] sm:$0xff]   ;;  %v3052_v63 = vld [vmem:[#allocation2 + $0x90] sm:$0xff] }
 0x6fe   : > { %2928 = vst.msk [vmem:[#allocation2 + $0x60] sm:$0xff] %vm1236_vm0, %v2896_v18 }
 0x6ff   : > { %v2880_v45 = vmul.f32 %v2848_v5, %v24989_v7  ;;  %v2914_v4 = vadd.f32 %v2882_v27, %v24995_v47  ;;  %2947 = vst.msk [vmem:[#allocation2 + $0xf8] sm:$0xff] %vm1236_vm0, %v2915_v52  ;;  %v3039_v5 = vld [vmem:[#allocation2 + $0x28] sm:$0xff]  ;;  %v3054_v27 = vld [vmem:[#allocation2 + $0xa0] sm:$0xff] }
 0x701   : > { %2946 = vst.msk [vmem:[#allocation2 + $0xf0] sm:$0xff] %vm1236_vm0, %v2914_v4  ;;  %v3053_v47 = vld [vmem:[#allocation2 + $0x98] sm:$0xff] }
 0x702   : > { %v3056_v28 = vld [vmem:[#allocation2 + $0xb0] sm:$0xff]  ;;  %v21726_v62 = vpack.c.bf16 %v3054_v27, %v3053_v47 }
 0x703   : > { %v2968_v47 = vld [vmem:[#allocation2 + $0x8f] sm:$0xff] }
 0x785   : > { %v1987_v56 = vpop.xlane.xlu1 %1986 }
 0x786   : > { %v1988_v24 = vsub.f32 %v1983_v58, %v1987_v56  ;;  %v2831_v58 = vmul.f32 %v21474_v33, %v21322_v59  ;;  %v24966_v56 = vld [vmem:[#allocation75_spill] sm:$0xff]  ;;  %v2833_v59 = vmul.f32 %v21474_v33, %v21339_v16  ;;  %v2898_v16 = vadd.f32 %v2866_v19, %v24971_v14 }
 0x787   : > { %v2912_v19 = vadd.f32 %v2880_v45, %v24989_v7  ;;  %v21699_v45 = vld [vmem:[%s24959_s10 + $0x20] sm:$0xff]  }
 0x788   : > { %v1989_v30 = vmul.f32 1.442695, %v1988_v24  ;;  %v2861_v24 = vmul.f32 %v2829_v22, %v24966_v56  ;;  %v2863_v48 = vmul.f32 %v2831_v58, %v24968_v17  ;;  %v2865_v39 = vmul.f32 %v2833_v59, %v24970_v23  ;;  %2930 = vst.msk [vmem:[#allocation2 + $0x70] sm:$0xff] %vm1236_vm0, %v2898_v16  ;;  %v24980_v22 = vld [vmem:[#allocation89_spill] sm:$0xff]  ;;  %v24981_v58 = vld [vmem:[#allocation90_spill] sm:$0xff] }
 0x789   : > { %v2876_v31 = vmul.f32 %v2844_v42, %v24981_v58  ;;  %v24988_v59 = vld [vmem:[#allocation93_spill] sm:$0xff]  ;;  %2944 = vst.msk [vmem:[#allocation2 + $0xe0] sm:$0xff] %vm1236_vm0, %v2912_v19  ;;  %v3046_v19 = vld [vmem:[#allocation2 + $0x60] sm:$0xff] }
 0x78a   : > { %19320 = vpow2.f32 %v1989_v30  ;;  %v24967_v30 = vld [vmem:[#allocation76_spill] sm:$0xff]  ;;  %v2893_v21 = vadd.f32 %v2861_v24, %v24966_v56  ;;  %v2895_v46 = vadd.f32 %v2863_v48, %v24968_v17  ;;  %v2897_v13 = vadd.f32 %v2865_v39, %v24970_v23  ;;  %v24984_v17 = vld [vmem:[#allocation103_spill] sm:$0xff] }
 0x78b   : > { %v2905_v56 = vadd.f32 %v2873_v20, %v24978_v38  ;;  %v2908_v24 = vadd.f32 %v2876_v31, %v24981_v58  ;;  %v2847_v48 = vmul.f32 %v21474_v33, %v24984_v17  ;;  %v3037_v17 = vld [vmem:[#allocation2 + $0x18] sm:$0xff] }
 0x78c   : > { %2925 = vst.msk [vmem:[#allocation2 + $0x48] sm:$0xff] %vm1236_vm0, %v2893_v21  ;;  %2927 = vst.msk [vmem:[#allocation2 + $0x58] sm:$0xff] %vm1236_vm0, %v2895_v46  ;;  %v24986_v21 = vld [vmem:[#allocation91_spill] sm:$0xff]  ;;  %v24987_v46 = vld [vmem:[#allocation92_spill] sm:$0xff] }
 0x78d   : > { %2929 = vst.msk [vmem:[#allocation2 + $0x68] sm:$0xff] %vm1236_vm0, %v2897_v13  ;;  %2937 = vst.msk [vmem:[#allocation2 + $0xa8] sm:$0xff] %vm1236_vm0, %v2905_v56  ;;  %v2879_v36 = vmul.f32 %v2847_v48, %v24988_v59  ;;  %v24992_v13 = vld [vmem:[#allocation105_spill] sm:$0xff]  ;;  %v3038_v48 = vld [vmem:[#allocation2 + $0x20] sm:$0xff] }
 0x78e   : > { %2940 = vst.msk [vmem:[#allocation2 + $0xc0] sm:$0xff] %vm1236_vm0, %v2908_v24  ;;  %v2849_v16 = vmul.f32 %v21474_v33, %v24992_v13  ;;  %v3036_v24 = vld [vmem:[#allocation2 + $0x10] sm:$0xff]  ;;  %v3049_v13 = vld [vmem:[#allocation2 + $0x78] sm:$0xff] }
 0x78f   : > { %v2911_v14 = vadd.f32 %v2879_v36, %v24988_v59  ;;  %v3042_v59 = vld [vmem:[#allocation2 + $0x40] sm:$0xff]  ;;  %v3048_v10 = vld [vmem:[#allocation2 + $0x70] sm:$0xff] }
 0x790   : > { %v2881_v6 = vmul.f32 %v2849_v16, %v24994_v32  ;;  %v3050_v16 = vld [vmem:[#allocation2 + $0x80] sm:$0xff] }
 0x791   : > { %2943 = vst.msk [vmem:[#allocation2 + $0xd8] sm:$0xff] %vm1236_vm0, %v2911_v14 }
 0x792   : > { %v2913_v55 = vadd.f32 %v2881_v6, %v24994_v32  ;;  %v21718_v32 = vpack.c.bf16 %v3050_v16, %v3049_v13  ;;  %v21720_v6 = vpack.c.bf16 %v3052_v63, %v3051_v0  ;;  %v2965_v13 = vld [vmem:[#allocation2 + $0x77] sm:$0xff]  ;;  %v2967_v16 = vld [vmem:[#allocation2 + $0x87] sm:$0xff]  ;;  %v2966_v0 = vld [vmem:[#allocation2 + $0x7f] sm:$0xff] }
 0x793   : > { %v3043_v36 = vld [vmem:[#allocation2 + $0x48] sm:$0xff]  ;;  %v3045_v14 = vld [vmem:[#allocation2 + $0x58] sm:$0xff]  ;;  %v2997_v63 = vsel %vm1232_vm7, %v2965_v13, 0.0  ;;  %v2999_v27 = vsel %vm1232_vm7, %v2967_v16, 0.0 }
 0x794   : > { %v21512_v57 = vpop.eup %19320  ;;  %2945 = vst.msk [vmem:[#allocation2 + $0xe8] sm:$0xff] %vm1236_vm0, %v2913_v55  ;;  %v3047_v9 = vld [vmem:[#allocation2 + $0x68] sm:$0xff]  ;;  %v21710_v61 = vpack.c.bf16 %v3046_v19, %v3045_v14  ;;  %v3534_v16 = vld [vmem:[#allocation2 + $0x31] sm:$0xff] }
 0x795   : > { %v1991_v40 = vsel %vm1984_vm6, %v21512_v57, 0.0  ;;  %v21712_v54 = vpack.c.bf16 %v3048_v10, %v3047_v9  ;;  %v3055_v1 = vld [vmem:[#allocation2 + $0xa8] sm:$0xff]  ;;  %v3058_v4 = vld [vmem:[#allocation2 + $0xc0] sm:$0xff] }
 0x796   : > { %1992 = vadd.xlane.f32.xlu0 %v1991_v40  ;;  %v2862_v40 = vmul.f32 %v2830_v49, %v24967_v30  ;;  %v2875_v49 = vmul.f32 %v2843_v35, %v24980_v22  ;;  %v21728_v11 = vpack.c.bf16 %v3056_v28, %v3055_v1  ;;  %v2964_v14 = vld [vmem:[#allocation2 + $0x6f] sm:$0xff]  ;;  %v21804_v1 = vpack.c.bf16 %v2966_v0, %v2997_v63  ;;  %v3532_v13 = vld [vmem:[#allocation2 + $0x21] sm:$0xff]  ;;  %v3531_v0 = vld [vmem:[#allocation2 + $0x19] sm:$0xff] }
 0x797   : > { %v21806_v28 = vpack.c.bf16 %v2968_v47, %v2999_v27  ;;  %v3533_v47 = vld [vmem:[#allocation2 + $0x29] sm:$0xff] }
 0x798   : > { %v2894_v60 = vadd.f32 %v2862_v40, %v24967_v30  ;;  %v2907_v8 = vadd.f32 %v2875_v49, %v24980_v22  ;;  %v24983_v30 = vld [vmem:[#allocation102_spill] sm:$0xff] }
 0x799   : > { %v2846_v40 = vmul.f32 %v21474_v33, %v24983_v30 }
 0x79a   : > { %2926 = vst.msk [vmem:[#allocation2 + $0x50] sm:$0xff] %vm1236_vm0, %v2894_v60  ;;  %2939 = vst.msk [vmem:[#allocation2 + $0xb8] sm:$0xff] %vm1236_vm0, %v2907_v8  ;;  %v2877_v60 = vmul.f32 %v2845_v44, %v24986_v21  ;;  %v3035_v8 = vld [vmem:[#allocation2 + $0x8] sm:$0xff] }
 0x79b   : > { %v2878_v18 = vmul.f32 %v2846_v40, %v24987_v46  ;;  %v3067_v44 = vpack.c.bf16 %v3036_v24, %v3035_v8  ;;  %v19189_v40 = vld [vmem:[%s24959_s10 + $0x18] sm:$0xff]  }
 0x79c   : > { %v2909_v23 = vadd.f32 %v2877_v60, %v24986_v21  ;;  %v3040_v21 = vld [vmem:[#allocation2 + $0x30] sm:$0xff]  ;;  %v21689_v60 = vpack.c.bf16 %v3038_v48, %v3037_v17  ;;  %v2958_v17 = vld [vmem:[#allocation2 + $0x3f] sm:$0xff] }
 0x79d   : > { %v2910_v39 = vadd.f32 %v2878_v18, %v24987_v46  ;;  %v21691_v46 = vpack.c.bf16 %v3040_v21, %v3039_v5  ;;  %v19191_v18 = vld [vmem:[%s24959_s10 + $0x8] sm:$0xff]   ;;  %v21777_v21 = vld [vmem:[%s24959_s10 + $0x30] sm:$0xff]  }
 0x79e   : > { %2941 = vst.msk [vmem:[#allocation2 + $0xc8] sm:$0xff] %vm1236_vm0, %v2909_v23 }
 0x79f   : > { %2942 = vst.msk [vmem:[#allocation2 + $0xd0] sm:$0xff] %vm1236_vm0, %v2910_v39 }
 0x7a1   : > { %v3044_v7 = vld [vmem:[#allocation2 + $0x50] sm:$0xff]  ;;  %v3057_v55 = vld [vmem:[#allocation2 + $0xb8] sm:$0xff] }
 0x7a2   : > { %v21703_v39 = vpack.c.bf16 %v3044_v7, %v3043_v36  ;;  %v2963_v36 = vld [vmem:[#allocation2 + $0x67] sm:$0xff]  ;;  %v2962_v7 = vld [vmem:[#allocation2 + $0x5f] sm:$0xff] }
 0x7a3   : > { %v2995_v19 = vsel %vm1232_vm7, %v2963_v36, 0.0 }
 0x7a4   : > { %v21794_v10 = vpack.c.bf16 %v2964_v14, %v2995_v19 }
 0x7a5   : > { %v3059_v52 = vld [vmem:[#allocation2 + $0xc8] sm:$0xff] }
 0x7a6   : > { %v3060_v43 = vld [vmem:[#allocation2 + $0xd0] sm:$0xff] }
 0x823   : > { %v1993_v33 = vpop.xlane.xlu0 %1992 }
 0x824   : > { %19322 = vrcp.f32 %v1993_v33  ;;  %v21734_v33 = vpack.c.bf16 %v3058_v4, %v3057_v55  ;;  %v2969_v55 = vld [vmem:[#allocation2 + $0x97] sm:$0xff]  ;;  %v2971_v4 = vld [vmem:[#allocation2 + $0xa7] sm:$0xff] }
 0x82e   : > { %v19323_v15 = vpop.eup %19322 }
 0x82f   : > { %v1995_v34 = vmul.f32 %v19323_v15, %v21512_v57  ;;  %v21736_v15 = vpack.c.bf16 %v3060_v43, %v3059_v52  ;;  %v2970_v52 = vld [vmem:[#allocation2 + $0x9f] sm:$0xff]  ;;  %v3001_v43 = vsel %vm1232_vm7, %v2969_v55, 0.0 }
 0x831   : > { %v1996_v50 = vsel %vm1984_vm6, %v1995_v34, -inf }
 0x832   : > { %v1997_v37 = vrot.slane %v1996_v50, 4 }
 0x834   : > { %v1998_v29 = vmax.f32 %v1996_v50, %v1997_v37  ;;  %v3062_v50 = vld [vmem:[#allocation2 + $0xe0] sm:$0xff]  ;;  %v3063_v37 = vld [vmem:[#allocation2 + $0xe8] sm:$0xff] }
 0x836   : > { %v1999_v25 = vrot.slane %v1998_v29, 2 }
 0x838   : > { %v2000_v35 = vmax.f32 %v1998_v29, %v1999_v25  ;;  %v3064_v29 = vld [vmem:[#allocation2 + $0xf0] sm:$0xff] }
 0x83a   : > { %v2001_v42 = vrot.slane %v2000_v35, 1 }
 0x83c   : > { %v2002_v38 = vmax.f32 %v2000_v35, %v2001_v42  ;;  %v21744_v35 = vpack.c.bf16 %v3064_v29, %v3063_v37  ;;  %v2951_v42 = vld [vmem:[#allocation2 + $0x7] sm:$0xff]  ;;  %v21816_v37 = vpack.c.bf16 %v2970_v52, %v3001_v43  ;;  %v19195_v43 = vld [vmem:[%s24959_s10 + $0x38] sm:$0xff]  }
 0x83d   : > { %v3536_v52 = vld [vmem:[#allocation2 + $0x41] sm:$0xff] }
 0x83e   : > { %v2003_v20 = vsub.f32 %v1995_v34, %v2002_v38  ;;  %v3061_v34 = vld [vmem:[#allocation2 + $0xd8] sm:$0xff] }
 0x83f   : > { %v21742_v25 = vpack.c.bf16 %v3062_v50, %v3061_v34  ;;  %v3065_v38 = vld [vmem:[#allocation2 + $0xf8] sm:$0xff]  ;;  %v2972_v34 = vld [vmem:[#allocation2 + $0xaf] sm:$0xff]  ;;  %v3003_v50 = vsel %vm1232_vm7, %v2971_v4, 0.0 }
 0x840   : > { %v2004_v26 = vmul.f32 1.442695, %v2003_v20  ;;  %v3066_v20 = vld [vmem:[#allocation2 + $0x100] sm:$0xff]  ;;  %v21818_v29 = vpack.c.bf16 %v2972_v34, %v3003_v50  ;;  %v3538_v34 = vld [vmem:[#allocation2 + $0x51] sm:$0xff] }
 0x841   : > { %v3535_v50 = vld [vmem:[#allocation2 + $0x39] sm:$0xff] }
 0x842   : > { %19324 = vpow2.f32 %v2004_v26  ;;  %v2952_v26 = vld [vmem:[#allocation2 + $0xf] sm:$0xff] }
 0x84c   : > { %v19325_v2 = vpop.eup %19324 }
 0x84d   : > { %v2006_v22 = vsel %vm1984_vm6, %v19325_v2, 0.0 }
 0x84e   : > { %v2007_v49 = vrot.slane %v2006_v22, 4 }
 0x850   : > { %v2008_v58 = vadd.f32 %v2007_v49, %v2006_v22  ;;  %v21753_v22 = vpack.c.bf16 %v3066_v20, %v3065_v38  ;;  %v2975_v38 = vld [vmem:[#allocation2 + $0xc7] sm:$0xff]  ;;  %v2974_v20 = vld [vmem:[#allocation2 + $0xbf] sm:$0xff] }
 0x852   : > { %v2009_v31 = vrot.slane %v2008_v58, 2 }
 0x854   : > { %v2010_v56 = vadd.f32 %v2009_v31, %v2008_v58  ;;  %v2953_v58 = vld [vmem:[#allocation2 + $0x17] sm:$0xff]  ;;  %v2955_v31 = vld [vmem:[#allocation2 + $0x27] sm:$0xff] }
 0x855   : > { %v2987_v8 = vsel %vm1232_vm7, %v2955_v31, 0.0 }
 0x856   : > { %v2011_v57 = vrot.slane %v2010_v56, 1 }
 0x858   : > { %v2012_v51 = vadd.f32 %v2011_v57, %v2010_v56  ;;  %v2954_v56 = vld [vmem:[#allocation2 + $0x1f] sm:$0xff]  ;;  %v2985_v57 = vsel %vm1232_vm7, %v2953_v58, 0.0 }
 0x859   : > { %v21762_v24 = vpack.c.bf16 %v2954_v56, %v2985_v57  ;;  %v2977_v56 = vld [vmem:[#allocation2 + $0xd7] sm:$0xff]  ;;  %v2979_v57 = vld [vmem:[#allocation2 + $0xe7] sm:$0xff] }
 0x85a   : > { %19326 = vrcp.f32 %v2012_v51  ;;  %v2956_v51 = vld [vmem:[#allocation2 + $0x2f] sm:$0xff] }
 0x864   : > { %v19327_v41 = vpop.eup %19326 }
 0x865   : > { %v2014_v30 = vmul.f32 %v19327_v41, %v19325_v2  ;;  %v2983_v2 = vsel %vm1232_vm7, %v2951_v42, 0.0  ;;  %v21764_v41 = vpack.c.bf16 %v2956_v51, %v2987_v8  ;;  %v2973_v42 = vld [vmem:[#allocation2 + $0xb7] sm:$0xff]  ;;  %v2978_v51 = vld [vmem:[#allocation2 + $0xdf] sm:$0xff]  ;;  %v3009_v8 = vsel %vm1232_vm7, %v2977_v56, 0.0 }
 0x866   : > { %v3015_v49 = vpack.c.bf16 %v2952_v26, %v2983_v2  ;;  %v3005_v26 = vsel %vm1232_vm7, %v2973_v42, 0.0  ;;  %v2976_v2 = vld [vmem:[#allocation2 + $0xcf] sm:$0xff] }
 0x867   : > { %16650 = vmatmul.mubr.msk.f32.vlgmr.msra.gmra.mrb[4].mxu0 %vm1236_vm0, %v2014_v30  ;;  %16661 = vmatmul.mubr.msk.f32.vlgmr.msra.gmra.mrb[6].mxu1 %vm1236_vm0, %v2014_v30  ;;  %v19193_v30 = vld [vmem:[%s24959_s10 + $0x28] sm:$0xff]   ;;  %v21828_v58 = vpack.c.bf16 %v2974_v20, %v3005_v26  ;;  %v21880_v26 = vld [vmem:[%s24959_s10 + $0x40] sm:$0xff]   ;;  %v3542_v56 = vld [vmem:[#allocation2 + $0x71] sm:$0xff] }
 0x868   : > { %16664 = vmatpush3.bf16.msra.mxu0 %v21526_v3  ;;  %16667 = vmatprep.mubr.msk.bf16.mxu0 %vm1236_vm0, %v3067_v44  ;;  %v3041_v3 = vld [vmem:[#allocation2 + $0x38] sm:$0xff] }
 0x869   : > { %16665 = vmatprep.subr.bf16.mxu0 %v19189_v40  ;;  %v21701_v23 = vpack.c.bf16 %v3042_v59, %v3041_v3  ;;  %v2957_v44 = vld [vmem:[#allocation2 + $0x37] sm:$0xff] }
 0x86a   : > { %v2989_v48 = vsel %vm1232_vm7, %v2957_v44, 0.0  ;;  %v2961_v59 = vld [vmem:[#allocation2 + $0x57] sm:$0xff]  ;;  %v2980_v44 = vld [vmem:[#allocation2 + $0xef] sm:$0xff] }
 0x86c   : > { %16666 = vmatpush3.bf16.msra.mxu0 %v19189_v40  ;;  %v2959_v40 = vld [vmem:[#allocation2 + $0x47] sm:$0xff] }
 0x86d   : > { %16699 = vmatprep.subr.bf16.mxu0 %v19190_v53  ;;  %v2991_v5 = vsel %vm1232_vm7, %v2959_v40, 0.0  ;;  %v21841_v40 = vadd.s32 8, %v21506_v12 }
 0x86f   : > { %16668 = vmatmul.mubr.msk.bf16.vlgmr.msra.gmra.mrb[8].mxu0 %vm1236_vm0, %v21689_v60  ;;  %24998 = vst [vmem:[#allocation100_spill] sm:$0xff] %v21841_v40  ;;  %vm1235_vm8 = vcmp.le.s32.totalorder %v21841_v40, 14 }
 0x870   : > { %16700 = vmatpush3.bf16.msra.mxu0 %v19190_v53  ;;  %16671 = vmatprep.mubr.msk.bf16.mxu0 %vm1236_vm0, %v21691_v46  ;;  %v2960_v53 = vld [vmem:[#allocation2 + $0x4f] sm:$0xff]  ;;  %v3564_v63 = vsel %vm1235_vm8, %v3532_v13, 0.0  ;;  %v3566_v27 = vsel %vm1235_vm8, %v3534_v16, 0.0  ;;  %v3568_v42 = vsel %vm1235_vm8, %v3536_v52, 0.0  ;;  %v3570_v20 = vsel %vm1235_vm8, %v3538_v34, 0.0 }
 0x871   : > { %16701 = vmatprep.subr.bf16.mxu0 %v19191_v18  ;;  %v21781_v3 = vpack.c.bf16 %v2960_v53, %v2991_v5  ;;  %v2981_v53 = vld [vmem:[#allocation2 + $0xf7] sm:$0xff]  ;;  %v21865_v55 = vpack.c.bf16 %v3564_v63, %v3531_v0  ;;  %v21867_v4 = vpack.c.bf16 %v3566_v27, %v3533_v47  ;;  %v3548_v0 = vld [vmem:[#allocation2 + $0xa1] sm:$0xff]  ;;  %v3549_v52 = vld [vmem:[#allocation2 + $0xa9] sm:$0xff] }
 0x872   : > { %v3530_v5 = vld [vmem:[#allocation2 + $0x11] sm:$0xff]  ;;  %v3013_v36 = vsel %vm1232_vm7, %v2981_v53, 0.0  ;;  %v3547_v47 = vld [vmem:[#allocation2 + $0x99] sm:$0xff]  ;;  %v3580_v27 = vsel %vm1235_vm8, %v3548_v0, 0.0 }
 0x873   : > { %v3550_v63 = vld [vmem:[#allocation2 + $0xb1] sm:$0xff]  ;;  %v21919_v34 = vpack.c.bf16 %v3580_v27, %v3547_v47  ;;  %v3559_v47 = vld [vmem:[#allocation2 + $0xf9] sm:$0xff] }
 0x874   : > { %16702 = vmatpush3.bf16.msra.mxu0 %v19191_v18  ;;  %v21779_v18 = vpack.c.bf16 %v2958_v17, %v2989_v48  ;;  %v21843_v17 = vpack.c.bf16 %v2978_v51, %v3009_v8  ;;  %v3541_v8 = vld [vmem:[#allocation2 + $0x69] sm:$0xff] }
 0x875   : > { %16735 = vmatprep.subr.bf16.mxu0 %v21699_v45 }
 0x877   : > { %16672 = vmatmul.mubr.msk.bf16.gmra.mrb[12].mxu0 %vm1236_vm0, %v21701_v23 }
 0x878   : > { %16675 = vmatprep.mubr.msk.bf16.mxu0 %vm1236_vm0, %v21703_v39 }
 0x87f   : > { %16676 = vmatmul.mubr.msk.bf16.gmra.mrb[16].mxu0 %vm1236_vm0, %v21710_v61 }
 0x880   : > { %16679 = vmatprep.mubr.msk.bf16.mxu0 %vm1236_vm0, %v21712_v54 }
 0x887   : > { %16680 = vmatmul.mubr.msk.bf16.gmra.mrb[20].mxu0 %vm1236_vm0, %v21718_v32 }
 0x888   : > { %16683 = vmatprep.mubr.msk.bf16.mxu0 %vm1236_vm0, %v21720_v6 }
 0x88f   : > { %16684 = vmatmul.mubr.msk.bf16.gmra.mrb[24].mxu0 %vm1236_vm0, %v21726_v62 }
 0x890   : > { %16687 = vmatprep.mubr.msk.bf16.mxu0 %vm1236_vm0, %v21728_v11 }
 0x897   : > { %16688 = vmatmul.mubr.msk.bf16.gmra.mrb[28].mxu0 %vm1236_vm0, %v21734_v33 }
 0x898   : > { %16691 = vmatprep.mubr.msk.bf16.mxu0 %vm1236_vm0, %v21736_v15 }
 0x89f   : > { %16692 = vmatmul.mubr.msk.bf16.gmra.mrb[32].mxu0 %vm1236_vm0, %v21742_v25 }
 0x8a0   : > { %16695 = vmatprep.mubr.msk.bf16.mxu0 %vm1236_vm0, %v21744_v35 }
 0x8a7   : > { %16696 = vmatmul.mubr.msk.bf16.gmra.mrb[36].mxu0 %vm1236_vm0, %v21753_v22 }
 0x8a8   : > { %16703 = vmatprep.mubr.msk.bf16.mxu0 %vm1236_vm0, %v3015_v49  ;;  %v3007_v49 = vsel %vm1232_vm7, %v2975_v38, 0.0  ;;  %v3537_v38 = vld [vmem:[#allocation2 + $0x49] sm:$0xff] }
 0x8a9   : > { %v21830_v31 = vpack.c.bf16 %v2976_v2, %v3007_v49  ;;  %v21882_v2 = vpack.c.bf16 %v3568_v42, %v3535_v50  ;;  %v21884_v49 = vpack.c.bf16 %v3570_v20, %v3537_v38  ;;  %v3552_v42 = vld [vmem:[#allocation2 + $0xc1] sm:$0xff]  ;;  %v3554_v38 = vld [vmem:[#allocation2 + $0xd1] sm:$0xff]  ;;  %v3551_v20 = vld [vmem:[#allocation2 + $0xb9] sm:$0xff] }
 0x8af   : > { %16704 = vmatmul.mubr.msk.bf16.vlgmr.msra.gmra.mrb[8].mxu0 %vm1236_vm0, %v21762_v24 }
 0x8b0   : > { %16736 = vmatpush3.bf16.msra.mxu0 %v21699_v45  ;;  %16707 = vmatprep.mubr.msk.bf16.mxu0 %vm1236_vm0, %v21764_v41  ;;  %v2993_v45 = vsel %vm1232_vm7, %v2961_v59, 0.0  ;;  %v2982_v59 = vld [vmem:[#allocation2 + $0xff] sm:$0xff] }
 0x8b1   : > { %16737 = vmatprep.subr.bf16.mxu0 %v19193_v30  ;;  %v21792_v9 = vpack.c.bf16 %v2962_v7, %v2993_v45  ;;  %v3529_v7 = vld [vmem:[#allocation2 + $0x9] sm:$0xff]  ;;  %v3562_v45 = vsel %vm1235_vm8, %v3530_v5, 0.0  ;;  %v21856_v14 = vpack.c.bf16 %v2982_v59, %v3013_v36  ;;  %v3544_v5 = vld [vmem:[#allocation2 + $0x81] sm:$0xff]  ;;  %v3546_v59 = vld [vmem:[#allocation2 + $0x91] sm:$0xff] }
 0x8b2   : > { %v3593_v19 = vpack.c.bf16 %v3562_v45, %v3529_v7  ;;  %v3543_v36 = vld [vmem:[#allocation2 + $0x79] sm:$0xff]  ;;  %v3576_v7 = vsel %vm1235_vm8, %v3544_v5, 0.0  ;;  %v3545_v45 = vld [vmem:[#allocation2 + $0x89] sm:$0xff]  ;;  %v3558_v5 = vld [vmem:[#allocation2 + $0xf1] sm:$0xff] }
 0x8b3   : > { %v21907_v13 = vpack.c.bf16 %v3576_v7, %v3543_v36  ;;  %v3557_v7 = vld [vmem:[#allocation2 + $0xe9] sm:$0xff] }
 0x8b4   : > { %16738 = vmatpush3.bf16.msra.mxu0 %v19193_v30  ;;  %v3011_v30 = vsel %vm1232_vm7, %v2979_v57, 0.0  ;;  %v3539_v57 = vld [vmem:[#allocation2 + $0x59] sm:$0xff] }
 0x8b5   : > { %16771 = vmatprep.subr.bf16.mxu0 %v21777_v21  ;;  %v21845_v48 = vpack.c.bf16 %v2980_v44, %v3011_v30  ;;  %v3574_v44 = vsel %vm1235_vm8, %v3542_v56, 0.0  ;;  %v3553_v56 = vld [vmem:[#allocation2 + $0xc9] sm:$0xff] }
 0x8b6   : > { %v21897_v53 = vpack.c.bf16 %v3574_v44, %v3541_v8  ;;  %v3556_v44 = vld [vmem:[#allocation2 + $0xe1] sm:$0xff] }
 0x8b7   : > { %16708 = vmatmul.mubr.msk.bf16.gmra.mrb[12].mxu0 %vm1236_vm0, %v21779_v18  ;;  %v3588_v36 = vsel %vm1235_vm8, %v3556_v44, 0.0 }
 0x8b8   : > { %16711 = vmatprep.mubr.msk.bf16.mxu0 %vm1236_vm0, %v21781_v3 }
 0x8bf   : > { %16712 = vmatmul.mubr.msk.bf16.gmra.mrb[16].mxu0 %vm1236_vm0, %v21792_v9 }
 0x8c0   : > { %16715 = vmatprep.mubr.msk.bf16.mxu0 %vm1236_vm0, %v21794_v10 }
 0x8c7   : > { %16716 = vmatmul.mubr.msk.bf16.gmra.mrb[20].mxu0 %vm1236_vm0, %v21804_v1 }
 0x8c8   : > { %16719 = vmatprep.mubr.msk.bf16.mxu0 %vm1236_vm0, %v21806_v28 }
 0x8cf   : > { %16720 = vmatmul.mubr.msk.bf16.gmra.mrb[24].mxu0 %vm1236_vm0, %v21816_v37 }
 0x8d0   : > { %16723 = vmatprep.mubr.msk.bf16.mxu0 %vm1236_vm0, %v21818_v29 }
 0x8d7   : > { %16724 = vmatmul.mubr.msk.bf16.gmra.mrb[28].mxu0 %vm1236_vm0, %v21828_v58 }
 0x8d8   : > { %16727 = vmatprep.mubr.msk.bf16.mxu0 %vm1236_vm0, %v21830_v31 }
 0x8df   : > { %16728 = vmatmul.mubr.msk.bf16.gmra.mrb[32].mxu0 %vm1236_vm0, %v21843_v17 }
 0x8e0   : > { %16731 = vmatprep.mubr.msk.bf16.mxu0 %vm1236_vm0, %v21845_v48 }
 0x8e7   : > { %16732 = vmatmul.mubr.msk.bf16.gmra.mrb[36].mxu0 %vm1236_vm0, %v21856_v14 }
 0x8e8   : > { %16739 = vmatprep.mubr.msk.bf16.mxu0 %vm1236_vm0, %v3593_v19  ;;  %v3578_v19 = vsel %vm1235_vm8, %v3546_v59, 0.0  ;;  %v3555_v59 = vld [vmem:[#allocation2 + $0xd9] sm:$0xff] }
 0x8e9   : > { %v21909_v16 = vpack.c.bf16 %v3578_v19, %v3545_v45  ;;  %v3590_v45 = vsel %vm1235_vm8, %v3558_v5, 0.0  ;;  %v21943_v19 = vpack.c.bf16 %v3588_v36, %v3555_v59  ;;  %v19199_v5 = vld [vmem:[%s24959_s10 + $0x58] sm:$0xff]   ;;  %v19200_v59 = vld [vmem:[%s24959_s10 + $0x60] sm:$0xff]  }
 0x8ea   : > { %v21945_v0 = vpack.c.bf16 %v3590_v45, %v3557_v7  ;;  %v5192_v7 = vld [vmem:[#allocation2 + $0x78] sm:$0xff]  ;;  %v5193_v45 = vld [vmem:[#allocation2 + $0x80] sm:$0xff] }
 0x8ef   : > { %16740 = vmatmul.mubr.msk.bf16.vlgmr.msra.gmra.mrb[8].mxu0 %vm1236_vm0, %v21865_v55 }
 0x8f0   : > { %16772 = vmatpush3.bf16.msra.mxu0 %v21777_v21  ;;  %16743 = vmatprep.mubr.msk.bf16.mxu0 %vm1236_vm0, %v21867_v4  ;;  %v3540_v21 = vld [vmem:[#allocation2 + $0x61] sm:$0xff] }
 0x8f1   : > { %16773 = vmatprep.subr.bf16.mxu0 %v19195_v43  ;;  %v3572_v51 = vsel %vm1235_vm8, %v3540_v21, 0.0  ;;  %v3584_v21 = vsel %vm1235_vm8, %v3552_v42, 0.0  ;;  %v19198_v42 = vld [vmem:[%s24959_s10 + $0x50] sm:$0xff]  }
 0x8f2   : > { %v21895_v30 = vpack.c.bf16 %v3572_v51, %v3539_v57  ;;  %v3586_v57 = vsel %vm1235_vm8, %v3554_v38, 0.0  ;;  %v21931_v51 = vpack.c.bf16 %v3584_v21, %v3551_v20 }
 0x8f3   : > { %v21933_v8 = vpack.c.bf16 %v3586_v57, %v3553_v56  ;;  %v3897_v56 = vld [vmem:[#allocation2 + $0x10f] sm:$0xff] }
 0x8f4   : > { %16774 = vmatpush3.bf16.msra.mxu0 %v19195_v43  ;;  %v3582_v43 = vsel %vm1235_vm8, %v3550_v63, 0.0  ;;  %v3560_v63 = vld [vmem:[#allocation2 + $0x101] sm:$0xff] }
 0x8f5   : > { %16807 = vmatprep.subr.bf16.mxu0 %v21880_v26  ;;  %v21921_v50 = vpack.c.bf16 %v3582_v43, %v3549_v52  ;;  %v3592_v27 = vsel %vm1235_vm8, %v3560_v63, 0.0  ;;  %v19197_v43 = vld [vmem:[%s24959_s10 + $0x48] sm:$0xff]  }
 0x8f6   : > { %v21953_v52 = vpack.c.bf16 %v3592_v27, %v3559_v47  ;;  %v5194_v63 = vld [vmem:[#allocation2 + $0x88] sm:$0xff]  ;;  %v5195_v47 = vld [vmem:[#allocation2 + $0x90] sm:$0xff]  ;;  %v5219_v27 = vpack.c.bf16 %v5193_v45, %v5192_v7 }
 0x8f7   : > { %16744 = vmatmul.mubr.msk.bf16.gmra.mrb[12].mxu0 %vm1236_vm0, %v21882_v2 }
 0x8f8   : > { %16747 = vmatprep.mubr.msk.bf16.mxu0 %vm1236_vm0, %v21884_v49 }
 0x8ff   : > { %16748 = vmatmul.mubr.msk.bf16.gmra.mrb[16].mxu0 %vm1236_vm0, %v21895_v30 }
 0x900   : > { %16751 = vmatprep.mubr.msk.bf16.mxu0 %vm1236_vm0, %v21897_v53 }
 0x907   : > { %16752 = vmatmul.mubr.msk.bf16.gmra.mrb[20].mxu0 %vm1236_vm0, %v21907_v13 }
 0x908   : > { %16755 = vmatprep.mubr.msk.bf16.mxu0 %vm1236_vm0, %v21909_v16 }
 0x90f   : > { %16756 = vmatmul.mubr.msk.bf16.gmra.mrb[24].mxu0 %vm1236_vm0, %v21919_v34 }
 0x910   : > { %16759 = vmatprep.mubr.msk.bf16.mxu0 %vm1236_vm0, %v21921_v50 }
 0x917   : > { %16760 = vmatmul.mubr.msk.bf16.gmra.mrb[28].mxu0 %vm1236_vm0, %v21931_v51 }
 0x918   : > { %16763 = vmatprep.mubr.msk.bf16.mxu0 %vm1236_vm0, %v21933_v8 }
 0x91f   : > { %16764 = vmatmul.mubr.msk.bf16.gmra.mrb[32].mxu0 %vm1236_vm0, %v21943_v19 }
 0x920   : > { %16767 = vmatprep.mubr.msk.bf16.mxu0 %vm1236_vm0, %v21945_v0 }
 0x927   : > { %16768 = vmatmul.mubr.msk.bf16.gmra.mrb[36].mxu0 %vm1236_vm0, %v21953_v52 }
 0x928   : > { %16775 = vmatprep.mubr.msk.bf16.mxu0 %vm1236_vm0, %v21762_v24 }
 0x92f   : > { %16776 = vmatmul.mubr.msk.bf16.vlgmr.msra.gmra.mrb[8].mxu0 %vm1236_vm0, %v21764_v41 }
 0x930   : > { %16808 = vmatpush3.bf16.msra.mxu0 %v21880_v26  ;;  %16779 = vmatprep.mubr.msk.bf16.mxu0 %vm1236_vm0, %v21779_v18  ;;  %v3896_v26 = vld [vmem:[#allocation2 + $0x107] sm:$0xff] }
 0x931   : > { %16809 = vmatprep.subr.bf16.mxu0 %v19197_v43  ;;  %v3928_v57 = vsel %vm1232_vm7, %v3896_v26, 0.0  ;;  %v5199_v26 = vld [vmem:[#allocation2 + $0xb0] sm:$0xff] }
 0x932   : > { %v21996_v44 = vpack.c.bf16 %v3897_v56, %v3928_v57 }
 0x934   : > { %16810 = vmatpush3.bf16.msra.mxu0 %v19197_v43  ;;  %v5220_v43 = vpack.c.bf16 %v5195_v47, %v5194_v63 }
 0x935   : > { %16843 = vmatprep.subr.bf16.mxu0 %v19198_v42 }
 0x937   : > { %16780 = vmatmul.mubr.msk.bf16.gmra.mrb[12].mxu0 %vm1236_vm0, %v21781_v3 }
 0x938   : > { %16783 = vmatprep.mubr.msk.bf16.mxu0 %vm1236_vm0, %v21792_v9 }
 0x93a   : > { %v21970_v24 = vpop.f32.mrb[4].mxu0  ;;  %v21972_v38 = vpop.f32.mrb[6].mxu1 }
 0x93b   : > { %v16651_v20 = vpop.f32.mrb[5].mxu0  ;;  %v16662_v21 = vpop.f32.mrb[7].mxu1 }
 0x93c   : > { %v5197_v20 = vld [vmem:[#allocation2 + $0xa0] sm:$0xff]  ;;  %v5198_v21 = vld [vmem:[#allocation2 + $0xa8] sm:$0xff] }
 0x93d   : > { %v5222_v57 = vpack.c.bf16 %v5199_v26, %v5198_v21 }
 0x93f   : > { %16784 = vmatmul.mubr.msk.bf16.gmra.mrb[16].mxu0 %vm1236_vm0, %v21794_v10 }
 0x940   : > { %16787 = vmatprep.mubr.msk.bf16.mxu0 %vm1236_vm0, %v21804_v1 }
 0x947   : > { %16788 = vmatmul.mubr.msk.bf16.gmra.mrb[20].mxu0 %vm1236_vm0, %v21806_v28 }
 0x948   : > { %16791 = vmatprep.mubr.msk.bf16.mxu0 %vm1236_vm0, %v21816_v37 }
 0x94f   : > { %16792 = vmatmul.mubr.msk.bf16.gmra.mrb[24].mxu0 %vm1236_vm0, %v21818_v29 }
 0x950   : > { %16795 = vmatprep.mubr.msk.bf16.mxu0 %vm1236_vm0, %v21828_v58 }
 0x957   : > { %16796 = vmatmul.mubr.msk.bf16.gmra.mrb[28].mxu0 %vm1236_vm0, %v21830_v31 }
 0x958   : > { %16799 = vmatprep.mubr.msk.bf16.mxu0 %vm1236_vm0, %v21843_v17 }
 0x95f   : > { %16800 = vmatmul.mubr.msk.bf16.gmra.mrb[32].mxu0 %vm1236_vm0, %v21845_v48 }
 0x960   : > { %16803 = vmatprep.mubr.msk.bf16.mxu0 %vm1236_vm0, %v21856_v14 }
 0x967   : > { %16804 = vmatmul.mubr.msk.bf16.gmra.mrb[36].mxu0 %vm1236_vm0, %v21996_v44 }
 0x968   : > { %16811 = vmatprep.mubr.msk.bf16.mxu0 %vm1236_vm0, %v21689_v60  ;;  %v4233_v60 = vld [vmem:[#allocation2 + $0x108] sm:$0xff] }
 0x96f   : > { %16812 = vmatmul.mubr.msk.bf16.vlgmr.msra.gmra.mrb[8].mxu0 %vm1236_vm0, %v21691_v46  ;;  %v4234_v46 = vld [vmem:[#allocation2 + $0x110] sm:$0xff] }
 0x970   : > { %16844 = vmatpush3.bf16.msra.mxu0 %v19198_v42  ;;  %16815 = vmatprep.mubr.msk.bf16.mxu0 %vm1236_vm0, %v21701_v23  ;;  %v22032_v23 = vpack.c.bf16 %v4234_v46, %v4233_v60  ;;  %v5196_v42 = vld [vmem:[#allocation2 + $0x98] sm:$0xff]  ;;  %v5203_v60 = vld [vmem:[#allocation2 + $0xd0] sm:$0xff] }
 0x971   : > { %16845 = vmatprep.subr.bf16.mxu0 %v19199_v5  ;;  %v5221_v56 = vpack.c.bf16 %v5197_v20, %v5196_v42 }
 0x974   : > { %16846 = vmatpush3.bf16.msra.mxu0 %v19199_v5  ;;  %v5201_v5 = vld [vmem:[#allocation2 + $0xc0] sm:$0xff] }
 0x975   : > { %16879 = vmatprep.subr.bf16.mxu0 %v19200_v59 }
 0x977   : > { %16816 = vmatmul.mubr.msk.bf16.gmra.mrb[12].mxu0 %vm1236_vm0, %v21703_v39  ;;  %v19201_v39 = vld [vmem:[%s24959_s10 + $0x68] sm:$0xff]  }
 0x978   : > { %16819 = vmatprep.mubr.msk.bf16.mxu0 %vm1236_vm0, %v21710_v61  ;;  %v19202_v61 = vld [vmem:[%s24959_s10 + $0x70] sm:$0xff]  }
 0x97f   : > { %16820 = vmatmul.mubr.msk.bf16.gmra.mrb[16].mxu0 %vm1236_vm0, %v21712_v54  ;;  %v4539_v54 = vld [vmem:[#allocation2 + $0x111] sm:$0xff] }
 0x980   : > { %16823 = vmatprep.mubr.msk.bf16.mxu0 %vm1236_vm0, %v21718_v32  ;;  %v4538_v32 = vld [vmem:[#allocation2 + $0x109] sm:$0xff] }
 0x987   : > { %16824 = vmatmul.mubr.msk.bf16.gmra.mrb[20].mxu0 %vm1236_vm0, %v21720_v6  ;;  %v4571_v6 = vsel %vm1235_vm8, %v4539_v54, 0.0  ;;  %v5205_v54 = vld [vmem:[#allocation2 + $0xe0] sm:$0xff] }
 0x988   : > { %16827 = vmatprep.mubr.msk.bf16.mxu0 %vm1236_vm0, %v21726_v62  ;;  %v22070_v62 = vpack.c.bf16 %v4571_v6, %v4538_v32  ;;  %v5206_v32 = vld [vmem:[#allocation2 + $0xe8] sm:$0xff]  ;;  %v5207_v6 = vld [vmem:[#allocation2 + $0xf0] sm:$0xff] }
 0x98f   : > { %16828 = vmatmul.mubr.msk.bf16.gmra.mrb[24].mxu0 %vm1236_vm0, %v21728_v11  ;;  %v19203_v11 = vld [vmem:[%s24959_s10 + $0x78] sm:$0xff]  }
 0x990   : > { %16831 = vmatprep.mubr.msk.bf16.mxu0 %vm1236_vm0, %v21734_v33  ;;  %v19204_v33 = vld [vmem:[%s24959_s10 + $0x80] sm:$0xff]  }
 0x997   : > { %16832 = vmatmul.mubr.msk.bf16.gmra.mrb[28].mxu0 %vm1236_vm0, %v21736_v15  ;;  %v4875_v15 = vld [vmem:[#allocation2 + $0x117] sm:$0xff] }
 0x998   : > { %16835 = vmatprep.mubr.msk.bf16.mxu0 %vm1236_vm0, %v21742_v25  ;;  %v4876_v25 = vld [vmem:[#allocation2 + $0x11f] sm:$0xff] }
 0x99f   : > { %16836 = vmatmul.mubr.msk.bf16.gmra.mrb[32].mxu0 %vm1236_vm0, %v21744_v35  ;;  %v4907_v35 = vsel %vm1232_vm7, %v4875_v15, 0.0  ;;  %v5208_v15 = vld [vmem:[#allocation2 + $0xf8] sm:$0xff] }
 0x9a0   : > { %16839 = vmatprep.mubr.msk.bf16.mxu0 %vm1236_vm0, %v21753_v22  ;;  %v5182_v22 = vld [vmem:[#allocation2 + $0x28] sm:$0xff] }
 0x9a7   : > { %16840 = vmatmul.mubr.msk.bf16.gmra.mrb[36].mxu0 %vm1236_vm0, %v22032_v23 }
 0x9a8   : > { %16847 = vmatprep.mubr.msk.bf16.mxu0 %vm1236_vm0, %v21865_v55 }
 0x9af   : > { %16848 = vmatmul.mubr.msk.bf16.vlgmr.msra.gmra.mrb[8].mxu0 %vm1236_vm0, %v21867_v4 }
 0x9b0   : > { %16880 = vmatpush3.bf16.msra.mxu0 %v19200_v59  ;;  %16851 = vmatprep.mubr.msk.bf16.mxu0 %vm1236_vm0, %v21882_v2  ;;  %v5202_v59 = vld [vmem:[#allocation2 + $0xc8] sm:$0xff] }
 0x9b1   : > { %16881 = vmatprep.subr.bf16.mxu0 %v19201_v39 }
 0x9b4   : > { %16882 = vmatpush3.bf16.msra.mxu0 %v19201_v39  ;;  %v5224_v39 = vpack.c.bf16 %v5203_v60, %v5202_v59 }
 0x9b5   : > { %16915 = vmatprep.subr.bf16.mxu0 %v19202_v61 }
 0x9b7   : > { %16852 = vmatmul.mubr.msk.bf16.gmra.mrb[12].mxu0 %vm1236_vm0, %v21884_v49 }
 0x9b8   : > { %16855 = vmatprep.mubr.msk.bf16.mxu0 %vm1236_vm0, %v21895_v30 }
 0x9bf   : > { %16856 = vmatmul.mubr.msk.bf16.gmra.mrb[16].mxu0 %vm1236_vm0, %v21897_v53 }
 0x9c0   : > { %16859 = vmatprep.mubr.msk.bf16.mxu0 %vm1236_vm0, %v21907_v13 }
 0x9c7   : > { %16860 = vmatmul.mubr.msk.bf16.gmra.mrb[20].mxu0 %vm1236_vm0, %v21909_v16 }
 0x9c8   : > { %16863 = vmatprep.mubr.msk.bf16.mxu0 %vm1236_vm0, %v21919_v34 }
 0x9cf   : > { %16864 = vmatmul.mubr.msk.bf16.gmra.mrb[24].mxu0 %vm1236_vm0, %v21921_v50 }
 0x9d0   : > { %16867 = vmatprep.mubr.msk.bf16.mxu0 %vm1236_vm0, %v21931_v51 }
 0x9d7   : > { %16868 = vmatmul.mubr.msk.bf16.gmra.mrb[28].mxu0 %vm1236_vm0, %v21933_v8 }
 0x9d8   : > { %16871 = vmatprep.mubr.msk.bf16.mxu0 %vm1236_vm0, %v21943_v19 }
 0x9df   : > { %16872 = vmatmul.mubr.msk.bf16.gmra.mrb[32].mxu0 %vm1236_vm0, %v21945_v0 }
 0x9e0   : > { %16875 = vmatprep.mubr.msk.bf16.mxu0 %vm1236_vm0, %v21953_v52 }
 0x9e7   : > { %16876 = vmatmul.mubr.msk.bf16.gmra.mrb[36].mxu0 %vm1236_vm0, %v22070_v62 }
 0x9e8   : > { %16883 = vmatprep.mubr.msk.bf16.mxu0 %vm1236_vm0, %v21764_v41  ;;  %v5183_v41 = vld [vmem:[#allocation2 + $0x30] sm:$0xff] }
 0x9ef   : > { %16884 = vmatmul.mubr.msk.bf16.vlgmr.msra.gmra.mrb[8].mxu0 %vm1236_vm0, %v21779_v18  ;;  %v4924_v18 = vpack.c.bf16 %v4876_v25, %v4907_v35  ;;  %v5209_v25 = vld [vmem:[#allocation2 + $0x100] sm:$0xff] }
 0x9f0   : > { %16916 = vmatpush3.bf16.msra.mxu0 %v19202_v61  ;;  %16887 = vmatprep.mubr.msk.bf16.mxu0 %vm1236_vm0, %v21781_v3  ;;  %v5214_v3 = vpack.c.bf16 %v5183_v41, %v5182_v22  ;;  %v5204_v61 = vld [vmem:[#allocation2 + $0xd8] sm:$0xff]  ;;  %v5227_v35 = vpack.c.bf16 %v5209_v25, %v5208_v15  ;;  %v5213_v41 = vld [vmem:[#allocation2 + $0x120] sm:$0xff] }
 0x9f1   : > { %16917 = vmatprep.subr.bf16.mxu0 %v19203_v11  ;;  %v5212_v22 = vld [vmem:[#allocation2 + $0x118] sm:$0xff] }
 0x9f4   : > { %16918 = vmatpush3.bf16.msra.mxu0 %v19203_v11  ;;  %v5225_v11 = vpack.c.bf16 %v5205_v54, %v5204_v61 }
 0x9f5   : > { %16951 = vmatprep.subr.bf16.mxu0 %v19204_v33 }
 0x9f7   : > { %16888 = vmatmul.mubr.msk.bf16.gmra.mrb[12].mxu0 %vm1236_vm0, %v21792_v9  ;;  %v5184_v9 = vld [vmem:[#allocation2 + $0x38] sm:$0xff] }
 0x9f8   : > { %16891 = vmatprep.mubr.msk.bf16.mxu0 %vm1236_vm0, %v21794_v10  ;;  %v5185_v10 = vld [vmem:[#allocation2 + $0x40] sm:$0xff] }
 0x9ff   : > { %16892 = vmatmul.mubr.msk.bf16.gmra.mrb[16].mxu0 %vm1236_vm0, %v21804_v1  ;;  %v5186_v1 = vld [vmem:[#allocation2 + $0x48] sm:$0xff] }
 0xa00   : > { %16895 = vmatprep.mubr.msk.bf16.mxu0 %vm1236_vm0, %v21806_v28  ;;  %v5187_v28 = vld [vmem:[#allocation2 + $0x50] sm:$0xff] }
 0xa07   : > { %16896 = vmatmul.mubr.msk.bf16.gmra.mrb[20].mxu0 %vm1236_vm0, %v21816_v37  ;;  %v5215_v37 = vpack.c.bf16 %v5185_v10, %v5184_v9 }
 0xa08   : > { %16899 = vmatprep.mubr.msk.bf16.mxu0 %vm1236_vm0, %v21818_v29  ;;  %v5216_v29 = vpack.c.bf16 %v5187_v28, %v5186_v1 }
 0xa0f   : > { %16900 = vmatmul.mubr.msk.bf16.gmra.mrb[24].mxu0 %vm1236_vm0, %v21828_v58  ;;  %v19205_v58 = vld [vmem:[%s24959_s10 + $0x88] sm:$0xff]  }
 0xa10   : > { %16903 = vmatprep.mubr.msk.bf16.mxu0 %vm1236_vm0, %v21830_v31  ;;  %v5188_v31 = vld [vmem:[#allocation2 + $0x58] sm:$0xff] }
 0xa17   : > { %16904 = vmatmul.mubr.msk.bf16.gmra.mrb[28].mxu0 %vm1236_vm0, %v21843_v17  ;;  %v5189_v17 = vld [vmem:[#allocation2 + $0x60] sm:$0xff] }
 0xa18   : > { %16907 = vmatprep.mubr.msk.bf16.mxu0 %vm1236_vm0, %v21845_v48  ;;  %v5190_v48 = vld [vmem:[#allocation2 + $0x68] sm:$0xff]  ;;  %v5217_v55 = vpack.c.bf16 %v5189_v17, %v5188_v31 }
 0xa1f   : > { %16908 = vmatmul.mubr.msk.bf16.gmra.mrb[32].mxu0 %vm1236_vm0, %v21856_v14  ;;  %v5191_v14 = vld [vmem:[#allocation2 + $0x70] sm:$0xff] }
 0xa20   : > { %16911 = vmatprep.mubr.msk.bf16.mxu0 %vm1236_vm0, %v21996_v44  ;;  %v5218_v36 = vpack.c.bf16 %v5191_v14, %v5190_v48  ;;  %v5200_v44 = vld [vmem:[#allocation2 + $0xb8] sm:$0xff] }
 0xa21   : > { %v5223_v46 = vpack.c.bf16 %v5201_v5, %v5200_v44 }
 0xa27   : > { %16912 = vmatmul.mubr.msk.bf16.gmra.mrb[36].mxu0 %vm1236_vm0, %v4924_v18  ;;  %v5229_v18 = vpack.c.bf16 %v5213_v41, %v5212_v22 }
 0xa28   : > { %16919 = vmatprep.mubr.msk.bf16.mxu0 %vm1236_vm0, %v5214_v3 }
 0xa2f   : > { %16920 = vmatmul.mubr.msk.bf16.vlgmr.msra.gmra.mrb[8].mxu0 %vm1236_vm0, %v5215_v37 }
 0xa30   : > { %16952 = vmatpush3.bf16.msra.mxu0 %v19204_v33  ;;  %16923 = vmatprep.mubr.msk.bf16.mxu0 %vm1236_vm0, %v5216_v29  ;;  %v5226_v33 = vpack.c.bf16 %v5207_v6, %v5206_v32 }
 0xa31   : > { %16953 = vmatprep.subr.bf16.mxu0 %v19205_v58 }
 0xa34   : > { %16954 = vmatpush3.bf16.msra.mxu0 %v19205_v58 }
 0xa37   : > { %16924 = vmatmul.mubr.msk.bf16.gmra.mrb[12].mxu0 %vm1236_vm0, %v5217_v55 }
 0xa38   : > { %16927 = vmatprep.mubr.msk.bf16.mxu0 %vm1236_vm0, %v5218_v36 }
 0xa3f   : > { %16928 = vmatmul.mubr.msk.bf16.gmra.mrb[16].mxu0 %vm1236_vm0, %v5219_v27 }
 0xa40   : > { %16931 = vmatprep.mubr.msk.bf16.mxu0 %vm1236_vm0, %v5220_v43  ;;  %v15117_v43 = vld [vmem:[#allocation14] ss:$0 sm:$0xff] }
 0xa41   : > { %v2096_v5 = vadd.f32 %v15117_v43, %v21970_v24 }
 0xa47   : > { %16932 = vmatmul.mubr.msk.bf16.gmra.mrb[20].mxu0 %vm1236_vm0, %v5221_v56 }
 0xa48   : > { %16935 = vmatprep.mubr.msk.bf16.mxu0 %vm1236_vm0, %v5222_v57 }
 0xa4f   : > { %16936 = vmatmul.mubr.msk.bf16.gmra.mrb[24].mxu0 %vm1236_vm0, %v5223_v46  ;;  %v6537_v46 = vld [vmem:[#allocation2 + $0x9] sm:$0xff] }
 0xa50   : > { %16939 = vmatprep.mubr.msk.bf16.mxu0 %vm1236_vm0, %v5224_v39 }
 0xa57   : > { %16940 = vmatmul.mubr.msk.bf16.gmra.mrb[28].mxu0 %vm1236_vm0, %v5225_v11 }
 0xa58   : > { %16943 = vmatprep.mubr.msk.bf16.mxu0 %vm1236_vm0, %v5226_v33 }
 0xa5f   : > { %16944 = vmatmul.mubr.msk.bf16.gmra.mrb[32].mxu0 %vm1236_vm0, %v5227_v35 }
 0xa60   : > { %16947 = vmatprep.mubr.msk.bf16.mxu0 %vm1236_vm0, %v22032_v23 }
 0xa67   : > { %16948 = vmatmul.mubr.msk.bf16.gmra.mrb[36].mxu0 %vm1236_vm0, %v5229_v18  ;;  %v2099_v18 = vmax.f32 %v2096_v5, 0.0 }
 0xa68   : > { %16955 = vmatprep.mubr.msk.bf16.mxu0 %vm1236_vm0, %v21867_v4  ;;  %v5518_v4 = vld [vmem:[#allocation2 + $0x121] sm:$0xff] }
 0xa6f   : > { %16956 = vmatmul.mubr.msk.bf16.vlgmr.msra.gmra.mrb[8].mxu0 %vm1236_vm0, %v21882_v2  ;;  %v5517_v2 = vld [vmem:[#allocation2 + $0x119] sm:$0xff] }
 0xa70   : > { %16959 = vmatprep.mubr.msk.bf16.mxu0 %vm1236_vm0, %v21884_v49  ;;  %v5550_v49 = vsel %vm1235_vm8, %v5518_v4, 0.0 }
 0xa77   : > { %16960 = vmatmul.mubr.msk.bf16.gmra.mrb[12].mxu0 %vm1236_vm0, %v21895_v30  ;;  %v5566_v30 = vpack.c.bf16 %v5550_v49, %v5517_v2 }
 0xa78   : > { %16963 = vmatprep.mubr.msk.bf16.mxu0 %vm1236_vm0, %v21897_v53  ;;  %v19206_v53 = vld [vmem:[%s24999_s2 + $0x10] sm:$0xff]  }
 0xa79   : > { %16987 = vmatprep.subr.bf16.mxu0 %v19206_v53 }
 0xa7a   : > { %16988 = vmatpush3.bf16.msra.mxu0 %v19206_v53 }
 0xa7f   : > { %16964 = vmatmul.mubr.msk.bf16.gmra.mrb[16].mxu0 %vm1236_vm0, %v21907_v13  ;;  %v19207_v13 = vld [vmem:[%s25000_s18 + $0x20] sm:$0xff]  }
 0xa80   : > { %16967 = vmatprep.mubr.msk.bf16.mxu0 %vm1236_vm0, %v21909_v16  ;;  %17059 = vmatprep.subr.bf16.mxu1 %v19207_v13  ;;  %v19208_v16 = vld [vmem:[%s25000_s18 + $0x18] sm:$0xff]  }
 0xa81   : > { %17060 = vmatpush3.bf16.msra.mxu1 %v19207_v13  ;;  %16989 = vmatprep.subr.bf16.mxu0 %v19208_v16  ;;  %v19212_v13 = vld [vmem:[%s25000_s18 + $0x8] sm:$0xff]  }
 0xa82   : > { %16990 = vmatpush3.bf16.msra.mxu0 %v19208_v16 }
 0xa87   : > { %16968 = vmatmul.mubr.msk.bf16.gmra.mrb[20].mxu0 %vm1236_vm0, %v21919_v34  ;;  %v19209_v34 = vld [vmem:[%s25000_s18 + $0x28] sm:$0xff]  }
 0xa88   : > { %16971 = vmatprep.mubr.msk.bf16.mxu0 %vm1236_vm0, %v21921_v50  ;;  %v6043_v50 = vld [vmem:[#allocation2 + $0x8] sm:$0xff]  ;;  %17061 = vmatprep.subr.bf16.mxu1 %v19209_v34 }
 0xa89   : > { %17062 = vmatpush3.bf16.msra.mxu1 %v19209_v34 }
 0xa8f   : > { %16972 = vmatmul.mubr.msk.bf16.gmra.mrb[24].mxu0 %vm1236_vm0, %v21931_v51  ;;  %v6044_v51 = vld [vmem:[#allocation2 + $0x10] sm:$0xff] }
 0xa90   : > { %16975 = vmatprep.mubr.msk.bf16.mxu0 %vm1236_vm0, %v21933_v8  ;;  %v6075_v8 = vpack.c.bf16 %v6044_v51, %v6043_v50 }
 0xa97   : > { %16976 = vmatmul.mubr.msk.bf16.gmra.mrb[28].mxu0 %vm1236_vm0, %v21943_v19  ;;  %v22165_v19 = vld [vmem:[%s25000_s18] sm:$0xff]  }
 0xa98   : > { %16979 = vmatprep.mubr.msk.bf16.mxu0 %vm1236_vm0, %v21945_v0  ;;  %17023 = vmatprep.subr.bf16.mxu0 %v22165_v19  ;;  %v22170_v0 = vld [vmem:[%s25000_s18 + $0x30] sm:$0xff]  }
 0xa99   : > { %17095 = vmatprep.subr.bf16.mxu1 %v22170_v0 }
 0xa9f   : > { %16980 = vmatmul.mubr.msk.bf16.gmra.mrb[32].mxu0 %vm1236_vm0, %v21953_v52  ;;  %v22173_v52 = vld [vmem:[#allocation17] ss:$0 sm:$0xff] }
 0xaa0   : > { %16983 = vmatprep.mubr.msk.bf16.mxu0 %vm1236_vm0, %v22070_v62 }
 0xaa7   : > { %16984 = vmatmul.mubr.msk.bf16.gmra.mrb[36].mxu0 %vm1236_vm0, %v5566_v30 }
 0xaa8   : > { %16991 = vmatprep.mubr.msk.bf16.mxu0 %vm1236_vm0, %v6075_v8 }
 0xb42   : > { %v16957_v23 = vpop.f32.mrb[8].mxu0 }
 0xb43   : > { %v5833_v62 = vadd.f32 %v16957_v23, %v22173_v52  ;;  %v5665_v3 = vpop.f32.mrb[9].mxu0 }
 0xb44   : > { %v5831_v9 = vadd.f32 %v22173_v52, %v5665_v3  ;;  %v16958_v10 = vpop.f32.mrb[10].mxu0  ;;  %v19213_v3 = vld [vmem:[%s25000_s18 + $0x38] sm:$0xff]  }
 0xb45   : > { %v5865_v1 = vmax.f32 %v5833_v62, 0.0  ;;  %v5834_v28 = vadd.f32 %v16958_v10, %v22173_v52  ;;  %v5668_v37 = vpop.f32.mrb[11].mxu0 }
 0xb46   : > { %v5863_v29 = vmax.f32 %v5831_v9, 0.0  ;;  %v5832_v58 = vadd.f32 %v22173_v52, %v5668_v37  ;;  %v22244_v37 = vmin.f32 %v2099_v18, 6.0 }
 0xb47   : > { %v22179_v31 = vmin.f32 %v5865_v1, 6.0  ;;  %v5866_v17 = vmax.f32 %v5834_v28, 0.0 }
 0xb48   : > { %v22181_v48 = vmin.f32 %v5863_v29, 6.0  ;;  %v5864_v14 = vmax.f32 %v5832_v58, 0.0  ;;  %v22252_v58 = vld [vmem:[%s25000_s18 + $0x40] sm:$0xff]  }
 0xb49   : > { %25001 = vst [vmem:[#allocation69_spill] sm:$0xff] %v22179_v31  ;;  %5929 = vst.msk [vmem:[#allocation2 + $0x28] sm:$0xff] %vm1236_vm0, %v22179_v31  ;;  %v22185_v55 = vmin.f32 %v5866_v17, 6.0 }
 0xb4a   : > { %25002 = vst [vmem:[#allocation70_spill] sm:$0xff] %v22181_v48  ;;  %5927 = vst.msk [vmem:[#allocation2 + $0x18] sm:$0xff] %vm1236_vm0, %v22181_v48  ;;  %v22189_v36 = vmin.f32 %v5864_v14, 6.0  ;;  %v16961_v7 = vpop.f32.mrb[12].mxu0 }
 0xb4b   : > { %25003 = vst [vmem:[#allocation71_spill] sm:$0xff] %v22185_v55  ;;  %5930 = vst.msk [vmem:[#allocation2 + $0x30] sm:$0xff] %vm1236_vm0, %v22185_v55  ;;  %v5837_v45 = vadd.f32 %v16961_v7, %v22173_v52  ;;  %v5681_v63 = vpop.f32.mrb[13].mxu0 }
 0xb4c   : > { %25004 = vst [vmem:[#allocation72_spill] sm:$0xff] %v22189_v36  ;;  %5928 = vst.msk [vmem:[#allocation2 + $0x20] sm:$0xff] %vm1236_vm0, %v22189_v36  ;;  %v5835_v47 = vadd.f32 %v22173_v52, %v5681_v63  ;;  %v16962_v27 = vpop.f32.mrb[14].mxu0 }
 0xb4d   : > { %v5869_v42 = vmax.f32 %v5837_v45, 0.0  ;;  %v5838_v20 = vadd.f32 %v16962_v27, %v22173_v52  ;;  %v5684_v21 = vpop.f32.mrb[15].mxu0 }
 0xb4e   : > { %v5867_v26 = vmax.f32 %v5835_v47, 0.0  ;;  %v5836_v56 = vadd.f32 %v22173_v52, %v5684_v21 }
 0xb4f   : > { %v22199_v57 = vmin.f32 %v5869_v42, 6.0  ;;  %v5870_v44 = vmax.f32 %v5838_v20, 0.0 }
 0xb50   : > { %v22202_v59 = vmin.f32 %v5867_v26, 6.0  ;;  %v5868_v60 = vmax.f32 %v5836_v56, 0.0  ;;  %v6047_v30 = vld [vmem:[#allocation2 + $0x28] sm:$0xff] }
 0xb51   : > { %25005 = vst [vmem:[#allocation73_spill] sm:$0xff] %v22199_v57  ;;  %5933 = vst.msk [vmem:[#allocation2 + $0x48] sm:$0xff] %vm1236_vm0, %v22199_v57  ;;  %v22206_v39 = vmin.f32 %v5870_v44, 6.0  ;;  %v6538_v61 = vld [vmem:[#allocation2 + $0x11] sm:$0xff] }
 0xb52   : > { %25006 = vst [vmem:[#allocation74_spill] sm:$0xff] %v22202_v59  ;;  %5931 = vst.msk [vmem:[#allocation2 + $0x38] sm:$0xff] %vm1236_vm0, %v22202_v59  ;;  %v22210_v54 = vmin.f32 %v5868_v60, 6.0  ;;  %v16965_v32 = vpop.f32.mrb[16].mxu0  ;;  %v6570_v6 = vsel %vm1235_vm8, %v6538_v61, 0.0  ;;  %v6045_v24 = vld [vmem:[#allocation2 + $0x18] sm:$0xff] }
 0xb53   : > { %25007 = vst [vmem:[#allocation75_spill] sm:$0xff] %v22206_v39  ;;  %v6048_v11 = vld [vmem:[#allocation2 + $0x30] sm:$0xff]  ;;  %5934 = vst.msk [vmem:[#allocation2 + $0x50] sm:$0xff] %vm1236_vm0, %v22206_v39  ;;  %v5841_v33 = vadd.f32 %v16965_v32, %v22173_v52  ;;  %v5697_v15 = vpop.f32.mrb[17].mxu0  ;;  %v6601_v25 = vpack.c.bf16 %v6570_v6, %v6537_v46  ;;  %v6046_v35 = vld [vmem:[#allocation2 + $0x20] sm:$0xff] }
 0xb54   : > { %25008 = vst [vmem:[#allocation76_spill] sm:$0xff] %v22210_v54  ;;  %v6539_v22 = vld [vmem:[#allocation2 + $0x19] sm:$0xff]  ;;  %v6540_v41 = vld [vmem:[#allocation2 + $0x21] sm:$0xff]  ;;  %5932 = vst.msk [vmem:[#allocation2 + $0x40] sm:$0xff] %vm1236_vm0, %v22210_v54  ;;  %v5839_v4 = vadd.f32 %v22173_v52, %v5697_v15  ;;  %v16966_v2 = vpop.f32.mrb[18].mxu0  ;;  %v22220_v49 = vpack.c.bf16 %v6046_v35, %v6045_v24  ;;  %v22227_v51 = vpack.c.bf16 %v6048_v11, %v6047_v30 }
 0xb55   : > { %v6572_v53 = vsel %vm1235_vm8, %v6540_v41, 0.0  ;;  %v5873_v16 = vmax.f32 %v5841_v33, 0.0  ;;  %v5842_v34 = vadd.f32 %v16966_v2, %v22173_v52  ;;  %v5700_v50 = vpop.f32.mrb[19].mxu0  ;;  %17063 = vmatprep.mubr.msk.bf16.mxu1 %vm1236_vm0, %v6601_v25  ;;  %v6541_v7 = vld [vmem:[#allocation2 + $0x29] sm:$0xff] }
 0xb56   : > { %v22229_v8 = vpack.c.bf16 %v6572_v53, %v6539_v22  ;;  %v5871_v23 = vmax.f32 %v5839_v4, 0.0  ;;  %v5840_v62 = vadd.f32 %v22173_v52, %v5700_v50  ;;  %16992 = vmatmul.mubr.msk.bf16.vlgmr.msra.gmra.mrb[40].mxu0 %vm1236_vm0, %v22220_v49 }
 0xb57   : > { %v22235_v9 = vmin.f32 %v5873_v16, 6.0  ;;  %v5874_v10 = vmax.f32 %v5842_v34, 0.0  ;;  %17024 = vmatpush3.bf16.msra.mxu0 %v22165_v19  ;;  %16995 = vmatprep.mubr.msk.bf16.mxu0 %vm1236_vm0, %v22227_v51 }
 0xb58   : > { %v22240_v1 = vmin.f32 %v5871_v23, 6.0  ;;  %v5872_v28 = vmax.f32 %v5840_v62, 0.0  ;;  %17064 = vmatmul.mubr.msk.bf16.vlgmr.msra.gmra.mrb[8].mxu1 %vm1236_vm0, %v22229_v8  ;;  %17025 = vmatprep.subr.bf16.mxu0 %v19212_v13  ;;  %v6051_v5 = vld [vmem:[#allocation2 + $0x48] sm:$0xff] }
 0xb59   : > { %25009 = vst [vmem:[#allocation77_spill] sm:$0xff] %v22235_v9  ;;  %5937 = vst.msk [vmem:[#allocation2 + $0x68] sm:$0xff] %vm1236_vm0, %v22235_v9  ;;  %v22248_v29 = vmin.f32 %v5874_v10, 6.0  ;;  %17096 = vmatpush3.bf16.msra.mxu1 %v22170_v0  ;;  %v6542_v19 = vld [vmem:[#allocation2 + $0x31] sm:$0xff] }
 0xb5a   : > { %25010 = vst [vmem:[#allocation78_spill] sm:$0xff] %v22240_v1  ;;  %5935 = vst.msk [vmem:[#allocation2 + $0x58] sm:$0xff] %vm1236_vm0, %v22240_v1  ;;  %v22256_v17 = vmin.f32 %v5872_v28, 6.0  ;;  %v16969_v14 = vpop.f32.mrb[20].mxu0  ;;  %v6574_v45 = vsel %vm1235_vm8, %v6542_v19, 0.0  ;;  %v6049_v63 = vld [vmem:[#allocation2 + $0x38] sm:$0xff]  ;;  %17097 = vmatprep.subr.bf16.mxu1 %v19213_v3 }
 0xb5b   : > { %25011 = vst [vmem:[#allocation79_spill] sm:$0xff] %v22248_v29  ;;  %v6052_v47 = vld [vmem:[#allocation2 + $0x50] sm:$0xff]  ;;  %5938 = vst.msk [vmem:[#allocation2 + $0x70] sm:$0xff] %vm1236_vm0, %v22248_v29  ;;  %v5845_v0 = vadd.f32 %v16969_v14, %v22173_v52  ;;  %17026 = vmatpush3.bf16.msra.mxu0 %v19212_v13  ;;  %v5713_v27 = vpop.f32.mrb[21].mxu0  ;;  %v22263_v43 = vpack.c.bf16 %v6574_v45, %v6541_v7  ;;  %v6050_v42 = vld [vmem:[#allocation2 + $0x40] sm:$0xff] }
 0xb5c   : > { %25012 = vst [vmem:[#allocation80_spill] sm:$0xff] %v22256_v17  ;;  %v6543_v20 = vld [vmem:[#allocation2 + $0x39] sm:$0xff]  ;;  %v6544_v21 = vld [vmem:[#allocation2 + $0x41] sm:$0xff]  ;;  %5936 = vst.msk [vmem:[#allocation2 + $0x60] sm:$0xff] %vm1236_vm0, %v22256_v17  ;;  %v5843_v26 = vadd.f32 %v22173_v52, %v5713_v27  ;;  %17311 = vmatprep.subr.msk.mxu0 %vm8935_vm9, %v22244_v37  ;;  %v16970_v56 = vpop.f32.mrb[22].mxu0  ;;  %v22270_v44 = vpack.c.bf16 %v6050_v42, %v6049_v63  ;;  %v22277_v6 = vpack.c.bf16 %v6052_v47, %v6051_v5 }
 0xb5d   : > { %v6576_v60 = vsel %vm1235_vm8, %v6544_v21, 0.0  ;;  %v5877_v46 = vmax.f32 %v5845_v0, 0.0  ;;  %v5846_v61 = vadd.f32 %v16970_v56, %v22173_v52  ;;  %v5716_v32 = vpop.f32.mrb[23].mxu0  ;;  %17067 = vmatprep.mubr.msk.bf16.mxu1 %vm1236_vm0, %v22263_v43  ;;  %17098 = vmatpush3.bf16.msra.mxu1 %v19213_v3  ;;  %v6545_v30 = vld [vmem:[#allocation2 + $0x49] sm:$0xff] }
 0xb5e   : > { %v22279_v24 = vpack.c.bf16 %v6576_v60, %v6543_v20  ;;  %v5875_v11 = vmax.f32 %v5843_v26, 0.0  ;;  %v5844_v33 = vadd.f32 %v22173_v52, %v5716_v32  ;;  %16996 = vmatmul.mubr.msk.bf16.gmra.mrb[44].mxu0 %vm1236_vm0, %v22270_v44  ;;  %17131 = vmatprep.subr.bf16.mxu1 %v22252_v58 }
 0xb5f   : > { %v22285_v15 = vmin.f32 %v5877_v46, 6.0  ;;  %v5878_v25 = vmax.f32 %v5846_v61, 0.0  ;;  %16999 = vmatprep.mubr.msk.bf16.mxu0 %vm1236_vm0, %v22277_v6 }
 0xb60   : > { %v22289_v35 = vmin.f32 %v5875_v11, 6.0  ;;  %v5876_v22 = vmax.f32 %v5844_v33, 0.0  ;;  %17068 = vmatmul.mubr.msk.bf16.gmra.mrb[12].mxu1 %vm1236_vm0, %v22279_v24  ;;  %v6055_v7 = vld [vmem:[#allocation2 + $0x68] sm:$0xff] }
 0xb61   : > { %25013 = vst [vmem:[#allocation81_spill] sm:$0xff] %v22285_v15  ;;  %5941 = vst.msk [vmem:[#allocation2 + $0x88] sm:$0xff] %vm1236_vm0, %v22285_v15  ;;  %v22295_v41 = vmin.f32 %v5878_v25, 6.0  ;;  %v6546_v18 = vld [vmem:[#allocation2 + $0x51] sm:$0xff] }
 0xb62   : > { %25014 = vst [vmem:[#allocation82_spill] sm:$0xff] %v22289_v35  ;;  %5939 = vst.msk [vmem:[#allocation2 + $0x78] sm:$0xff] %vm1236_vm0, %v22289_v35  ;;  %v22299_v4 = vmin.f32 %v5876_v22, 6.0  ;;  %v16973_v2 = vpop.f32.mrb[24].mxu0  ;;  %v6578_v53 = vsel %vm1235_vm8, %v6546_v18, 0.0  ;;  %v6053_v13 = vld [vmem:[#allocation2 + $0x58] sm:$0xff] }
 0xb63   : > { %25015 = vst [vmem:[#allocation83_spill] sm:$0xff] %v22295_v41  ;;  %v6056_v16 = vld [vmem:[#allocation2 + $0x70] sm:$0xff]  ;;  %5942 = vst.msk [vmem:[#allocation2 + $0x90] sm:$0xff] %vm1236_vm0, %v22295_v41  ;;  %v5849_v34 = vadd.f32 %v16973_v2, %v22173_v52  ;;  %v5729_v50 = vpop.f32.mrb[25].mxu0  ;;  %v22306_v23 = vpack.c.bf16 %v6578_v53, %v6545_v30  ;;  %v6054_v62 = vld [vmem:[#allocation2 + $0x60] sm:$0xff] }
 0xb64   : > { %25016 = vst [vmem:[#allocation84_spill] sm:$0xff] %v22299_v4  ;;  %v6547_v3 = vld [vmem:[#allocation2 + $0x59] sm:$0xff]  ;;  %v6548_v10 = vld [vmem:[#allocation2 + $0x61] sm:$0xff]  ;;  %5940 = vst.msk [vmem:[#allocation2 + $0x80] sm:$0xff] %vm1236_vm0, %v22299_v4  ;;  %v5847_v28 = vadd.f32 %v22173_v52, %v5729_v50  ;;  %v16974_v19 = vpop.f32.mrb[26].mxu0  ;;  %v22311_v14 = vpack.c.bf16 %v6054_v62, %v6053_v13  ;;  %v22318_v27 = vpack.c.bf16 %v6056_v16, %v6055_v7 }
 0xb65   : > { %v6580_v45 = vsel %vm1235_vm8, %v6548_v10, 0.0  ;;  %v5881_v63 = vmax.f32 %v5849_v34, 0.0  ;;  %v5850_v47 = vadd.f32 %v16974_v19, %v22173_v52  ;;  %v5732_v0 = vpop.f32.mrb[27].mxu0  ;;  %17071 = vmatprep.mubr.msk.bf16.mxu1 %vm1236_vm0, %v22306_v23  ;;  %v6549_v33 = vld [vmem:[#allocation2 + $0x69] sm:$0xff] }
 0xb66   : > { %v22320_v42 = vpack.c.bf16 %v6580_v45, %v6547_v3  ;;  %v5879_v20 = vmax.f32 %v5847_v28, 0.0  ;;  %v5848_v21 = vadd.f32 %v22173_v52, %v5732_v0  ;;  %17000 = vmatmul.mubr.msk.bf16.gmra.mrb[48].mxu0 %vm1236_vm0, %v22311_v14 }
 0xb67   : > { %v22325_v26 = vmin.f32 %v5881_v63, 6.0  ;;  %v5882_v56 = vmax.f32 %v5850_v47, 0.0  ;;  %17003 = vmatprep.mubr.msk.bf16.mxu0 %vm1236_vm0, %v22318_v27 }
 0xb68   : > { %v22329_v5 = vmin.f32 %v5879_v20, 6.0  ;;  %v5880_v60 = vmax.f32 %v5848_v21, 0.0  ;;  %17072 = vmatmul.mubr.msk.bf16.gmra.mrb[16].mxu1 %vm1236_vm0, %v22320_v42  ;;  %v6059_v10 = vld [vmem:[#allocation2 + $0x88] sm:$0xff] }
 0xb69   : > { %25017 = vst [vmem:[#allocation85_spill] sm:$0xff] %v22325_v26  ;;  %5945 = vst.msk [vmem:[#allocation2 + $0xa8] sm:$0xff] %vm1236_vm0, %v22325_v26  ;;  %v22335_v46 = vmin.f32 %v5882_v56, 6.0  ;;  %v6550_v61 = vld [vmem:[#allocation2 + $0x71] sm:$0xff] }
 0xb6a   : > { %25018 = vst [vmem:[#allocation86_spill] sm:$0xff] %v22329_v5  ;;  %5943 = vst.msk [vmem:[#allocation2 + $0x98] sm:$0xff] %vm1236_vm0, %v22329_v5  ;;  %v22339_v32 = vmin.f32 %v5880_v60, 6.0  ;;  %v16977_v11 = vpop.f32.mrb[28].mxu0  ;;  %v6582_v25 = vsel %vm1235_vm8, %v6550_v61, 0.0  ;;  %v6057_v22 = vld [vmem:[#allocation2 + $0x78] sm:$0xff] }
 0xb6b   : > { %25019 = vst [vmem:[#allocation87_spill] sm:$0xff] %v22335_v46  ;;  %v6060_v18 = vld [vmem:[#allocation2 + $0x90] sm:$0xff]  ;;  %5946 = vst.msk [vmem:[#allocation2 + $0xb0] sm:$0xff] %vm1236_vm0, %v22335_v46  ;;  %v5853_v2 = vadd.f32 %v16977_v11, %v22173_v52  ;;  %v5745_v30 = vpop.f32.mrb[29].mxu0  ;;  %v22346_v53 = vpack.c.bf16 %v6582_v25, %v6549_v33  ;;  %v6058_v13 = vld [vmem:[#allocation2 + $0x80] sm:$0xff] }
 0xb6c   : > { %25020 = vst [vmem:[#allocation88_spill] sm:$0xff] %v22339_v32  ;;  %v6551_v16 = vld [vmem:[#allocation2 + $0x79] sm:$0xff]  ;;  %v6552_v34 = vld [vmem:[#allocation2 + $0x81] sm:$0xff]  ;;  %5944 = vst.msk [vmem:[#allocation2 + $0xa0] sm:$0xff] %vm1236_vm0, %v22339_v32  ;;  %v5851_v50 = vadd.f32 %v22173_v52, %v5745_v30  ;;  %v16978_v62 = vpop.f32.mrb[30].mxu0  ;;  %v22351_v3 = vpack.c.bf16 %v6058_v13, %v6057_v22  ;;  %v22358_v63 = vpack.c.bf16 %v6060_v18, %v6059_v10 }
 0xb6d   : > { %v6584_v28 = vsel %vm1235_vm8, %v6552_v34, 0.0  ;;  %v5885_v19 = vmax.f32 %v5853_v2, 0.0  ;;  %v5854_v7 = vadd.f32 %v16978_v62, %v22173_v52  ;;  %v5748_v45 = vpop.f32.mrb[31].mxu0  ;;  %17075 = vmatprep.mubr.msk.bf16.mxu1 %vm1236_vm0, %v22346_v53  ;;  %v6553_v18 = vld [vmem:[#allocation2 + $0x89] sm:$0xff]  ;;  %v6875_v32 = vld [vmem:[#allocation2 + $0x1f] sm:$0xff] }
 0xb6e   : > { %v22360_v47 = vpack.c.bf16 %v6584_v28, %v6551_v16  ;;  %v5883_v0 = vmax.f32 %v5851_v50, 0.0  ;;  %v5852_v20 = vadd.f32 %v22173_v52, %v5748_v45  ;;  %17004 = vmatmul.mubr.msk.bf16.gmra.mrb[52].mxu0 %vm1236_vm0, %v22351_v3 }
 0xb6f   : > { %v22365_v21 = vmin.f32 %v5885_v19, 6.0  ;;  %v5886_v56 = vmax.f32 %v5854_v7, 0.0  ;;  %17007 = vmatprep.mubr.msk.bf16.mxu0 %vm1236_vm0, %v22358_v63 }
 0xb70   : > { %v22369_v60 = vmin.f32 %v5883_v0, 6.0  ;;  %v5884_v61 = vmax.f32 %v5852_v20, 0.0  ;;  %17076 = vmatmul.mubr.msk.bf16.gmra.mrb[20].mxu1 %vm1236_vm0, %v22360_v47  ;;  %v6063_v0 = vld [vmem:[#allocation2 + $0xa8] sm:$0xff] }
 0xb71   : > { %25021 = vst [vmem:[#allocation89_spill] sm:$0xff] %v22365_v21  ;;  %5949 = vst.msk [vmem:[#allocation2 + $0xc8] sm:$0xff] %vm1236_vm0, %v22365_v21  ;;  %v22375_v11 = vmin.f32 %v5886_v56, 6.0  ;;  %v6554_v33 = vld [vmem:[#allocation2 + $0x91] sm:$0xff] }
 0xb72   : > { %25022 = vst [vmem:[#allocation90_spill] sm:$0xff] %v22369_v60  ;;  %5947 = vst.msk [vmem:[#allocation2 + $0xb8] sm:$0xff] %vm1236_vm0, %v22369_v60  ;;  %v22379_v25 = vmin.f32 %v5884_v61, 6.0  ;;  %v16981_v22 = vpop.f32.mrb[32].mxu0  ;;  %v6586_v2 = vsel %vm1235_vm8, %v6554_v33, 0.0  ;;  %v6061_v30 = vld [vmem:[#allocation2 + $0x98] sm:$0xff] }
 0xb73   : > { %25023 = vst [vmem:[#allocation101_spill] sm:$0xff] %v22375_v11  ;;  %v6064_v13 = vld [vmem:[#allocation2 + $0xb0] sm:$0xff]  ;;  %5950 = vst.msk [vmem:[#allocation2 + $0xd0] sm:$0xff] %vm1236_vm0, %v22375_v11  ;;  %v5857_v16 = vadd.f32 %v16981_v22, %v22173_v52  ;;  %v5761_v34 = vpop.f32.mrb[33].mxu0  ;;  %v22386_v50 = vpack.c.bf16 %v6586_v2, %v6553_v18  ;;  %v6062_v62 = vld [vmem:[#allocation2 + $0xa0] sm:$0xff] }
 0xb74   : > { %25024 = vst [vmem:[#allocation102_spill] sm:$0xff] %v22379_v25  ;;  %v6555_v10 = vld [vmem:[#allocation2 + $0x99] sm:$0xff]  ;;  %v6556_v28 = vld [vmem:[#allocation2 + $0xa1] sm:$0xff]  ;;  %5948 = vst.msk [vmem:[#allocation2 + $0xc0] sm:$0xff] %vm1236_vm0, %v22379_v25  ;;  %v5855_v19 = vadd.f32 %v22173_v52, %v5761_v34  ;;  %v16982_v7 = vpop.f32.mrb[34].mxu0  ;;  %v22391_v45 = vpack.c.bf16 %v6062_v62, %v6061_v30  ;;  %v22398_v22 = vpack.c.bf16 %v6064_v13, %v6063_v0 }
 0xb75   : > { %v6588_v20 = vsel %vm1235_vm8, %v6556_v28, 0.0  ;;  %v5889_v56 = vmax.f32 %v5857_v16, 0.0  ;;  %v5858_v61 = vadd.f32 %v16982_v7, %v22173_v52  ;;  %v5764_v33 = vpop.f32.mrb[35].mxu0  ;;  %17079 = vmatprep.mubr.msk.bf16.mxu1 %vm1236_vm0, %v22386_v50  ;;  %v6557_v0 = vld [vmem:[#allocation2 + $0xa9] sm:$0xff] }
 0xb76   : > { %v22400_v18 = vpack.c.bf16 %v6588_v20, %v6555_v10  ;;  %v5887_v2 = vmax.f32 %v5855_v19, 0.0  ;;  %v5856_v34 = vadd.f32 %v22173_v52, %v5764_v33  ;;  %17008 = vmatmul.mubr.msk.bf16.gmra.mrb[56].mxu0 %vm1236_vm0, %v22391_v45 }
 0xb77   : > { %v22405_v30 = vmin.f32 %v5889_v56, 6.0  ;;  %v5890_v62 = vmax.f32 %v5858_v61, 0.0  ;;  %17011 = vmatprep.mubr.msk.bf16.mxu0 %vm1236_vm0, %v22398_v22 }
 0xb78   : > { %v22409_v16 = vmin.f32 %v5887_v2, 6.0  ;;  %v5888_v28 = vmax.f32 %v5856_v34, 0.0  ;;  %17080 = vmatmul.mubr.msk.bf16.gmra.mrb[24].mxu1 %vm1236_vm0, %v22400_v18  ;;  %v6067_v11 = vld [vmem:[#allocation2 + $0xc8] sm:$0xff] }
 0xb79   : > { %25025 = vst [vmem:[#allocation103_spill] sm:$0xff] %v22405_v30  ;;  %5953 = vst.msk [vmem:[#allocation2 + $0xe8] sm:$0xff] %vm1236_vm0, %v22405_v30  ;;  %v22415_v13 = vmin.f32 %v5890_v62, 6.0  ;;  %v6558_v10 = vld [vmem:[#allocation2 + $0xb1] sm:$0xff] }
 0xb7a   : > { %25026 = vst [vmem:[#allocation104_spill] sm:$0xff] %v22409_v16  ;;  %5951 = vst.msk [vmem:[#allocation2 + $0xd8] sm:$0xff] %vm1236_vm0, %v22409_v16  ;;  %v22419_v19 = vmin.f32 %v5888_v28, 6.0  ;;  %v16985_v7 = vpop.f32.mrb[36].mxu0  ;;  %v6590_v20 = vsel %vm1235_vm8, %v6558_v10, 0.0  ;;  %v6065_v56 = vld [vmem:[#allocation2 + $0xb8] sm:$0xff] }
 0xb7b   : > { %25027 = vst [vmem:[#allocation91_spill] sm:$0xff] %v22415_v13  ;;  %v6068_v61 = vld [vmem:[#allocation2 + $0xd0] sm:$0xff]  ;;  %5954 = vst.msk [vmem:[#allocation2 + $0xf0] sm:$0xff] %vm1236_vm0, %v22415_v13  ;;  %v5861_v33 = vadd.f32 %v16985_v7, %v22173_v52  ;;  %v5777_v2 = vpop.f32.mrb[37].mxu0  ;;  %v22426_v34 = vpack.c.bf16 %v6590_v20, %v6557_v0  ;;  %v6066_v62 = vld [vmem:[#allocation2 + $0xc0] sm:$0xff] }
 0xb7c   : > { %25028 = vst [vmem:[#allocation92_spill] sm:$0xff] %v22419_v19  ;;  %v6559_v30 = vld [vmem:[#allocation2 + $0xb9] sm:$0xff]  ;;  %v6560_v16 = vld [vmem:[#allocation2 + $0xc1] sm:$0xff]  ;;  %5952 = vst.msk [vmem:[#allocation2 + $0xe0] sm:$0xff] %vm1236_vm0, %v22419_v19  ;;  %v5859_v28 = vadd.f32 %v22173_v52, %v5777_v2  ;;  %v16986_v21 = vpop.f32.mrb[38].mxu0  ;;  %v22431_v10 = vpack.c.bf16 %v6066_v62, %v6065_v56  ;;  %v22438_v20 = vpack.c.bf16 %v6068_v61, %v6067_v11 }
 0xb7d   : > { %v6592_v13 = vsel %vm1235_vm8, %v6560_v16, 0.0  ;;  %v5893_v60 = vmax.f32 %v5861_v33, 0.0  ;;  %v5862_v7 = vadd.f32 %v16986_v21, %v22173_v52  ;;  %v5780_v0 = vpop.f32.mrb[39].mxu0  ;;  %17083 = vmatprep.mubr.msk.bf16.mxu1 %vm1236_vm0, %v22426_v34 }
 0xb7e   : > { %v22440_v25 = vpack.c.bf16 %v6592_v13, %v6559_v30  ;;  %v5891_v19 = vmax.f32 %v5859_v28, 0.0  ;;  %v5860_v2 = vadd.f32 %v22173_v52, %v5780_v0  ;;  %17012 = vmatmul.mubr.msk.bf16.gmra.mrb[60].mxu0 %vm1236_vm0, %v22431_v10  ;;  %v6561_v30 = vld [vmem:[#allocation2 + $0xc9] sm:$0xff] }
 0xb7f   : > { %v22445_v56 = vmin.f32 %v5893_v60, 6.0  ;;  %v5894_v16 = vmax.f32 %v5862_v7, 0.0  ;;  %17015 = vmatprep.mubr.msk.bf16.mxu0 %vm1236_vm0, %v22438_v20 }
 0xb80   : > { %v22449_v21 = vmin.f32 %v5891_v19, 6.0  ;;  %v5892_v33 = vmax.f32 %v5860_v2, 0.0  ;;  %17084 = vmatmul.mubr.msk.bf16.gmra.mrb[28].mxu1 %vm1236_vm0, %v22440_v25 }
 0xb81   : > { %25029 = vst [vmem:[#allocation93_spill] sm:$0xff] %v22445_v56  ;;  %5957 = vst.msk [vmem:[#allocation2 + $0x108] sm:$0xff] %vm1236_vm0, %v22445_v56  ;;  %v22455_v11 = vmin.f32 %v5894_v16, 6.0  ;;  %v6562_v52 = vld [vmem:[#allocation2 + $0xd1] sm:$0xff]  ;;  %v6071_v16 = vld [vmem:[#allocation2 + $0xe8] sm:$0xff] }
 0xb82   : > { %25030 = vst [vmem:[#allocation94_spill] sm:$0xff] %v22449_v21  ;;  %5955 = vst.msk [vmem:[#allocation2 + $0xf8] sm:$0xff] %vm1236_vm0, %v22449_v21  ;;  %v22459_v60 = vmin.f32 %v5892_v33, 6.0  ;;  %v6594_v13 = vsel %vm1235_vm8, %v6562_v52, 0.0  ;;  %v6069_v19 = vld [vmem:[#allocation2 + $0xd8] sm:$0xff]  ;;  %v6072_v61 = vld [vmem:[#allocation2 + $0xf0] sm:$0xff] }
 0xb83   : > { %25031 = vst [vmem:[#allocation107_spill] sm:$0xff] %v22455_v11  ;;  %5958 = vst.msk [vmem:[#allocation2 + $0x110] sm:$0xff] %vm1236_vm0, %v22455_v11  ;;  %v22465_v62 = vpack.c.bf16 %v6594_v13, %v6561_v30  ;;  %v6070_v28 = vld [vmem:[#allocation2 + $0xe0] sm:$0xff]  ;;  %v22475_v52 = vpack.c.bf16 %v6072_v61, %v6071_v16  ;;  %v5960_v13 = vld [vmem:[#allocation2 + $0xf] sm:$0xff] }
 0xb84   : > { %25032 = vst [vmem:[#allocation108_spill] sm:$0xff] %v22459_v60  ;;  %v6563_v7 = vld [vmem:[#allocation2 + $0xd9] sm:$0xff]  ;;  %v6564_v0 = vld [vmem:[#allocation2 + $0xe1] sm:$0xff]  ;;  %5956 = vst.msk [vmem:[#allocation2 + $0x100] sm:$0xff] %vm1236_vm0, %v22459_v60  ;;  %v22469_v2 = vpack.c.bf16 %v6070_v28, %v6069_v19 }
 0xb85   : > { %v6596_v33 = vsel %vm1235_vm8, %v6564_v0, 0.0  ;;  %17087 = vmatprep.mubr.msk.bf16.mxu1 %vm1236_vm0, %v22465_v62  ;;  %v5959_v30 = vld [vmem:[#allocation2 + $0x7] sm:$0xff]  ;;  %v6874_v0 = vld [vmem:[#allocation2 + $0x17] sm:$0xff] }
 0xb86   : > { %v22477_v56 = vpack.c.bf16 %v6596_v33, %v6563_v7  ;;  %17016 = vmatmul.mubr.msk.bf16.gmra.mrb[64].mxu0 %vm1236_vm0, %v22469_v2  ;;  %v5991_v19 = vsel %vm1232_vm7, %v5959_v30, 0.0  ;;  %v6565_v61 = vld [vmem:[#allocation2 + $0xe9] sm:$0xff]  ;;  %v6906_v30 = vsel %vm1232_vm7, %v6874_v0, 0.0 }
 0xb87   : > { %17019 = vmatprep.mubr.msk.bf16.mxu0 %vm1236_vm0, %v22475_v52  ;;  %v6023_v26 = vpack.c.bf16 %v5960_v13, %v5991_v19  ;;  %v5964_v19 = vld [vmem:[#allocation2 + $0x2f] sm:$0xff] }
 0xb88   : > { %17088 = vmatmul.mubr.msk.bf16.gmra.mrb[32].mxu1 %vm1236_vm0, %v22477_v56 }
 0xb89   : > { %v6566_v28 = vld [vmem:[#allocation2 + $0xf1] sm:$0xff] }
 0xb8a   : > { %v6598_v7 = vsel %vm1235_vm8, %v6566_v28, 0.0  ;;  %v6073_v16 = vld [vmem:[#allocation2 + $0xf8] sm:$0xff] }
 0xb8b   : > { %v22489_v33 = vpack.c.bf16 %v6598_v7, %v6565_v61  ;;  %v6074_v11 = vld [vmem:[#allocation2 + $0x100] sm:$0xff]  ;;  %v6938_v61 = vpack.c.bf16 %v6875_v32, %v6906_v30 }
 0xb8c   : > { %v6567_v21 = vld [vmem:[#allocation2 + $0xf9] sm:$0xff]  ;;  %v6568_v60 = vld [vmem:[#allocation2 + $0x101] sm:$0xff]  ;;  %v22491_v46 = vpack.c.bf16 %v6074_v11, %v6073_v16 }
 0xb8d   : > { %v6600_v5 = vsel %vm1235_vm8, %v6568_v60, 0.0  ;;  %17091 = vmatprep.mubr.msk.bf16.mxu1 %vm1236_vm0, %v22489_v33  ;;  %v5963_v11 = vld [vmem:[#allocation2 + $0x27] sm:$0xff]  ;;  %v6878_v60 = vld [vmem:[#allocation2 + $0x37] sm:$0xff] }
 0xb8e   : > { %v22499_v28 = vpack.c.bf16 %v6600_v5, %v6567_v21  ;;  %17020 = vmatmul.mubr.msk.bf16.gmra.mrb[68].mxu0 %vm1236_vm0, %v22491_v46  ;;  %v5995_v13 = vsel %vm1232_vm7, %v5963_v11, 0.0  ;;  %v6879_v5 = vld [vmem:[#allocation2 + $0x3f] sm:$0xff]  ;;  %v6910_v21 = vsel %vm1232_vm7, %v6878_v60, 0.0  ;;  %v5967_v7 = vld [vmem:[#allocation2 + $0x47] sm:$0xff]  ;;  %v6882_v16 = vld [vmem:[#allocation2 + $0x57] sm:$0xff] }
 0xb8f   : > { %17027 = vmatprep.mubr.msk.bf16.mxu0 %vm1236_vm0, %v6023_v26  ;;  %v22511_v0 = vpack.c.bf16 %v5964_v19, %v5995_v13  ;;  %v19215_v26 = vld [vmem:[%s25000_s18 + $0x48] sm:$0xff]   ;;  %v22519_v32 = vpack.c.bf16 %v6879_v5, %v6910_v21  ;;  %v5999_v30 = vsel %vm1232_vm7, %v5967_v7, 0.0  ;;  %v6883_v11 = vld [vmem:[#allocation2 + $0x5f] sm:$0xff]  ;;  %v6914_v60 = vsel %vm1232_vm7, %v6882_v16, 0.0  ;;  %v6886_v5 = vld [vmem:[#allocation2 + $0x77] sm:$0xff] }
 0xb90   : > { %17092 = vmatmul.mubr.msk.bf16.gmra.mrb[36].mxu1 %vm1236_vm0, %v22499_v28  ;;  %v5971_v19 = vld [vmem:[#allocation2 + $0x67] sm:$0xff]  ;;  %v6887_v7 = vld [vmem:[#allocation2 + $0x7f] sm:$0xff]  ;;  %v6918_v16 = vsel %vm1232_vm7, %v6886_v5, 0.0  ;;  %v5976_v5 = vld [vmem:[#allocation2 + $0x8f] sm:$0xff] }
 0xb91   : > { %17099 = vmatprep.mubr.msk.bf16.mxu1 %vm1236_vm0, %v6938_v61  ;;  %v6003_v21 = vsel %vm1232_vm7, %v5971_v19, 0.0 }
 0xb96   : > { %17028 = vmatmul.mubr.msk.bf16.vlgmr.msra.gmra.mrb[40].mxu0 %vm1236_vm0, %v6938_v61  ;;  %v5968_v61 = vld [vmem:[#allocation2 + $0x4f] sm:$0xff] }
 0xb97   : > { %17312 = vmatpush3.xpose.msk.msra.mxu0 %vm8935_vm9, %v22244_v37  ;;  %17031 = vmatprep.mubr.msk.bf16.mxu0 %vm1236_vm0, %v22511_v0  ;;  %v22529_v37 = vld [vmem:[%s25000_s18 + $0x50] sm:$0xff]   ;;  %v22533_v13 = vpack.c.bf16 %v5968_v61, %v5999_v30  ;;  %v22556_v61 = vpack.c.bf16 %v6887_v7, %v6918_v16  ;;  %v5979_v16 = vld [vmem:[#allocation2 + $0xa7] sm:$0xff] }
 0xb98   : > { %17100 = vmatmul.mubr.msk.bf16.vlgmr.msra.gmra.mrb[8].mxu1 %vm1236_vm0, %v22511_v0 }
 0xb99   : > { %17103 = vmatprep.mubr.msk.bf16.mxu1 %vm1236_vm0, %v22519_v32  ;;  %17132 = vmatpush3.bf16.msra.mxu1 %v22252_v58  ;;  %v22540_v58 = vpack.c.bf16 %v6883_v11, %v6914_v60  ;;  %v5975_v11 = vld [vmem:[#allocation2 + $0x87] sm:$0xff]  ;;  %v6890_v60 = vld [vmem:[#allocation2 + $0x97] sm:$0xff] }
 0xb9a   : > { %17133 = vmatprep.subr.bf16.mxu1 %v19215_v26  ;;  %v6007_v19 = vsel %vm1232_vm7, %v5975_v11, 0.0  ;;  %v6894_v11 = vld [vmem:[#allocation2 + $0xb7] sm:$0xff] }
 0xb9b   : > { %v22566_v15 = vpack.c.bf16 %v5976_v5, %v6007_v19  ;;  %v5980_v19 = vld [vmem:[#allocation2 + $0xaf] sm:$0xff]  ;;  %v6895_v5 = vld [vmem:[#allocation2 + $0xbf] sm:$0xff]  ;;  %v6926_v41 = vsel %vm1232_vm7, %v6894_v11, 0.0 }
 0xb9d   : > { %17134 = vmatpush3.bf16.msra.mxu1 %v19215_v26  ;;  %v5972_v26 = vld [vmem:[#allocation2 + $0x6f] sm:$0xff] }
 0xb9e   : > { %17032 = vmatmul.mubr.msk.bf16.gmra.mrb[44].mxu0 %vm1236_vm0, %v22519_v32  ;;  %17167 = vmatprep.subr.bf16.mxu1 %v22529_v37  ;;  %v22550_v30 = vpack.c.bf16 %v5972_v26, %v6003_v21  ;;  %v6891_v21 = vld [vmem:[#allocation2 + $0x9f] sm:$0xff]  ;;  %v6922_v26 = vsel %vm1232_vm7, %v6890_v60, 0.0  ;;  %v6011_v60 = vsel %vm1232_vm7, %v5979_v16, 0.0  ;;  %v6898_v16 = vld [vmem:[#allocation2 + $0xd7] sm:$0xff] }
 0xb9f   : > { %17035 = vmatprep.mubr.msk.bf16.mxu0 %vm1236_vm0, %v22533_v13  ;;  %v22572_v7 = vpack.c.bf16 %v6891_v21, %v6922_v26  ;;  %v22582_v35 = vpack.c.bf16 %v5980_v19, %v6011_v60  ;;  %v22588_v21 = vpack.c.bf16 %v6895_v5, %v6926_v41  ;;  %v5983_v26 = vld [vmem:[#allocation2 + $0xc7] sm:$0xff]  ;;  %v5984_v60 = vld [vmem:[#allocation2 + $0xcf] sm:$0xff]  ;;  %v6899_v19 = vld [vmem:[#allocation2 + $0xdf] sm:$0xff]  ;;  %v6930_v4 = vsel %vm1232_vm7, %v6898_v16, 0.0 }
 0xba0   : > { %17104 = vmatmul.mubr.msk.bf16.gmra.mrb[12].mxu1 %vm1236_vm0, %v22533_v13  ;;  %v6015_v11 = vsel %vm1232_vm7, %v5983_v26, 0.0  ;;  %v22604_v41 = vpack.c.bf16 %v6899_v19, %v6930_v4  ;;  %v5987_v5 = vld [vmem:[#allocation2 + $0xe7] sm:$0xff]  ;;  %v6902_v26 = vld [vmem:[#allocation2 + $0xf7] sm:$0xff] }
 0xba1   : > { %17107 = vmatprep.mubr.msk.bf16.mxu1 %vm1236_vm0, %v22540_v58  ;;  %v22598_v9 = vpack.c.bf16 %v5984_v60, %v6015_v11  ;;  %v6019_v16 = vsel %vm1232_vm7, %v5987_v5, 0.0  ;;  %v5988_v11 = vld [vmem:[#allocation2 + $0xef] sm:$0xff]  ;;  %v6903_v60 = vld [vmem:[#allocation2 + $0xff] sm:$0xff]  ;;  %v6934_v29 = vsel %vm1232_vm7, %v6902_v26, 0.0  ;;  %v6904_v19 = vld [vmem:[#allocation2 + $0x107] sm:$0xff] }
 0xba2   : > { %v22614_v1 = vpack.c.bf16 %v5988_v11, %v6019_v16  ;;  %v22620_v4 = vpack.c.bf16 %v6903_v60, %v6934_v29  ;;  %v6936_v5 = vsel %vm1232_vm7, %v6904_v19, 0.0  ;;  %v6905_v26 = vld [vmem:[#allocation2 + $0x10f] sm:$0xff]  ;;  %v19217_v29 = vld [vmem:[%s25000_s18 + $0x58] sm:$0xff]   ;;  %v19218_v11 = vld [vmem:[%s25000_s18 + $0x60] sm:$0xff]  }
 0xba3   : > { %v22630_v16 = vpack.c.bf16 %v6905_v26, %v6936_v5  ;;  %v8192_v19 = vld [vmem:[#allocation2 + $0x38] sm:$0xff]  ;;  %v8194_v26 = vld [vmem:[#allocation2 + $0x48] sm:$0xff] }
 0xba6   : > { %17036 = vmatmul.mubr.msk.bf16.gmra.mrb[48].mxu0 %vm1236_vm0, %v22540_v58 }
 0xba7   : > { %17039 = vmatprep.mubr.msk.bf16.mxu0 %vm1236_vm0, %v22550_v30 }
 0xba8   : > { %17108 = vmatmul.mubr.msk.bf16.gmra.mrb[16].mxu1 %vm1236_vm0, %v22550_v30 }
 0xba9   : > { %17111 = vmatprep.mubr.msk.bf16.mxu1 %vm1236_vm0, %v22556_v61 }
 0xbae   : > { %17040 = vmatmul.mubr.msk.bf16.gmra.mrb[52].mxu0 %vm1236_vm0, %v22556_v61 }
 0xbaf   : > { %17043 = vmatprep.mubr.msk.bf16.mxu0 %vm1236_vm0, %v22566_v15 }
 0xbb0   : > { %17112 = vmatmul.mubr.msk.bf16.gmra.mrb[20].mxu1 %vm1236_vm0, %v22566_v15 }
 0xbb1   : > { %17115 = vmatprep.mubr.msk.bf16.mxu1 %vm1236_vm0, %v22572_v7 }
 0xbb6   : > { %17044 = vmatmul.mubr.msk.bf16.gmra.mrb[56].mxu0 %vm1236_vm0, %v22572_v7 }
 0xbb7   : > { %17047 = vmatprep.mubr.msk.bf16.mxu0 %vm1236_vm0, %v22582_v35 }
 0xbb8   : > { %17116 = vmatmul.mubr.msk.bf16.gmra.mrb[24].mxu1 %vm1236_vm0, %v22582_v35 }
 0xbb9   : > { %17119 = vmatprep.mubr.msk.bf16.mxu1 %vm1236_vm0, %v22588_v21 }
 0xbbe   : > { %17048 = vmatmul.mubr.msk.bf16.gmra.mrb[60].mxu0 %vm1236_vm0, %v22588_v21 }
 0xbbf   : > { %17051 = vmatprep.mubr.msk.bf16.mxu0 %vm1236_vm0, %v22598_v9 }
 0xbc0   : > { %17120 = vmatmul.mubr.msk.bf16.gmra.mrb[28].mxu1 %vm1236_vm0, %v22598_v9 }
 0xbc1   : > { %17123 = vmatprep.mubr.msk.bf16.mxu1 %vm1236_vm0, %v22604_v41 }
 0xbc6   : > { %17052 = vmatmul.mubr.msk.bf16.gmra.mrb[64].mxu0 %vm1236_vm0, %v22604_v41 }
 0xbc7   : > { %17055 = vmatprep.mubr.msk.bf16.mxu0 %vm1236_vm0, %v22614_v1 }
 0xbc8   : > { %17124 = vmatmul.mubr.msk.bf16.gmra.mrb[32].mxu1 %vm1236_vm0, %v22614_v1 }
 0xbc9   : > { %17127 = vmatprep.mubr.msk.bf16.mxu1 %vm1236_vm0, %v22620_v4 }
 0xbce   : > { %17056 = vmatmul.mubr.msk.bf16.gmra.mrb[68].mxu0 %vm1236_vm0, %v22620_v4 }
 0xbd0   : > { %17128 = vmatmul.mubr.msk.bf16.gmra.mrb[36].mxu1 %vm1236_vm0, %v22630_v16 }
 0xbd1   : > { %17135 = vmatprep.mubr.msk.bf16.mxu1 %vm1236_vm0, %v22220_v49  ;;  %v7242_v49 = vld [vmem:[#allocation2 + $0x110] sm:$0xff] }
 0xbd8   : > { %17136 = vmatmul.mubr.msk.bf16.vlgmr.msra.gmra.mrb[8].mxu1 %vm1236_vm0, %v22227_v51  ;;  %v7241_v51 = vld [vmem:[#allocation2 + $0x108] sm:$0xff] }
 0xbd9   : > { %17139 = vmatprep.mubr.msk.bf16.mxu1 %vm1236_vm0, %v22270_v44  ;;  %17168 = vmatpush3.bf16.msra.mxu1 %v22529_v37  ;;  %v22667_v44 = vpack.c.bf16 %v7242_v49, %v7241_v51  ;;  %v8190_v37 = vld [vmem:[#allocation2 + $0x28] sm:$0xff] }
 0xbda   : > { %17169 = vmatprep.subr.bf16.mxu1 %v19217_v29 }
 0xbdd   : > { %17170 = vmatpush3.bf16.msra.mxu1 %v19217_v29 }
 0xbde   : > { %17203 = vmatprep.subr.bf16.mxu1 %v19218_v11 }
 0xbe0   : > { %17140 = vmatmul.mubr.msk.bf16.gmra.mrb[12].mxu1 %vm1236_vm0, %v22277_v6  ;;  %v19219_v6 = vld [vmem:[%s25000_s18 + $0x68] sm:$0xff]  }
 0xbe1   : > { %17143 = vmatprep.mubr.msk.bf16.mxu1 %vm1236_vm0, %v22311_v14  ;;  %v19220_v14 = vld [vmem:[%s25000_s18 + $0x70] sm:$0xff]  }
 0xbe8   : > { %17144 = vmatmul.mubr.msk.bf16.gmra.mrb[16].mxu1 %vm1236_vm0, %v22318_v27  ;;  %v19221_v27 = vld [vmem:[%s25000_s18 + $0x78] sm:$0xff]  }
 0xbe9   : > { %17147 = vmatprep.mubr.msk.bf16.mxu1 %vm1236_vm0, %v22351_v3 }
 0xbf0   : > { %17148 = vmatmul.mubr.msk.bf16.gmra.mrb[20].mxu1 %vm1236_vm0, %v22358_v63 }
 0xbf1   : > { %17151 = vmatprep.mubr.msk.bf16.mxu1 %vm1236_vm0, %v22391_v45 }
 0xbf8   : > { %17152 = vmatmul.mubr.msk.bf16.gmra.mrb[24].mxu1 %vm1236_vm0, %v22398_v22 }
 0xbf9   : > { %17155 = vmatprep.mubr.msk.bf16.mxu1 %vm1236_vm0, %v22431_v10 }
 0xc00   : > { %17156 = vmatmul.mubr.msk.bf16.gmra.mrb[28].mxu1 %vm1236_vm0, %v22438_v20 }
 0xc01   : > { %17159 = vmatprep.mubr.msk.bf16.mxu1 %vm1236_vm0, %v22469_v2 }
 0xc08   : > { %17160 = vmatmul.mubr.msk.bf16.gmra.mrb[32].mxu1 %vm1236_vm0, %v22475_v52  ;;  %v7884_v52 = vld [vmem:[#allocation2 + $0x11f] sm:$0xff] }
 0xc09   : > { %17163 = vmatprep.mubr.msk.bf16.mxu1 %vm1236_vm0, %v22491_v46 }
 0xc10   : > { %17164 = vmatmul.mubr.msk.bf16.gmra.mrb[36].mxu1 %vm1236_vm0, %v22667_v44 }
 0xc11   : > { %17171 = vmatprep.mubr.msk.bf16.mxu1 %vm1236_vm0, %v22229_v8  ;;  %v7547_v8 = vld [vmem:[#allocation2 + $0x111] sm:$0xff] }
 0xc18   : > { %17172 = vmatmul.mubr.msk.bf16.vlgmr.msra.gmra.mrb[8].mxu1 %vm1236_vm0, %v22263_v43  ;;  %v7546_v43 = vld [vmem:[#allocation2 + $0x109] sm:$0xff] }
 0xc19   : > { %17175 = vmatprep.mubr.msk.bf16.mxu1 %vm1236_vm0, %v22279_v24  ;;  %17204 = vmatpush3.bf16.msra.mxu1 %v19218_v11  ;;  %v7579_v24 = vsel %vm1235_vm8, %v7547_v8, 0.0 }
 0xc1a   : > { %17205 = vmatprep.subr.bf16.mxu1 %v19219_v6 }
 0xc1d   : > { %17206 = vmatpush3.bf16.msra.mxu1 %v19219_v6  ;;  %v8197_v6 = vld [vmem:[#allocation2 + $0x60] sm:$0xff] }
 0xc1e   : > { %17239 = vmatprep.subr.bf16.mxu1 %v19220_v14 }
 0xc20   : > { %17176 = vmatmul.mubr.msk.bf16.gmra.mrb[12].mxu1 %vm1236_vm0, %v22306_v23  ;;  %v22705_v23 = vpack.c.bf16 %v7579_v24, %v7546_v43  ;;  %v8199_v43 = vld [vmem:[#allocation2 + $0x70] sm:$0xff]  ;;  %v8196_v24 = vld [vmem:[#allocation2 + $0x58] sm:$0xff] }
 0xc21   : > { %17179 = vmatprep.mubr.msk.bf16.mxu1 %vm1236_vm0, %v22320_v42  ;;  %v19222_v42 = vld [vmem:[%s25000_s18 + $0x80] sm:$0xff]  }
 0xc28   : > { %17180 = vmatmul.mubr.msk.bf16.gmra.mrb[16].mxu1 %vm1236_vm0, %v22346_v53 }
 0xc29   : > { %17183 = vmatprep.mubr.msk.bf16.mxu1 %vm1236_vm0, %v22360_v47 }
 0xc30   : > { %17184 = vmatmul.mubr.msk.bf16.gmra.mrb[20].mxu1 %vm1236_vm0, %v22386_v50 }
 0xc31   : > { %17187 = vmatprep.mubr.msk.bf16.mxu1 %vm1236_vm0, %v22400_v18 }
 0xc38   : > { %17188 = vmatmul.mubr.msk.bf16.gmra.mrb[24].mxu1 %vm1236_vm0, %v22426_v34 }
 0xc39   : > { %17191 = vmatprep.mubr.msk.bf16.mxu1 %vm1236_vm0, %v22440_v25 }
 0xc40   : > { %17192 = vmatmul.mubr.msk.bf16.gmra.mrb[28].mxu1 %vm1236_vm0, %v22465_v62 }
 0xc41   : > { %17195 = vmatprep.mubr.msk.bf16.mxu1 %vm1236_vm0, %v22477_v56  ;;  %v7883_v56 = vld [vmem:[#allocation2 + $0x117] sm:$0xff] }
 0xc48   : > { %17196 = vmatmul.mubr.msk.bf16.gmra.mrb[32].mxu1 %vm1236_vm0, %v22489_v33  ;;  %v7915_v33 = vsel %vm1232_vm7, %v7883_v56, 0.0 }
 0xc49   : > { %17199 = vmatprep.mubr.msk.bf16.mxu1 %vm1236_vm0, %v22499_v28 }
 0xc50   : > { %17200 = vmatmul.mubr.msk.bf16.gmra.mrb[36].mxu1 %vm1236_vm0, %v22705_v23 }
 0xc51   : > { %17207 = vmatprep.mubr.msk.bf16.mxu1 %vm1236_vm0, %v22511_v0  ;;  %v8191_v0 = vld [vmem:[#allocation2 + $0x30] sm:$0xff] }
 0xc58   : > { %17208 = vmatmul.mubr.msk.bf16.vlgmr.msra.gmra.mrb[8].mxu1 %vm1236_vm0, %v22519_v32  ;;  %v7932_v32 = vpack.c.bf16 %v7884_v52, %v7915_v33 }
 0xc59   : > { %17211 = vmatprep.mubr.msk.bf16.mxu1 %vm1236_vm0, %v22533_v13  ;;  %17240 = vmatpush3.bf16.msra.mxu1 %v19220_v14  ;;  %v8222_v13 = vpack.c.bf16 %v8191_v0, %v8190_v37 }
 0xc5a   : > { %17241 = vmatprep.subr.bf16.mxu1 %v19221_v27 }
 0xc5d   : > { %17242 = vmatpush3.bf16.msra.mxu1 %v19221_v27  ;;  %v8225_v27 = vpack.c.bf16 %v8197_v6, %v8196_v24  ;;  %v8209_v6 = vld [vmem:[#allocation2 + $0xc0] sm:$0xff]  ;;  %v8208_v24 = vld [vmem:[#allocation2 + $0xb8] sm:$0xff] }
 0xc5e   : > { %17275 = vmatprep.subr.bf16.mxu1 %v19222_v42 }
 0xc60   : > { %17212 = vmatmul.mubr.msk.bf16.gmra.mrb[12].mxu1 %vm1236_vm0, %v22540_v58  ;;  %v15119_v58 = vld [vmem:[#allocation15] ss:$0 sm:$0xff] }
 0xc61   : > { %17215 = vmatprep.mubr.msk.bf16.mxu1 %vm1236_vm0, %v22550_v30 }
 0xc68   : > { %17216 = vmatmul.mubr.msk.bf16.gmra.mrb[16].mxu1 %vm1236_vm0, %v22556_v61 }
 0xc69   : > { %17219 = vmatprep.mubr.msk.bf16.mxu1 %vm1236_vm0, %v22566_v15  ;;  %v22725_v46 = vpop.f32.mrb[40].mxu0 }
 0xc6a   : > { %v22727_v53 = vpop.f32.mrb[41].mxu0 }
 0xc6b   : > { %v22729_v3 = vpop.f32.mrb[42].mxu0 }
 0xc6c   : > { %v22731_v63 = vpop.f32.mrb[43].mxu0 }
 0xc70   : > { %17220 = vmatmul.mubr.msk.bf16.gmra.mrb[20].mxu1 %vm1236_vm0, %v22572_v7 }
 0xc71   : > { %17223 = vmatprep.mubr.msk.bf16.mxu1 %vm1236_vm0, %v22582_v35  ;;  %v22737_v47 = vpop.f32.mrb[44].mxu0 }
 0xc72   : > { %v22739_v25 = vpop.f32.mrb[45].mxu0 }
 0xc73   : > { %v22741_v50 = vpop.f32.mrb[46].mxu0 }
 0xc74   : > { %v22743_v15 = vpop.f32.mrb[47].mxu0 }
 0xc78   : > { %17224 = vmatmul.mubr.msk.bf16.gmra.mrb[24].mxu1 %vm1236_vm0, %v22588_v21  ;;  %v8193_v21 = vld [vmem:[#allocation2 + $0x40] sm:$0xff] }
 0xc79   : > { %17227 = vmatprep.mubr.msk.bf16.mxu1 %vm1236_vm0, %v22598_v9  ;;  %v22749_v45 = vpop.f32.mrb[48].mxu0  ;;  %v8223_v5 = vpack.c.bf16 %v8193_v21, %v8192_v19  ;;  %v8205_v19 = vld [vmem:[#allocation2 + $0xa0] sm:$0xff] }
 0xc7a   : > { %v22751_v22 = vpop.f32.mrb[49].mxu0 }
 0xc7b   : > { %v22753_v18 = vpop.f32.mrb[50].mxu0 }
 0xc7c   : > { %v22755_v35 = vpop.f32.mrb[51].mxu0 }
 0xc80   : > { %17228 = vmatmul.mubr.msk.bf16.gmra.mrb[28].mxu1 %vm1236_vm0, %v22604_v41  ;;  %v2179_v41 = vadd.f32 %v15119_v58, %v21972_v38  ;;  %v8200_v58 = vld [vmem:[#allocation2 + $0x78] sm:$0xff] }
 0xc81   : > { %17231 = vmatprep.mubr.msk.bf16.mxu1 %vm1236_vm0, %v22614_v1  ;;  %v22761_v34 = vpop.f32.mrb[52].mxu0 }
 0xc82   : > { %v22763_v10 = vpop.f32.mrb[53].mxu0  ;;  %v2182_v11 = vmax.f32 %v2179_v41, 0.0  ;;  %v8202_v41 = vld [vmem:[#allocation2 + $0x88] sm:$0xff] }
 0xc83   : > { %v22765_v20 = vpop.f32.mrb[54].mxu0 }
 0xc84   : > { %v22767_v9 = vpop.f32.mrb[55].mxu0  ;;  %v22803_v14 = vmin.f32 %v2182_v11, 6.0 }
 0xc88   : > { %17232 = vmatmul.mubr.msk.bf16.gmra.mrb[32].mxu1 %vm1236_vm0, %v22620_v4  ;;  %v8195_v4 = vld [vmem:[#allocation2 + $0x50] sm:$0xff] }
 0xc89   : > { %17235 = vmatprep.mubr.msk.bf16.mxu1 %vm1236_vm0, %v22630_v16  ;;  %v22773_v62 = vpop.f32.mrb[56].mxu0  ;;  %v19223_v16 = vld [vmem:[%s25000_s18 + $0x88] sm:$0xff]   ;;  %v8224_v29 = vpack.c.bf16 %v8195_v4, %v8194_v26  ;;  %v8204_v26 = vld [vmem:[#allocation2 + $0x98] sm:$0xff] }
 0xc8a   : > { %v22775_v2 = vpop.f32.mrb[57].mxu0 }
 0xc8b   : > { %v22777_v1 = vpop.f32.mrb[58].mxu0 }
 0xc8c   : > { %v22781_v28 = vpop.f32.mrb[59].mxu0 }
 0xc90   : > { %17236 = vmatmul.mubr.msk.bf16.gmra.mrb[36].mxu1 %vm1236_vm0, %v7932_v32  ;;  %v8201_v32 = vld [vmem:[#allocation2 + $0x80] sm:$0xff] }
 0xc91   : > { %17243 = vmatprep.mubr.msk.bf16.mxu1 %vm1236_vm0, %v8222_v13  ;;  %v22785_v30 = vpop.f32.mrb[60].mxu0  ;;  %v8203_v13 = vld [vmem:[#allocation2 + $0x90] sm:$0xff]  ;;  %v8227_v21 = vpack.c.bf16 %v8201_v32, %v8200_v58  ;;  %v8213_v32 = vld [vmem:[#allocation2 + $0xe0] sm:$0xff]  ;;  %v8212_v58 = vld [vmem:[#allocation2 + $0xd8] sm:$0xff] }
 0xc92   : > { %v22787_v61 = vpop.f32.mrb[61].mxu0  ;;  %v8228_v4 = vpack.c.bf16 %v8203_v13, %v8202_v41  ;;  %v8215_v13 = vld [vmem:[#allocation2 + $0xf0] sm:$0xff]  ;;  %v8214_v41 = vld [vmem:[#allocation2 + $0xe8] sm:$0xff] }
 0xc93   : > { %v22789_v7 = vpop.f32.mrb[62].mxu0 }
 0xc94   : > { %v22792_v60 = vpop.f32.mrb[63].mxu0 }
 0xc98   : > { %17244 = vmatmul.mubr.msk.bf16.vlgmr.msra.gmra.mrb[8].mxu1 %vm1236_vm0, %v8223_v5  ;;  %v8207_v5 = vld [vmem:[#allocation2 + $0xb0] sm:$0xff] }
 0xc99   : > { %17276 = vmatpush3.bf16.msra.mxu1 %v19222_v42  ;;  %17247 = vmatprep.mubr.msk.bf16.mxu1 %vm1236_vm0, %v8224_v29  ;;  %v22797_v49 = vpop.f32.mrb[64].mxu0  ;;  %v8198_v42 = vld [vmem:[#allocation2 + $0x68] sm:$0xff] }
 0xc9a   : > { %v22799_v51 = vpop.f32.mrb[65].mxu0  ;;  %17277 = vmatprep.subr.bf16.mxu1 %v19223_v16  ;;  %v8226_v56 = vpack.c.bf16 %v8199_v43, %v8198_v42  ;;  %v8206_v29 = vld [vmem:[#allocation2 + $0xa8] sm:$0xff]  ;;  %v8211_v43 = vld [vmem:[#allocation2 + $0xd0] sm:$0xff] }
 0xc9b   : > { %v22801_v38 = vpop.f32.mrb[66].mxu0  ;;  %v8230_v11 = vpack.c.bf16 %v8207_v5, %v8206_v29  ;;  %v8210_v42 = vld [vmem:[#allocation2 + $0xc8] sm:$0xff]  ;;  %v8216_v5 = vld [vmem:[#allocation2 + $0xf8] sm:$0xff]  ;;  %v8221_v29 = vld [vmem:[#allocation2 + $0x120] sm:$0xff] }
 0xc9c   : > { %v22805_v8 = vpop.f32.mrb[67].mxu0 }
 0xc9d   : > { %17278 = vmatpush3.bf16.msra.mxu1 %v19223_v16  ;;  %v8229_v16 = vpack.c.bf16 %v8205_v19, %v8204_v26  ;;  %v8217_v19 = vld [vmem:[#allocation2 + $0x100] sm:$0xff] }
 0xc9e   : > { %17361 = vmatprep.subr.msk.mxu1 %vm9656_vm10, %v22803_v14  ;;  %v8235_v26 = vpack.c.bf16 %v8217_v19, %v8216_v5  ;;  %v8504_v19 = vld [vmem:[#allocation2 + $0x71] sm:$0xff]  ;;  %v8501_v5 = vld [vmem:[#allocation2 + $0x59] sm:$0xff] }
 0xca0   : > { %17248 = vmatmul.mubr.msk.bf16.gmra.mrb[12].mxu1 %vm1236_vm0, %v8225_v27  ;;  %v8231_v27 = vpack.c.bf16 %v8209_v6, %v8208_v24  ;;  %v8495_v24 = vld [vmem:[#allocation2 + $0x29] sm:$0xff] }
 0xca1   : > { %17251 = vmatprep.mubr.msk.bf16.mxu1 %vm1236_vm0, %v8226_v56  ;;  %v22811_v52 = vpop.f32.mrb[68].mxu0  ;;  %v8232_v56 = vpack.c.bf16 %v8211_v43, %v8210_v42  ;;  %v8498_v42 = vld [vmem:[#allocation2 + $0x41] sm:$0xff] }
 0xca2   : > { %v22813_v33 = vpop.f32.mrb[69].mxu0 }
 0xca3   : > { %v22815_v0 = vpop.f32.mrb[70].mxu0 }
 0xca4   : > { %v22817_v37 = vpop.f32.mrb[71].mxu0 }
 0xca8   : > { %17252 = vmatmul.mubr.msk.bf16.gmra.mrb[16].mxu1 %vm1236_vm0, %v8227_v21  ;;  %v8233_v21 = vpack.c.bf16 %v8213_v32, %v8212_v58  ;;  %v8497_v32 = vld [vmem:[#allocation2 + $0x39] sm:$0xff] }
 0xca9   : > { %17255 = vmatprep.mubr.msk.bf16.mxu1 %vm1236_vm0, %v8228_v4  ;;  %v8234_v4 = vpack.c.bf16 %v8215_v13, %v8214_v41  ;;  %v8530_v13 = vsel %vm1235_vm8, %v8498_v42, 0.0 }
 0xcaa   : > { %v8560_v58 = vpack.c.bf16 %v8530_v13, %v8497_v32  ;;  %v8507_v32 = vld [vmem:[#allocation2 + $0x89] sm:$0xff] }
 0xcb0   : > { %17256 = vmatmul.mubr.msk.bf16.gmra.mrb[20].mxu1 %vm1236_vm0, %v8229_v16  ;;  %v8220_v16 = vld [vmem:[#allocation2 + $0x118] sm:$0xff] }
 0xcb1   : > { %17259 = vmatprep.mubr.msk.bf16.mxu1 %vm1236_vm0, %v8230_v11  ;;  %v8496_v11 = vld [vmem:[#allocation2 + $0x31] sm:$0xff]  ;;  %v8237_v6 = vpack.c.bf16 %v8221_v29, %v8220_v16  ;;  %v8536_v16 = vsel %vm1235_vm8, %v8504_v19, 0.0 }
 0xcb2   : > { %v8528_v43 = vsel %vm1235_vm8, %v8496_v11, 0.0  ;;  %v8503_v11 = vld [vmem:[#allocation2 + $0x69] sm:$0xff] }
 0xcb8   : > { %17260 = vmatmul.mubr.msk.bf16.gmra.mrb[24].mxu1 %vm1236_vm0, %v8231_v27  ;;  %v8559_v27 = vpack.c.bf16 %v8528_v43, %v8495_v24  ;;  %v8506_v43 = vld [vmem:[#allocation2 + $0x81] sm:$0xff]  ;;  %v8508_v24 = vld [vmem:[#allocation2 + $0x91] sm:$0xff] }
 0xcb9   : > { %17263 = vmatprep.mubr.msk.bf16.mxu1 %vm1236_vm0, %v8232_v56  ;;  %v8500_v56 = vld [vmem:[#allocation2 + $0x51] sm:$0xff]  ;;  %v8540_v42 = vsel %vm1235_vm8, %v8508_v24, 0.0 }
 0xcba   : > { %v8565_v13 = vpack.c.bf16 %v8540_v42, %v8507_v32  ;;  %v8518_v42 = vld [vmem:[#allocation2 + $0xe1] sm:$0xff]  ;;  %v8517_v32 = vld [vmem:[#allocation2 + $0xd9] sm:$0xff] }
 0xcc0   : > { %17264 = vmatmul.mubr.msk.bf16.gmra.mrb[28].mxu1 %vm1236_vm0, %v8233_v21  ;;  %v8499_v21 = vld [vmem:[#allocation2 + $0x49] sm:$0xff] }
 0xcc1   : > { %17267 = vmatprep.mubr.msk.bf16.mxu1 %vm1236_vm0, %v8234_v4  ;;  %v8502_v4 = vld [vmem:[#allocation2 + $0x61] sm:$0xff] }
 0xcc8   : > { %17268 = vmatmul.mubr.msk.bf16.gmra.mrb[32].mxu1 %vm1236_vm0, %v8235_v26  ;;  %v8534_v26 = vsel %vm1235_vm8, %v8502_v4, 0.0 }
 0xcc9   : > { %17271 = vmatprep.mubr.msk.bf16.mxu1 %vm1236_vm0, %v22667_v44  ;;  %v8532_v44 = vsel %vm1235_vm8, %v8500_v56, 0.0  ;;  %v8562_v29 = vpack.c.bf16 %v8534_v26, %v8501_v5  ;;  %v8511_v5 = vld [vmem:[#allocation2 + $0xa9] sm:$0xff] }
 0xcca   : > { %v8561_v41 = vpack.c.bf16 %v8532_v44, %v8499_v21  ;;  %v8510_v44 = vld [vmem:[#allocation2 + $0xa1] sm:$0xff]  ;;  %v8509_v21 = vld [vmem:[#allocation2 + $0x99] sm:$0xff] }
 0xcd0   : > { %17272 = vmatmul.mubr.msk.bf16.gmra.mrb[36].mxu1 %vm1236_vm0, %v8237_v6  ;;  %v8563_v6 = vpack.c.bf16 %v8536_v16, %v8503_v11  ;;  %v8514_v16 = vld [vmem:[#allocation2 + $0xc1] sm:$0xff]  ;;  %v8513_v11 = vld [vmem:[#allocation2 + $0xb9] sm:$0xff] }
 0xcd1   : > { %17279 = vmatprep.mubr.msk.bf16.mxu1 %vm1236_vm0, %v8559_v27  ;;  %v8538_v27 = vsel %vm1235_vm8, %v8506_v43, 0.0 }
 0xcd8   : > { %17280 = vmatmul.mubr.msk.bf16.vlgmr.msra.gmra.mrb[8].mxu1 %vm1236_vm0, %v8560_v58  ;;  %v8512_v58 = vld [vmem:[#allocation2 + $0xb1] sm:$0xff] }
 0xcd9   : > { %17362 = vmatpush3.msk.msra.mxu1 %vm9656_vm10, %v22803_v14  ;;  %17283 = vmatprep.mubr.msk.bf16.mxu1 %vm1236_vm0, %v8561_v41  ;;  %v8505_v14 = vld [vmem:[#allocation2 + $0x79] sm:$0xff]  ;;  %v8542_v41 = vsel %vm1235_vm8, %v8510_v44, 0.0  ;;  %v8544_v4 = vsel %vm1235_vm8, %v8512_v58, 0.0 }
 0xcda   : > { %v8564_v56 = vpack.c.bf16 %v8538_v27, %v8505_v14  ;;  %v8566_v19 = vpack.c.bf16 %v8542_v41, %v8509_v21  ;;  %v8567_v26 = vpack.c.bf16 %v8544_v4, %v8511_v5  ;;  %v8515_v14 = vld [vmem:[#allocation2 + $0xc9] sm:$0xff]  ;;  %v8522_v4 = vld [vmem:[#allocation2 + $0x101] sm:$0xff] }
 0xcdb   : > { %v8519_v21 = vld [vmem:[#allocation2 + $0xe9] sm:$0xff]  ;;  %v8554_v5 = vsel %vm1235_vm8, %v8522_v4, 0.0 }
 0xce0   : > { %17284 = vmatmul.mubr.msk.bf16.gmra.mrb[12].mxu1 %vm1236_vm0, %v8562_v29  ;;  %v8516_v29 = vld [vmem:[#allocation2 + $0xd1] sm:$0xff] }
 0xce1   : > { %17287 = vmatprep.mubr.msk.bf16.mxu1 %vm1236_vm0, %v8563_v6  ;;  %v8546_v6 = vsel %vm1235_vm8, %v8514_v16, 0.0  ;;  %v8548_v43 = vsel %vm1235_vm8, %v8516_v29, 0.0  ;;  %v8526_v16 = vld [vmem:[#allocation2 + $0x121] sm:$0xff]  ;;  %v8525_v29 = vld [vmem:[#allocation2 + $0x119] sm:$0xff] }
 0xce2   : > { %v8568_v24 = vpack.c.bf16 %v8546_v6, %v8513_v11  ;;  %v8569_v27 = vpack.c.bf16 %v8548_v43, %v8515_v14  ;;  %v8558_v11 = vsel %vm1235_vm8, %v8526_v16, 0.0 }
 0xce3   : > { %v8574_v6 = vpack.c.bf16 %v8558_v11, %v8525_v29 }
 0xce8   : > { %17288 = vmatmul.mubr.msk.bf16.gmra.mrb[16].mxu1 %vm1236_vm0, %v8564_v56  ;;  %v8520_v56 = vld [vmem:[#allocation2 + $0xf1] sm:$0xff] }
 0xce9   : > { %17291 = vmatprep.mubr.msk.bf16.mxu1 %vm1236_vm0, %v8565_v13  ;;  %v8550_v13 = vsel %vm1235_vm8, %v8518_v42, 0.0  ;;  %v8552_v44 = vsel %vm1235_vm8, %v8520_v56, 0.0 }
 0xcea   : > { %v8570_v58 = vpack.c.bf16 %v8550_v13, %v8517_v32  ;;  %v8571_v41 = vpack.c.bf16 %v8552_v44, %v8519_v21 }
 0xcf0   : > { %17292 = vmatmul.mubr.msk.bf16.gmra.mrb[20].mxu1 %vm1236_vm0, %v8566_v19  ;;  %v8521_v19 = vld [vmem:[#allocation2 + $0xf9] sm:$0xff] }
 0xcf1   : > { %17295 = vmatprep.mubr.msk.bf16.mxu1 %vm1236_vm0, %v8567_v26  ;;  %v8572_v26 = vpack.c.bf16 %v8554_v5, %v8521_v19 }
 0xcf8   : > { %17296 = vmatmul.mubr.msk.bf16.gmra.mrb[24].mxu1 %vm1236_vm0, %v8568_v24  ;;  %v22881_v24 = vld [vmem:[%s25033_s7] ss:$0 sm:$0xff] }
 0xcf9   : > { %17299 = vmatprep.mubr.msk.bf16.mxu1 %vm1236_vm0, %v8569_v27 }
 0xd00   : > { %17300 = vmatmul.mubr.msk.bf16.gmra.mrb[28].mxu1 %vm1236_vm0, %v8570_v58 }
 0xd01   : > { %17303 = vmatprep.mubr.msk.bf16.mxu1 %vm1236_vm0, %v8571_v41 }
 0xd08   : > { %17304 = vmatmul.mubr.msk.bf16.gmra.mrb[32].mxu1 %vm1236_vm0, %v8572_v26 }
 0xd09   : > { %17307 = vmatprep.mubr.msk.bf16.mxu1 %vm1236_vm0, %v22705_v23 }
 0xd10   : > { %17308 = vmatmul.mubr.msk.bf16.gmra.mrb[36].mxu1 %vm1236_vm0, %v8574_v6 }
 0xdab   : > { %v17281_v43 = vpop.f32.mrb[8].mxu1 }
 0xdac   : > { %v18139_v14 = vadd.f32 %v17281_v43, %v22725_v46  ;;  %v8673_v27 = vpop.f32.mrb[9].mxu1 }
 0xdad   : > { %v18140_v42 = vadd.f32 %v8673_v27, %v22727_v53  ;;  %v17282_v56 = vpop.f32.mrb[10].mxu1 }
 0xdae   : > { %v8841_v32 = vadd.f32 %v18139_v14, %v22881_v24  ;;  %v18141_v23 = vadd.f32 %v17282_v56, %v22729_v3  ;;  %v8676_v13 = vpop.f32.mrb[11].mxu1 }
 0xdaf   : > { %v8839_v44 = vadd.f32 %v18140_v42, %v22881_v24  ;;  %v18142_v58 = vadd.f32 %v8676_v13, %v22731_v63 }
 0xdb0   : > { %v8842_v41 = vadd.f32 %v18141_v23, %v22881_v24  ;;  %v8873_v19 = vmax.f32 %v8841_v32, 0.0 }
 0xdb1   : > { %v8871_v21 = vmax.f32 %v8839_v44, 0.0  ;;  %v8840_v4 = vadd.f32 %v18142_v58, %v22881_v24 }
 0xdb2   : > { %v8874_v29 = vmax.f32 %v8842_v41, 0.0  ;;  %v22899_v63 = vmin.f32 %v8873_v19, 6.0 }
 0xdb3   : > { %v22891_v46 = vmin.f32 %v8871_v21, 6.0  ;;  %v8872_v5 = vmax.f32 %v8840_v4, 0.0  ;;  %v17285_v53 = vpop.f32.mrb[12].mxu1 }
 0xdb4   : > { %v18143_v26 = vadd.f32 %v17285_v53, %v22737_v47  ;;  %v8689_v16 = vpop.f32.mrb[13].mxu1 }
 0xdb5   : > { %v22894_v3 = vmin.f32 %v8872_v5, 6.0  ;;  %v18144_v11 = vadd.f32 %v8689_v16, %v22739_v25  ;;  %v17286_v6 = vpop.f32.mrb[14].mxu1  ;;  %17313 = vmatprep.mubr.msk.f32.mxu0 %vm8935_vm9, %v22891_v46  ;;  %v22909_v25 = vmin.f32 %v8874_v29, 6.0 }
 0xdb6   : > { %v8845_v43 = vadd.f32 %v18143_v26, %v22881_v24  ;;  %v18145_v14 = vadd.f32 %v17286_v6, %v22741_v50  ;;  %v8692_v27 = vpop.f32.mrb[15].mxu1 }
 0xdb7   : > { %v8843_v42 = vadd.f32 %v18144_v11, %v22881_v24  ;;  %v18146_v47 = vadd.f32 %v8692_v27, %v22743_v15  ;;  %17314 = vmatmul.mubr.msk.f32.vlgmr.msra.gmra.mrb[6].mxu0 %vm8935_vm9, %v22894_v3 }
 0xdb8   : > { %17316 = vmatprep.mubr.msk.f32.mxu0 %vm8935_vm9, %v22899_v63  ;;  %v8846_v32 = vadd.f32 %v18145_v14, %v22881_v24  ;;  %v8877_v13 = vmax.f32 %v8845_v43, 0.0 }
 0xdb9   : > { %v8875_v56 = vmax.f32 %v8843_v42, 0.0  ;;  %v8844_v23 = vadd.f32 %v18146_v47, %v22881_v24 }
 0xdba   : > { %v8878_v41 = vmax.f32 %v8846_v32, 0.0  ;;  %v22923_v53 = vmin.f32 %v8877_v13, 6.0 }
 0xdbb   : > { %v22913_v50 = vmin.f32 %v8875_v56, 6.0  ;;  %v8876_v44 = vmax.f32 %v8844_v23, 0.0  ;;  %v17289_v58 = vpop.f32.mrb[16].mxu1  ;;  %17317 = vmatmul.mubr.msk.f32.gmra.mrb[72].mxu0 %vm8935_vm9, %v22909_v25 }
 0xdbc   : > { %v18147_v15 = vadd.f32 %v17289_v58, %v22749_v45  ;;  %v8705_v21 = vpop.f32.mrb[17].mxu1 }
 0xdbd   : > { %v22918_v4 = vmin.f32 %v8876_v44, 6.0  ;;  %v18148_v19 = vadd.f32 %v8705_v21, %v22751_v22  ;;  %v17290_v5 = vpop.f32.mrb[18].mxu1  ;;  %17319 = vmatprep.mubr.msk.f32.mxu0 %vm8935_vm9, %v22913_v50  ;;  %v22933_v22 = vmin.f32 %v8878_v41, 6.0 }
 0xdbe   : > { %v8849_v26 = vadd.f32 %v18147_v15, %v22881_v24  ;;  %v18149_v16 = vadd.f32 %v17290_v5, %v22753_v18  ;;  %v8708_v29 = vpop.f32.mrb[19].mxu1 }
 0xdbf   : > { %v8847_v11 = vadd.f32 %v18148_v19, %v22881_v24  ;;  %v18150_v45 = vadd.f32 %v8708_v29, %v22755_v35  ;;  %17320 = vmatmul.mubr.msk.f32.gmra.mrb[74].mxu0 %vm8935_vm9, %v22918_v4 }
 0xdc0   : > { %17322 = vmatprep.mubr.msk.f32.mxu0 %vm8935_vm9, %v22923_v53  ;;  %v8850_v43 = vadd.f32 %v18149_v16, %v22881_v24  ;;  %v8881_v27 = vmax.f32 %v8849_v26, 0.0 }
 0xdc1   : > { %v8879_v6 = vmax.f32 %v8847_v11, 0.0  ;;  %v8848_v14 = vadd.f32 %v18150_v45, %v22881_v24 }
 0xdc2   : > { %v8882_v32 = vmax.f32 %v8850_v43, 0.0  ;;  %v22947_v58 = vmin.f32 %v8881_v27, 6.0 }
 0xdc3   : > { %v22937_v18 = vmin.f32 %v8879_v6, 6.0  ;;  %v8880_v42 = vmax.f32 %v8848_v14, 0.0  ;;  %v17293_v47 = vpop.f32.mrb[20].mxu1  ;;  %17323 = vmatmul.mubr.msk.f32.gmra.mrb[76].mxu0 %vm8935_vm9, %v22933_v22 }
 0xdc4   : > { %v18151_v35 = vadd.f32 %v17293_v47, %v22761_v34  ;;  %v8721_v56 = vpop.f32.mrb[21].mxu1 }
 0xdc5   : > { %v22942_v23 = vmin.f32 %v8880_v42, 6.0  ;;  %v18152_v13 = vadd.f32 %v8721_v56, %v22763_v10  ;;  %v17294_v44 = vpop.f32.mrb[22].mxu1  ;;  %17325 = vmatprep.mubr.msk.f32.mxu0 %vm8935_vm9, %v22937_v18  ;;  %v22957_v10 = vmin.f32 %v8882_v32, 6.0 }
 0xdc6   : > { %v8853_v15 = vadd.f32 %v18151_v35, %v22881_v24  ;;  %v18153_v21 = vadd.f32 %v17294_v44, %v22765_v20  ;;  %v8724_v41 = vpop.f32.mrb[23].mxu1 }
 0xdc7   : > { %v8851_v19 = vadd.f32 %v18152_v13, %v22881_v24  ;;  %v18154_v34 = vadd.f32 %v8724_v41, %v22767_v9  ;;  %17326 = vmatmul.mubr.msk.f32.gmra.mrb[78].mxu0 %vm8935_vm9, %v22942_v23 }
 0xdc8   : > { %17328 = vmatprep.mubr.msk.f32.mxu0 %vm8935_vm9, %v22947_v58  ;;  %v8854_v26 = vadd.f32 %v18153_v21, %v22881_v24  ;;  %v8885_v29 = vmax.f32 %v8853_v15, 0.0 }
 0xdc9   : > { %v8883_v5 = vmax.f32 %v8851_v19, 0.0  ;;  %v8852_v16 = vadd.f32 %v18154_v34, %v22881_v24 }
 0xdca   : > { %v8886_v43 = vmax.f32 %v8854_v26, 0.0  ;;  %v22971_v47 = vmin.f32 %v8885_v29, 6.0 }
 0xdcb   : > { %v22961_v20 = vmin.f32 %v8883_v5, 6.0  ;;  %v8884_v11 = vmax.f32 %v8852_v16, 0.0  ;;  %v17297_v45 = vpop.f32.mrb[24].mxu1  ;;  %17329 = vmatmul.mubr.msk.f32.gmra.mrb[80].mxu0 %vm8935_vm9, %v22957_v10 }
 0xdcc   : > { %v18155_v9 = vadd.f32 %v17297_v45, %v22773_v62  ;;  %v8737_v6 = vpop.f32.mrb[25].mxu1  ;;  %25034 = vst [vmem:[#allocation105_spill] sm:$0xff] %v22971_v47 }
 0xdcd   : > { %v22966_v14 = vmin.f32 %v8884_v11, 6.0  ;;  %v18156_v27 = vadd.f32 %v8737_v6, %v22775_v2  ;;  %v17298_v42 = vpop.f32.mrb[26].mxu1  ;;  %17331 = vmatprep.mubr.msk.f32.mxu0 %vm8935_vm9, %v22961_v20  ;;  %v22981_v2 = vmin.f32 %v8886_v43, 6.0 }
 0xdce   : > { %v8857_v35 = vadd.f32 %v18155_v9, %v22881_v24  ;;  %v18157_v56 = vadd.f32 %v17298_v42, %v22777_v1  ;;  %v8740_v32 = vpop.f32.mrb[27].mxu1 }
 0xdcf   : > { %v8855_v13 = vadd.f32 %v18156_v27, %v22881_v24  ;;  %v18158_v62 = vadd.f32 %v8740_v32, %v22781_v28  ;;  %17332 = vmatmul.mubr.msk.f32.gmra.mrb[82].mxu0 %vm8935_vm9, %v22966_v14  ;;  %25035 = vst [vmem:[#allocation106_spill] sm:$0xff] %v22981_v2 }
 0xdd0   : > { %17334 = vmatprep.mubr.msk.f32.mxu0 %vm8935_vm9, %v22971_v47  ;;  %v8858_v15 = vadd.f32 %v18157_v56, %v22881_v24  ;;  %v8889_v41 = vmax.f32 %v8857_v35, 0.0 }
 0xdd1   : > { %v8887_v44 = vmax.f32 %v8855_v13, 0.0  ;;  %v8856_v21 = vadd.f32 %v18158_v62, %v22881_v24 }
 0xdd2   : > { %v8890_v26 = vmax.f32 %v8858_v15, 0.0  ;;  %v22995_v45 = vmin.f32 %v8889_v41, 6.0 }
 0xdd3   : > { %v22985_v1 = vmin.f32 %v8887_v44, 6.0  ;;  %v8888_v19 = vmax.f32 %v8856_v21, 0.0  ;;  %v17301_v34 = vpop.f32.mrb[28].mxu1  ;;  %17335 = vmatmul.mubr.msk.f32.gmra.mrb[84].mxu0 %vm8935_vm9, %v22981_v2 }
 0xdd4   : > { %v18159_v28 = vadd.f32 %v17301_v34, %v22785_v30  ;;  %v8753_v5 = vpop.f32.mrb[29].mxu1  ;;  %25038 = vst [vmem:[#allocation97_spill] sm:$0xff] %v22995_v45 }
 0xdd5   : > { %25036 = vst [vmem:[#allocation95_spill] sm:$0xff] %v22985_v1  ;;  %v22990_v16 = vmin.f32 %v8888_v19, 6.0  ;;  %v18160_v29 = vadd.f32 %v8753_v5, %v22787_v61  ;;  %v17302_v11 = vpop.f32.mrb[30].mxu1  ;;  %17337 = vmatprep.mubr.msk.f32.mxu0 %vm8935_vm9, %v22985_v1  ;;  %v23005_v61 = vmin.f32 %v8890_v26, 6.0 }
 0xdd6   : > { %v8861_v9 = vadd.f32 %v18159_v28, %v22881_v24  ;;  %v18161_v6 = vadd.f32 %v17302_v11, %v22789_v7  ;;  %v8756_v43 = vpop.f32.mrb[31].mxu1 }
 0xdd7   : > { %25037 = vst [vmem:[#allocation96_spill] sm:$0xff] %v22990_v16  ;;  %v8859_v27 = vadd.f32 %v18160_v29, %v22881_v24  ;;  %v18162_v30 = vadd.f32 %v8756_v43, %v22792_v60  ;;  %17338 = vmatmul.mubr.msk.f32.gmra.mrb[86].mxu0 %vm8935_vm9, %v22990_v16  ;;  %25039 = vst [vmem:[#allocation98_spill] sm:$0xff] %v23005_v61 }
 0xdd8   : > { %17340 = vmatprep.mubr.msk.f32.mxu0 %vm8935_vm9, %v22995_v45  ;;  %v8862_v35 = vadd.f32 %v18161_v6, %v22881_v24  ;;  %v8893_v32 = vmax.f32 %v8861_v9, 0.0 }
 0xdd9   : > { %v8891_v42 = vmax.f32 %v8859_v27, 0.0  ;;  %v8860_v56 = vadd.f32 %v18162_v30, %v22881_v24 }
 0xdda   : > { %v8894_v15 = vmax.f32 %v8862_v35, 0.0  ;;  %v23019_v34 = vmin.f32 %v8893_v32, 6.0 }
 0xddb   : > { %v23009_v7 = vmin.f32 %v8891_v42, 6.0  ;;  %v8892_v13 = vmax.f32 %v8860_v56, 0.0  ;;  %v17305_v62 = vpop.f32.mrb[32].mxu1  ;;  %17341 = vmatmul.mubr.msk.f32.gmra.mrb[88].mxu0 %vm8935_vm9, %v23005_v61 }
 0xddc   : > { %v18163_v60 = vadd.f32 %v17305_v62, %v22797_v49  ;;  %v8769_v44 = vpop.f32.mrb[33].mxu1  ;;  %25042 = vst [vmem:[#allocation111_spill] sm:$0xff] %v23019_v34 }
 0xddd   : > { %25040 = vst [vmem:[#allocation109_spill] sm:$0xff] %v23009_v7  ;;  %v23014_v21 = vmin.f32 %v8892_v13, 6.0  ;;  %v18164_v41 = vadd.f32 %v8769_v44, %v22799_v51  ;;  %v17306_v19 = vpop.f32.mrb[34].mxu1  ;;  %17343 = vmatprep.mubr.msk.f32.mxu0 %vm8935_vm9, %v23009_v7  ;;  %v23029_v51 = vmin.f32 %v8894_v15, 6.0 }
 0xdde   : > { %v8865_v28 = vadd.f32 %v18163_v60, %v22881_v24  ;;  %v18165_v5 = vadd.f32 %v17306_v19, %v22801_v38  ;;  %v8772_v26 = vpop.f32.mrb[35].mxu1 }
 0xddf   : > { %25041 = vst [vmem:[#allocation110_spill] sm:$0xff] %v23014_v21  ;;  %v8863_v29 = vadd.f32 %v18164_v41, %v22881_v24  ;;  %v18166_v49 = vadd.f32 %v8772_v26, %v22805_v8  ;;  %17344 = vmatmul.mubr.msk.f32.gmra.mrb[90].mxu0 %vm8935_vm9, %v23014_v21  ;;  %25043 = vst [vmem:[#allocation112_spill] sm:$0xff] %v23029_v51 }
 0xde0   : > { %17346 = vmatprep.mubr.msk.f32.mxu0 %vm8935_vm9, %v23019_v34  ;;  %v8866_v9 = vadd.f32 %v18165_v5, %v22881_v24  ;;  %v8897_v43 = vmax.f32 %v8865_v28, 0.0 }
 0xde1   : > { %v8895_v11 = vmax.f32 %v8863_v29, 0.0  ;;  %v8864_v6 = vadd.f32 %v18166_v49, %v22881_v24 }
 0xde2   : > { %v8898_v35 = vmax.f32 %v8866_v9, 0.0  ;;  %v23043_v62 = vmin.f32 %v8897_v43, 6.0 }
 0xde3   : > { %v23033_v38 = vmin.f32 %v8895_v11, 6.0  ;;  %v8896_v27 = vmax.f32 %v8864_v6, 0.0  ;;  %v17309_v30 = vpop.f32.mrb[36].mxu1  ;;  %17347 = vmatmul.mubr.msk.f32.gmra.mrb[92].mxu0 %vm8935_vm9, %v23029_v51 }
 0xde4   : > { %v18167_v8 = vadd.f32 %v17309_v30, %v22811_v52  ;;  %v8785_v42 = vpop.f32.mrb[37].mxu1  ;;  %25046 = vst [vmem:[#allocation115_spill] sm:$0xff] %v23043_v62 }
 0xde5   : > { %25044 = vst [vmem:[#allocation113_spill] sm:$0xff] %v23033_v38  ;;  %v23038_v56 = vmin.f32 %v8896_v27, 6.0  ;;  %v18168_v32 = vadd.f32 %v8785_v42, %v22813_v33  ;;  %v17310_v13 = vpop.f32.mrb[38].mxu1  ;;  %17349 = vmatprep.mubr.msk.f32.mxu0 %vm8935_vm9, %v23033_v38  ;;  %v23053_v33 = vmin.f32 %v8898_v35, 6.0 }
 0xde6   : > { %v8869_v60 = vadd.f32 %v18167_v8, %v22881_v24  ;;  %v18169_v44 = vadd.f32 %v17310_v13, %v22815_v0  ;;  %v8788_v15 = vpop.f32.mrb[39].mxu1 }
 0xde7   : > { %25045 = vst [vmem:[#allocation114_spill] sm:$0xff] %v23038_v56  ;;  %v8867_v41 = vadd.f32 %v18168_v32, %v22881_v24  ;;  %v18170_v52 = vadd.f32 %v8788_v15, %v22817_v37  ;;  %17350 = vmatmul.mubr.msk.f32.gmra.mrb[94].mxu0 %vm8935_vm9, %v23038_v56  ;;  %25047 = vst [vmem:[#allocation116_spill] sm:$0xff] %v23053_v33 }
 0xde8   : > { %17352 = vmatprep.mubr.msk.f32.mxu0 %vm8935_vm9, %v23043_v62  ;;  %v8870_v28 = vadd.f32 %v18169_v44, %v22881_v24  ;;  %v8901_v26 = vmax.f32 %v8869_v60, 0.0 }
 0xde9   : > { %v8899_v19 = vmax.f32 %v8867_v41, 0.0  ;;  %v8868_v5 = vadd.f32 %v18170_v52, %v22881_v24 }
 0xdea   : > { %v8902_v37 = vmax.f32 %v8870_v28, 0.0  ;;  %v23065_v11 = vmin.f32 %v8901_v26, 6.0 }
 0xdeb   : > { %v23057_v0 = vmin.f32 %v8899_v19, 6.0  ;;  %v8900_v29 = vmax.f32 %v8868_v5, 0.0  ;;  %17353 = vmatmul.mubr.msk.f32.gmra.mrb[96].mxu0 %vm8935_vm9, %v23053_v33 }
 0xdec   : > { %25050 = vst [vmem:[#allocation119_spill] sm:$0xff] %v23065_v11  ;;  %v23071_v24 = vmin.f32 %v8902_v37, 6.0 }
 0xded   : > { %25048 = vst [vmem:[#allocation117_spill] sm:$0xff] %v23057_v0  ;;  %v23061_v49 = vmin.f32 %v8900_v29, 6.0  ;;  %17355 = vmatprep.mubr.msk.f32.mxu0 %vm8935_vm9, %v23057_v0 }
 0xdee   : > { %25051 = vst [vmem:[#allocation120_spill] sm:$0xff] %v23071_v24 }
 0xdef   : > { %25049 = vst [vmem:[#allocation118_spill] sm:$0xff] %v23061_v49  ;;  %17356 = vmatmul.mubr.msk.f32.gmra.mrb[98].mxu0 %vm8935_vm9, %v23061_v49 }
 0xdf0   : > { %17358 = vmatprep.mubr.msk.f32.mxu0 %vm8935_vm9, %v23065_v11 }
 0xdf3   : > { %17359 = vmatmul.mubr.msk.f32.gmra.mrb[100].mxu0 %vm8935_vm9, %v23071_v24 }
 0xe8a   : > { %v17315_v9 = vpop.f32.mrb[6].mxu0 }
 0xe8b   : > { %v9101_v6 = vpop.f32.mrb[7].mxu0  ;;  %v23075_v30 = vmul.f32 0.25, %v17315_v9 }
 0xe8c   : > { %v23077_v8 = vmul.f32 0.25, %v9101_v6 }
 0xe8d   : > { %v9294_v60 = vsel %vm9292_vm11, %v23075_v30, -inf }
 0xe8e   : > { %v17318_v43 = vpop.f32.mrb[72].mxu0  ;;  %v9293_v41 = vsel %vm9292_vm11, %v23077_v8, -inf }
 0xe8f   : > { %v9111_v27 = vpop.f32.mrb[73].mxu0  ;;  %v23085_v44 = vmul.f32 0.25, %v17318_v43 }
 0xe90   : > { %v23091_v52 = vmul.f32 0.25, %v9111_v27 }
 0xe91   : > { %v9296_v6 = vsel %vm9292_vm11, %v23085_v44, -inf }
 0xe92   : > { %v17321_v42 = vpop.f32.mrb[74].mxu0  ;;  %v9295_v27 = vsel %vm9292_vm11, %v23091_v52, -inf }
 0xe93   : > { %v23079_v35 = vmul.f32 0.25, %v17321_v42  ;;  %v9121_v32 = vpop.f32.mrb[75].mxu0 }
 0xe94   : > { %v23081_v13 = vmul.f32 0.25, %v9121_v32 }
 0xe95   : > { %v9299_v15 = vsel %vm9292_vm11, %v23079_v35, -inf }
 0xe96   : > { %v9300_v19 = vmax.f32 %v9294_v60, %v9299_v15  ;;  %v9297_v28 = vsel %vm9292_vm11, %v23081_v13, -inf  ;;  %v17324_v5 = vpop.f32.mrb[76].mxu0 }
 0xe97   : > { %v9298_v26 = vmax.f32 %v9293_v41, %v9297_v28  ;;  %v23095_v29 = vmul.f32 0.25, %v17324_v5  ;;  %v9131_v37 = vpop.f32.mrb[77].mxu0 }
 0xe98   : > { %v23097_v9 = vmul.f32 0.25, %v9131_v37 }
 0xe99   : > { %v9303_v43 = vsel %vm9292_vm11, %v23095_v29, -inf }
 0xe9a   : > { %v9304_v42 = vmax.f32 %v9296_v6, %v9303_v43  ;;  %v9301_v32 = vsel %vm9292_vm11, %v23097_v9, -inf  ;;  %v17327_v60 = vpop.f32.mrb[78].mxu0 }
 0xe9b   : > { %v9302_v15 = vmax.f32 %v9295_v27, %v9301_v32  ;;  %v23107_v41 = vmul.f32 0.25, %v17327_v60  ;;  %v9141_v28 = vpop.f32.mrb[79].mxu0 }
 0xe9c   : > { %v23109_v5 = vmul.f32 0.25, %v9141_v28 }
 0xe9d   : > { %v9307_v37 = vsel %vm9292_vm11, %v23107_v41, -inf }
 0xe9e   : > { %v9308_v40 = vmax.f32 %v9300_v19, %v9307_v37  ;;  %v9305_v12 = vsel %vm9292_vm11, %v23109_v5, -inf  ;;  %v17330_v17 = vpop.f32.mrb[80].mxu0 }
 0xe9f   : > { %v9306_v57 = vmax.f32 %v9298_v26, %v9305_v12  ;;  %v23115_v6 = vmul.f32 0.25, %v17330_v17  ;;  %v9151_v43 = vpop.f32.mrb[81].mxu0 }
 0xea0   : > { %v23117_v39 = vmul.f32 0.25, %v9151_v43 }
 0xea1   : > { %v9311_v27 = vsel %vm9292_vm11, %v23115_v6, -inf }
 0xea2   : > { %v9312_v32 = vmax.f32 %v9304_v42, %v9311_v27  ;;  %v9309_v60 = vsel %vm9292_vm11, %v23117_v39, -inf  ;;  %v17333_v28 = vpop.f32.mrb[82].mxu0 }
 0xea3   : > { %v9310_v59 = vmax.f32 %v9302_v15, %v9309_v60  ;;  %v23123_v19 = vmul.f32 0.25, %v17333_v28  ;;  %v9161_v37 = vpop.f32.mrb[83].mxu0 }
 0xea4   : > { %v23125_v54 = vmul.f32 0.25, %v9161_v37 }
 0xea5   : > { %v9315_v12 = vsel %vm9292_vm11, %v23123_v19, -inf }
 0xea6   : > { %v9316_v17 = vmax.f32 %v9308_v40, %v9315_v12  ;;  %v9313_v26 = vsel %vm9292_vm11, %v23125_v54, -inf  ;;  %v17336_v43 = vpop.f32.mrb[84].mxu0 }
 0xea7   : > { %v9314_v31 = vmax.f32 %v9306_v57, %v9313_v26  ;;  %v23131_v42 = vmul.f32 0.25, %v17336_v43  ;;  %v9171_v27 = vpop.f32.mrb[85].mxu0 }
 0xea8   : > { %v23133_v55 = vmul.f32 0.25, %v9171_v27 }
 0xea9   : > { %v9319_v15 = vsel %vm9292_vm11, %v23131_v42, -inf }
 0xeaa   : > { %v9320_v60 = vmax.f32 %v9312_v32, %v9319_v15  ;;  %v9317_v28 = vsel %vm9292_vm11, %v23133_v55, -inf  ;;  %v17339_v37 = vpop.f32.mrb[86].mxu0 }
 0xeab   : > { %v9318_v48 = vmax.f32 %v9310_v59, %v9317_v28  ;;  %v23139_v40 = vmul.f32 0.25, %v17339_v37  ;;  %v9181_v12 = vpop.f32.mrb[87].mxu0 }
 0xeac   : > { %v23141_v36 = vmul.f32 0.25, %v9181_v12 }
 0xead   : > { %v9323_v57 = vsel %vm9292_vm11, %v23139_v40, -inf }
 0xeae   : > { %v9324_v26 = vmax.f32 %v9316_v17, %v9323_v57  ;;  %v9321_v43 = vsel %vm9292_vm11, %v23141_v36, -inf  ;;  %v17342_v27 = vpop.f32.mrb[88].mxu0 }
 0xeaf   : > { %v9322_v24 = vmax.f32 %v9314_v31, %v9321_v43  ;;  %v23147_v32 = vmul.f32 0.25, %v17342_v27  ;;  %v9191_v15 = vpop.f32.mrb[89].mxu0 }
 0xeb0   : > { %v23149_v11 = vmul.f32 0.25, %v9191_v15 }
 0xeb1   : > { %v9327_v59 = vsel %vm9292_vm11, %v23147_v32, -inf }
 0xeb2   : > { %v9328_v28 = vmax.f32 %v9320_v60, %v9327_v59  ;;  %v9325_v37 = vsel %vm9292_vm11, %v23149_v11, -inf  ;;  %v17345_v12 = vpop.f32.mrb[90].mxu0 }
 0xeb3   : > { %v9326_v49 = vmax.f32 %v9318_v48, %v9325_v37  ;;  %v23155_v17 = vmul.f32 0.25, %v17345_v12  ;;  %v9201_v57 = vpop.f32.mrb[91].mxu0 }
 0xeb4   : > { %v23157_v0 = vmul.f32 0.25, %v9201_v57 }
 0xeb5   : > { %v9331_v31 = vsel %vm9292_vm11, %v23155_v17, -inf }
 0xeb6   : > { %v9332_v43 = vmax.f32 %v9324_v26, %v9331_v31  ;;  %v9329_v27 = vsel %vm9292_vm11, %v23157_v0, -inf  ;;  %v17348_v15 = vpop.f32.mrb[92].mxu0 }
 0xeb7   : > { %v9330_v33 = vmax.f32 %v9322_v24, %v9329_v27  ;;  %v23163_v60 = vmul.f32 0.25, %v17348_v15  ;;  %v9211_v59 = vpop.f32.mrb[93].mxu0 }
 0xeb8   : > { %v23165_v62 = vmul.f32 0.25, %v9211_v59 }
 0xeb9   : > { %v9335_v48 = vsel %vm9292_vm11, %v23163_v60, -inf }
 0xeba   : > { %v9336_v37 = vmax.f32 %v9328_v28, %v9335_v48  ;;  %v9333_v12 = vsel %vm9292_vm11, %v23165_v62, -inf  ;;  %v17351_v57 = vpop.f32.mrb[94].mxu0 }
 0xebb   : > { %v9334_v56 = vmax.f32 %v9326_v49, %v9333_v12  ;;  %v23171_v26 = vmul.f32 0.25, %v17351_v57  ;;  %v9221_v31 = vpop.f32.mrb[95].mxu0 }
 0xebc   : > { %v23173_v38 = vmul.f32 0.25, %v9221_v31 }
 0xebd   : > { %v9339_v24 = vsel %vm9292_vm11, %v23171_v26, -inf }
 0xebe   : > { %v9340_v27 = vmax.f32 %v9332_v43, %v9339_v24  ;;  %v9337_v15 = vsel %vm9292_vm11, %v23173_v38, -inf  ;;  %v17354_v59 = vpop.f32.mrb[96].mxu0 }
 0xebf   : > { %v9338_v51 = vmax.f32 %v9330_v33, %v9337_v15  ;;  %v23179_v28 = vmul.f32 0.25, %v17354_v59  ;;  %v9231_v48 = vpop.f32.mrb[97].mxu0 }
 0xec0   : > { %v23181_v34 = vmul.f32 0.25, %v9231_v48 }
 0xec1   : > { %v9343_v49 = vsel %vm9292_vm11, %v23179_v28, -inf }
 0xec2   : > { %v9344_v12 = vmax.f32 %v9336_v37, %v9343_v49  ;;  %v9341_v57 = vsel %vm9292_vm11, %v23181_v34, -inf  ;;  %v17357_v31 = vpop.f32.mrb[98].mxu0 }
 0xec3   : > { %v9342_v21 = vmax.f32 %v9334_v56, %v9341_v57  ;;  %v23187_v43 = vmul.f32 0.25, %v17357_v31  ;;  %v9241_v24 = vpop.f32.mrb[99].mxu0 }
 0xec4   : > { %v23189_v7 = vmul.f32 0.25, %v9241_v24 }
 0xec5   : > { %v9347_v33 = vsel %vm9292_vm11, %v23187_v43, -inf }
 0xec6   : > { %v9348_v15 = vmax.f32 %v9340_v27, %v9347_v33  ;;  %v9345_v59 = vsel %vm9292_vm11, %v23189_v7, -inf  ;;  %v17360_v48 = vpop.f32.mrb[100].mxu0 }
 0xec7   : > { %v9346_v61 = vmax.f32 %v9338_v51, %v9345_v59  ;;  %v23195_v37 = vmul.f32 0.25, %v17360_v48  ;;  %v9251_v49 = vpop.f32.mrb[101].mxu0 }
 0xec8   : > { %v23197_v45 = vmul.f32 0.25, %v9251_v49 }
 0xec9   : > { %v9353_v56 = vmax.f32 %v9346_v61, %v9348_v15  ;;  %v9351_v57 = vsel %vm9292_vm11, %v23195_v37, -inf }
 0xeca   : > { %v9352_v31 = vmax.f32 %v9344_v12, %v9351_v57  ;;  %v9349_v24 = vsel %vm9292_vm11, %v23197_v45, -inf }
 0xecb   : > { %v9350_v16 = vmax.f32 %v9342_v21, %v9349_v24 }
 0xecd   : > { %v9354_v27 = vmax.f32 %v9350_v16, %v9352_v31 }
 0xecf   : > { %v9355_v33 = vmax.f32 %v9353_v56, %v9354_v27 }
 0xed1   : > { %v9356_v1 = vrot.slane %v9355_v33, 4 }
 0xed3   : > { %v9357_v2 = vmax.f32 %v9355_v33, %v9356_v1 }
 0xed5   : > { %v9358_v47 = vrot.slane %v9357_v2, 2 }
 0xed7   : > { %v9359_v51 = vmax.f32 %v9357_v2, %v9358_v47 }
 0xed9   : > { %v9360_v59 = vrot.slane %v9359_v51, 1 }
 0xedb   : > { %v23203_v48 = vmax.f32 %v9359_v51, %v9360_v59 }
 0xedd   : > { %v9362_v61 = vsub.f32 %v23077_v8, %v23203_v48  ;;  %v9363_v15 = vsub.f32 %v23075_v30, %v23203_v48  ;;  %v9364_v12 = vsub.f32 %v23091_v52, %v23203_v48  ;;  %v9365_v16 = vsub.f32 %v23085_v44, %v23203_v48 }
 0xede   : > { %v9366_v1 = vsub.f32 %v23081_v13, %v23203_v48  ;;  %v9367_v47 = vsub.f32 %v23079_v35, %v23203_v48  ;;  %v9368_v2 = vsub.f32 %v23097_v9, %v23203_v48  ;;  %v9369_v21 = vsub.f32 %v23095_v29, %v23203_v48 }
 0xedf   : > { %v9370_v30 = vsub.f32 %v23109_v5, %v23203_v48  ;;  %v9371_v8 = vsub.f32 %v23107_v41, %v23203_v48  ;;  %v9372_v44 = vsub.f32 %v23117_v39, %v23203_v48  ;;  %v9373_v13 = vsub.f32 %v23115_v6, %v23203_v48 }
 0xee0   : > { %v9374_v35 = vsub.f32 %v23125_v54, %v23203_v48  ;;  %v9375_v52 = vsub.f32 %v23123_v19, %v23203_v48  ;;  %v9376_v29 = vsub.f32 %v23133_v55, %v23203_v48  ;;  %v9377_v9 = vsub.f32 %v23131_v42, %v23203_v48 }
 0xee1   : > { %v9378_v41 = vsub.f32 %v23141_v36, %v23203_v48  ;;  %v9379_v39 = vsub.f32 %v23139_v40, %v23203_v48  ;;  %v9380_v5 = vsub.f32 %v23149_v11, %v23203_v48  ;;  %v9381_v54 = vsub.f32 %v23147_v32, %v23203_v48 }
 0xee2   : > { %v9393_v59 = vsub.f32 %v23195_v37, %v23203_v48  ;;  %v9394_v56 = vmul.f32 1.442695, %v9362_v61  ;;  %v9396_v57 = vmul.f32 1.442695, %v9363_v15  ;;  %v9398_v49 = vmul.f32 1.442695, %v9364_v12 }
 0xee3   : > { %v9400_v19 = vmul.f32 1.442695, %v9365_v16  ;;  %v9402_v31 = vmul.f32 1.442695, %v9366_v1  ;;  %v9404_v24 = vmul.f32 1.442695, %v9367_v47  ;;  %v25052_v11 = vsub.f32 %v23157_v0, %v23203_v48 }
 0xee4   : > { %19328 = vpow2.f32 %v9394_v56  ;;  %v9406_v27 = vmul.f32 1.442695, %v9368_v2  ;;  %v9408_v33 = vmul.f32 1.442695, %v9369_v21  ;;  %v9410_v55 = vmul.f32 1.442695, %v9370_v30 }
 0xee5   : > { %19330 = vpow2.f32 %v9396_v57  ;;  %v9412_v61 = vmul.f32 1.442695, %v9371_v8  ;;  %v9414_v47 = vmul.f32 1.442695, %v9372_v44  ;;  %v9416_v8 = vmul.f32 1.442695, %v9373_v13 }
 0xee6   : > { %19332 = vpow2.f32 %v9398_v49  ;;  %v9418_v57 = vmul.f32 1.442695, %v9374_v35  ;;  %v9428_v42 = vmul.f32 1.442695, %v9379_v39  ;;  %v9430_v36 = vmul.f32 1.442695, %v9380_v5 }
 0xee7   : > { %19334 = vpow2.f32 %v9400_v19  ;;  %v9432_v40 = vmul.f32 1.442695, %v9381_v54  ;;  %v9434_v5 = vmul.f32 1.442695, %v25052_v11  ;;  %v25053_v54 = vsub.f32 %v23155_v17, %v23203_v48 }
 0xee8   : > { %19336 = vpow2.f32 %v9402_v31  ;;  %v25055_v17 = vsub.f32 %v23163_v60, %v23203_v48  ;;  %v25057_v60 = vsub.f32 %v23171_v26, %v23203_v48  ;;  %v25059_v26 = vsub.f32 %v23179_v28, %v23203_v48 }
 0xee9   : > { %19338 = vpow2.f32 %v9404_v24  ;;  %v9420_v24 = vmul.f32 1.442695, %v9375_v52  ;;  %v25061_v28 = vsub.f32 %v23187_v43, %v23203_v48  ;;  %v9456_v43 = vmul.f32 1.442695, %v9393_v59 }
 0xeea   : > { %19340 = vpow2.f32 %v9406_v27 }
 0xeeb   : > { %19342 = vpow2.f32 %v9408_v33 }
 0xeec   : > { %19344 = vpow2.f32 %v9410_v55 }
 0xeed   : > { %19346 = vpow2.f32 %v9412_v61  ;;  %v9422_v61 = vmul.f32 1.442695, %v9376_v29  ;;  %v9426_v29 = vmul.f32 1.442695, %v9378_v41 }
 0xeee   : > { %v23269_v51 = vpop.eup %19328  ;;  %19348 = vpow2.f32 %v9414_v47  ;;  %v9424_v47 = vmul.f32 1.442695, %v9377_v9 }
 0xeef   : > { %v23271_v6 = vpop.eup %19330  ;;  %v9458_v15 = vsel %vm9292_vm11, %v23269_v51, 0.0  ;;  %19350 = vpow2.f32 %v9416_v8 }
 0xef0   : > { %v23275_v12 = vpop.eup %19332  ;;  %v9459_v16 = vsel %vm9292_vm11, %v23271_v6, 0.0  ;;  %19352 = vpow2.f32 %v9418_v57 }
 0xef1   : > { %v23279_v1 = vpop.eup %19334  ;;  %v9460_v2 = vadd.f32 %v9459_v16, %v9458_v15  ;;  %v9461_v21 = vsel %vm9292_vm11, %v23275_v12, 0.0  ;;  %19354 = vpow2.f32 %v9420_v24 }
 0xef2   : > { %v23283_v30 = vpop.eup %19336  ;;  %v9463_v49 = vsel %vm9292_vm11, %v23279_v1, 0.0  ;;  %19356 = vpow2.f32 %v9422_v61 }
 0xef3   : > { %v9462_v19 = vadd.f32 %v9461_v21, %v9460_v2  ;;  %v23287_v56 = vpop.eup %19338  ;;  %v9465_v44 = vsel %vm9292_vm11, %v23283_v30, 0.0  ;;  %19358 = vpow2.f32 %v9424_v47 }
 0xef4   : > { %v23291_v55 = vpop.eup %19340  ;;  %v9467_v13 = vsel %vm9292_vm11, %v23287_v56, 0.0  ;;  %19360 = vpow2.f32 %v9426_v29 }
 0xef5   : > { %v9464_v31 = vadd.f32 %v9463_v49, %v9462_v19  ;;  %v23295_v33 = vpop.eup %19342  ;;  %v9469_v35 = vsel %vm9292_vm11, %v23291_v55, 0.0  ;;  %19362 = vpow2.f32 %v9428_v42 }
 0xef6   : > { %v23299_v16 = vpop.eup %19344  ;;  %v9471_v2 = vsel %vm9292_vm11, %v23295_v33, 0.0  ;;  %19364 = vpow2.f32 %v9430_v36 }
 0xef7   : > { %v9466_v27 = vadd.f32 %v9465_v44, %v9464_v31  ;;  %v23306_v21 = vpop.eup %19346  ;;  %v9473_v19 = vsel %vm9292_vm11, %v23299_v16, 0.0  ;;  %19366 = vpow2.f32 %v9432_v40 }
 0xef8   : > { %v23313_v49 = vpop.eup %19348  ;;  %v9475_v57 = vsel %vm9292_vm11, %v23306_v21, 0.0  ;;  %19368 = vpow2.f32 %v9434_v5 }
 0xef9   : > { %v9468_v15 = vadd.f32 %v9467_v13, %v9466_v27  ;;  %v23320_v31 = vpop.eup %19350  ;;  %v9477_v44 = vsel %vm9292_vm11, %v23313_v49, 0.0 }
 0xefa   : > { %v23327_v24 = vpop.eup %19352  ;;  %v9479_v27 = vsel %vm9292_vm11, %v23320_v31, 0.0 }
 0xefb   : > { %v9470_v52 = vadd.f32 %v9469_v35, %v9468_v15  ;;  %v23334_v13 = vpop.eup %19354  ;;  %v9885_v15 = vld [vmem:[#allocation18] sm:$0xff]  ;;  %v9886_v35 = vld [vmem:[#allocation18 + $0x8] sm:$0xff]  ;;  %v9481_v47 = vsel %vm9292_vm11, %v23327_v24, 0.0 }
 0xefc   : > { %v23341_v32 = vpop.eup %19356 }
 0xefd   : > { %v9472_v8 = vadd.f32 %v9471_v2, %v9470_v52  ;;  %v18075_v52 = vpack.c.bf16 %v9886_v35, %v9885_v15  ;;  %v9436_v2 = vmul.f32 1.442695, %v25053_v54  ;;  %v23348_v0 = vpop.eup %19358  ;;  %v9444_v15 = vmul.f32 1.442695, %v25057_v60 }
 0xefe   : > { %v23355_v36 = vpop.eup %19360  ;;  %v9487_v40 = vsel %vm9292_vm11, %v23348_v0, 0.0 }
 0xeff   : > { %v9474_v9 = vadd.f32 %v9473_v19, %v9472_v8  ;;  %v9483_v8 = vsel %vm9292_vm11, %v23334_v13, 0.0  ;;  %18076 = vmatprep.subr.bf16.mxu0 %v18075_v52  ;;  %v25054_v19 = vsub.f32 %v23165_v62, %v23203_v48  ;;  %19370 = vpow2.f32 %v9436_v2 }
 0xf00   : > { %18078 = vmatpush3.bf16.msra.mxu0 %v18075_v52  ;;  %v25056_v62 = vsub.f32 %v23173_v38, %v23203_v48  ;;  %v9489_v5 = vsel %vm9292_vm11, %v23355_v36, 0.0  ;;  %v25058_v38 = vsub.f32 %v23181_v34, %v23203_v48  ;;  %v25060_v34 = vsub.f32 %v23189_v7, %v23203_v48 }
 0xf01   : > { %v9476_v41 = vadd.f32 %v9475_v57, %v9474_v9  ;;  %v9438_v42 = vmul.f32 1.442695, %v25054_v19  ;;  %v9485_v57 = vsel %vm9292_vm11, %v23341_v32, 0.0  ;;  %v9448_v19 = vmul.f32 1.442695, %v25059_v26 }
 0xf02   : > { %v9446_v54 = vmul.f32 1.442695, %v25058_v38  ;;  %v25062_v7 = vsub.f32 %v23197_v45, %v23203_v48 }
 0xf03   : > { %v9478_v39 = vadd.f32 %v9477_v44, %v9476_v41  ;;  %v9440_v41 = vmul.f32 1.442695, %v25055_v17  ;;  %19372 = vpow2.f32 %v9438_v42  ;;  %v9450_v17 = vmul.f32 1.442695, %v25060_v34 }
 0xf04   : > { %v9454_v60 = vmul.f32 1.442695, %v25062_v7 }
 0xf05   : > { %v9480_v61 = vadd.f32 %v9479_v27, %v9478_v39  ;;  %v23362_v39 = vpop.eup %19362  ;;  %v9442_v27 = vmul.f32 1.442695, %v25056_v62  ;;  %19374 = vpow2.f32 %v9440_v41  ;;  %v9452_v62 = vmul.f32 1.442695, %v25061_v28 }
 0xf07   : > { %v9482_v29 = vadd.f32 %v9481_v47, %v9480_v61  ;;  %v23369_v61 = vpop.eup %19364  ;;  %v9491_v47 = vsel %vm9292_vm11, %v23362_v39, 0.0  ;;  %19376 = vpow2.f32 %v9442_v27 }
 0xf08   : > { %v23376_v52 = vpop.eup %19366  ;;  %19378 = vpow2.f32 %v9444_v15 }
 0xf09   : > { %v9484_v9 = vadd.f32 %v9483_v8, %v9482_v29  ;;  %v9493_v29 = vsel %vm9292_vm11, %v23369_v61, 0.0  ;;  %v23383_v8 = vpop.eup %19368  ;;  %19380 = vpow2.f32 %v9446_v54 }
 0xf0a   : > { %19382 = vpow2.f32 %v9448_v19 }
 0xf0b   : > { %v9486_v44 = vadd.f32 %v9485_v57, %v9484_v9  ;;  %v9495_v9 = vsel %vm9292_vm11, %v23376_v52, 0.0  ;;  %v23390_v57 = vpop.eup %19370  ;;  %19384 = vpow2.f32 %v9450_v17 }
 0xf0c   : > { %19386 = vpow2.f32 %v9452_v62 }
 0xf0d   : > { %v9488_v11 = vadd.f32 %v9487_v40, %v9486_v44  ;;  %v9497_v44 = vsel %vm9292_vm11, %v23383_v8, 0.0  ;;  %v23397_v40 = vpop.eup %19372  ;;  %19388 = vpow2.f32 %v9454_v60 }
 0xf0e   : > { %19390 = vpow2.f32 %v9456_v43 }
 0xf0f   : > { %v9490_v35 = vadd.f32 %v9489_v5, %v9488_v11  ;;  %v9499_v11 = vsel %vm9292_vm11, %v23390_v57, 0.0  ;;  %v23404_v5 = vpop.eup %19374 }
 0xf10   : > { %v9503_v54 = vsel %vm9292_vm11, %v23404_v5, 0.0 }
 0xf11   : > { %v9492_v2 = vadd.f32 %v9491_v47, %v9490_v35  ;;  %v9501_v35 = vsel %vm9292_vm11, %v23397_v40, 0.0  ;;  %v23411_v47 = vpop.eup %19376 }
 0xf13   : > { %v9494_v42 = vadd.f32 %v9493_v29, %v9492_v2  ;;  %v23418_v2 = vpop.eup %19378  ;;  %v9505_v29 = vsel %vm9292_vm11, %v23411_v47, 0.0 }
 0xf14   : > { %v23422_v26 = vpop.eup %19380 }
 0xf15   : > { %v9496_v41 = vadd.f32 %v9495_v9, %v9494_v42  ;;  %v9507_v42 = vsel %vm9292_vm11, %v23418_v2, 0.0  ;;  %v23426_v37 = vpop.eup %19382  ;;  %v9509_v59 = vsel %vm9292_vm11, %v23422_v26, 0.0 }
 0xf16   : > { %v23430_v9 = vpop.eup %19384  ;;  %v9511_v17 = vsel %vm9292_vm11, %v23426_v37, 0.0 }
 0xf17   : > { %v9498_v27 = vadd.f32 %v9497_v44, %v9496_v41  ;;  %v23434_v41 = vpop.eup %19386  ;;  %v9513_v28 = vsel %vm9292_vm11, %v23430_v9, 0.0 }
 0xf18   : > { %v19389_v62 = vpop.eup %19388 }
 0xf19   : > { %v9500_v15 = vadd.f32 %v9499_v11, %v9498_v27  ;;  %v9515_v11 = vsel %vm9292_vm11, %v23434_v41, 0.0  ;;  %v19391_v7 = vpop.eup %19390 }
 0xf1a   : > { %v9519_v43 = vsel %vm9292_vm11, %v19391_v7, 0.0 }
 0xf1b   : > { %v9502_v38 = vadd.f32 %v9501_v35, %v9500_v15  ;;  %v9517_v15 = vsel %vm9292_vm11, %v19389_v62, 0.0 }
 0xf1d   : > { %v9504_v45 = vadd.f32 %v9503_v54, %v9502_v38 }
 0xf1f   : > { %v9506_v19 = vadd.f32 %v9505_v29, %v9504_v45 }
 0xf21   : > { %v9508_v48 = vadd.f32 %v9507_v42, %v9506_v19 }
 0xf23   : > { %v9510_v34 = vadd.f32 %v9509_v59, %v9508_v48 }
 0xf25   : > { %v9512_v44 = vadd.f32 %v9511_v17, %v9510_v34 }
 0xf27   : > { %v9514_v27 = vadd.f32 %v9513_v28, %v9512_v44 }
 0xf29   : > { %v9516_v60 = vadd.f32 %v9515_v11, %v9514_v27 }
 0xf2b   : > { %v9518_v35 = vadd.f32 %v9517_v15, %v9516_v60  ;;  %v19225_v15 = vld [vmem:[%s25065_s22 + $0x18] sm:$0xff]  }
 0xf2d   : > { %v9520_v38 = vadd.f32 %v9519_v43, %v9518_v35 }
 0xf2f   : > { %v9521_v54 = vrot.slane %v9520_v38, 4 }
 0xf31   : > { %v9522_v45 = vadd.f32 %v9521_v54, %v9520_v38  ;;  %v13328_v54 = vld [vmem:[%s25063_s4 + $0x28] sm:$0xff] }
 0xf33   : > { %v9523_v29 = vrot.slane %v9522_v45, 2 }
 0xf35   : > { %v9524_v19 = vadd.f32 %v9523_v29, %v9522_v45 }
 0xf37   : > { %v9525_v42 = vrot.slane %v9524_v19, 1 }
 0xf39   : > { %v9526_v48 = vadd.f32 %v9525_v42, %v9524_v19 }
 0xf3b   : > { %19392 = vrcp.f32 %v9526_v48 }
 0xf45   : > { %v19393_v59 = vpop.eup %19392 }
 0xf46   : > { %v9529_v34 = vmul.f32 %v19393_v59, %v23271_v6  ;;  %v9528_v17 = vmul.f32 %v19393_v59, %v23269_v51  ;;  %v9530_v44 = vmul.f32 %v19393_v59, %v23275_v12  ;;  %v9531_v28 = vmul.f32 %v19393_v59, %v23279_v1 }
 0xf47   : > { %v9532_v27 = vmul.f32 %v19393_v59, %v23283_v30  ;;  %v9558_v11 = vmul.f32 %v19393_v59, %v19389_v62  ;;  %v9559_v60 = vmul.f32 %v19393_v59, %v19391_v7  ;;  %v9533_v6 = vmul.f32 %v19393_v59, %v23287_v56  ;;  %v19224_v7 = vld [vmem:[%s25064_s28 + $0x10] sm:$0xff]   ;;  %s15815_s28 = sshll.u32 %s20250_s0, 12  ;;  %s25119_s0 = sand.u32 1, %s19992_s1  }
 0xf48   : > { %17363 = vmatprep.mubr.msk.f32.mxu1 %vm9292_vm11, %v9528_v17  ;;  %v9534_v51 = vmul.f32 %v19393_v59, %v23291_v55  ;;  %v9535_v12 = vmul.f32 %v19393_v59, %v23295_v33  ;;  %v9536_v1 = vmul.f32 %v19393_v59, %v23299_v16  ;;  %v9537_v30 = vmul.f32 %v19393_v59, %v23306_v21  ;;  %s24617_s3 = scalar_lea.hbm %s20227_s13, %s15815_s28  ;;  %s20056_s28 = smov [#allocation30]  }
 0xf49   : > { %17364 = vmatmul.mubr.msk.f32.vlgmr.msra.gmra.mrb[40].mxu1 %vm9292_vm11, %v9529_v34  ;;  %v9538_v62 = vmul.f32 %v19393_v59, %v23313_v49  ;;  %v9539_v56 = vmul.f32 %v19393_v59, %v23320_v31  ;;  %v9540_v55 = vmul.f32 %v19393_v59, %v23327_v24  ;;  %v9541_v33 = vmul.f32 %v19393_v59, %v23334_v13  ;;  %s19906_s6 = sshll.u32 %s20056_s28, 4  ;;  %s19907_s6 = int_to_ptr.vmem [resolvable:$false] %s19906_s6 }
 0xf4a   : > { %17366 = vmatprep.mubr.msk.f32.mxu1 %vm9292_vm11, %v9530_v44  ;;  %v9542_v16 = vmul.f32 %v19393_v59, %v23341_v32  ;;  %v9543_v21 = vmul.f32 %v19393_v59, %v23348_v0  ;;  %v9544_v49 = vmul.f32 %v19393_v59, %v23355_v36  ;;  %v9545_v31 = vmul.f32 %v19393_v59, %v23362_v39  ;;  %s19908_s8 = scalar_lea.vmem %s19907_s6, 8192 }
 0xf4b   : > { %v9546_v24 = vmul.f32 %v19393_v59, %v23369_v61  ;;  %v9547_v13 = vmul.f32 %v19393_v59, %v23376_v52  ;;  %v9548_v32 = vmul.f32 %v19393_v59, %v23383_v8  ;;  %v9549_v0 = vmul.f32 %v19393_v59, %v23390_v57  ;;  %17463 = vmatprep.subr.bf16.mxu1 %v19224_v7 }
 0xf4c   : > { %v9550_v36 = vmul.f32 %v19393_v59, %v23397_v40  ;;  %v9551_v39 = vmul.f32 %v19393_v59, %v23404_v5  ;;  %v9552_v61 = vmul.f32 %v19393_v59, %v23411_v47  ;;  %v9553_v52 = vmul.f32 %v19393_v59, %v23418_v2  ;;  %v13323_v47 = vld [vmem:[%s25063_s4] sm:$0xff]  ;;  %v13324_v2 = vld [vmem:[%s25063_s4 + $0x8] sm:$0xff]  ;;  %17464 = vmatpush3.bf16.msra.mxu1 %v19224_v7 }
 0xf4d   : > { %17367 = vmatmul.mubr.msk.f32.gmra.mrb[42].mxu1 %vm9292_vm11, %v9531_v28  ;;  %v9554_v8 = vmul.f32 %v19393_v59, %v23422_v26  ;;  %v9555_v57 = vmul.f32 %v19393_v59, %v23426_v37  ;;  %v9556_v40 = vmul.f32 %v19393_v59, %v23430_v9  ;;  %v9557_v5 = vmul.f32 %v19393_v59, %v23434_v41  ;;  %v13325_v37 = vld [vmem:[%s25063_s4 + $0x10] sm:$0xff]  ;;  %v13326_v9 = vld [vmem:[%s25063_s4 + $0x18] sm:$0xff]  ;;  %v13327_v41 = vld [vmem:[%s25063_s4 + $0x20] sm:$0xff]  ;;  %s24628_s4 = scalar_lea.sflag [#allocation5], %s25119_s0 }
 0xf4e   : > { %17369 = vmatprep.mubr.msk.f32.mxu1 %vm9292_vm11, %v9532_v27  ;;  %v18079_v26 = vpack.c.bf16 %v13324_v2, %v13323_v47  ;;  %v18083_v38 = vpack.c.bf16 %v13326_v9, %v13325_v37  ;;  %17465 = vmatprep.subr.bf16.mxu1 %v19225_v15  ;;  %v18087_v19 = vpack.c.bf16 %v13328_v54, %v13327_v41  ;;  %v25083_v47 = vld [vmem:[#allocation120_spill] sm:$0xff]  ;;  %v23613_v2 = vld [vmem:[#allocation20] ss:$0 sm:$0xff] }
 0xf50   : > { %18080 = vmatprep.subr.bf16.mxu0 %v18079_v26  ;;  %17466 = vmatpush3.bf16.msra.mxu1 %v19225_v15 }
 0xf51   : > { %17370 = vmatmul.mubr.msk.f32.gmra.mrb[44].mxu1 %vm9292_vm11, %v9533_v6 }
 0xf52   : > { %17372 = vmatprep.mubr.msk.f32.mxu1 %vm9292_vm11, %v9534_v51 }
 0xf55   : > { %17373 = vmatmul.mubr.msk.f32.gmra.mrb[46].mxu1 %vm9292_vm11, %v9535_v12 }
 0xf56   : > { %17375 = vmatprep.mubr.msk.f32.mxu1 %vm9292_vm11, %v9536_v1 }
 0xf59   : > { %17376 = vmatmul.mubr.msk.f32.gmra.mrb[48].mxu1 %vm9292_vm11, %v9537_v30 }
 0xf5a   : > { %17378 = vmatprep.mubr.msk.f32.mxu1 %vm9292_vm11, %v9538_v62 }
 0xf5d   : > { %17379 = vmatmul.mubr.msk.f32.gmra.mrb[50].mxu1 %vm9292_vm11, %v9539_v56 }
 0xf5e   : > { %17381 = vmatprep.mubr.msk.f32.mxu1 %vm9292_vm11, %v9540_v55 }
 0xf61   : > { %17382 = vmatmul.mubr.msk.f32.gmra.mrb[52].mxu1 %vm9292_vm11, %v9541_v33 }
 0xf62   : > { %17384 = vmatprep.mubr.msk.f32.mxu1 %vm9292_vm11, %v9542_v16 }
 0xf65   : > { %17385 = vmatmul.mubr.msk.f32.gmra.mrb[54].mxu1 %vm9292_vm11, %v9543_v21 }
 0xf66   : > { %17387 = vmatprep.mubr.msk.f32.mxu1 %vm9292_vm11, %v9544_v49 }
 0xf69   : > { %17388 = vmatmul.mubr.msk.f32.gmra.mrb[56].mxu1 %vm9292_vm11, %v9545_v31 }
 0xf6a   : > { %17390 = vmatprep.mubr.msk.f32.mxu1 %vm9292_vm11, %v9546_v24 }
 0xf6d   : > { %17391 = vmatmul.mubr.msk.f32.gmra.mrb[58].mxu1 %vm9292_vm11, %v9547_v13 }
 0xf6e   : > { %17393 = vmatprep.mubr.msk.f32.mxu1 %vm9292_vm11, %v9548_v32 }
 0xf71   : > { %17394 = vmatmul.mubr.msk.f32.gmra.mrb[60].mxu1 %vm9292_vm11, %v9549_v0 }
 0xf72   : > { %17396 = vmatprep.mubr.msk.f32.mxu1 %vm9292_vm11, %v9550_v36 }
 0xf75   : > { %17397 = vmatmul.mubr.msk.f32.gmra.mrb[62].mxu1 %vm9292_vm11, %v9551_v39  ;;  %v25077_v39 = vld [vmem:[#allocation114_spill] sm:$0xff] }
 0xf76   : > { %17399 = vmatprep.mubr.msk.f32.mxu1 %vm9292_vm11, %v9552_v61  ;;  %v23598_v61 = vld [vmem:[%s25065_s22] sm:$0xff]  }
 0xf77   : > { %17499 = vmatprep.subr.bf16.mxu1 %v23598_v61 }
 0xf79   : > { %17400 = vmatmul.mubr.msk.f32.gmra.mrb[64].mxu1 %vm9292_vm11, %v9553_v52  ;;  %v25078_v52 = vld [vmem:[#allocation115_spill] sm:$0xff] }
 0xf7a   : > { %17402 = vmatprep.mubr.msk.f32.mxu1 %vm9292_vm11, %v9554_v8  ;;  %v25079_v8 = vld [vmem:[#allocation116_spill] sm:$0xff] }
 0xf7d   : > { %17403 = vmatmul.mubr.msk.f32.gmra.mrb[66].mxu1 %vm9292_vm11, %v9555_v57  ;;  %v25080_v57 = vld [vmem:[#allocation117_spill] sm:$0xff] }
 0xf7e   : > { %17405 = vmatprep.mubr.msk.f32.mxu1 %vm9292_vm11, %v9556_v40  ;;  %v25081_v40 = vld [vmem:[#allocation118_spill] sm:$0xff] }
 0xf81   : > { %17406 = vmatmul.mubr.msk.f32.gmra.mrb[68].mxu1 %vm9292_vm11, %v9557_v5  ;;  %v25082_v5 = vld [vmem:[#allocation119_spill] sm:$0xff] }
 0xf82   : > { %17408 = vmatprep.mubr.msk.f32.mxu1 %vm9292_vm11, %v9558_v11 }
 0xf85   : > { %17409 = vmatmul.mubr.msk.f32.gmra.mrb[70].mxu1 %vm9292_vm11, %v9559_v60 }
0x101c   : > { %v17365_v35 = vpop.f32.mrb[40].mxu1 }
0x101d   : > { %v9726_v43 = vpop.f32.mrb[41].mxu1 }
0x101e   : > { %17415 = vmatprep.mubr.msk.f32.mxu0 %vm8935_vm9, %v9726_v43 }
0x101f   : > { %17416 = vmatmul.mubr.msk.f32.vlgmr.msra.gmra.mrb[102].mxu0 %vm8935_vm9, %v17365_v35 }
0x1020   : > { %v17368_v45 = vpop.f32.mrb[42].mxu1  ;;  %18082 = vmatpush3.bf16.msra.mxu0 %v18079_v26 }
0x1021   : > { %v9736_v29 = vpop.f32.mrb[43].mxu1  ;;  %18084 = vmatprep.subr.bf16.mxu0 %v18083_v38 }
0x1022   : > { %17418 = vmatprep.mubr.msk.f32.mxu0 %vm8935_vm9, %v9736_v29 }
0x1023   : > { %17419 = vmatmul.mubr.msk.f32.gmra.mrb[104].mxu0 %vm8935_vm9, %v17368_v45 }
0x1024   : > { %v17371_v42 = vpop.f32.mrb[44].mxu1  ;;  %18086 = vmatpush3.bf16.msra.mxu0 %v18083_v38 }
0x1025   : > { %v9746_v48 = vpop.f32.mrb[45].mxu1  ;;  %18088 = vmatprep.subr.bf16.mxu0 %v18087_v19 }
0x1026   : > { %17421 = vmatprep.mubr.msk.f32.mxu0 %vm8935_vm9, %v9746_v48 }
0x1027   : > { %17422 = vmatmul.mubr.msk.f32.gmra.mrb[106].mxu0 %vm8935_vm9, %v17371_v42 }
0x1028   : > { %v17374_v59 = vpop.f32.mrb[46].mxu1  ;;  %18090 = vmatpush3.bf16.msra.mxu0 %v18087_v19  ;;  %v25084_v19 = vld [vmem:[#allocation72_spill] sm:$0xff] }
0x1029   : > { %v9756_v34 = vpop.f32.mrb[47].mxu1 }
0x102a   : > { %17424 = vmatprep.mubr.msk.f32.mxu0 %vm8935_vm9, %v9756_v34 }
0x102b   : > { %17425 = vmatmul.mubr.msk.f32.gmra.mrb[108].mxu0 %vm8935_vm9, %v17374_v59  ;;  %v25085_v59 = vld [vmem:[#allocation70_spill] sm:$0xff] }
0x102c   : > { %v17377_v17 = vpop.f32.mrb[48].mxu1 }
0x102d   : > { %v9766_v44 = vpop.f32.mrb[49].mxu1 }
0x102e   : > { %17427 = vmatprep.mubr.msk.f32.mxu0 %vm8935_vm9, %v9766_v44 }
0x102f   : > { %17428 = vmatmul.mubr.msk.f32.gmra.mrb[110].mxu0 %vm8935_vm9, %v17377_v17 }
0x1030   : > { %v17380_v28 = vpop.f32.mrb[50].mxu1 }
0x1031   : > { %v9776_v27 = vpop.f32.mrb[51].mxu1 }
0x1032   : > { %17430 = vmatprep.mubr.msk.f32.mxu0 %vm8935_vm9, %v9776_v27 }
0x1033   : > { %17431 = vmatmul.mubr.msk.f32.gmra.mrb[112].mxu0 %vm8935_vm9, %v17380_v28 }
0x1034   : > { %v17383_v11 = vpop.f32.mrb[52].mxu1 }
0x1035   : > { %v9786_v60 = vpop.f32.mrb[53].mxu1 }
0x1036   : > { %17433 = vmatprep.mubr.msk.f32.mxu0 %vm8935_vm9, %v9786_v60 }
0x1037   : > { %17434 = vmatmul.mubr.msk.f32.gmra.mrb[114].mxu0 %vm8935_vm9, %v17383_v11 }
0x1038   : > { %v17386_v6 = vpop.f32.mrb[54].mxu1 }
0x1039   : > { %v9796_v51 = vpop.f32.mrb[55].mxu1 }
0x103a   : > { %17436 = vmatprep.mubr.msk.f32.mxu0 %vm8935_vm9, %v9796_v51  ;;  %v25086_v51 = vld [vmem:[#allocation71_spill] sm:$0xff] }
0x103b   : > { %17437 = vmatmul.mubr.msk.f32.gmra.mrb[116].mxu0 %vm8935_vm9, %v17386_v6 }
0x103c   : > { %v17389_v12 = vpop.f32.mrb[56].mxu1 }
0x103d   : > { %v9806_v1 = vpop.f32.mrb[57].mxu1 }
0x103e   : > { %17439 = vmatprep.mubr.msk.f32.mxu0 %vm8935_vm9, %v9806_v1 }
0x103f   : > { %17440 = vmatmul.mubr.msk.f32.gmra.mrb[118].mxu0 %vm8935_vm9, %v17389_v12 }
0x1040   : > { %v17392_v30 = vpop.f32.mrb[58].mxu1 }
0x1041   : > { %v9816_v62 = vpop.f32.mrb[59].mxu1 }
0x1042   : > { %17442 = vmatprep.mubr.msk.f32.mxu0 %vm8935_vm9, %v9816_v62 }
0x1043   : > { %17443 = vmatmul.mubr.msk.f32.gmra.mrb[120].mxu0 %vm8935_vm9, %v17392_v30  ;;  %v25087_v30 = vld [vmem:[#allocation69_spill] sm:$0xff] }
0x1044   : > { %v17395_v56 = vpop.f32.mrb[60].mxu1 }
0x1045   : > { %v9826_v55 = vpop.f32.mrb[61].mxu1 }
0x1046   : > { %17445 = vmatprep.mubr.msk.f32.mxu0 %vm8935_vm9, %v9826_v55 }
0x1047   : > { %17446 = vmatmul.mubr.msk.f32.gmra.mrb[122].mxu0 %vm8935_vm9, %v17395_v56 }
0x1048   : > { %v17398_v33 = vpop.f32.mrb[62].mxu1 }
0x1049   : > { %v9836_v16 = vpop.f32.mrb[63].mxu1 }
0x104a   : > { %17448 = vmatprep.mubr.msk.f32.mxu0 %vm8935_vm9, %v9836_v16 }
0x104b   : > { %17449 = vmatmul.mubr.msk.f32.gmra.mrb[124].mxu0 %vm8935_vm9, %v17398_v33 }
0x104c   : > { %v17401_v21 = vpop.f32.mrb[64].mxu1 }
0x104d   : > { %v9846_v49 = vpop.f32.mrb[65].mxu1 }
0x104e   : > { %17451 = vmatprep.mubr.msk.f32.mxu0 %vm8935_vm9, %v9846_v49 }
0x104f   : > { %17452 = vmatmul.mubr.msk.f32.gmra.mrb[126].mxu0 %vm8935_vm9, %v17401_v21 }
0x1050   : > { %v17404_v31 = vpop.f32.mrb[66].mxu1 }
0x1051   : > { %v9856_v24 = vpop.f32.mrb[67].mxu1 }
0x1052   : > { %17454 = vmatprep.mubr.msk.f32.mxu0 %vm8935_vm9, %v9856_v24  ;;  %v25088_v24 = vld [vmem:[#allocation76_spill] sm:$0xff] }
0x1053   : > { %17455 = vmatmul.mubr.msk.f32.gmra.mrb[128].mxu0 %vm8935_vm9, %v17404_v31 }
0x1054   : > { %v17407_v13 = vpop.f32.mrb[68].mxu1 }
0x1055   : > { %v9866_v32 = vpop.f32.mrb[69].mxu1 }
0x1056   : > { %17457 = vmatprep.mubr.msk.f32.mxu0 %vm8935_vm9, %v9866_v32 }
0x1057   : > { %17458 = vmatmul.mubr.msk.f32.gmra.mrb[130].mxu0 %vm8935_vm9, %v17407_v13 }
0x1058   : > { %v17410_v0 = vpop.f32.mrb[70].mxu1 }
0x1059   : > { %v9876_v36 = vpop.f32.mrb[71].mxu1 }
0x105a   : > { %17460 = vmatprep.mubr.msk.f32.mxu0 %vm8935_vm9, %v9876_v36 }
0x105b   : > { %17461 = vmatmul.mubr.msk.f32.gmra.mrb[132].mxu0 %vm8935_vm9, %v17410_v0  ;;  %v25089_v0 = vld [vmem:[#allocation74_spill] sm:$0xff] }
0x105c   : > { %17799 = vmatprep.mubr.msk.f32.mxu0 %vm13329_vm12, %v22891_v46  ;;  %v25066_v46 = vld [vmem:[#allocation105_spill] sm:$0xff] }
0x105f   : > { %17800 = vmatmul.mubr.msk.f32.vlgmr.msra.gmra.mrb[134].mxu0 %vm13329_vm12, %v22894_v3  ;;  %v25067_v3 = vld [vmem:[#allocation106_spill] sm:$0xff] }
0x1060   : > { %17802 = vmatprep.mubr.msk.f32.mxu0 %vm13329_vm12, %v22899_v63  ;;  %v25068_v63 = vld [vmem:[#allocation95_spill] sm:$0xff] }
0x1063   : > { %17803 = vmatmul.mubr.msk.f32.gmra.mrb[136].mxu0 %vm13329_vm12, %v22909_v25  ;;  %v25069_v25 = vld [vmem:[#allocation96_spill] sm:$0xff] }
0x1064   : > { %17805 = vmatprep.mubr.msk.f32.mxu0 %vm13329_vm12, %v22913_v50  ;;  %v25070_v50 = vld [vmem:[#allocation97_spill] sm:$0xff] }
0x1067   : > { %17806 = vmatmul.mubr.msk.f32.gmra.mrb[138].mxu0 %vm13329_vm12, %v22918_v4  ;;  %v25071_v4 = vld [vmem:[#allocation98_spill] sm:$0xff] }
0x1068   : > { %17808 = vmatprep.mubr.msk.f32.mxu0 %vm13329_vm12, %v22923_v53  ;;  %v25072_v53 = vld [vmem:[#allocation109_spill] sm:$0xff] }
0x106b   : > { %17809 = vmatmul.mubr.msk.f32.gmra.mrb[140].mxu0 %vm13329_vm12, %v22933_v22  ;;  %v25073_v22 = vld [vmem:[#allocation110_spill] sm:$0xff] }
0x106c   : > { %17811 = vmatprep.mubr.msk.f32.mxu0 %vm13329_vm12, %v22937_v18  ;;  %v25074_v18 = vld [vmem:[#allocation111_spill] sm:$0xff] }
0x106f   : > { %17812 = vmatmul.mubr.msk.f32.gmra.mrb[142].mxu0 %vm13329_vm12, %v22942_v23  ;;  %v25075_v23 = vld [vmem:[#allocation112_spill] sm:$0xff] }
0x1070   : > { %17814 = vmatprep.mubr.msk.f32.mxu0 %vm13329_vm12, %v22947_v58  ;;  %v25076_v58 = vld [vmem:[#allocation113_spill] sm:$0xff] }
0x1073   : > { %17815 = vmatmul.mubr.msk.f32.gmra.mrb[144].mxu0 %vm13329_vm12, %v22957_v10  ;;  %v10427_v10 = vld [vmem:[#allocation2 + $0x8] sm:$0xff] }
0x1074   : > { %17817 = vmatprep.mubr.msk.f32.mxu0 %vm13329_vm12, %v22961_v20  ;;  %v10428_v20 = vld [vmem:[#allocation2 + $0x10] sm:$0xff] }
0x1077   : > { %17818 = vmatmul.mubr.msk.f32.gmra.mrb[146].mxu0 %vm13329_vm12, %v22966_v14  ;;  %v10459_v14 = vpack.c.bf16 %v10428_v20, %v10427_v10  ;;  %v25090_v10 = vld [vmem:[#allocation75_spill] sm:$0xff] }
0x1078   : > { %17820 = vmatprep.mubr.msk.f32.mxu0 %vm13329_vm12, %v25066_v46 }
0x1079   : > { %17467 = vmatprep.mubr.msk.bf16.mxu1 %vm1236_vm0, %v10459_v14 }
0x107b   : > { %17821 = vmatmul.mubr.msk.f32.gmra.mrb[148].mxu0 %vm13329_vm12, %v25067_v3 }
0x107c   : > { %17823 = vmatprep.mubr.msk.f32.mxu0 %vm13329_vm12, %v25068_v63 }
0x107f   : > { %17824 = vmatmul.mubr.msk.f32.gmra.mrb[150].mxu0 %vm13329_vm12, %v25069_v25 }
0x1080   : > { %17826 = vmatprep.mubr.msk.f32.mxu0 %vm13329_vm12, %v25070_v50 }
0x1083   : > { %17827 = vmatmul.mubr.msk.f32.gmra.mrb[152].mxu0 %vm13329_vm12, %v25071_v4 }
0x1084   : > { %17829 = vmatprep.mubr.msk.f32.mxu0 %vm13329_vm12, %v25072_v53 }
0x1087   : > { %17830 = vmatmul.mubr.msk.f32.gmra.mrb[154].mxu0 %vm13329_vm12, %v25073_v22 }
0x1088   : > { %17832 = vmatprep.mubr.msk.f32.mxu0 %vm13329_vm12, %v25074_v18 }
0x108b   : > { %17833 = vmatmul.mubr.msk.f32.gmra.mrb[156].mxu0 %vm13329_vm12, %v25075_v23 }
0x108c   : > { %17835 = vmatprep.mubr.msk.f32.mxu0 %vm13329_vm12, %v25076_v58  ;;  %v19227_v58 = vld [vmem:[%s25065_s22 + $0x8] sm:$0xff]  }
0x108f   : > { %17836 = vmatmul.mubr.msk.f32.gmra.mrb[158].mxu0 %vm13329_vm12, %v25077_v39  ;;  %v25091_v39 = vld [vmem:[#allocation73_spill] sm:$0xff] }
0x1090   : > { %17838 = vmatprep.mubr.msk.f32.mxu0 %vm13329_vm12, %v25078_v52 }
0x1093   : > { %17839 = vmatmul.mubr.msk.f32.gmra.mrb[160].mxu0 %vm13329_vm12, %v25079_v8 }
0x1094   : > { %17841 = vmatprep.mubr.msk.f32.mxu0 %vm13329_vm12, %v25080_v57 }
0x1097   : > { %17842 = vmatmul.mubr.msk.f32.gmra.mrb[162].mxu0 %vm13329_vm12, %v25081_v40 }
0x1098   : > { %17844 = vmatprep.mubr.msk.f32.mxu0 %vm13329_vm12, %v25082_v5 }
0x109b   : > { %17845 = vmatmul.mubr.msk.f32.gmra.mrb[164].mxu0 %vm13329_vm12, %v25083_v47 }
0x10f2   : > { %v17417_v26 = vpop.f32.mrb[102].mxu0 }
0x10f3   : > { %v10062_v37 = vadd.f32 %v17417_v26, %v23613_v2  ;;  %v10056_v9 = vpop.f32.mrb[103].mxu0 }
0x10f4   : > { %v10057_v7 = vadd.f32 %v23613_v2, %v10056_v9 }
0x10f5   : > { %v10216_v15 = vmax.f32 %v10062_v37, 0.0 }
0x10f6   : > { %v10215_v35 = vmax.f32 %v10057_v7, 0.0  ;;  %v17420_v43 = vpop.f32.mrb[104].mxu0 }
0x10f7   : > { %v10248_v38 = vmin.f32 %v10216_v15, 6.0  ;;  %v10072_v41 = vadd.f32 %v17420_v43, %v23613_v2  ;;  %v10066_v54 = vpop.f32.mrb[105].mxu0  ;;  %v25092_v43 = vld [vmem:[#allocation80_spill] sm:$0xff] }
0x10f8   : > { %v10247_v45 = vmin.f32 %v10215_v35, 6.0  ;;  %v10067_v29 = vadd.f32 %v23613_v2, %v10066_v54  ;;  %v23652_v35 = vld [vmem:[%s25065_s22 + $0x20] sm:$0xff]  }
0x10f9   : > { %v10280_v42 = vadd.f32 %v10248_v38, %v25084_v19  ;;  %v10218_v48 = vmax.f32 %v10072_v41, 0.0  ;;  %v25093_v54 = vld [vmem:[#allocation78_spill] sm:$0xff] }
0x10fa   : > { %v10279_v34 = vadd.f32 %v10247_v45, %v25085_v59  ;;  %v10217_v17 = vmax.f32 %v10067_v29, 0.0  ;;  %v17423_v44 = vpop.f32.mrb[106].mxu0 }
0x10fb   : > { %10312 = vst.msk [vmem:[#allocation2 + $0x20] sm:$0xff] %vm1236_vm0, %v10280_v42  ;;  %v10250_v28 = vmin.f32 %v10218_v48, 6.0  ;;  %v10082_v27 = vadd.f32 %v17423_v44, %v23613_v2  ;;  %v10076_v11 = vpop.f32.mrb[107].mxu0 }
0x10fc   : > { %10311 = vst.msk [vmem:[#allocation2 + $0x18] sm:$0xff] %vm1236_vm0, %v10279_v34  ;;  %v10249_v60 = vmin.f32 %v10217_v17, 6.0  ;;  %v10077_v6 = vadd.f32 %v23613_v2, %v10076_v11 }
0x10fd   : > { %v10282_v12 = vadd.f32 %v10250_v28, %v25086_v51  ;;  %v10220_v1 = vmax.f32 %v10082_v27, 0.0  ;;  %v25094_v27 = vld [vmem:[#allocation79_spill] sm:$0xff] }
0x10fe   : > { %v10281_v62 = vadd.f32 %v10249_v60, %v25087_v30  ;;  %v10219_v56 = vmax.f32 %v10077_v6, 0.0  ;;  %v17426_v55 = vpop.f32.mrb[108].mxu0  ;;  %v25095_v6 = vld [vmem:[#allocation77_spill] sm:$0xff] }
0x10ff   : > { %10314 = vst.msk [vmem:[#allocation2 + $0x30] sm:$0xff] %vm1236_vm0, %v10282_v12  ;;  %v10252_v33 = vmin.f32 %v10220_v1, 6.0  ;;  %v10092_v16 = vadd.f32 %v17426_v55, %v23613_v2  ;;  %v10086_v21 = vpop.f32.mrb[109].mxu0 }
0x1100   : > { %10313 = vst.msk [vmem:[#allocation2 + $0x28] sm:$0xff] %vm1236_vm0, %v10281_v62  ;;  %v10251_v49 = vmin.f32 %v10219_v56, 6.0  ;;  %v10087_v31 = vadd.f32 %v23613_v2, %v10086_v21 }
0x1101   : > { %v10284_v13 = vadd.f32 %v10252_v33, %v25088_v24  ;;  %v10222_v32 = vmax.f32 %v10092_v16, 0.0 }
0x1102   : > { %v10283_v36 = vadd.f32 %v10251_v49, %v25089_v0  ;;  %v10221_v46 = vmax.f32 %v10087_v31, 0.0  ;;  %v17429_v3 = vpop.f32.mrb[110].mxu0  ;;  %v10430_v63 = vld [vmem:[#allocation2 + $0x20] sm:$0xff]  ;;  %v25096_v31 = vld [vmem:[#allocation84_spill] sm:$0xff] }
0x1103   : > { %10316 = vst.msk [vmem:[#allocation2 + $0x40] sm:$0xff] %vm1236_vm0, %v10284_v13  ;;  %v10254_v25 = vmin.f32 %v10222_v32, 6.0  ;;  %v10102_v50 = vadd.f32 %v17429_v3, %v23613_v2  ;;  %v10096_v4 = vpop.f32.mrb[111].mxu0  ;;  %v10429_v53 = vld [vmem:[#allocation2 + $0x18] sm:$0xff]  ;;  %v25097_v32 = vld [vmem:[#allocation82_spill] sm:$0xff] }
0x1104   : > { %10315 = vst.msk [vmem:[#allocation2 + $0x38] sm:$0xff] %vm1236_vm0, %v10283_v36  ;;  %v10253_v22 = vmin.f32 %v10221_v46, 6.0  ;;  %v10097_v18 = vadd.f32 %v23613_v2, %v10096_v4  ;;  %v23637_v23 = vpack.c.bf16 %v10430_v63, %v10429_v53 }
0x1105   : > { %v10286_v20 = vadd.f32 %v10254_v25, %v25090_v10  ;;  %v10224_v14 = vmax.f32 %v10102_v50, 0.0 }
0x1106   : > { %v10285_v52 = vadd.f32 %v10253_v22, %v25091_v39  ;;  %v10223_v8 = vmax.f32 %v10097_v18, 0.0  ;;  %v17432_v57 = vpop.f32.mrb[112].mxu0  ;;  %17468 = vmatmul.mubr.msk.bf16.vlgmr.msra.gmra.mrb[72].mxu1 %vm1236_vm0, %v23637_v23  ;;  %v10432_v40 = vld [vmem:[#allocation2 + $0x30] sm:$0xff] }
0x1107   : > { %10318 = vst.msk [vmem:[#allocation2 + $0x50] sm:$0xff] %vm1236_vm0, %v10286_v20  ;;  %v10256_v5 = vmin.f32 %v10224_v14, 6.0  ;;  %v10112_v47 = vadd.f32 %v17432_v57, %v23613_v2  ;;  %v10106_v26 = vpop.f32.mrb[113].mxu0  ;;  %17500 = vmatpush3.bf16.msra.mxu1 %v23598_v61  ;;  %v10431_v37 = vld [vmem:[#allocation2 + $0x28] sm:$0xff]  ;;  %v25099_v14 = vld [vmem:[#allocation81_spill] sm:$0xff] }
0x1108   : > { %10317 = vst.msk [vmem:[#allocation2 + $0x48] sm:$0xff] %vm1236_vm0, %v10285_v52  ;;  %v10255_v9 = vmin.f32 %v10223_v8, 6.0  ;;  %v10107_v7 = vadd.f32 %v23613_v2, %v10106_v26  ;;  %v23649_v15 = vpack.c.bf16 %v10432_v40, %v10431_v37  ;;  %17501 = vmatprep.subr.bf16.mxu1 %v19227_v58 }
0x1109   : > { %v10288_v38 = vadd.f32 %v10256_v5, %v25092_v43  ;;  %v10226_v41 = vmax.f32 %v10112_v47, 0.0  ;;  %v25100_v43 = vld [vmem:[#allocation88_spill] sm:$0xff] }
0x110a   : > { %v10287_v45 = vadd.f32 %v10255_v9, %v25093_v54  ;;  %v10225_v29 = vmax.f32 %v10107_v7, 0.0  ;;  %v17435_v19 = vpop.f32.mrb[114].mxu0  ;;  %17471 = vmatprep.mubr.msk.bf16.mxu1 %vm1236_vm0, %v23649_v15  ;;  %v10434_v61 = vld [vmem:[#allocation2 + $0x40] sm:$0xff] }
0x110b   : > { %10320 = vst.msk [vmem:[#allocation2 + $0x60] sm:$0xff] %vm1236_vm0, %v10288_v38  ;;  %v10258_v42 = vmin.f32 %v10226_v41, 6.0  ;;  %v10122_v48 = vadd.f32 %v17435_v19, %v23613_v2  ;;  %v10116_v59 = vpop.f32.mrb[115].mxu0  ;;  %v10433_v34 = vld [vmem:[#allocation2 + $0x38] sm:$0xff]  ;;  %17502 = vmatpush3.bf16.msra.mxu1 %v19227_v58  ;;  %v25098_v58 = vld [vmem:[#allocation83_spill] sm:$0xff]  ;;  %v25101_v54 = vld [vmem:[#allocation86_spill] sm:$0xff] }
0x110c   : > { %10319 = vst.msk [vmem:[#allocation2 + $0x58] sm:$0xff] %vm1236_vm0, %v10287_v45  ;;  %v10257_v17 = vmin.f32 %v10225_v29, 6.0  ;;  %v10117_v44 = vadd.f32 %v23613_v2, %v10116_v59  ;;  %v23662_v28 = vpack.c.bf16 %v10434_v61, %v10433_v34  ;;  %17535 = vmatprep.subr.bf16.mxu1 %v23652_v35 }
0x110d   : > { %v10290_v11 = vadd.f32 %v10258_v42, %v25094_v27  ;;  %v10228_v60 = vmax.f32 %v10122_v48, 0.0 }
0x110e   : > { %v10289_v51 = vadd.f32 %v10257_v17, %v25095_v6  ;;  %v10227_v12 = vmax.f32 %v10117_v44, 0.0  ;;  %v17438_v1 = vpop.f32.mrb[116].mxu0  ;;  %17472 = vmatmul.mubr.msk.bf16.gmra.mrb[76].mxu1 %vm1236_vm0, %v23662_v28  ;;  %v10436_v30 = vld [vmem:[#allocation2 + $0x50] sm:$0xff] }
0x110f   : > { %10322 = vst.msk [vmem:[#allocation2 + $0x70] sm:$0xff] %vm1236_vm0, %v10290_v11  ;;  %v10260_v62 = vmin.f32 %v10228_v60, 6.0  ;;  %v10132_v56 = vadd.f32 %v17438_v1, %v23613_v2  ;;  %v10126_v55 = vpop.f32.mrb[117].mxu0  ;;  %v10435_v33 = vld [vmem:[#allocation2 + $0x48] sm:$0xff] }
0x1110   : > { %10321 = vst.msk [vmem:[#allocation2 + $0x68] sm:$0xff] %vm1236_vm0, %v10289_v51  ;;  %v10259_v16 = vmin.f32 %v10227_v12, 6.0  ;;  %v10127_v21 = vadd.f32 %v23613_v2, %v10126_v55  ;;  %v23673_v49 = vpack.c.bf16 %v10436_v30, %v10435_v33  ;;  %v25102_v11 = vld [vmem:[#allocation87_spill] sm:$0xff]  ;;  %v25103_v51 = vld [vmem:[#allocation85_spill] sm:$0xff] }
0x1111   : > { %v10292_v24 = vadd.f32 %v10260_v62, %v25096_v31  ;;  %v10230_v13 = vmax.f32 %v10132_v56, 0.0 }
0x1112   : > { %v10291_v0 = vadd.f32 %v10259_v16, %v25097_v32  ;;  %v10229_v36 = vmax.f32 %v10127_v21, 0.0  ;;  %v17441_v46 = vpop.f32.mrb[118].mxu0  ;;  %17475 = vmatprep.mubr.msk.bf16.mxu1 %vm1236_vm0, %v23673_v49  ;;  %v10438_v3 = vld [vmem:[#allocation2 + $0x60] sm:$0xff] }
0x1113   : > { %10324 = vst.msk [vmem:[#allocation2 + $0x80] sm:$0xff] %vm1236_vm0, %v10292_v24  ;;  %v10262_v63 = vmin.f32 %v10230_v13, 6.0  ;;  %v10142_v25 = vadd.f32 %v17441_v46, %v23613_v2  ;;  %v10136_v50 = vpop.f32.mrb[119].mxu0  ;;  %v10437_v4 = vld [vmem:[#allocation2 + $0x58] sm:$0xff]  ;;  %v25104_v13 = vld [vmem:[#allocation102_spill] sm:$0xff] }
0x1114   : > { %10323 = vst.msk [vmem:[#allocation2 + $0x78] sm:$0xff] %vm1236_vm0, %v10291_v0  ;;  %v10261_v53 = vmin.f32 %v10229_v36, 6.0  ;;  %v10137_v22 = vadd.f32 %v23613_v2, %v10136_v50  ;;  %v23683_v18 = vpack.c.bf16 %v10438_v3, %v10437_v4  ;;  %v25105_v36 = vld [vmem:[#allocation90_spill] sm:$0xff] }
0x1115   : > { %v10294_v10 = vadd.f32 %v10262_v63, %v25098_v58  ;;  %v10232_v20 = vmax.f32 %v10142_v25, 0.0 }
0x1116   : > { %v10293_v39 = vadd.f32 %v10261_v53, %v25099_v14  ;;  %v10231_v52 = vmax.f32 %v10137_v22, 0.0  ;;  %v17444_v8 = vpop.f32.mrb[120].mxu0  ;;  %17476 = vmatmul.mubr.msk.bf16.gmra.mrb[80].mxu1 %vm1236_vm0, %v23683_v18  ;;  %v10440_v57 = vld [vmem:[#allocation2 + $0x70] sm:$0xff]  ;;  %v25106_v14 = vld [vmem:[#allocation101_spill] sm:$0xff] }
0x1117   : > { %10326 = vst.msk [vmem:[#allocation2 + $0x90] sm:$0xff] %vm1236_vm0, %v10294_v10  ;;  %v10264_v40 = vmin.f32 %v10232_v20, 6.0  ;;  %v10152_v5 = vadd.f32 %v17444_v8, %v23613_v2  ;;  %v10146_v47 = vpop.f32.mrb[121].mxu0  ;;  %v10439_v26 = vld [vmem:[#allocation2 + $0x68] sm:$0xff]  ;;  %v25107_v8 = vld [vmem:[#allocation89_spill] sm:$0xff] }
0x1118   : > { %10325 = vst.msk [vmem:[#allocation2 + $0x88] sm:$0xff] %vm1236_vm0, %v10293_v39  ;;  %v10263_v37 = vmin.f32 %v10231_v52, 6.0  ;;  %v10147_v9 = vadd.f32 %v23613_v2, %v10146_v47  ;;  %v23693_v7 = vpack.c.bf16 %v10440_v57, %v10439_v26 }
0x1119   : > { %v10296_v38 = vadd.f32 %v10264_v40, %v25100_v43  ;;  %v10234_v41 = vmax.f32 %v10152_v5, 0.0 }
0x111a   : > { %v10295_v45 = vadd.f32 %v10263_v37, %v25101_v54  ;;  %v10233_v29 = vmax.f32 %v10147_v9, 0.0  ;;  %v17447_v19 = vpop.f32.mrb[122].mxu0  ;;  %17479 = vmatprep.mubr.msk.bf16.mxu1 %vm1236_vm0, %v23693_v7  ;;  %v10442_v61 = vld [vmem:[#allocation2 + $0x80] sm:$0xff] }
0x111b   : > { %10328 = vst.msk [vmem:[#allocation2 + $0xa0] sm:$0xff] %vm1236_vm0, %v10296_v38  ;;  %v10266_v42 = vmin.f32 %v10234_v41, 6.0  ;;  %v10162_v48 = vadd.f32 %v17447_v19, %v23613_v2  ;;  %v10156_v59 = vpop.f32.mrb[123].mxu0  ;;  %v10441_v34 = vld [vmem:[#allocation2 + $0x78] sm:$0xff] }
0x111c   : > { %10327 = vst.msk [vmem:[#allocation2 + $0x98] sm:$0xff] %vm1236_vm0, %v10295_v45  ;;  %v10265_v17 = vmin.f32 %v10233_v29, 6.0  ;;  %v10157_v44 = vadd.f32 %v23613_v2, %v10156_v59  ;;  %v23703_v27 = vpack.c.bf16 %v10442_v61, %v10441_v34  ;;  %v25108_v45 = vld [vmem:[#allocation92_spill] sm:$0xff] }
0x111d   : > { %v10298_v60 = vadd.f32 %v10266_v42, %v25102_v11  ;;  %v10236_v6 = vmax.f32 %v10162_v48, 0.0  ;;  %v25109_v61 = vld [vmem:[#allocation104_spill] sm:$0xff] }
0x111e   : > { %v10297_v12 = vadd.f32 %v10265_v17, %v25103_v51  ;;  %v10235_v1 = vmax.f32 %v10157_v44, 0.0  ;;  %v17450_v30 = vpop.f32.mrb[124].mxu0  ;;  %17480 = vmatmul.mubr.msk.bf16.gmra.mrb[84].mxu1 %vm1236_vm0, %v23703_v27  ;;  %v10444_v62 = vld [vmem:[#allocation2 + $0x90] sm:$0xff] }
0x111f   : > { %10330 = vst.msk [vmem:[#allocation2 + $0xb0] sm:$0xff] %vm1236_vm0, %v10298_v60  ;;  %v10268_v56 = vmin.f32 %v10236_v6, 6.0  ;;  %v10172_v55 = vadd.f32 %v17450_v30, %v23613_v2  ;;  %v10166_v33 = vpop.f32.mrb[125].mxu0  ;;  %v10443_v16 = vld [vmem:[#allocation2 + $0x88] sm:$0xff] }
0x1120   : > { %10329 = vst.msk [vmem:[#allocation2 + $0xa8] sm:$0xff] %vm1236_vm0, %v10297_v12  ;;  %v10267_v21 = vmin.f32 %v10235_v1, 6.0  ;;  %v10167_v31 = vadd.f32 %v23613_v2, %v10166_v33  ;;  %v23713_v24 = vpack.c.bf16 %v10444_v62, %v10443_v16  ;;  %v25110_v1 = vld [vmem:[#allocation91_spill] sm:$0xff] }
0x1121   : > { %v10300_v32 = vadd.f32 %v10268_v56, %v25104_v13  ;;  %v10238_v0 = vmax.f32 %v10172_v55, 0.0  ;;  %v25111_v56 = vld [vmem:[#allocation103_spill] sm:$0xff] }
0x1122   : > { %v10299_v46 = vadd.f32 %v10267_v21, %v25105_v36  ;;  %v10237_v3 = vmax.f32 %v10167_v31, 0.0  ;;  %v17453_v63 = vpop.f32.mrb[126].mxu0  ;;  %17483 = vmatprep.mubr.msk.bf16.mxu1 %vm1236_vm0, %v23713_v24  ;;  %v10446_v25 = vld [vmem:[#allocation2 + $0xa0] sm:$0xff] }
0x1123   : > { %10332 = vst.msk [vmem:[#allocation2 + $0xc0] sm:$0xff] %vm1236_vm0, %v10300_v32  ;;  %v10270_v50 = vmin.f32 %v10238_v0, 6.0  ;;  %v10182_v4 = vadd.f32 %v17453_v63, %v23613_v2  ;;  %v10176_v53 = vpop.f32.mrb[127].mxu0  ;;  %v10445_v22 = vld [vmem:[#allocation2 + $0x98] sm:$0xff]  ;;  %v25112_v63 = vld [vmem:[#allocation108_spill] sm:$0xff] }
0x1124   : > { %10331 = vst.msk [vmem:[#allocation2 + $0xb8] sm:$0xff] %vm1236_vm0, %v10299_v46  ;;  %v10269_v58 = vmin.f32 %v10237_v3, 6.0  ;;  %v10177_v10 = vadd.f32 %v23613_v2, %v10176_v53  ;;  %v23723_v20 = vpack.c.bf16 %v10446_v25, %v10445_v22 }
0x1125   : > { %v10302_v39 = vadd.f32 %v10270_v50, %v25106_v14  ;;  %v10240_v52 = vmax.f32 %v10182_v4, 0.0  ;;  %v25113_v4 = vld [vmem:[#allocation94_spill] sm:$0xff] }
0x1126   : > { %v10301_v57 = vadd.f32 %v10269_v58, %v25107_v8  ;;  %v10239_v40 = vmax.f32 %v10177_v10, 0.0  ;;  %v17456_v5 = vpop.f32.mrb[128].mxu0  ;;  %17484 = vmatmul.mubr.msk.bf16.gmra.mrb[88].mxu1 %vm1236_vm0, %v23723_v20  ;;  %v10448_v47 = vld [vmem:[#allocation2 + $0xb0] sm:$0xff] }
0x1127   : > { %10334 = vst.msk [vmem:[#allocation2 + $0xd0] sm:$0xff] %vm1236_vm0, %v10302_v39  ;;  %v10272_v26 = vmin.f32 %v10240_v52, 6.0  ;;  %v10192_v37 = vadd.f32 %v17456_v5, %v23613_v2  ;;  %v10186_v9 = vpop.f32.mrb[129].mxu0  ;;  %v10447_v43 = vld [vmem:[#allocation2 + $0xa8] sm:$0xff] }
0x1128   : > { %10333 = vst.msk [vmem:[#allocation2 + $0xc8] sm:$0xff] %vm1236_vm0, %v10301_v57  ;;  %v10271_v38 = vmin.f32 %v10239_v40, 6.0  ;;  %v10187_v41 = vadd.f32 %v23613_v2, %v10186_v9  ;;  %v23733_v54 = vpack.c.bf16 %v10448_v47, %v10447_v43  ;;  %v25114_v52 = vld [vmem:[#allocation107_spill] sm:$0xff]  ;;  %v25115_v40 = vld [vmem:[#allocation93_spill] sm:$0xff] }
0x1129   : > { %v10304_v29 = vadd.f32 %v10272_v26, %v25108_v45  ;;  %v10242_v19 = vmax.f32 %v10192_v37, 0.0  ;;  %v10343_v57 = vld [vmem:[#allocation2 + $0x7] sm:$0xff]  ;;  %v10344_v9 = vld [vmem:[#allocation2 + $0xf] sm:$0xff] }
0x112a   : > { %v10303_v42 = vadd.f32 %v10271_v38, %v25109_v61  ;;  %v10241_v48 = vmax.f32 %v10187_v41, 0.0  ;;  %v17459_v59 = vpop.f32.mrb[130].mxu0  ;;  %17487 = vmatprep.mubr.msk.bf16.mxu1 %vm1236_vm0, %v23733_v54  ;;  %v10450_v34 = vld [vmem:[#allocation2 + $0xc0] sm:$0xff]  ;;  %v10375_v38 = vsel %vm1232_vm7, %v10343_v57, 0.0  ;;  %v10345_v61 = vld [vmem:[#allocation2 + $0x17] sm:$0xff]  ;;  %v10364_v57 = vld [vmem:[#allocation2 + $0xaf] sm:$0xff] }
0x112b   : > { %10336 = vst.msk [vmem:[#allocation2 + $0xe0] sm:$0xff] %vm1236_vm0, %v10304_v29  ;;  %v10274_v17 = vmin.f32 %v10242_v19, 6.0  ;;  %v10202_v44 = vadd.f32 %v17459_v59, %v23613_v2  ;;  %v10196_v11 = vpop.f32.mrb[131].mxu0  ;;  %v10449_v60 = vld [vmem:[#allocation2 + $0xb8] sm:$0xff]  ;;  %v10407_v29 = vpack.c.bf16 %v10344_v9, %v10375_v38  ;;  %v10377_v59 = vsel %vm1232_vm7, %v10345_v61, 0.0  ;;  %v12578_v43 = vld [vmem:[#allocation2 + $0x48] sm:$0xff] }
0x112c   : > { %10335 = vst.msk [vmem:[#allocation2 + $0xd8] sm:$0xff] %vm1236_vm0, %v10303_v42  ;;  %v10273_v6 = vmin.f32 %v10241_v48, 6.0  ;;  %v10197_v51 = vadd.f32 %v23613_v2, %v10196_v11  ;;  %v23743_v12 = vpack.c.bf16 %v10450_v34, %v10449_v60  ;;  %v10347_v42 = vld [vmem:[#allocation2 + $0x27] sm:$0xff]  ;;  %v10346_v48 = vld [vmem:[#allocation2 + $0x1f] sm:$0xff]  ;;  %v10348_v34 = vld [vmem:[#allocation2 + $0x2f] sm:$0xff] }
0x112d   : > { %v10306_v30 = vadd.f32 %v10274_v17, %v25110_v1  ;;  %v10244_v62 = vmax.f32 %v10202_v44, 0.0  ;;  %v10379_v17 = vsel %vm1232_vm7, %v10347_v42, 0.0  ;;  %v23784_v44 = vpack.c.bf16 %v10346_v48, %v10377_v59  ;;  %v19229_v11 = vld [vmem:[%s25065_s22 + $0x28] sm:$0xff]   ;;  %v23795_v1 = vld [vmem:[%s25065_s22 + $0x30] sm:$0xff]   ;;  %v10366_v38 = vld [vmem:[#allocation2 + $0xbf] sm:$0xff] }
0x112e   : > { %v10305_v55 = vadd.f32 %v10273_v6, %v25111_v56  ;;  %v10243_v33 = vmax.f32 %v10197_v51, 0.0  ;;  %v17462_v16 = vpop.f32.mrb[132].mxu0  ;;  %17488 = vmatmul.mubr.msk.bf16.gmra.mrb[92].mxu1 %vm1236_vm0, %v23743_v12  ;;  %v10452_v21 = vld [vmem:[#allocation2 + $0xd0] sm:$0xff]  ;;  %v23787_v60 = vpack.c.bf16 %v10348_v34, %v10379_v17  ;;  %v10351_v51 = vld [vmem:[#allocation2 + $0x47] sm:$0xff] }
0x112f   : > { %10338 = vst.msk [vmem:[#allocation2 + $0xf0] sm:$0xff] %vm1236_vm0, %v10306_v30  ;;  %v10276_v31 = vmin.f32 %v10244_v62, 6.0  ;;  %v10212_v13 = vadd.f32 %v17462_v16, %v23613_v2  ;;  %v10206_v32 = vpop.f32.mrb[133].mxu0  ;;  %v10451_v0 = vld [vmem:[#allocation2 + $0xc8] sm:$0xff]  ;;  %v10349_v6 = vld [vmem:[#allocation2 + $0x37] sm:$0xff]  ;;  %v10350_v30 = vld [vmem:[#allocation2 + $0x3f] sm:$0xff] }
0x1130   : > { %10337 = vst.msk [vmem:[#allocation2 + $0xe8] sm:$0xff] %vm1236_vm0, %v10305_v55  ;;  %v10275_v36 = vmin.f32 %v10243_v33, 6.0  ;;  %v10207_v46 = vadd.f32 %v23613_v2, %v10206_v32  ;;  %v23753_v3 = vpack.c.bf16 %v10452_v21, %v10451_v0  ;;  %v10381_v62 = vsel %vm1232_vm7, %v10349_v6, 0.0  ;;  %v10352_v56 = vld [vmem:[#allocation2 + $0x4f] sm:$0xff]  ;;  %v10355_v21 = vld [vmem:[#allocation2 + $0x67] sm:$0xff] }
0x1131   : > { %v10308_v25 = vadd.f32 %v10276_v31, %v25112_v63  ;;  %v10246_v50 = vmax.f32 %v10212_v13, 0.0  ;;  %v10383_v55 = vsel %vm1232_vm7, %v10351_v51, 0.0  ;;  %v23801_v33 = vpack.c.bf16 %v10350_v30, %v10381_v62  ;;  %v10354_v31 = vld [vmem:[#allocation2 + $0x5f] sm:$0xff]  ;;  %v10356_v32 = vld [vmem:[#allocation2 + $0x6f] sm:$0xff]  ;;  %v10357_v63 = vld [vmem:[#allocation2 + $0x77] sm:$0xff] }
0x1132   : > { %v10307_v53 = vadd.f32 %v10275_v36, %v25113_v4  ;;  %v10245_v22 = vmax.f32 %v10207_v46, 0.0  ;;  %17491 = vmatprep.mubr.msk.bf16.mxu1 %vm1236_vm0, %v23753_v3  ;;  %v10454_v58 = vld [vmem:[#allocation2 + $0xe0] sm:$0xff]  ;;  %v23804_v16 = vpack.c.bf16 %v10352_v56, %v10383_v55  ;;  %v10387_v0 = vsel %vm1232_vm7, %v10355_v21, 0.0  ;;  %v10922_v56 = vld [vmem:[#allocation2 + $0x11] sm:$0xff]  ;;  %v10921_v21 = vld [vmem:[#allocation2 + $0x9] sm:$0xff] }
0x1133   : > { %10340 = vst.msk [vmem:[#allocation2 + $0x100] sm:$0xff] %vm1236_vm0, %v10308_v25  ;;  %v10278_v10 = vmin.f32 %v10246_v50, 6.0  ;;  %v10453_v14 = vld [vmem:[#allocation2 + $0xd8] sm:$0xff]  ;;  %v23816_v46 = vpack.c.bf16 %v10356_v32, %v10387_v0  ;;  %v10359_v25 = vld [vmem:[#allocation2 + $0x87] sm:$0xff]  ;;  %v10389_v4 = vsel %vm1232_vm7, %v10357_v63, 0.0 }
0x1134   : > { %10339 = vst.msk [vmem:[#allocation2 + $0xf8] sm:$0xff] %vm1236_vm0, %v10307_v53  ;;  %v10277_v39 = vmin.f32 %v10245_v22, 6.0  ;;  %v23761_v2 = vpack.c.bf16 %v10454_v58, %v10453_v14  ;;  %v10358_v50 = vld [vmem:[#allocation2 + $0x7f] sm:$0xff]  ;;  %v10360_v53 = vld [vmem:[#allocation2 + $0x8f] sm:$0xff]  ;;  %v10391_v22 = vsel %vm1232_vm7, %v10359_v25, 0.0  ;;  %v10361_v14 = vld [vmem:[#allocation2 + $0x97] sm:$0xff] }
0x1135   : > { %v10310_v8 = vadd.f32 %v10278_v10, %v25114_v52  ;;  %v23826_v58 = vpack.c.bf16 %v10358_v50, %v10389_v4  ;;  %v23828_v10 = vpack.c.bf16 %v10360_v53, %v10391_v22  ;;  %v10362_v52 = vld [vmem:[#allocation2 + $0x9f] sm:$0xff]  ;;  %v10367_v9 = vld [vmem:[#allocation2 + $0xc7] sm:$0xff]  ;;  %v10369_v48 = vld [vmem:[#allocation2 + $0xd7] sm:$0xff] }
0x1136   : > { %v10309_v5 = vadd.f32 %v10277_v39, %v25115_v40  ;;  %17492 = vmatmul.mubr.msk.bf16.gmra.mrb[96].mxu1 %vm1236_vm0, %v23761_v2  ;;  %v10456_v47 = vld [vmem:[#allocation2 + $0xf0] sm:$0xff]  ;;  %v10363_v39 = vld [vmem:[#allocation2 + $0xa7] sm:$0xff]  ;;  %v10370_v34 = vld [vmem:[#allocation2 + $0xdf] sm:$0xff]  ;;  %v10401_v17 = vsel %vm1232_vm7, %v10369_v48, 0.0 }
0x1137   : > { %10342 = vst.msk [vmem:[#allocation2 + $0x110] sm:$0xff] %vm1236_vm0, %v10310_v8  ;;  %v10455_v26 = vld [vmem:[#allocation2 + $0xe8] sm:$0xff]  ;;  %v10393_v8 = vsel %vm1232_vm7, %v10361_v14, 0.0  ;;  %v10395_v40 = vsel %vm1232_vm7, %v10363_v39, 0.0  ;;  %v23862_v51 = vpack.c.bf16 %v10370_v34, %v10401_v17  ;;  %v10926_v25 = vld [vmem:[#allocation2 + $0x31] sm:$0xff]  ;;  %v10923_v53 = vld [vmem:[#allocation2 + $0x19] sm:$0xff] }
0x1138   : > { %10341 = vst.msk [vmem:[#allocation2 + $0x108] sm:$0xff] %vm1236_vm0, %v10309_v5  ;;  %v23769_v37 = vpack.c.bf16 %v10456_v47, %v10455_v26  ;;  %v23838_v5 = vpack.c.bf16 %v10362_v52, %v10393_v8  ;;  %v23840_v47 = vpack.c.bf16 %v10364_v57, %v10395_v40  ;;  %v10365_v26 = vld [vmem:[#allocation2 + $0xb7] sm:$0xff]  ;;  %v10371_v59 = vld [vmem:[#allocation2 + $0xe7] sm:$0xff]  ;;  %v10958_v4 = vsel %vm1235_vm8, %v10926_v25, 0.0 }
0x1139   : > { %v10403_v6 = vsel %vm1232_vm7, %v10371_v59, 0.0  ;;  %v10924_v63 = vld [vmem:[#allocation2 + $0x21] sm:$0xff]  ;;  %v10925_v14 = vld [vmem:[#allocation2 + $0x29] sm:$0xff]  ;;  %v19231_v39 = vld [vmem:[%s25065_s22 + $0x38] sm:$0xff]  }
0x113a   : > { %17495 = vmatprep.mubr.msk.bf16.mxu1 %vm1236_vm0, %v23769_v37  ;;  %v10458_v41 = vld [vmem:[#allocation2 + $0x100] sm:$0xff]  ;;  %v10956_v50 = vsel %vm1235_vm8, %v10924_v63, 0.0  ;;  %v23886_v52 = vpack.c.bf16 %v10958_v4, %v10925_v14  ;;  %v10930_v57 = vld [vmem:[#allocation2 + $0x51] sm:$0xff]  ;;  %v10937_v63 = vld [vmem:[#allocation2 + $0x89] sm:$0xff] }
0x113b   : > { %v10457_v45 = vld [vmem:[#allocation2 + $0xf8] sm:$0xff]  ;;  %v23883_v22 = vpack.c.bf16 %v10956_v50, %v10923_v53  ;;  %v10928_v8 = vld [vmem:[#allocation2 + $0x41] sm:$0xff] }
0x113c   : > { %v23775_v19 = vpack.c.bf16 %v10458_v41, %v10457_v45  ;;  %v10397_v41 = vsel %vm1232_vm7, %v10365_v26, 0.0  ;;  %v10368_v45 = vld [vmem:[#allocation2 + $0xcf] sm:$0xff]  ;;  %v10373_v62 = vld [vmem:[#allocation2 + $0xf7] sm:$0xff]  ;;  %v10374_v55 = vld [vmem:[#allocation2 + $0xff] sm:$0xff]  ;;  %v10960_v26 = vsel %vm1235_vm8, %v10928_v8, 0.0 }
0x113d   : > { %v23850_v61 = vpack.c.bf16 %v10366_v38, %v10397_v41  ;;  %v23894_v40 = vld [vmem:[%s25065_s22 + $0x40] sm:$0xff]   ;;  %v10934_v48 = vld [vmem:[#allocation2 + $0x71] sm:$0xff] }
0x113e   : > { %17496 = vmatmul.mubr.msk.bf16.gmra.mrb[100].mxu1 %vm1236_vm0, %v23775_v19  ;;  %v10927_v38 = vld [vmem:[#allocation2 + $0x39] sm:$0xff]  ;;  %v10966_v34 = vsel %vm1235_vm8, %v10934_v48, 0.0  ;;  %v10940_v50 = vld [vmem:[#allocation2 + $0xa1] sm:$0xff]  ;;  %v10942_v4 = vld [vmem:[#allocation2 + $0xb1] sm:$0xff] }
0x113f   : > { %17503 = vmatprep.mubr.msk.bf16.mxu1 %vm1236_vm0, %v10407_v29  ;;  %v10399_v29 = vsel %vm1232_vm7, %v10367_v9, 0.0  ;;  %v10962_v9 = vsel %vm1235_vm8, %v10930_v57, 0.0  ;;  %v23900_v41 = vpack.c.bf16 %v10960_v26, %v10927_v38  ;;  %v10931_v17 = vld [vmem:[#allocation2 + $0x59] sm:$0xff]  ;;  %v10972_v53 = vsel %vm1235_vm8, %v10940_v50, 0.0  ;;  %v10941_v57 = vld [vmem:[#allocation2 + $0xa9] sm:$0xff]  ;;  %v10946_v38 = vld [vmem:[#allocation2 + $0xd1] sm:$0xff] }
0x1140   : > { %v23852_v42 = vpack.c.bf16 %v10368_v45, %v10399_v29  ;;  %v10929_v45 = vld [vmem:[#allocation2 + $0x49] sm:$0xff]  ;;  %v10974_v14 = vsel %vm1235_vm8, %v10942_v4, 0.0  ;;  %v10943_v48 = vld [vmem:[#allocation2 + $0xb9] sm:$0xff]  ;;  %v10952_v4 = vld [vmem:[#allocation2 + $0x101] sm:$0xff] }
0x1141   : > { %v23903_v29 = vpack.c.bf16 %v10962_v9, %v10929_v45  ;;  %v23939_v26 = vpack.c.bf16 %v10974_v14, %v10941_v57  ;;  %v10944_v9 = vld [vmem:[#allocation2 + $0xc1] sm:$0xff]  ;;  %v10951_v14 = vld [vmem:[#allocation2 + $0xf9] sm:$0xff] }
0x1142   : > { %v10976_v45 = vsel %vm1235_vm8, %v10944_v9, 0.0  ;;  %v19233_v57 = vld [vmem:[%s25065_s22 + $0x48] sm:$0xff]   ;;  %v19234_v9 = vld [vmem:[%s25065_s22 + $0x50] sm:$0xff]  }
0x1146   : > { %17504 = vmatmul.mubr.msk.bf16.vlgmr.msra.gmra.mrb[72].mxu1 %vm1236_vm0, %v23784_v44 }
0x1147   : > { %17507 = vmatprep.mubr.msk.bf16.mxu1 %vm1236_vm0, %v23787_v60  ;;  %17536 = vmatpush3.bf16.msra.mxu1 %v23652_v35  ;;  %v10353_v35 = vld [vmem:[#allocation2 + $0x57] sm:$0xff] }
0x1148   : > { %17537 = vmatprep.subr.bf16.mxu1 %v19229_v11  ;;  %v10385_v13 = vsel %vm1232_vm7, %v10353_v35, 0.0  ;;  %v10405_v35 = vsel %vm1232_vm7, %v10373_v62, 0.0 }
0x1149   : > { %v23814_v36 = vpack.c.bf16 %v10354_v31, %v10385_v13  ;;  %v10954_v13 = vsel %vm1235_vm8, %v10922_v56, 0.0  ;;  %v23874_v32 = vpack.c.bf16 %v10374_v55, %v10405_v35  ;;  %v10936_v56 = vld [vmem:[#allocation2 + $0x81] sm:$0xff]  ;;  %v10938_v55 = vld [vmem:[#allocation2 + $0x91] sm:$0xff] }
0x114a   : > { %v10985_v0 = vpack.c.bf16 %v10954_v13, %v10921_v21  ;;  %v10968_v35 = vsel %vm1235_vm8, %v10936_v56, 0.0  ;;  %v10970_v21 = vsel %vm1235_vm8, %v10938_v55, 0.0  ;;  %v10935_v13 = vld [vmem:[#allocation2 + $0x79] sm:$0xff]  ;;  %v10950_v56 = vld [vmem:[#allocation2 + $0xf1] sm:$0xff] }
0x114b   : > { %17538 = vmatpush3.bf16.msra.mxu1 %v19229_v11  ;;  %v10372_v11 = vld [vmem:[#allocation2 + $0xef] sm:$0xff]  ;;  %v23927_v25 = vpack.c.bf16 %v10970_v21, %v10937_v63  ;;  %v10947_v21 = vld [vmem:[#allocation2 + $0xd9] sm:$0xff] }
0x114c   : > { %17571 = vmatprep.subr.bf16.mxu1 %v23795_v1  ;;  %v23864_v30 = vpack.c.bf16 %v10372_v11, %v10403_v6  ;;  %v10933_v6 = vld [vmem:[#allocation2 + $0x69] sm:$0xff] }
0x114d   : > { %v23915_v62 = vpack.c.bf16 %v10966_v34, %v10933_v6  ;;  %v10945_v34 = vld [vmem:[#allocation2 + $0xc9] sm:$0xff]  ;;  %v10948_v6 = vld [vmem:[#allocation2 + $0xe1] sm:$0xff] }
0x114e   : > { %17508 = vmatmul.mubr.msk.bf16.gmra.mrb[76].mxu1 %vm1236_vm0, %v23801_v33  ;;  %v10980_v55 = vsel %vm1235_vm8, %v10948_v6, 0.0  ;;  %v10949_v63 = vld [vmem:[#allocation2 + $0xe9] sm:$0xff]  ;;  %v12581_v6 = vld [vmem:[#allocation2 + $0x60] sm:$0xff] }
0x114f   : > { %17511 = vmatprep.mubr.msk.bf16.mxu1 %vm1236_vm0, %v23804_v16 }
0x1156   : > { %17512 = vmatmul.mubr.msk.bf16.gmra.mrb[80].mxu1 %vm1236_vm0, %v23814_v36 }
0x1157   : > { %17515 = vmatprep.mubr.msk.bf16.mxu1 %vm1236_vm0, %v23816_v46 }
0x115e   : > { %17516 = vmatmul.mubr.msk.bf16.gmra.mrb[84].mxu1 %vm1236_vm0, %v23826_v58 }
0x115f   : > { %17519 = vmatprep.mubr.msk.bf16.mxu1 %vm1236_vm0, %v23828_v10 }
0x1166   : > { %17520 = vmatmul.mubr.msk.bf16.gmra.mrb[88].mxu1 %vm1236_vm0, %v23838_v5 }
0x1167   : > { %17523 = vmatprep.mubr.msk.bf16.mxu1 %vm1236_vm0, %v23840_v47 }
0x116e   : > { %17524 = vmatmul.mubr.msk.bf16.gmra.mrb[92].mxu1 %vm1236_vm0, %v23850_v61 }
0x116f   : > { %17527 = vmatprep.mubr.msk.bf16.mxu1 %vm1236_vm0, %v23852_v42 }
0x1176   : > { %17528 = vmatmul.mubr.msk.bf16.gmra.mrb[96].mxu1 %vm1236_vm0, %v23862_v51 }
0x1177   : > { %17531 = vmatprep.mubr.msk.bf16.mxu1 %vm1236_vm0, %v23864_v30 }
0x117e   : > { %17532 = vmatmul.mubr.msk.bf16.gmra.mrb[100].mxu1 %vm1236_vm0, %v23874_v32 }
0x117f   : > { %17539 = vmatprep.mubr.msk.bf16.mxu1 %vm1236_vm0, %v10985_v0  ;;  %v23925_v0 = vpack.c.bf16 %v10968_v35, %v10935_v13  ;;  %v10982_v35 = vsel %vm1235_vm8, %v10950_v56, 0.0  ;;  %v23961_v13 = vpack.c.bf16 %v10980_v55, %v10947_v21  ;;  %v12582_v56 = vld [vmem:[#allocation2 + $0x68] sm:$0xff]  ;;  %v12583_v55 = vld [vmem:[#allocation2 + $0x70] sm:$0xff] }
0x1180   : > { %v23963_v50 = vpack.c.bf16 %v10982_v35, %v10949_v63  ;;  %v12610_v21 = vpack.c.bf16 %v12583_v55, %v12582_v56  ;;  %v12584_v63 = vld [vmem:[#allocation2 + $0x78] sm:$0xff] }
0x1186   : > { %17540 = vmatmul.mubr.msk.bf16.vlgmr.msra.gmra.mrb[72].mxu1 %vm1236_vm0, %v23883_v22 }
0x1187   : > { %17543 = vmatprep.mubr.msk.bf16.mxu1 %vm1236_vm0, %v23886_v52  ;;  %17572 = vmatpush3.bf16.msra.mxu1 %v23795_v1  ;;  %v10932_v1 = vld [vmem:[#allocation2 + $0x61] sm:$0xff] }
0x1188   : > { %17573 = vmatprep.subr.bf16.mxu1 %v19231_v39  ;;  %v10964_v59 = vsel %vm1235_vm8, %v10932_v1, 0.0  ;;  %v10978_v1 = vsel %vm1235_vm8, %v10946_v38, 0.0 }
0x1189   : > { %v23913_v11 = vpack.c.bf16 %v10964_v59, %v10931_v17  ;;  %v23949_v59 = vpack.c.bf16 %v10976_v45, %v10943_v48  ;;  %v23951_v17 = vpack.c.bf16 %v10978_v1, %v10945_v34  ;;  %v19235_v1 = vld [vmem:[%s25065_s22 + $0x58] sm:$0xff]   ;;  %v19236_v48 = vld [vmem:[%s25065_s22 + $0x60] sm:$0xff]  }
0x118a   : > { %v12580_v34 = vld [vmem:[#allocation2 + $0x58] sm:$0xff] }
0x118b   : > { %17574 = vmatpush3.bf16.msra.mxu1 %v19231_v39  ;;  %v10939_v39 = vld [vmem:[#allocation2 + $0x99] sm:$0xff]  ;;  %v12609_v35 = vpack.c.bf16 %v12581_v6, %v12580_v34 }
0x118c   : > { %17607 = vmatprep.subr.bf16.mxu1 %v23894_v40  ;;  %v23937_v8 = vpack.c.bf16 %v10972_v53, %v10939_v39  ;;  %v10984_v53 = vsel %vm1235_vm8, %v10952_v4, 0.0  ;;  %v12585_v4 = vld [vmem:[#allocation2 + $0x80] sm:$0xff] }
0x118d   : > { %v23971_v39 = vpack.c.bf16 %v10984_v53, %v10951_v14  ;;  %v12586_v53 = vld [vmem:[#allocation2 + $0x88] sm:$0xff]  ;;  %v12587_v14 = vld [vmem:[#allocation2 + $0x90] sm:$0xff] }
0x118e   : > { %17544 = vmatmul.mubr.msk.bf16.gmra.mrb[76].mxu1 %vm1236_vm0, %v23900_v41 }
0x118f   : > { %17547 = vmatprep.mubr.msk.bf16.mxu1 %vm1236_vm0, %v23903_v29 }
0x1196   : > { %17548 = vmatmul.mubr.msk.bf16.gmra.mrb[80].mxu1 %vm1236_vm0, %v23913_v11 }
0x1197   : > { %17551 = vmatprep.mubr.msk.bf16.mxu1 %vm1236_vm0, %v23915_v62 }
0x119e   : > { %17552 = vmatmul.mubr.msk.bf16.gmra.mrb[84].mxu1 %vm1236_vm0, %v23925_v0 }
0x119f   : > { %17555 = vmatprep.mubr.msk.bf16.mxu1 %vm1236_vm0, %v23927_v25 }
0x11a6   : > { %17556 = vmatmul.mubr.msk.bf16.gmra.mrb[88].mxu1 %vm1236_vm0, %v23937_v8 }
0x11a7   : > { %17559 = vmatprep.mubr.msk.bf16.mxu1 %vm1236_vm0, %v23939_v26 }
0x11ae   : > { %17560 = vmatmul.mubr.msk.bf16.gmra.mrb[92].mxu1 %vm1236_vm0, %v23949_v59 }
0x11af   : > { %17563 = vmatprep.mubr.msk.bf16.mxu1 %vm1236_vm0, %v23951_v17 }
0x11b6   : > { %17564 = vmatmul.mubr.msk.bf16.gmra.mrb[96].mxu1 %vm1236_vm0, %v23961_v13 }
0x11b7   : > { %17567 = vmatprep.mubr.msk.bf16.mxu1 %vm1236_vm0, %v23963_v50 }
0x11be   : > { %17568 = vmatmul.mubr.msk.bf16.gmra.mrb[100].mxu1 %vm1236_vm0, %v23971_v39 }
0x11bf   : > { %17575 = vmatprep.mubr.msk.bf16.mxu1 %vm1236_vm0, %v23784_v44  ;;  %v11288_v44 = vld [vmem:[#allocation2 + $0x107] sm:$0xff] }
0x11c0   : > { %v11320_v38 = vsel %vm1232_vm7, %v11288_v44, 0.0  ;;  %v12588_v44 = vld [vmem:[#allocation2 + $0x98] sm:$0xff] }
0x11c6   : > { %17576 = vmatmul.mubr.msk.bf16.vlgmr.msra.gmra.mrb[72].mxu1 %vm1236_vm0, %v23787_v60 }
0x11c7   : > { %17579 = vmatprep.mubr.msk.bf16.mxu1 %vm1236_vm0, %v23801_v33  ;;  %17608 = vmatpush3.bf16.msra.mxu1 %v23894_v40  ;;  %v11289_v40 = vld [vmem:[#allocation2 + $0x10f] sm:$0xff] }
0x11c8   : > { %17609 = vmatprep.subr.bf16.mxu1 %v19233_v57  ;;  %v24010_v45 = vpack.c.bf16 %v11289_v40, %v11320_v38  ;;  %v12589_v40 = vld [vmem:[#allocation2 + $0xa0] sm:$0xff]  ;;  %v12590_v38 = vld [vmem:[#allocation2 + $0xa8] sm:$0xff] }
0x11cb   : > { %17610 = vmatpush3.bf16.msra.mxu1 %v19233_v57  ;;  %v12611_v57 = vpack.c.bf16 %v12585_v4, %v12584_v63 }
0x11cc   : > { %17643 = vmatprep.subr.bf16.mxu1 %v19234_v9 }
0x11ce   : > { %17580 = vmatmul.mubr.msk.bf16.gmra.mrb[76].mxu1 %vm1236_vm0, %v23804_v16 }
0x11cf   : > { %17583 = vmatprep.mubr.msk.bf16.mxu1 %vm1236_vm0, %v23814_v36 }
0x11d6   : > { %17584 = vmatmul.mubr.msk.bf16.gmra.mrb[80].mxu1 %vm1236_vm0, %v23816_v46 }
0x11d7   : > { %17587 = vmatprep.mubr.msk.bf16.mxu1 %vm1236_vm0, %v23826_v58 }
0x11de   : > { %17588 = vmatmul.mubr.msk.bf16.gmra.mrb[84].mxu1 %vm1236_vm0, %v23828_v10 }
0x11df   : > { %17591 = vmatprep.mubr.msk.bf16.mxu1 %vm1236_vm0, %v23838_v5 }
0x11e6   : > { %17592 = vmatmul.mubr.msk.bf16.gmra.mrb[88].mxu1 %vm1236_vm0, %v23840_v47 }
0x11e7   : > { %17595 = vmatprep.mubr.msk.bf16.mxu1 %vm1236_vm0, %v23850_v61 }
0x11ee   : > { %17596 = vmatmul.mubr.msk.bf16.gmra.mrb[92].mxu1 %vm1236_vm0, %v23852_v42 }
0x11ef   : > { %17599 = vmatprep.mubr.msk.bf16.mxu1 %vm1236_vm0, %v23862_v51 }
0x11f6   : > { %17600 = vmatmul.mubr.msk.bf16.gmra.mrb[96].mxu1 %vm1236_vm0, %v23864_v30 }
0x11f7   : > { %17603 = vmatprep.mubr.msk.bf16.mxu1 %vm1236_vm0, %v23874_v32 }
0x11fe   : > { %17604 = vmatmul.mubr.msk.bf16.gmra.mrb[100].mxu1 %vm1236_vm0, %v24010_v45 }
0x11ff   : > { %17611 = vmatprep.mubr.msk.bf16.mxu1 %vm1236_vm0, %v23637_v23  ;;  %v11625_v23 = vld [vmem:[#allocation2 + $0x108] sm:$0xff] }
0x1206   : > { %17612 = vmatmul.mubr.msk.bf16.vlgmr.msra.gmra.mrb[72].mxu1 %vm1236_vm0, %v23649_v15  ;;  %v11626_v15 = vld [vmem:[#allocation2 + $0x110] sm:$0xff] }
0x1207   : > { %17615 = vmatprep.mubr.msk.bf16.mxu1 %vm1236_vm0, %v23662_v28  ;;  %17644 = vmatpush3.bf16.msra.mxu1 %v19234_v9  ;;  %v24046_v28 = vpack.c.bf16 %v11626_v15, %v11625_v23  ;;  %v12612_v9 = vpack.c.bf16 %v12587_v14, %v12586_v53  ;;  %v12592_v23 = vld [vmem:[#allocation2 + $0xb8] sm:$0xff]  ;;  %v12593_v15 = vld [vmem:[#allocation2 + $0xc0] sm:$0xff] }
0x1208   : > { %17645 = vmatprep.subr.bf16.mxu1 %v19235_v1 }
0x120b   : > { %17646 = vmatpush3.bf16.msra.mxu1 %v19235_v1  ;;  %v12613_v1 = vpack.c.bf16 %v12589_v40, %v12588_v44 }
0x120c   : > { %17679 = vmatprep.subr.bf16.mxu1 %v19236_v48 }
0x120e   : > { %17616 = vmatmul.mubr.msk.bf16.gmra.mrb[76].mxu1 %vm1236_vm0, %v23673_v49  ;;  %v19237_v49 = vld [vmem:[%s25065_s22 + $0x68] sm:$0xff]  }
0x120f   : > { %17619 = vmatprep.mubr.msk.bf16.mxu1 %vm1236_vm0, %v23683_v18  ;;  %v19238_v18 = vld [vmem:[%s25065_s22 + $0x70] sm:$0xff]  }
0x1216   : > { %17620 = vmatmul.mubr.msk.bf16.gmra.mrb[80].mxu1 %vm1236_vm0, %v23693_v7  ;;  %v11931_v7 = vld [vmem:[#allocation2 + $0x111] sm:$0xff] }
0x1217   : > { %17623 = vmatprep.mubr.msk.bf16.mxu1 %vm1236_vm0, %v23703_v27  ;;  %v11930_v27 = vld [vmem:[#allocation2 + $0x109] sm:$0xff] }
0x121e   : > { %17624 = vmatmul.mubr.msk.bf16.gmra.mrb[84].mxu1 %vm1236_vm0, %v23713_v24  ;;  %v11963_v24 = vsel %vm1235_vm8, %v11931_v7, 0.0  ;;  %v12615_v7 = vpack.c.bf16 %v12593_v15, %v12592_v23 }
0x121f   : > { %17627 = vmatprep.mubr.msk.bf16.mxu1 %vm1236_vm0, %v23723_v20  ;;  %v24084_v20 = vpack.c.bf16 %v11963_v24, %v11930_v27  ;;  %v12596_v24 = vld [vmem:[#allocation2 + $0xd8] sm:$0xff] }
0x1226   : > { %17628 = vmatmul.mubr.msk.bf16.gmra.mrb[88].mxu1 %vm1236_vm0, %v23733_v54  ;;  %v19239_v54 = vld [vmem:[%s25065_s22 + $0x78] sm:$0xff]  }
0x1227   : > { %17631 = vmatprep.mubr.msk.bf16.mxu1 %vm1236_vm0, %v23743_v12  ;;  %v19240_v12 = vld [vmem:[%s25065_s22 + $0x80] sm:$0xff]  }
0x122e   : > { %17632 = vmatmul.mubr.msk.bf16.gmra.mrb[92].mxu1 %vm1236_vm0, %v23753_v3  ;;  %v12267_v3 = vld [vmem:[#allocation2 + $0x117] sm:$0xff] }
0x122f   : > { %17635 = vmatprep.mubr.msk.bf16.mxu1 %vm1236_vm0, %v23761_v2  ;;  %v12268_v2 = vld [vmem:[#allocation2 + $0x11f] sm:$0xff] }
0x1236   : > { %17636 = vmatmul.mubr.msk.bf16.gmra.mrb[96].mxu1 %vm1236_vm0, %v23769_v37  ;;  %v12299_v37 = vsel %vm1232_vm7, %v12267_v3, 0.0  ;;  %v12599_v3 = vld [vmem:[#allocation2 + $0xf0] sm:$0xff] }
0x1237   : > { %17639 = vmatprep.mubr.msk.bf16.mxu1 %vm1236_vm0, %v23775_v19  ;;  %v12574_v19 = vld [vmem:[#allocation2 + $0x28] sm:$0xff] }
0x123e   : > { %17640 = vmatmul.mubr.msk.bf16.gmra.mrb[100].mxu1 %vm1236_vm0, %v24046_v28 }
0x123f   : > { %17647 = vmatprep.mubr.msk.bf16.mxu1 %vm1236_vm0, %v23883_v22 }
0x1246   : > { %17648 = vmatmul.mubr.msk.bf16.vlgmr.msra.gmra.mrb[72].mxu1 %vm1236_vm0, %v23886_v52 }
0x1247   : > { %17651 = vmatprep.mubr.msk.bf16.mxu1 %vm1236_vm0, %v23900_v41  ;;  %17680 = vmatpush3.bf16.msra.mxu1 %v19236_v48 }
0x1248   : > { %17681 = vmatprep.subr.bf16.mxu1 %v19237_v49 }
0x124b   : > { %17682 = vmatpush3.bf16.msra.mxu1 %v19237_v49  ;;  %v12594_v49 = vld [vmem:[#allocation2 + $0xc8] sm:$0xff] }
0x124c   : > { %17715 = vmatprep.subr.bf16.mxu1 %v19238_v18 }
0x124e   : > { %17652 = vmatmul.mubr.msk.bf16.gmra.mrb[76].mxu1 %vm1236_vm0, %v23903_v29 }
0x124f   : > { %17655 = vmatprep.mubr.msk.bf16.mxu1 %vm1236_vm0, %v23913_v11 }
0x1256   : > { %17656 = vmatmul.mubr.msk.bf16.gmra.mrb[80].mxu1 %vm1236_vm0, %v23915_v62 }
0x1257   : > { %17659 = vmatprep.mubr.msk.bf16.mxu1 %vm1236_vm0, %v23925_v0 }
0x125e   : > { %17660 = vmatmul.mubr.msk.bf16.gmra.mrb[84].mxu1 %vm1236_vm0, %v23927_v25 }
0x125f   : > { %17663 = vmatprep.mubr.msk.bf16.mxu1 %vm1236_vm0, %v23937_v8 }
0x1266   : > { %17664 = vmatmul.mubr.msk.bf16.gmra.mrb[88].mxu1 %vm1236_vm0, %v23939_v26 }
0x1267   : > { %17667 = vmatprep.mubr.msk.bf16.mxu1 %vm1236_vm0, %v23949_v59 }
0x126e   : > { %17668 = vmatmul.mubr.msk.bf16.gmra.mrb[92].mxu1 %vm1236_vm0, %v23951_v17 }
0x126f   : > { %17671 = vmatprep.mubr.msk.bf16.mxu1 %vm1236_vm0, %v23961_v13 }
0x1276   : > { %17672 = vmatmul.mubr.msk.bf16.gmra.mrb[96].mxu1 %vm1236_vm0, %v23963_v50 }
0x1277   : > { %17675 = vmatprep.mubr.msk.bf16.mxu1 %vm1236_vm0, %v23971_v39 }
0x127e   : > { %17676 = vmatmul.mubr.msk.bf16.gmra.mrb[100].mxu1 %vm1236_vm0, %v24084_v20 }
0x127f   : > { %17683 = vmatprep.mubr.msk.bf16.mxu1 %vm1236_vm0, %v23787_v60  ;;  %v12575_v60 = vld [vmem:[#allocation2 + $0x30] sm:$0xff] }
0x1286   : > { %17684 = vmatmul.mubr.msk.bf16.vlgmr.msra.gmra.mrb[72].mxu1 %vm1236_vm0, %v23801_v33  ;;  %v12316_v33 = vpack.c.bf16 %v12268_v2, %v12299_v37 }
0x1287   : > { %17687 = vmatprep.mubr.msk.bf16.mxu1 %vm1236_vm0, %v23804_v16  ;;  %17716 = vmatpush3.bf16.msra.mxu1 %v19238_v18  ;;  %v12606_v16 = vpack.c.bf16 %v12575_v60, %v12574_v19  ;;  %v12595_v18 = vld [vmem:[#allocation2 + $0xd0] sm:$0xff]  ;;  %v12600_v19 = vld [vmem:[#allocation2 + $0xf8] sm:$0xff]  ;;  %v12601_v60 = vld [vmem:[#allocation2 + $0x100] sm:$0xff] }
0x1288   : > { %17717 = vmatprep.subr.bf16.mxu1 %v19239_v54  ;;  %v12616_v27 = vpack.c.bf16 %v12595_v18, %v12594_v49 }
0x128b   : > { %17718 = vmatpush3.bf16.msra.mxu1 %v19239_v54  ;;  %v12597_v54 = vld [vmem:[#allocation2 + $0xe0] sm:$0xff] }
0x128c   : > { %17751 = vmatprep.subr.bf16.mxu1 %v19240_v12  ;;  %v12617_v2 = vpack.c.bf16 %v12597_v54, %v12596_v24 }
0x128e   : > { %17688 = vmatmul.mubr.msk.bf16.gmra.mrb[76].mxu1 %vm1236_vm0, %v23814_v36  ;;  %v13319_v36 = vld [vmem:[#allocation23] sm:$0xff] }
0x128f   : > { %17691 = vmatprep.mubr.msk.bf16.mxu1 %vm1236_vm0, %v23816_v46  ;;  %v13320_v46 = vld [vmem:[#allocation23 + $0x8] sm:$0xff] }
0x1296   : > { %17692 = vmatmul.mubr.msk.bf16.gmra.mrb[80].mxu1 %vm1236_vm0, %v23826_v58  ;;  %v13321_v58 = vld [vmem:[#allocation23 + $0x10] sm:$0xff] }
0x1297   : > { %17695 = vmatprep.mubr.msk.bf16.mxu1 %vm1236_vm0, %v23828_v10  ;;  %v18091_v10 = vpack.c.bf16 %v13320_v46, %v13319_v36  ;;  %v12605_v36 = vld [vmem:[#allocation2 + $0x120] sm:$0xff] }
0x1299   : > { %18092 = vmatprep.subr.bf16.mxu0 %v18091_v10 }
0x129a   : > { %18094 = vmatpush3.bf16.msra.mxu0 %v18091_v10  ;;  %v14077_v10 = vld [vmem:[#allocation26 + $0x10] sm:$0xff] }
0x129e   : > { %17696 = vmatmul.mubr.msk.bf16.gmra.mrb[84].mxu1 %vm1236_vm0, %v23838_v5  ;;  %v13322_v5 = vld [vmem:[#allocation23 + $0x18] sm:$0xff] }
0x129f   : > { %17699 = vmatprep.mubr.msk.bf16.mxu1 %vm1236_vm0, %v23840_v47  ;;  %v18095_v47 = vpack.c.bf16 %v13322_v5, %v13321_v58  ;;  %v14078_v5 = vld [vmem:[#allocation26 + $0x18] sm:$0xff] }
0x12a1   : > { %18096 = vmatprep.subr.bf16.mxu0 %v18095_v47 }
0x12a2   : > { %18098 = vmatpush3.bf16.msra.mxu0 %v18095_v47 }
0x12a6   : > { %17700 = vmatmul.mubr.msk.bf16.gmra.mrb[88].mxu1 %vm1236_vm0, %v23850_v61  ;;  %v12576_v61 = vld [vmem:[#allocation2 + $0x38] sm:$0xff] }
0x12a7   : > { %17703 = vmatprep.mubr.msk.bf16.mxu1 %vm1236_vm0, %v23852_v42  ;;  %v12577_v42 = vld [vmem:[#allocation2 + $0x40] sm:$0xff] }
0x12ae   : > { %17704 = vmatmul.mubr.msk.bf16.gmra.mrb[92].mxu1 %vm1236_vm0, %v23862_v51  ;;  %v12579_v51 = vld [vmem:[#allocation2 + $0x50] sm:$0xff] }
0x12af   : > { %17707 = vmatprep.mubr.msk.bf16.mxu1 %vm1236_vm0, %v23864_v30  ;;  %v12607_v30 = vpack.c.bf16 %v12577_v42, %v12576_v61  ;;  %v12608_v22 = vpack.c.bf16 %v12579_v51, %v12578_v43 }
0x12b6   : > { %17708 = vmatmul.mubr.msk.bf16.gmra.mrb[96].mxu1 %vm1236_vm0, %v23874_v32  ;;  %v19241_v32 = vld [vmem:[%s25065_s22 + $0x88] sm:$0xff]  }
0x12b7   : > { %17711 = vmatprep.mubr.msk.bf16.mxu1 %vm1236_vm0, %v24010_v45  ;;  %v12591_v45 = vld [vmem:[#allocation2 + $0xb0] sm:$0xff] }
0x12b8   : > { %v12614_v48 = vpack.c.bf16 %v12591_v45, %v12590_v38 }
0x12be   : > { %17712 = vmatmul.mubr.msk.bf16.gmra.mrb[100].mxu1 %vm1236_vm0, %v12316_v33  ;;  %v12619_v33 = vpack.c.bf16 %v12601_v60, %v12600_v19 }
0x12bf   : > { %17719 = vmatprep.mubr.msk.bf16.mxu1 %vm1236_vm0, %v12606_v16  ;;  %v12604_v16 = vld [vmem:[#allocation2 + $0x118] sm:$0xff] }
0x12c0   : > { %v12621_v46 = vpack.c.bf16 %v12605_v36, %v12604_v16 }
0x12c6   : > { %17720 = vmatmul.mubr.msk.bf16.vlgmr.msra.gmra.mrb[72].mxu1 %vm1236_vm0, %v12607_v30  ;;  %v18103_v30 = vpack.c.bf16 %v14078_v5, %v14077_v10 }
0x12c7   : > { %17723 = vmatprep.mubr.msk.bf16.mxu1 %vm1236_vm0, %v12608_v22  ;;  %17752 = vmatpush3.bf16.msra.mxu1 %v19240_v12  ;;  %v12598_v12 = vld [vmem:[#allocation2 + $0xe8] sm:$0xff] }
0x12c8   : > { %17753 = vmatprep.subr.bf16.mxu1 %v19241_v32  ;;  %v12618_v37 = vpack.c.bf16 %v12599_v3, %v12598_v12 }
0x12cb   : > { %17754 = vmatpush3.bf16.msra.mxu1 %v19241_v32 }
0x12ce   : > { %17724 = vmatmul.mubr.msk.bf16.gmra.mrb[76].mxu1 %vm1236_vm0, %v12609_v35 }
0x12cf   : > { %17727 = vmatprep.mubr.msk.bf16.mxu1 %vm1236_vm0, %v12610_v21 }
0x12d6   : > { %17728 = vmatmul.mubr.msk.bf16.gmra.mrb[80].mxu1 %vm1236_vm0, %v12611_v57 }
0x12d7   : > { %17731 = vmatprep.mubr.msk.bf16.mxu1 %vm1236_vm0, %v12612_v9 }
0x12de   : > { %17732 = vmatmul.mubr.msk.bf16.gmra.mrb[84].mxu1 %vm1236_vm0, %v12613_v1 }
0x12df   : > { %17735 = vmatprep.mubr.msk.bf16.mxu1 %vm1236_vm0, %v12614_v48 }
0x12e6   : > { %17736 = vmatmul.mubr.msk.bf16.gmra.mrb[88].mxu1 %vm1236_vm0, %v12615_v7 }
0x12e7   : > { %17739 = vmatprep.mubr.msk.bf16.mxu1 %vm1236_vm0, %v12616_v27 }
0x12ee   : > { %17740 = vmatmul.mubr.msk.bf16.gmra.mrb[92].mxu1 %vm1236_vm0, %v12617_v2 }
0x12ef   : > { %17743 = vmatprep.mubr.msk.bf16.mxu1 %vm1236_vm0, %v12618_v37 }
0x12f6   : > { %17744 = vmatmul.mubr.msk.bf16.gmra.mrb[96].mxu1 %vm1236_vm0, %v12619_v33 }
0x12f7   : > { %17747 = vmatprep.mubr.msk.bf16.mxu1 %vm1236_vm0, %v24046_v28 }
0x12fe   : > { %17748 = vmatmul.mubr.msk.bf16.gmra.mrb[100].mxu1 %vm1236_vm0, %v12621_v46 }
0x12ff   : > { %17755 = vmatprep.mubr.msk.bf16.mxu1 %vm1236_vm0, %v23886_v52  ;;  %v12910_v52 = vld [vmem:[#allocation2 + $0x121] sm:$0xff] }
0x1306   : > { %17756 = vmatmul.mubr.msk.bf16.vlgmr.msra.gmra.mrb[72].mxu1 %vm1236_vm0, %v23900_v41  ;;  %v12909_v41 = vld [vmem:[#allocation2 + $0x119] sm:$0xff] }
0x1307   : > { %17759 = vmatprep.mubr.msk.bf16.mxu1 %vm1236_vm0, %v23903_v29  ;;  %v12942_v29 = vsel %vm1235_vm8, %v12910_v52, 0.0 }
0x130e   : > { %17760 = vmatmul.mubr.msk.bf16.gmra.mrb[76].mxu1 %vm1236_vm0, %v23913_v11  ;;  %v12958_v11 = vpack.c.bf16 %v12942_v29, %v12909_v41 }
0x130f   : > { %17763 = vmatprep.mubr.msk.bf16.mxu1 %vm1236_vm0, %v23915_v62  ;;  %v14075_v62 = vld [vmem:[#allocation26] sm:$0xff] }
0x1316   : > { %17764 = vmatmul.mubr.msk.bf16.gmra.mrb[80].mxu1 %vm1236_vm0, %v23925_v0  ;;  %v14076_v0 = vld [vmem:[#allocation26 + $0x8] sm:$0xff] }
0x1317   : > { %17767 = vmatprep.mubr.msk.bf16.mxu1 %vm1236_vm0, %v23927_v25  ;;  %v18099_v25 = vpack.c.bf16 %v14076_v0, %v14075_v62 }
0x1319   : > { %18100 = vmatprep.subr.bf16.mxu0 %v18099_v25 }
0x131e   : > { %17768 = vmatmul.mubr.msk.bf16.gmra.mrb[84].mxu1 %vm1236_vm0, %v23937_v8  ;;  %v24174_v8 = vld [vmem:[#allocation21] ss:$0 sm:$0xff] }
0x131f   : > { %17771 = vmatprep.mubr.msk.bf16.mxu1 %vm1236_vm0, %v23939_v26 }
0x1326   : > { %17772 = vmatmul.mubr.msk.bf16.gmra.mrb[88].mxu1 %vm1236_vm0, %v23949_v59 }
0x1327   : > { %17775 = vmatprep.mubr.msk.bf16.mxu1 %vm1236_vm0, %v23951_v17 }
0x132e   : > { %17776 = vmatmul.mubr.msk.bf16.gmra.mrb[92].mxu1 %vm1236_vm0, %v23961_v13 }
0x132f   : > { %17779 = vmatprep.mubr.msk.bf16.mxu1 %vm1236_vm0, %v23963_v50 }
0x1336   : > { %17780 = vmatmul.mubr.msk.bf16.gmra.mrb[96].mxu1 %vm1236_vm0, %v23971_v39 }
0x1337   : > { %17783 = vmatprep.mubr.msk.bf16.mxu1 %vm1236_vm0, %v24084_v20 }
0x133e   : > { %17784 = vmatmul.mubr.msk.bf16.gmra.mrb[100].mxu1 %vm1236_vm0, %v12958_v11 }
0x13d9   : > { %v17757_v26 = vpop.f32.mrb[72].mxu1 }
0x13da   : > { %v13225_v59 = vadd.f32 %v17757_v26, %v24174_v8  ;;  %v13057_v17 = vpop.f32.mrb[73].mxu1 }
0x13db   : > { %v13223_v13 = vadd.f32 %v24174_v8, %v13057_v17  ;;  %v17758_v50 = vpop.f32.mrb[74].mxu1 }
0x13dc   : > { %v13060_v39 = vpop.f32.mrb[75].mxu1  ;;  %v13226_v31 = vadd.f32 %v17758_v50, %v24174_v8  ;;  %v13257_v58 = vmax.f32 %v13225_v59, 0.0 }
0x13dd   : > { %v13255_v28 = vmax.f32 %v13223_v13, 0.0  ;;  %v13224_v20 = vadd.f32 %v24174_v8, %v13060_v39 }
0x13de   : > { %v13258_v42 = vmax.f32 %v13226_v31, 0.0  ;;  %v13289_v32 = vmin.f32 %v13257_v58, 6.0 }
0x13df   : > { %v13287_v47 = vmin.f32 %v13255_v28, 6.0  ;;  %v13256_v61 = vmax.f32 %v13224_v20, 0.0 }
0x13e0   : > { %v13290_v35 = vmin.f32 %v13258_v42, 6.0 }
0x13e1   : > { %v13288_v43 = vmin.f32 %v13256_v61, 6.0  ;;  %v17761_v51 = vpop.f32.mrb[76].mxu1  ;;  %17855 = vmatprep.mubr.msk.f32.mxu0 %vm1236_vm0, %v13287_v47 }
0x13e2   : > { %v13229_v22 = vadd.f32 %v17761_v51, %v24174_v8  ;;  %v13073_v34 = vpop.f32.mrb[77].mxu1 }
0x13e3   : > { %v13227_v6 = vadd.f32 %v24174_v8, %v13073_v34  ;;  %v17762_v56 = vpop.f32.mrb[78].mxu1  ;;  %17856 = vmatmul.mubr.msk.f32.vlgmr.msra.gmra.mrb[134].mxu0 %vm1236_vm0, %v13288_v43 }
0x13e4   : > { %v13076_v55 = vpop.f32.mrb[79].mxu1  ;;  %17858 = vmatprep.mubr.msk.f32.mxu0 %vm1236_vm0, %v13289_v32  ;;  %18102 = vmatpush3.bf16.msra.mxu0 %v18099_v25  ;;  %v13230_v63 = vadd.f32 %v17762_v56, %v24174_v8  ;;  %v13261_v53 = vmax.f32 %v13229_v22, 0.0 }
0x13e5   : > { %v13259_v21 = vmax.f32 %v13227_v6, 0.0  ;;  %v13228_v4 = vadd.f32 %v24174_v8, %v13076_v55  ;;  %18104 = vmatprep.subr.bf16.mxu0 %v18103_v30 }
0x13e6   : > { %v13262_v9 = vmax.f32 %v13230_v63, 0.0  ;;  %v13293_v38 = vmin.f32 %v13261_v53, 6.0 }
0x13e7   : > { %v13291_v14 = vmin.f32 %v13259_v21, 6.0  ;;  %v13260_v57 = vmax.f32 %v13228_v4, 0.0  ;;  %17859 = vmatmul.mubr.msk.f32.gmra.mrb[136].mxu0 %vm1236_vm0, %v13290_v35 }
0x13e8   : > { %18106 = vmatpush3.bf16.msra.mxu0 %v18103_v30  ;;  %v13294_v49 = vmin.f32 %v13262_v9, 6.0 }
0x13e9   : > { %v13292_v44 = vmin.f32 %v13260_v57, 6.0  ;;  %v17765_v40 = vpop.f32.mrb[80].mxu1  ;;  %17861 = vmatprep.mubr.msk.f32.mxu0 %vm1236_vm0, %v13291_v14 }
0x13ea   : > { %v13233_v45 = vadd.f32 %v17765_v40, %v24174_v8  ;;  %v13089_v1 = vpop.f32.mrb[81].mxu1 }
0x13eb   : > { %v13231_v48 = vadd.f32 %v24174_v8, %v13089_v1  ;;  %v17766_v23 = vpop.f32.mrb[82].mxu1  ;;  %17862 = vmatmul.mubr.msk.f32.gmra.mrb[138].mxu0 %vm1236_vm0, %v13292_v44 }
0x13ec   : > { %v13092_v15 = vpop.f32.mrb[83].mxu1  ;;  %17864 = vmatprep.mubr.msk.f32.mxu0 %vm1236_vm0, %v13293_v38  ;;  %v13234_v7 = vadd.f32 %v17766_v23, %v24174_v8  ;;  %v13265_v24 = vmax.f32 %v13233_v45, 0.0 }
0x13ed   : > { %v13263_v18 = vmax.f32 %v13231_v48, 0.0  ;;  %v13232_v27 = vadd.f32 %v24174_v8, %v13092_v15 }
0x13ee   : > { %v13266_v3 = vmax.f32 %v13234_v7, 0.0  ;;  %v13297_v19 = vmin.f32 %v13265_v24, 6.0 }
0x13ef   : > { %v13295_v54 = vmin.f32 %v13263_v18, 6.0  ;;  %v13264_v12 = vmax.f32 %v13232_v27, 0.0  ;;  %17865 = vmatmul.mubr.msk.f32.gmra.mrb[140].mxu0 %vm1236_vm0, %v13294_v49 }
0x13f0   : > { %v13298_v52 = vmin.f32 %v13266_v3, 6.0 }
0x13f1   : > { %v13296_v2 = vmin.f32 %v13264_v12, 6.0  ;;  %v17769_v37 = vpop.f32.mrb[84].mxu1  ;;  %17867 = vmatprep.mubr.msk.f32.mxu0 %vm1236_vm0, %v13295_v54 }
0x13f2   : > { %v13237_v60 = vadd.f32 %v17769_v37, %v24174_v8  ;;  %v13105_v33 = vpop.f32.mrb[85].mxu1 }
0x13f3   : > { %v13235_v16 = vadd.f32 %v24174_v8, %v13105_v33  ;;  %v17770_v36 = vpop.f32.mrb[86].mxu1  ;;  %17868 = vmatmul.mubr.msk.f32.gmra.mrb[142].mxu0 %vm1236_vm0, %v13296_v2 }
0x13f4   : > { %v13108_v46 = vpop.f32.mrb[87].mxu1  ;;  %17870 = vmatprep.mubr.msk.f32.mxu0 %vm1236_vm0, %v13297_v19  ;;  %v13238_v29 = vadd.f32 %v17770_v36, %v24174_v8  ;;  %v13269_v62 = vmax.f32 %v13237_v60, 0.0 }
0x13f5   : > { %v13267_v41 = vmax.f32 %v13235_v16, 0.0  ;;  %v13236_v11 = vadd.f32 %v24174_v8, %v13108_v46 }
0x13f6   : > { %v13270_v26 = vmax.f32 %v13238_v29, 0.0  ;;  %v13301_v13 = vmin.f32 %v13269_v62, 6.0 }
0x13f7   : > { %v13299_v0 = vmin.f32 %v13267_v41, 6.0  ;;  %v13268_v25 = vmax.f32 %v13236_v11, 0.0  ;;  %17871 = vmatmul.mubr.msk.f32.gmra.mrb[144].mxu0 %vm1236_vm0, %v13298_v52 }
0x13f8   : > { %v13302_v58 = vmin.f32 %v13270_v26, 6.0 }
0x13f9   : > { %v13300_v59 = vmin.f32 %v13268_v25, 6.0  ;;  %v17773_v17 = vpop.f32.mrb[88].mxu1  ;;  %17873 = vmatprep.mubr.msk.f32.mxu0 %vm1236_vm0, %v13299_v0 }
0x13fa   : > { %v13241_v50 = vadd.f32 %v17773_v17, %v24174_v8  ;;  %v13121_v39 = vpop.f32.mrb[89].mxu1 }
0x13fb   : > { %v13239_v28 = vadd.f32 %v24174_v8, %v13121_v39  ;;  %v17774_v31 = vpop.f32.mrb[90].mxu1  ;;  %17874 = vmatmul.mubr.msk.f32.gmra.mrb[146].mxu0 %vm1236_vm0, %v13300_v59  ;;  %v14471_v39 = vld [vmem:[%s20217_s17] sm:$0xff] }
0x13fc   : > { %v13124_v20 = vpop.f32.mrb[91].mxu1  ;;  %17876 = vmatprep.mubr.msk.f32.mxu0 %vm1236_vm0, %v13301_v13  ;;  %v13242_v5 = vadd.f32 %v17774_v31, %v24174_v8  ;;  %v13273_v61 = vmax.f32 %v13241_v50, 0.0  ;;  %v24242_v31 = vld [vmem:[#allocation24] ss:$0 sm:$0xff] }
0x13fd   : > { %v13271_v10 = vmax.f32 %v13239_v28, 0.0  ;;  %v13240_v47 = vadd.f32 %v24174_v8, %v13124_v20  ;;  %v14472_v28 = vld [vmem:[%s20217_s17 + $0x8] sm:$0xff] }
0x13fe   : > { %v13274_v51 = vmax.f32 %v13242_v5, 0.0  ;;  %v13305_v22 = vmin.f32 %v13273_v61, 6.0 }
0x13ff   : > { %v13303_v42 = vmin.f32 %v13271_v10, 6.0  ;;  %v13272_v43 = vmax.f32 %v13240_v47, 0.0  ;;  %17877 = vmatmul.mubr.msk.f32.gmra.mrb[148].mxu0 %vm1236_vm0, %v13302_v58 }
0x1400   : > { %v13306_v21 = vmin.f32 %v13274_v51, 6.0 }
0x1401   : > { %v13304_v30 = vmin.f32 %v13272_v43, 6.0  ;;  %v17777_v32 = vpop.f32.mrb[92].mxu1  ;;  %17879 = vmatprep.mubr.msk.f32.mxu0 %vm1236_vm0, %v13303_v42 }
0x1402   : > { %v13245_v34 = vadd.f32 %v17777_v32, %v24174_v8  ;;  %v13137_v6 = vpop.f32.mrb[93].mxu1 }
0x1403   : > { %v13243_v56 = vadd.f32 %v24174_v8, %v13137_v6  ;;  %v17778_v55 = vpop.f32.mrb[94].mxu1  ;;  %17880 = vmatmul.mubr.msk.f32.gmra.mrb[150].mxu0 %vm1236_vm0, %v13304_v30  ;;  %v14474_v6 = vld [vmem:[%s20217_s17 + $0x18] sm:$0xff] }
0x1404   : > { %v13140_v35 = vpop.f32.mrb[95].mxu1  ;;  %17882 = vmatprep.mubr.msk.f32.mxu0 %vm1236_vm0, %v13305_v22  ;;  %v13246_v4 = vadd.f32 %v17778_v55, %v24174_v8  ;;  %v13277_v14 = vmax.f32 %v13245_v34, 0.0  ;;  %v14473_v34 = vld [vmem:[%s20217_s17 + $0x10] sm:$0xff]  ;;  %v19394_v55 = vld [vmem:[%s20561_s11] sm:$0xff] }
0x1405   : > { %v13275_v63 = vmax.f32 %v13243_v56, 0.0  ;;  %v13244_v53 = vadd.f32 %v24174_v8, %v13140_v35 }
0x1406   : > { %v13278_v44 = vmax.f32 %v13246_v4, 0.0  ;;  %v13309_v45 = vmin.f32 %v13277_v14, 6.0  ;;  %v19395_v4 = vld [vmem:[%s20561_s11 + $0x8] sm:$0xff] }
0x1407   : > { %v13307_v57 = vmin.f32 %v13275_v63, 6.0  ;;  %v13276_v9 = vmax.f32 %v13244_v53, 0.0  ;;  %17883 = vmatmul.mubr.msk.f32.gmra.mrb[152].mxu0 %vm1236_vm0, %v13306_v21 }
0x1408   : > { %v13310_v18 = vmin.f32 %v13278_v44, 6.0  ;;  %v18111_v44 = vpack.c.bf16 %v14474_v6, %v14473_v34  ;;  %v19402_v34 = vld [vmem:[%s20561_s11 + $0x40] sm:$0xff] }
0x1409   : > { %v13308_v40 = vmin.f32 %v13276_v9, 6.0  ;;  %v17781_v38 = vpop.f32.mrb[96].mxu1  ;;  %17885 = vmatprep.mubr.msk.f32.mxu0 %vm1236_vm0, %v13307_v57 }
0x140a   : > { %v13249_v1 = vadd.f32 %v17781_v38, %v24174_v8  ;;  %v13153_v48 = vpop.f32.mrb[97].mxu1 }
0x140b   : > { %v13247_v23 = vadd.f32 %v24174_v8, %v13153_v48  ;;  %v17782_v15 = vpop.f32.mrb[98].mxu1  ;;  %17886 = vmatmul.mubr.msk.f32.gmra.mrb[154].mxu0 %vm1236_vm0, %v13308_v40 }
0x140c   : > { %v13156_v49 = vpop.f32.mrb[99].mxu1  ;;  %17888 = vmatprep.mubr.msk.f32.mxu0 %vm1236_vm0, %v13309_v45  ;;  %v13250_v27 = vadd.f32 %v17782_v15, %v24174_v8  ;;  %v13281_v54 = vmax.f32 %v13249_v1, 0.0  ;;  %v14475_v45 = vld [vmem:[%s20217_s17 + $0x20] sm:$0xff]  ;;  %v14476_v1 = vld [vmem:[%s20217_s17 + $0x28] sm:$0xff] }
0x140d   : > { %v13279_v7 = vmax.f32 %v13247_v23, 0.0  ;;  %v13248_v24 = vadd.f32 %v24174_v8, %v13156_v49  ;;  %v19396_v23 = vld [vmem:[%s20561_s11 + $0x10] sm:$0xff] }
0x140e   : > { %v13282_v2 = vmax.f32 %v13250_v27, 0.0  ;;  %v13313_v60 = vmin.f32 %v13281_v54, 6.0 }
0x140f   : > { %v13311_v12 = vmin.f32 %v13279_v7, 6.0  ;;  %v13280_v3 = vmax.f32 %v13248_v24, 0.0  ;;  %17889 = vmatmul.mubr.msk.f32.gmra.mrb[156].mxu0 %vm1236_vm0, %v13310_v18  ;;  %v19397_v7 = vld [vmem:[%s20561_s11 + $0x18] sm:$0xff] }
0x1410   : > { %v13314_v41 = vmin.f32 %v13282_v2, 6.0 }
0x1411   : > { %v13312_v37 = vmin.f32 %v13280_v3, 6.0  ;;  %v17785_v19 = vpop.f32.mrb[100].mxu1  ;;  %17891 = vmatprep.mubr.msk.f32.mxu0 %vm1236_vm0, %v13311_v12  ;;  %v18115_v3 = vpack.c.bf16 %v14476_v1, %v14475_v45  ;;  %v14484_v45 = vld [vmem:[%s20217_s17 + $0x68] sm:$0xff] }
0x1412   : > { %v13253_v33 = vadd.f32 %v17785_v19, %v24174_v8  ;;  %v13169_v16 = vpop.f32.mrb[101].mxu1  ;;  %v14477_v19 = vld [vmem:[%s20217_s17 + $0x30] sm:$0xff] }
0x1413   : > { %v13251_v36 = vadd.f32 %v24174_v8, %v13169_v16  ;;  %v17786_v46 = vpop.f32.mrb[102].mxu1  ;;  %17892 = vmatmul.mubr.msk.f32.gmra.mrb[158].mxu0 %vm1236_vm0, %v13312_v37  ;;  %v19398_v16 = vld [vmem:[%s20561_s11 + $0x20] sm:$0xff] }
0x1414   : > { %v13172_v52 = vpop.f32.mrb[103].mxu1  ;;  %17894 = vmatprep.mubr.msk.f32.mxu0 %vm1236_vm0, %v13313_v60  ;;  %v13254_v11 = vadd.f32 %v17786_v46, %v24174_v8  ;;  %v13285_v0 = vmax.f32 %v13253_v33, 0.0  ;;  %v14478_v60 = vld [vmem:[%s20217_s17 + $0x38] sm:$0xff] }
0x1415   : > { %v13283_v29 = vmax.f32 %v13251_v36, 0.0  ;;  %v13252_v62 = vadd.f32 %v24174_v8, %v13172_v52  ;;  %v18107_v8 = vpack.c.bf16 %v14472_v28, %v14471_v39  ;;  %v19400_v39 = vld [vmem:[%s20561_s11 + $0x30] sm:$0xff] }
0x1416   : > { %v13286_v59 = vmax.f32 %v13254_v11, 0.0  ;;  %v13317_v13 = vmin.f32 %v13285_v0, 6.0 }
0x1417   : > { %v13315_v25 = vmin.f32 %v13283_v29, 6.0  ;;  %v13284_v26 = vmax.f32 %v13252_v62, 0.0  ;;  %17895 = vmatmul.mubr.msk.f32.gmra.mrb[160].mxu0 %vm1236_vm0, %v13314_v41  ;;  %18108 = vmatprep.subr.bf16.mxu0 %v18107_v8  ;;  %v19399_v41 = vld [vmem:[%s20561_s11 + $0x28] sm:$0xff] }
0x1418   : > { %v13318_v50 = vmin.f32 %v13286_v59, 6.0 }
0x1419   : > { %v13316_v17 = vmin.f32 %v13284_v26, 6.0  ;;  %17897 = vmatprep.mubr.msk.f32.mxu0 %vm1236_vm0, %v13315_v25  ;;  %v18119_v25 = vpack.c.bf16 %v14478_v60, %v14477_v19 }
0x141b   : > { %17898 = vmatmul.mubr.msk.f32.gmra.mrb[162].mxu0 %vm1236_vm0, %v13316_v17  ;;  %v14479_v17 = vld [vmem:[%s20217_s17 + $0x40] sm:$0xff] }
0x141c   : > { %17900 = vmatprep.mubr.msk.f32.mxu0 %vm1236_vm0, %v13317_v13  ;;  %v14480_v13 = vld [vmem:[%s20217_s17 + $0x48] sm:$0xff] }
0x141f   : > { %17901 = vmatmul.mubr.msk.f32.gmra.mrb[164].mxu0 %vm1236_vm0, %v13318_v50 }
0x14b6   : > { %v17857_v20 = vpop.f32.mrb[134].mxu0 }
0x14b7   : > { %v13948_v58 = vadd.f32 %v17857_v20, %v24242_v31  ;;  %v13781_v10 = vpop.f32.mrb[135].mxu0 }
0x14b8   : > { %v13947_v5 = vadd.f32 %v24242_v31, %v13781_v10 }
0x14b9   : > { %v13980_v47 = vmax.f32 %v13948_v58, 0.0  ;;  %v19401_v58 = vld [vmem:[%s20561_s11 + $0x38] sm:$0xff] }
0x14ba   : > { %v13979_v61 = vmax.f32 %v13947_v5, 0.0  ;;  %v17860_v42 = vpop.f32.mrb[136].mxu0 }
0x14bb   : > { %v14012_v43 = vmin.f32 %v13980_v47, 6.0  ;;  %v13950_v51 = vadd.f32 %v17860_v42, %v24242_v31  ;;  %v13791_v30 = vpop.f32.mrb[137].mxu0  ;;  %v18123_v42 = vpack.c.bf16 %v14480_v13, %v14479_v17  ;;  %v19408_v13 = vld [vmem:[%s20561_s11 + $0x70] sm:$0xff] }
0x14bc   : > { %v14011_v32 = vmin.f32 %v13979_v61, 6.0  ;;  %v13949_v22 = vadd.f32 %v24242_v31, %v13791_v30  ;;  %v14481_v30 = vld [vmem:[%s20217_s17 + $0x50] sm:$0xff] }
0x14bd   : > { %v13982_v56 = vmax.f32 %v13950_v51, 0.0  ;;  %v24254_v53 = vadd.f32 %v19395_v4, %v14012_v43 }
0x14be   : > { %v24251_v35 = vadd.f32 %v19394_v55, %v14011_v32  ;;  %v13981_v21 = vmax.f32 %v13949_v22, 0.0  ;;  %v17863_v63 = vpop.f32.mrb[138].mxu0  ;;  %v14482_v32 = vld [vmem:[%s20217_s17 + $0x58] sm:$0xff] }
0x14bf   : > { %v14014_v14 = vmin.f32 %v13982_v56, 6.0  ;;  %v13952_v57 = vadd.f32 %v17863_v63, %v24242_v31  ;;  %v13801_v9 = vpop.f32.mrb[139].mxu0 }
0x14c0   : > { %v14013_v40 = vmin.f32 %v13981_v21, 6.0  ;;  %v13951_v38 = vadd.f32 %v24242_v31, %v13801_v9  ;;  %17911 = vmatprep.mubr.msk.f32.mxu0 %vm1236_vm0, %v24251_v35  ;;  %v19403_v21 = vld [vmem:[%s20561_s11 + $0x48] sm:$0xff]  ;;  %v18127_v9 = vpack.c.bf16 %v14482_v32, %v14481_v30  ;;  %v19410_v30 = vld [vmem:[%s20561_s11 + $0x80] sm:$0xff] }
0x14c1   : > { %v13984_v48 = vmax.f32 %v13952_v57, 0.0  ;;  %17912 = vmatmul.mubr.msk.f32.vlgmr.msra.gmra.mrb[166].mxu0 %vm1236_vm0, %v24254_v53  ;;  %v24268_v27 = vadd.f32 %v19397_v7, %v14014_v14  ;;  %v19405_v7 = vld [vmem:[%s20561_s11 + $0x58] sm:$0xff] }
0x14c2   : > { %v24265_v15 = vadd.f32 %v19396_v23, %v14013_v40  ;;  %v13983_v49 = vmax.f32 %v13951_v38, 0.0  ;;  %v17866_v18 = vpop.f32.mrb[140].mxu0  ;;  %18110 = vmatpush3.bf16.msra.mxu0 %v18107_v8  ;;  %v14483_v38 = vld [vmem:[%s20217_s17 + $0x60] sm:$0xff] }
0x14c3   : > { %v14016_v24 = vmin.f32 %v13984_v48, 6.0  ;;  %v13954_v54 = vadd.f32 %v17866_v18, %v24242_v31  ;;  %v13811_v12 = vpop.f32.mrb[141].mxu0  ;;  %18112 = vmatprep.subr.bf16.mxu0 %v18111_v44  ;;  %v19404_v48 = vld [vmem:[%s20561_s11 + $0x50] sm:$0xff] }
0x14c4   : > { %v14015_v2 = vmin.f32 %v13983_v49, 6.0  ;;  %v13953_v37 = vadd.f32 %v24242_v31, %v13811_v12  ;;  %17914 = vmatprep.mubr.msk.f32.mxu0 %vm1236_vm0, %v24265_v15 }
0x14c5   : > { %v13986_v33 = vmax.f32 %v13954_v54, 0.0  ;;  %17915 = vmatmul.mubr.msk.f32.gmra.mrb[168].mxu0 %vm1236_vm0, %v24268_v27  ;;  %v24282_v29 = vadd.f32 %v19399_v41, %v14016_v24  ;;  %v19407_v41 = vld [vmem:[%s20561_s11 + $0x68] sm:$0xff] }
0x14c6   : > { %v24279_v36 = vadd.f32 %v19398_v16, %v14015_v2  ;;  %v13985_v46 = vmax.f32 %v13953_v37, 0.0  ;;  %v17869_v52 = vpop.f32.mrb[142].mxu0  ;;  %18114 = vmatpush3.bf16.msra.mxu0 %v18111_v44  ;;  %v18131_v2 = vpack.c.bf16 %v14484_v45, %v14483_v38 }
0x14c7   : > { %v14018_v11 = vmin.f32 %v13986_v33, 6.0  ;;  %v13956_v62 = vadd.f32 %v17869_v52, %v24242_v31  ;;  %v13821_v0 = vpop.f32.mrb[143].mxu0  ;;  %18116 = vmatprep.subr.bf16.mxu0 %v18115_v3  ;;  %v19406_v33 = vld [vmem:[%s20561_s11 + $0x60] sm:$0xff] }
0x14c8   : > { %v14017_v26 = vmin.f32 %v13985_v46, 6.0  ;;  %v13955_v59 = vadd.f32 %v24242_v31, %v13821_v0  ;;  %17917 = vmatprep.mubr.msk.f32.mxu0 %vm1236_vm0, %v24279_v36 }
0x14c9   : > { %v13988_v50 = vmax.f32 %v13956_v62, 0.0  ;;  %17918 = vmatmul.mubr.msk.f32.gmra.mrb[170].mxu0 %vm1236_vm0, %v24282_v29  ;;  %v24296_v10 = vadd.f32 %v19401_v58, %v14018_v11 }
0x14ca   : > { %v24293_v28 = vadd.f32 %v19400_v39, %v14017_v26  ;;  %v13987_v8 = vmax.f32 %v13955_v59, 0.0  ;;  %v17872_v20 = vpop.f32.mrb[144].mxu0  ;;  %18118 = vmatpush3.bf16.msra.mxu0 %v18115_v3 }
0x14cb   : > { %v14020_v5 = vmin.f32 %v13988_v50, 6.0  ;;  %v13958_v47 = vadd.f32 %v17872_v20, %v24242_v31  ;;  %v13831_v61 = vpop.f32.mrb[145].mxu0  ;;  %18120 = vmatprep.subr.bf16.mxu0 %v18119_v25  ;;  %v19409_v20 = vld [vmem:[%s20561_s11 + $0x78] sm:$0xff] }
0x14cc   : > { %v14019_v43 = vmin.f32 %v13987_v8, 6.0  ;;  %v13957_v51 = vadd.f32 %v24242_v31, %v13831_v61  ;;  %17920 = vmatprep.mubr.msk.f32.mxu0 %vm1236_vm0, %v24293_v28 }
0x14cd   : > { %v13990_v22 = vmax.f32 %v13958_v47, 0.0  ;;  %17921 = vmatmul.mubr.msk.f32.gmra.mrb[172].mxu0 %vm1236_vm0, %v24296_v10  ;;  %v24310_v63 = vadd.f32 %v19403_v21, %v14020_v5 }
0x14ce   : > { %v24307_v6 = vadd.f32 %v19402_v34, %v14019_v43  ;;  %v13989_v56 = vmax.f32 %v13957_v51, 0.0  ;;  %v17875_v55 = vpop.f32.mrb[146].mxu0  ;;  %18122 = vmatpush3.bf16.msra.mxu0 %v18119_v25 }
0x14cf   : > { %v14022_v4 = vmin.f32 %v13990_v22, 6.0  ;;  %v13960_v14 = vadd.f32 %v17875_v55, %v24242_v31  ;;  %v13841_v57 = vpop.f32.mrb[147].mxu0  ;;  %18124 = vmatprep.subr.bf16.mxu0 %v18123_v42 }
0x14d0   : > { %v14021_v44 = vmin.f32 %v13989_v56, 6.0  ;;  %v13959_v40 = vadd.f32 %v24242_v31, %v13841_v57  ;;  %17923 = vmatprep.mubr.msk.f32.mxu0 %vm1236_vm0, %v24307_v6  ;;  %v19411_v56 = vld [vmem:[%s20561_s11 + $0x88] sm:$0xff] }
0x14d1   : > { %v13992_v1 = vmax.f32 %v13960_v14, 0.0  ;;  %17924 = vmatmul.mubr.msk.f32.gmra.mrb[174].mxu0 %vm1236_vm0, %v24310_v63  ;;  %v24324_v24 = vadd.f32 %v19405_v7, %v14022_v4 }
0x14d2   : > { %v24321_v23 = vadd.f32 %v19404_v48, %v14021_v44  ;;  %v13991_v49 = vmax.f32 %v13959_v40, 0.0  ;;  %v17878_v18 = vpop.f32.mrb[148].mxu0  ;;  %18126 = vmatpush3.bf16.msra.mxu0 %v18123_v42  ;;  %v19412_v40 = vld [vmem:[%s20561_s11 + $0x90] sm:$0xff]  ;;  %v19413_v48 = vld [vmem:[%s20561_s11 + $0x98] sm:$0xff] }
0x14d3   : > { %v14024_v54 = vmin.f32 %v13992_v1, 6.0  ;;  %v13962_v12 = vadd.f32 %v17878_v18, %v24242_v31  ;;  %v13851_v3 = vpop.f32.mrb[149].mxu0  ;;  %18128 = vmatprep.subr.bf16.mxu0 %v18127_v9 }
0x14d4   : > { %v14023_v37 = vmin.f32 %v13991_v49, 6.0  ;;  %v13961_v19 = vadd.f32 %v24242_v31, %v13851_v3  ;;  %17926 = vmatprep.mubr.msk.f32.mxu0 %vm1236_vm0, %v24321_v23 }
0x14d5   : > { %v13994_v60 = vmax.f32 %v13962_v12, 0.0  ;;  %17927 = vmatmul.mubr.msk.f32.gmra.mrb[176].mxu0 %vm1236_vm0, %v24324_v24  ;;  %v24336_v11 = vadd.f32 %v19407_v41, %v14024_v54 }
0x14d6   : > { %v24333_v16 = vadd.f32 %v19406_v33, %v14023_v37  ;;  %v13993_v46 = vmax.f32 %v13961_v19, 0.0  ;;  %v17881_v52 = vpop.f32.mrb[150].mxu0  ;;  %18130 = vmatpush3.bf16.msra.mxu0 %v18127_v9  ;;  %v19414_v37 = vld [vmem:[%s20561_s11 + $0xa0] sm:$0xff] }
0x14d7   : > { %v14026_v62 = vmin.f32 %v13994_v60, 6.0  ;;  %v13964_v0 = vadd.f32 %v17881_v52, %v24242_v31  ;;  %v13861_v25 = vpop.f32.mrb[151].mxu0  ;;  %18132 = vmatprep.subr.bf16.mxu0 %v18131_v2 }
0x14d8   : > { %v14025_v26 = vmin.f32 %v13993_v46, 6.0  ;;  %v13963_v59 = vadd.f32 %v24242_v31, %v13861_v25  ;;  %17929 = vmatprep.mubr.msk.f32.mxu0 %vm1236_vm0, %v24333_v16  ;;  %v19415_v46 = vld [vmem:[%s20561_s11 + $0xa8] sm:$0xff] }
0x14d9   : > { %v13996_v17 = vmax.f32 %v13964_v0, 0.0  ;;  %17930 = vmatmul.mubr.msk.f32.gmra.mrb[178].mxu0 %vm1236_vm0, %v24336_v11  ;;  %v24348_v58 = vadd.f32 %v19409_v20, %v14026_v62  ;;  %v19417_v20 = vld [vmem:[%s20561_s11 + $0xb8] sm:$0xff] }
0x14da   : > { %v24345_v50 = vadd.f32 %v19408_v13, %v14025_v26  ;;  %v13995_v39 = vmax.f32 %v13963_v59, 0.0  ;;  %v17884_v8 = vpop.f32.mrb[152].mxu0  ;;  %18134 = vmatpush3.bf16.msra.mxu0 %v18131_v2 }
0x14db   : > { %v14028_v5 = vmin.f32 %v13996_v17, 6.0  ;;  %v13966_v47 = vadd.f32 %v17884_v8, %v24242_v31  ;;  %v13871_v61 = vpop.f32.mrb[153].mxu0  ;;  %v19416_v17 = vld [vmem:[%s20561_s11 + $0xb0] sm:$0xff] }
0x14dc   : > { %v14027_v42 = vmin.f32 %v13995_v39, 6.0  ;;  %v13965_v43 = vadd.f32 %v24242_v31, %v13871_v61  ;;  %17932 = vmatprep.mubr.msk.f32.mxu0 %vm1236_vm0, %v24345_v50 }
0x14dd   : > { %v13998_v51 = vmax.f32 %v13966_v47, 0.0  ;;  %17933 = vmatmul.mubr.msk.f32.gmra.mrb[180].mxu0 %vm1236_vm0, %v24348_v58  ;;  %v24360_v55 = vadd.f32 %v19411_v56, %v14028_v5 }
0x14de   : > { %v24357_v32 = vadd.f32 %v19410_v30, %v14027_v42  ;;  %v13997_v22 = vmax.f32 %v13965_v43, 0.0  ;;  %v17887_v34 = vpop.f32.mrb[154].mxu0 }
0x14df   : > { %v14030_v21 = vmin.f32 %v13998_v51, 6.0  ;;  %v13968_v4 = vadd.f32 %v17887_v34, %v24242_v31  ;;  %v13881_v14 = vpop.f32.mrb[155].mxu0 }
0x14e0   : > { %v14029_v57 = vmin.f32 %v13997_v22, 6.0  ;;  %v13967_v9 = vadd.f32 %v24242_v31, %v13881_v14  ;;  %17935 = vmatprep.mubr.msk.f32.mxu0 %vm1236_vm0, %v24357_v32  ;;  %v19418_v22 = vld [vmem:[%s20561_s11 + $0xc0] sm:$0xff] }
0x14e1   : > { %v14000_v44 = vmax.f32 %v13968_v4, 0.0  ;;  %17936 = vmatmul.mubr.msk.f32.gmra.mrb[182].mxu0 %vm1236_vm0, %v24360_v55  ;;  %v24372_v49 = vadd.f32 %v19413_v48, %v14030_v21  ;;  %v19419_v4 = vld [vmem:[%s20561_s11 + $0xc8] sm:$0xff]  ;;  %v19420_v48 = vld [vmem:[%s20561_s11 + $0xd0] sm:$0xff] }
0x14e2   : > { %v24369_v38 = vadd.f32 %v19412_v40, %v14029_v57  ;;  %v13999_v45 = vmax.f32 %v13967_v9, 0.0  ;;  %v17890_v1 = vpop.f32.mrb[156].mxu0 }
0x14e3   : > { %v14032_v18 = vmin.f32 %v14000_v44, 6.0  ;;  %v13970_v7 = vadd.f32 %v17890_v1, %v24242_v31  ;;  %v13891_v54 = vpop.f32.mrb[157].mxu0 }
0x14e4   : > { %v14031_v12 = vmin.f32 %v13999_v45, 6.0  ;;  %v13969_v3 = vadd.f32 %v24242_v31, %v13891_v54  ;;  %17938 = vmatprep.mubr.msk.f32.mxu0 %vm1236_vm0, %v24369_v38 }
0x14e5   : > { %v14002_v2 = vmax.f32 %v13970_v7, 0.0  ;;  %17939 = vmatmul.mubr.msk.f32.gmra.mrb[184].mxu0 %vm1236_vm0, %v24372_v49  ;;  %v24384_v52 = vadd.f32 %v19415_v46, %v14032_v18 }
0x14e6   : > { %v24381_v19 = vadd.f32 %v19414_v37, %v14031_v12  ;;  %v14001_v60 = vmax.f32 %v13969_v3, 0.0  ;;  %v17893_v33 = vpop.f32.mrb[158].mxu0  ;;  %v19421_v12 = vld [vmem:[%s20561_s11 + $0xd8] sm:$0xff] }
0x14e7   : > { %v14034_v41 = vmin.f32 %v14002_v2, 6.0  ;;  %v13972_v62 = vadd.f32 %v17893_v33, %v24242_v31  ;;  %v13901_v0 = vpop.f32.mrb[159].mxu0 }
0x14e8   : > { %v14033_v25 = vmin.f32 %v14001_v60, 6.0  ;;  %v13971_v26 = vadd.f32 %v24242_v31, %v13901_v0  ;;  %17941 = vmatprep.mubr.msk.f32.mxu0 %vm1236_vm0, %v24381_v19 }
0x14e9   : > { %v14004_v59 = vmax.f32 %v13972_v62, 0.0  ;;  %17942 = vmatmul.mubr.msk.f32.gmra.mrb[186].mxu0 %vm1236_vm0, %v24384_v52  ;;  %v24396_v5 = vadd.f32 %v19417_v20, %v14034_v41  ;;  %v19422_v62 = vld [vmem:[%s20561_s11 + $0xe0] sm:$0xff]  ;;  %v19425_v20 = vld [vmem:[%s20561_s11 + $0xf8] sm:$0xff] }
0x14ea   : > { %v24393_v13 = vadd.f32 %v19416_v17, %v14033_v25  ;;  %v14003_v39 = vmax.f32 %v13971_v26, 0.0  ;;  %v17896_v8 = vpop.f32.mrb[160].mxu0  ;;  %v19423_v26 = vld [vmem:[%s20561_s11 + $0xe8] sm:$0xff] }
0x14eb   : > { %v14036_v47 = vmin.f32 %v14004_v59, 6.0  ;;  %v13974_v61 = vadd.f32 %v17896_v8, %v24242_v31  ;;  %v13911_v42 = vpop.f32.mrb[161].mxu0 }
0x14ec   : > { %v14035_v43 = vmin.f32 %v14003_v39, 6.0  ;;  %v13973_v51 = vadd.f32 %v24242_v31, %v13911_v42  ;;  %17944 = vmatprep.mubr.msk.f32.mxu0 %vm1236_vm0, %v24393_v13  ;;  %v14486_v42 = vld [vmem:[%s20217_s17 + $0x78] sm:$0xff] }
0x14ed   : > { %v14006_v30 = vmax.f32 %v13974_v61, 0.0  ;;  %17945 = vmatmul.mubr.msk.f32.gmra.mrb[188].mxu0 %vm1236_vm0, %v24396_v5  ;;  %v24408_v14 = vadd.f32 %v19419_v4, %v14036_v47  ;;  %v14485_v61 = vld [vmem:[%s20217_s17 + $0x70] sm:$0xff] }
0x14ee   : > { %v24405_v34 = vadd.f32 %v19418_v22, %v14035_v43  ;;  %v14005_v56 = vmax.f32 %v13973_v51, 0.0  ;;  %v17899_v21 = vpop.f32.mrb[162].mxu0  ;;  %v18135_v43 = vpack.c.bf16 %v14486_v42, %v14485_v61  ;;  %v24450_v51 = vld [vmem:[#allocation27] ss:$0 sm:$0xff] }
0x14ef   : > { %v14038_v57 = vmin.f32 %v14006_v30, 6.0  ;;  %v13976_v9 = vadd.f32 %v17899_v21, %v24242_v31  ;;  %v13921_v44 = vpop.f32.mrb[163].mxu0 }
0x14f0   : > { %v14037_v40 = vmin.f32 %v14005_v56, 6.0  ;;  %v13975_v45 = vadd.f32 %v24242_v31, %v13921_v44  ;;  %17947 = vmatprep.mubr.msk.f32.mxu0 %vm1236_vm0, %v24405_v34  ;;  %18136 = vmatprep.subr.bf16.mxu0 %v18135_v43 }
0x14f1   : > { %v14008_v1 = vmax.f32 %v13976_v9, 0.0  ;;  %17948 = vmatmul.mubr.msk.f32.gmra.mrb[190].mxu0 %vm1236_vm0, %v24408_v14  ;;  %v24420_v3 = vadd.f32 %v19421_v12, %v14038_v57 }
0x14f2   : > { %v24417_v18 = vadd.f32 %v19420_v48, %v14037_v40  ;;  %v14007_v7 = vmax.f32 %v13975_v45, 0.0  ;;  %v17902_v54 = vpop.f32.mrb[164].mxu0  ;;  %18138 = vmatpush3.bf16.msra.mxu0 %v18135_v43 }
0x14f3   : > { %v14040_v2 = vmin.f32 %v14008_v1, 6.0  ;;  %v13978_v37 = vadd.f32 %v17902_v54, %v24242_v31  ;;  %v13931_v60 = vpop.f32.mrb[165].mxu0 }
0x14f4   : > { %v14039_v33 = vmin.f32 %v14007_v7, 6.0  ;;  %v13977_v46 = vadd.f32 %v24242_v31, %v13931_v60  ;;  %17950 = vmatprep.mubr.msk.f32.mxu0 %vm1236_vm0, %v24417_v18  ;;  %v19424_v31 = vld [vmem:[%s20561_s11 + $0xf0] sm:$0xff]  ;;  %s24829_s11 = sand.u32 1, %s19992_s1  }
0x14f5   : > { %v14010_v41 = vmax.f32 %v13978_v37, 0.0  ;;  %17951 = vmatmul.mubr.msk.f32.gmra.mrb[192].mxu0 %vm1236_vm0, %v24420_v3  ;;  %v24432_v59 = vadd.f32 %v19423_v26, %v14040_v2  ;;  %s15105_s2 = sshll.u32 %s24829_s11, 8 }
0x14f6   : > { %v24429_v0 = vadd.f32 %v19422_v62, %v14039_v33  ;;  %v14009_v25 = vmax.f32 %v13977_v46, 0.0  ;;  %s24493_s7 = scalar_lea.vmem [#allocation30], %s15105_s2  ;;  %s25118_s2 = sld [smem:[#allocation67_spill]] }
0x14f7   : > { %v14042_v17 = vmin.f32 %v14010_v41, 6.0  ;;  %s14797_s11 = sshll.u32 %s24493_s7, 4  ;;  %s24619_s11 = int_to_ptr.vmem [resolvable:$true] %s14797_s11 }
0x14f8   : > { %v14041_v39 = vmin.f32 %v14009_v25, 6.0  ;;  %17953 = vmatprep.mubr.msk.f32.mxu0 %vm1236_vm0, %v24429_v0  ;;  %s19902_s5 = scalar_lea.vmem %s24619_s11, 4096  ;;  %p19909_p4 = scmp.lt.s32.totalorder %s24619_s11, %s19907_s6 }
0x14f9   : > { %17954 = vmatmul.mubr.msk.f32.gmra.mrb[194].mxu0 %vm1236_vm0, %v24432_v59  ;;  %v24442_v47 = vadd.f32 %v19425_v20, %v14042_v17  ;;  %p19903_p12 = scmp.ne.s32.totalorder %s24619_s11, %s19902_s5  ;;  %p19910_p7 = scmp.lt.s32.totalorder %s19908_s8, %s19902_s5 }
0x14fa   : > { %v24439_v8 = vadd.f32 %v19424_v31, %v14041_v39 }
0x14fb   : > { %p19911_p8 = por %p19910_p7, %p19909_p4 }
0x14fc   : > { %17956 = vmatprep.mubr.msk.f32.mxu0 %vm1236_vm0, %v24439_v8  ;;  %p25120_p1 = scmp.ne.s32.totalorder %s25118_s2, 0 }
0x14fd   : > { %17957 = vmatmul.mubr.msk.f32.gmra.mrb[196].mxu0 %vm1236_vm0, %v24442_v47 }
0x14fe   : > { %p19904_p2 = pnand %p19903_p12, %p25120_p1 }
0x1500   : > { %p19905_p3 = pneg %p19904_p2 }
0x1502   : > { %p19912_p11 = pnand %p19911_p8, %p19905_p3 }
0x1594   : > { %v17913_v30 = vpop.f32.mrb[166].mxu0 }
0x1595   : > { %v14254_v22 = vadd.f32 %v17913_v30, %v24450_v51  ;;  %v14248_v56 = vpop.f32.mrb[167].mxu0 }
0x1596   : > { %v14249_v21 = vadd.f32 %v24450_v51, %v14248_v56 }
0x1597   : > { %v14408_v4 = vmax.f32 %v14254_v22, 0.0 }
0x1598   : > { %v14407_v57 = vmax.f32 %v14249_v21, 0.0  ;;  %v17916_v9 = vpop.f32.mrb[168].mxu0 }
0x1599   : > { %v14264_v44 = vadd.f32 %v17916_v9, %v24450_v51  ;;  %v14258_v40 = vpop.f32.mrb[169].mxu0  ;;  %v14440_v48 = vmin.f32 %v14408_v4, 6.0 }
0x159a   : > { %v14439_v45 = vmin.f32 %v14407_v57, 6.0  ;;  %v14259_v1 = vadd.f32 %v24450_v51, %v14258_v40 }
0x159b   : > { %v14410_v7 = vmax.f32 %v14264_v44, 0.0 }
0x159c   : > { %v14409_v54 = vmax.f32 %v14259_v1, 0.0  ;;  %v17919_v12 = vpop.f32.mrb[170].mxu0  ;;  %17991 = vmatprep.mubr.f32.mxu0 %v14439_v45 }
0x159d   : > { %v14274_v2 = vadd.f32 %v17919_v12, %v24450_v51  ;;  %v14268_v37 = vpop.f32.mrb[171].mxu0  ;;  %17992 = vmatmul.mubr.f32.vlgmr.msra.gmra.mrb[198].mxu0 %v14440_v48  ;;  %v14442_v46 = vmin.f32 %v14410_v7, 6.0 }
0x159e   : > { %v14441_v60 = vmin.f32 %v14409_v54, 6.0  ;;  %v14269_v33 = vadd.f32 %v24450_v51, %v14268_v37 }
0x159f   : > { %v14412_v41 = vmax.f32 %v14274_v2, 0.0 }
0x15a0   : > { %v14411_v62 = vmax.f32 %v14269_v33, 0.0  ;;  %v17922_v25 = vpop.f32.mrb[172].mxu0  ;;  %17994 = vmatprep.mubr.f32.mxu0 %v14441_v60 }
0x15a1   : > { %v14284_v26 = vadd.f32 %v17922_v25, %v24450_v51  ;;  %v14278_v17 = vpop.f32.mrb[173].mxu0  ;;  %17995 = vmatmul.mubr.f32.gmra.mrb[200].mxu0 %v14442_v46  ;;  %v14444_v20 = vmin.f32 %v14412_v41, 6.0 }
0x15a2   : > { %v14443_v39 = vmin.f32 %v14411_v62, 6.0  ;;  %v14279_v31 = vadd.f32 %v24450_v51, %v14278_v17 }
0x15a3   : > { %v14414_v61 = vmax.f32 %v14284_v26, 0.0 }
0x15a4   : > { %v14413_v42 = vmax.f32 %v14279_v31, 0.0  ;;  %v17925_v43 = vpop.f32.mrb[174].mxu0  ;;  %17997 = vmatprep.mubr.f32.mxu0 %v14443_v39 }
0x15a5   : > { %v14294_v30 = vadd.f32 %v17925_v43, %v24450_v51  ;;  %v14288_v22 = vpop.f32.mrb[175].mxu0  ;;  %17998 = vmatmul.mubr.f32.gmra.mrb[202].mxu0 %v14444_v20  ;;  %v14446_v4 = vmin.f32 %v14414_v61, 6.0 }
0x15a6   : > { %v14445_v56 = vmin.f32 %v14413_v42, 6.0  ;;  %v14289_v21 = vadd.f32 %v24450_v51, %v14288_v22 }
0x15a7   : > { %v14416_v57 = vmax.f32 %v14294_v30, 0.0 }
0x15a8   : > { %v14415_v9 = vmax.f32 %v14289_v21, 0.0  ;;  %v17928_v44 = vpop.f32.mrb[176].mxu0  ;;  %18000 = vmatprep.mubr.f32.mxu0 %v14445_v56 }
0x15a9   : > { %v14304_v40 = vadd.f32 %v17928_v44, %v24450_v51  ;;  %v14298_v45 = vpop.f32.mrb[177].mxu0  ;;  %18001 = vmatmul.mubr.f32.gmra.mrb[204].mxu0 %v14446_v4  ;;  %v14448_v7 = vmin.f32 %v14416_v57, 6.0 }
0x15aa   : > { %v14447_v1 = vmin.f32 %v14415_v9, 6.0  ;;  %v14299_v48 = vadd.f32 %v24450_v51, %v14298_v45 }
0x15ab   : > { %v14418_v54 = vmax.f32 %v14304_v40, 0.0 }
0x15ac   : > { %v14417_v12 = vmax.f32 %v14299_v48, 0.0  ;;  %v17931_v2 = vpop.f32.mrb[178].mxu0  ;;  %18003 = vmatprep.mubr.f32.mxu0 %v14447_v1 }
0x15ad   : > { %v14314_v37 = vadd.f32 %v17931_v2, %v24450_v51  ;;  %v14308_v60 = vpop.f32.mrb[179].mxu0  ;;  %18004 = vmatmul.mubr.f32.gmra.mrb[206].mxu0 %v14448_v7  ;;  %v14450_v41 = vmin.f32 %v14418_v54, 6.0 }
0x15ae   : > { %v14449_v33 = vmin.f32 %v14417_v12, 6.0  ;;  %v14309_v46 = vadd.f32 %v24450_v51, %v14308_v60 }
0x15af   : > { %v14420_v62 = vmax.f32 %v14314_v37, 0.0 }
0x15b0   : > { %v14419_v25 = vmax.f32 %v14309_v46, 0.0  ;;  %v17934_v26 = vpop.f32.mrb[180].mxu0  ;;  %18006 = vmatprep.mubr.f32.mxu0 %v14449_v33 }
0x15b1   : > { %v14324_v17 = vadd.f32 %v17934_v26, %v24450_v51  ;;  %v14318_v39 = vpop.f32.mrb[181].mxu0  ;;  %18007 = vmatmul.mubr.f32.gmra.mrb[208].mxu0 %v14450_v41  ;;  %v14452_v61 = vmin.f32 %v14420_v62, 6.0 }
0x15b2   : > { %v14451_v31 = vmin.f32 %v14419_v25, 6.0  ;;  %v14319_v20 = vadd.f32 %v24450_v51, %v14318_v39 }
0x15b3   : > { %v14422_v42 = vmax.f32 %v14324_v17, 0.0 }
0x15b4   : > { %v14421_v43 = vmax.f32 %v14319_v20, 0.0  ;;  %v17937_v30 = vpop.f32.mrb[182].mxu0  ;;  %18009 = vmatprep.mubr.f32.mxu0 %v14451_v31 }
0x15b5   : > { %v14334_v22 = vadd.f32 %v17937_v30, %v24450_v51  ;;  %v14328_v56 = vpop.f32.mrb[183].mxu0  ;;  %18010 = vmatmul.mubr.f32.gmra.mrb[210].mxu0 %v14452_v61  ;;  %v14454_v57 = vmin.f32 %v14422_v42, 6.0 }
0x15b6   : > { %v14453_v21 = vmin.f32 %v14421_v43, 6.0  ;;  %v14329_v4 = vadd.f32 %v24450_v51, %v14328_v56 }
0x15b7   : > { %v14424_v9 = vmax.f32 %v14334_v22, 0.0 }
0x15b8   : > { %v14423_v44 = vmax.f32 %v14329_v4, 0.0  ;;  %v17940_v40 = vpop.f32.mrb[184].mxu0  ;;  %18012 = vmatprep.mubr.f32.mxu0 %v14453_v21 }
0x15b9   : > { %v14344_v45 = vadd.f32 %v17940_v40, %v24450_v51  ;;  %v14338_v1 = vpop.f32.mrb[185].mxu0  ;;  %18013 = vmatmul.mubr.f32.gmra.mrb[212].mxu0 %v14454_v57  ;;  %v14456_v54 = vmin.f32 %v14424_v9, 6.0 }
0x15ba   : > { %v14455_v48 = vmin.f32 %v14423_v44, 6.0  ;;  %v14339_v7 = vadd.f32 %v24450_v51, %v14338_v1 }
0x15bb   : > { %v14426_v12 = vmax.f32 %v14344_v45, 0.0 }
0x15bc   : > { %v14425_v2 = vmax.f32 %v14339_v7, 0.0  ;;  %v17943_v37 = vpop.f32.mrb[186].mxu0  ;;  %18015 = vmatprep.mubr.f32.mxu0 %v14455_v48 }
0x15bd   : > { %v14354_v60 = vadd.f32 %v17943_v37, %v24450_v51  ;;  %v14348_v33 = vpop.f32.mrb[187].mxu0  ;;  %18016 = vmatmul.mubr.f32.gmra.mrb[214].mxu0 %v14456_v54  ;;  %v14458_v62 = vmin.f32 %v14426_v12, 6.0 }
0x15be   : > { %v14457_v46 = vmin.f32 %v14425_v2, 6.0  ;;  %v14349_v41 = vadd.f32 %v24450_v51, %v14348_v33 }
0x15bf   : > { %v14428_v25 = vmax.f32 %v14354_v60, 0.0 }
0x15c0   : > { %v14427_v26 = vmax.f32 %v14349_v41, 0.0  ;;  %v17946_v17 = vpop.f32.mrb[188].mxu0  ;;  %18018 = vmatprep.mubr.f32.mxu0 %v14457_v46 }
0x15c1   : > { %v14364_v39 = vadd.f32 %v17946_v17, %v24450_v51  ;;  %v14358_v31 = vpop.f32.mrb[189].mxu0  ;;  %18019 = vmatmul.mubr.f32.gmra.mrb[216].mxu0 %v14458_v62  ;;  %v14460_v42 = vmin.f32 %v14428_v25, 6.0 }
0x15c2   : > { %v14459_v20 = vmin.f32 %v14427_v26, 6.0  ;;  %v14359_v61 = vadd.f32 %v24450_v51, %v14358_v31 }
0x15c3   : > { %v14430_v43 = vmax.f32 %v14364_v39, 0.0 }
0x15c4   : > { %v14429_v30 = vmax.f32 %v14359_v61, 0.0  ;;  %v17949_v22 = vpop.f32.mrb[190].mxu0  ;;  %18021 = vmatprep.mubr.f32.mxu0 %v14459_v20 }
0x15c5   : > { %v14374_v56 = vadd.f32 %v17949_v22, %v24450_v51  ;;  %v14368_v21 = vpop.f32.mrb[191].mxu0  ;;  %18022 = vmatmul.mubr.f32.gmra.mrb[218].mxu0 %v14460_v42  ;;  %v14462_v9 = vmin.f32 %v14430_v43, 6.0 }
0x15c6   : > { %v14461_v4 = vmin.f32 %v14429_v30, 6.0  ;;  %v14369_v57 = vadd.f32 %v24450_v51, %v14368_v21 }
0x15c7   : > { %v14432_v44 = vmax.f32 %v14374_v56, 0.0 }
0x15c8   : > { %v14431_v40 = vmax.f32 %v14369_v57, 0.0  ;;  %v17952_v45 = vpop.f32.mrb[192].mxu0  ;;  %18024 = vmatprep.mubr.f32.mxu0 %v14461_v4  ;;  %v24485_v4 = vld [vmem:[#allocation29] ss:$0 sm:$0xff] }
0x15c9   : > { %v14384_v1 = vadd.f32 %v17952_v45, %v24450_v51  ;;  %v14378_v48 = vpop.f32.mrb[193].mxu0  ;;  %18025 = vmatmul.mubr.f32.gmra.mrb[220].mxu0 %v14462_v9  ;;  %v14464_v12 = vmin.f32 %v14432_v44, 6.0 }
0x15ca   : > { %v14463_v7 = vmin.f32 %v14431_v40, 6.0  ;;  %v14379_v54 = vadd.f32 %v24450_v51, %v14378_v48 }
0x15cb   : > { %v14434_v2 = vmax.f32 %v14384_v1, 0.0 }
0x15cc   : > { %v14433_v37 = vmax.f32 %v14379_v54, 0.0  ;;  %v17955_v60 = vpop.f32.mrb[194].mxu0  ;;  %18027 = vmatprep.mubr.f32.mxu0 %v14463_v7 }
0x15cd   : > { %v14394_v33 = vadd.f32 %v17955_v60, %v24450_v51  ;;  %v14388_v46 = vpop.f32.mrb[195].mxu0  ;;  %18028 = vmatmul.mubr.f32.gmra.mrb[222].mxu0 %v14464_v12  ;;  %v14466_v25 = vmin.f32 %v14434_v2, 6.0 }
0x15ce   : > { %v14465_v41 = vmin.f32 %v14433_v37, 6.0  ;;  %v14389_v62 = vadd.f32 %v24450_v51, %v14388_v46 }
0x15cf   : > { %v14436_v26 = vmax.f32 %v14394_v33, 0.0 }
0x15d0   : > { %v14435_v17 = vmax.f32 %v14389_v62, 0.0  ;;  %v17958_v39 = vpop.f32.mrb[196].mxu0  ;;  %18030 = vmatprep.mubr.f32.mxu0 %v14465_v41 }
0x15d1   : > { %v14404_v31 = vadd.f32 %v17958_v39, %v24450_v51  ;;  %v14398_v20 = vpop.f32.mrb[197].mxu0  ;;  %18031 = vmatmul.mubr.f32.gmra.mrb[224].mxu0 %v14466_v25  ;;  %v14468_v43 = vmin.f32 %v14436_v26, 6.0 }
0x15d2   : > { %v14467_v61 = vmin.f32 %v14435_v17, 6.0  ;;  %v14399_v42 = vadd.f32 %v24450_v51, %v14398_v20 }
0x15d3   : > { %v14438_v30 = vmax.f32 %v14404_v31, 0.0 }
0x15d4   : > { %v14437_v22 = vmax.f32 %v14399_v42, 0.0  ;;  %18033 = vmatprep.mubr.f32.mxu0 %v14467_v61 }
0x15d5   : > { %18034 = vmatmul.mubr.f32.gmra.mrb[226].mxu0 %v14468_v43  ;;  %v14470_v21 = vmin.f32 %v14438_v30, 6.0 }
0x15d6   : > { %v14469_v56 = vmin.f32 %v14437_v22, 6.0 }
0x15d8   : > { %18036 = vmatprep.mubr.f32.mxu0 %v14469_v56 }
0x15d9   : > { %18037 = vmatmul.mubr.f32.gmra.mrb[228].mxu0 %v14470_v21 }
0x1670   : > { %v17993_v57 = vpop.f32.mrb[198].mxu0 }
0x1671   : > { %v14566_v9 = vadd.f32 %v17993_v57, %v24485_v4  ;;  %v14560_v44 = vpop.f32.mrb[199].mxu0 }
0x1672   : > { %v14561_v51 = vadd.f32 %v24485_v4, %v14560_v44 }
0x1673   : > { %v14720_v40 = vadd.f32 %v14566_v9, %v24254_v53 }
0x1674   : > { %v14719_v45 = vadd.f32 %v14561_v51, %v24251_v35  ;;  %v17996_v1 = vpop.f32.mrb[200].mxu0 }
0x1675   : > { %14752 = vst.msk [vmem:[%s24493_s7 + $0x8] sm:$0xff] %vm1236_vm0, %v14720_v40  ;;  %v14576_v48 = vadd.f32 %v17996_v1, %v24485_v4  ;;  %v14570_v7 = vpop.f32.mrb[201].mxu0 }
0x1676   : > { %14751 = vst.msk [vmem:[%s24493_s7] sm:$0xff] %vm1236_vm0, %v14719_v45  ;;  %v14571_v53 = vadd.f32 %v24485_v4, %v14570_v7 }
0x1677   : > { %v14722_v35 = vadd.f32 %v14576_v48, %v24268_v27 }
0x1678   : > { %v14721_v54 = vadd.f32 %v14571_v53, %v24265_v15  ;;  %v17999_v12 = vpop.f32.mrb[202].mxu0 }
0x1679   : > { %14754 = vst.msk [vmem:[%s24493_s7 + $0x18] sm:$0xff] %vm1236_vm0, %v14722_v35  ;;  %v14586_v2 = vadd.f32 %v17999_v12, %v24485_v4  ;;  %v14580_v37 = vpop.f32.mrb[203].mxu0 }
0x167a   : > { %14753 = vst.msk [vmem:[%s24493_s7 + $0x10] sm:$0xff] %vm1236_vm0, %v14721_v54  ;;  %v14581_v60 = vadd.f32 %v24485_v4, %v14580_v37 }
0x167b   : > { %v14724_v33 = vadd.f32 %v14586_v2, %v24282_v29 }
0x167c   : > { %v14723_v46 = vadd.f32 %v14581_v60, %v24279_v36  ;;  %v18002_v41 = vpop.f32.mrb[204].mxu0 }
0x167d   : > { %14756 = vst.msk [vmem:[%s24493_s7 + $0x28] sm:$0xff] %vm1236_vm0, %v14724_v33  ;;  %v14596_v15 = vadd.f32 %v18002_v41, %v24485_v4  ;;  %v14590_v27 = vpop.f32.mrb[205].mxu0 }
0x167e   : > { %14755 = vst.msk [vmem:[%s24493_s7 + $0x20] sm:$0xff] %vm1236_vm0, %v14723_v46  ;;  %v14591_v62 = vadd.f32 %v24485_v4, %v14590_v27 }
0x167f   : > { %v14726_v25 = vadd.f32 %v14596_v15, %v24296_v10 }
0x1680   : > { %v14725_v26 = vadd.f32 %v14591_v62, %v24293_v28  ;;  %v18005_v17 = vpop.f32.mrb[206].mxu0 }
0x1681   : > { %14758 = vst.msk [vmem:[%s24493_s7 + $0x38] sm:$0xff] %vm1236_vm0, %v14726_v25  ;;  %v14606_v36 = vadd.f32 %v18005_v17, %v24485_v4  ;;  %v14600_v29 = vpop.f32.mrb[207].mxu0 }
0x1682   : > { %14757 = vst.msk [vmem:[%s24493_s7 + $0x30] sm:$0xff] %vm1236_vm0, %v14725_v26  ;;  %v14601_v39 = vadd.f32 %v24485_v4, %v14600_v29 }
0x1683   : > { %v14728_v31 = vadd.f32 %v14606_v36, %v24310_v63 }
0x1684   : > { %v14727_v20 = vadd.f32 %v14601_v39, %v24307_v6  ;;  %v18008_v61 = vpop.f32.mrb[208].mxu0 }
0x1685   : > { %14760 = vst.msk [vmem:[%s24493_s7 + $0x48] sm:$0xff] %vm1236_vm0, %v14728_v31  ;;  %v14616_v28 = vadd.f32 %v18008_v61, %v24485_v4  ;;  %v14610_v10 = vpop.f32.mrb[209].mxu0 }
0x1686   : > { %14759 = vst.msk [vmem:[%s24493_s7 + $0x40] sm:$0xff] %vm1236_vm0, %v14727_v20  ;;  %v14611_v42 = vadd.f32 %v24485_v4, %v14610_v10 }
0x1687   : > { %v14730_v43 = vadd.f32 %v14616_v28, %v24324_v24 }
0x1688   : > { %v14729_v30 = vadd.f32 %v14611_v42, %v24321_v23  ;;  %v18011_v22 = vpop.f32.mrb[210].mxu0 }
0x1689   : > { %14762 = vst.msk [vmem:[%s24493_s7 + $0x58] sm:$0xff] %vm1236_vm0, %v14730_v43  ;;  %v14626_v6 = vadd.f32 %v18011_v22, %v24485_v4  ;;  %v14620_v63 = vpop.f32.mrb[211].mxu0 }
0x168a   : > { %14761 = vst.msk [vmem:[%s24493_s7 + $0x50] sm:$0xff] %vm1236_vm0, %v14729_v30  ;;  %v14621_v56 = vadd.f32 %v24485_v4, %v14620_v63 }
0x168b   : > { %v14732_v21 = vadd.f32 %v14626_v6, %v24336_v11 }
0x168c   : > { %v14731_v57 = vadd.f32 %v14621_v56, %v24333_v16  ;;  %v18014_v9 = vpop.f32.mrb[212].mxu0 }
0x168d   : > { %14764 = vst.msk [vmem:[%s24493_s7 + $0x68] sm:$0xff] %vm1236_vm0, %v14732_v21  ;;  %v14636_v23 = vadd.f32 %v18014_v9, %v24485_v4  ;;  %v14630_v24 = vpop.f32.mrb[213].mxu0 }
0x168e   : > { %14763 = vst.msk [vmem:[%s24493_s7 + $0x60] sm:$0xff] %vm1236_vm0, %v14731_v57  ;;  %v14631_v44 = vadd.f32 %v24485_v4, %v14630_v24 }
0x168f   : > { %v14734_v51 = vadd.f32 %v14636_v23, %v24348_v58 }
0x1690   : > { %v14733_v40 = vadd.f32 %v14631_v44, %v24345_v50  ;;  %v18017_v45 = vpop.f32.mrb[214].mxu0 }
0x1691   : > { %14766 = vst.msk [vmem:[%s24493_s7 + $0x78] sm:$0xff] %vm1236_vm0, %v14734_v51  ;;  %v14646_v16 = vadd.f32 %v18017_v45, %v24485_v4  ;;  %v14640_v11 = vpop.f32.mrb[215].mxu0 }
0x1692   : > { %14765 = vst.msk [vmem:[%s24493_s7 + $0x70] sm:$0xff] %vm1236_vm0, %v14733_v40  ;;  %v14641_v1 = vadd.f32 %v24485_v4, %v14640_v11 }
0x1693   : > { %v14736_v48 = vadd.f32 %v14646_v16, %v24360_v55 }
0x1694   : > { %v14735_v7 = vadd.f32 %v14641_v1, %v24357_v32  ;;  %v18020_v53 = vpop.f32.mrb[216].mxu0 }
0x1695   : > { %14768 = vst.msk [vmem:[%s24493_s7 + $0x88] sm:$0xff] %vm1236_vm0, %v14736_v48  ;;  %v14656_v50 = vadd.f32 %v18020_v53, %v24485_v4  ;;  %v14650_v58 = vpop.f32.mrb[217].mxu0 }
0x1696   : > { %14767 = vst.msk [vmem:[%s24493_s7 + $0x80] sm:$0xff] %vm1236_vm0, %v14735_v7  ;;  %v14651_v35 = vadd.f32 %v24485_v4, %v14650_v58 }
0x1697   : > { %v14738_v54 = vadd.f32 %v14656_v50, %v24372_v49 }
0x1698   : > { %v14737_v12 = vadd.f32 %v14651_v35, %v24369_v38  ;;  %v18023_v2 = vpop.f32.mrb[218].mxu0 }
0x1699   : > { %14770 = vst.msk [vmem:[%s24493_s7 + $0x98] sm:$0xff] %vm1236_vm0, %v14738_v54  ;;  %v14666_v32 = vadd.f32 %v18023_v2, %v24485_v4  ;;  %v14660_v55 = vpop.f32.mrb[219].mxu0 }
0x169a   : > { %14769 = vst.msk [vmem:[%s24493_s7 + $0x90] sm:$0xff] %vm1236_vm0, %v14737_v12  ;;  %v14661_v37 = vadd.f32 %v24485_v4, %v14660_v55 }
0x169b   : > { %v14740_v60 = vadd.f32 %v14666_v32, %v24384_v52 }
0x169c   : > { %v14739_v33 = vadd.f32 %v14661_v37, %v24381_v19  ;;  %v18026_v46 = vpop.f32.mrb[220].mxu0 }
0x169d   : > { %14772 = vst.msk [vmem:[%s24493_s7 + $0xa8] sm:$0xff] %vm1236_vm0, %v14740_v60  ;;  %v14676_v38 = vadd.f32 %v18026_v46, %v24485_v4  ;;  %v14670_v49 = vpop.f32.mrb[221].mxu0 }
0x169e   : > { %14771 = vst.msk [vmem:[%s24493_s7 + $0xa0] sm:$0xff] %vm1236_vm0, %v14739_v33  ;;  %v14671_v41 = vadd.f32 %v24485_v4, %v14670_v49 }
0x169f   : > { %v14742_v15 = vadd.f32 %v14676_v38, %v24396_v5 }
0x16a0   : > { %v14741_v27 = vadd.f32 %v14671_v41, %v24393_v13  ;;  %v18029_v62 = vpop.f32.mrb[222].mxu0 }
0x16a1   : > { %14774 = vst.msk [vmem:[%s24493_s7 + $0xb8] sm:$0xff] %vm1236_vm0, %v14742_v15  ;;  %v14686_v19 = vadd.f32 %v18029_v62, %v24485_v4  ;;  %v14680_v52 = vpop.f32.mrb[223].mxu0 }
0x16a2   : > { %14773 = vst.msk [vmem:[%s24493_s7 + $0xb0] sm:$0xff] %vm1236_vm0, %v14741_v27  ;;  %v14681_v25 = vadd.f32 %v24485_v4, %v14680_v52 }
0x16a3   : > { %v14744_v26 = vadd.f32 %v14686_v19, %v24408_v14 }
0x16a4   : > { %v14743_v17 = vadd.f32 %v14681_v25, %v24405_v34  ;;  %v18032_v36 = vpop.f32.mrb[224].mxu0 }
0x16a5   : > { %14776 = vst.msk [vmem:[%s24493_s7 + $0xc8] sm:$0xff] %vm1236_vm0, %v14744_v26  ;;  %v14696_v13 = vadd.f32 %v18032_v36, %v24485_v4  ;;  %v14690_v5 = vpop.f32.mrb[225].mxu0 }
0x16a6   : > { %14775 = vst.msk [vmem:[%s24493_s7 + $0xc0] sm:$0xff] %vm1236_vm0, %v14743_v17  ;;  %v14691_v29 = vadd.f32 %v24485_v4, %v14690_v5 }
0x16a7   : > { %v14746_v39 = vadd.f32 %v14696_v13, %v24420_v3 }
0x16a8   : > { %v14745_v14 = vadd.f32 %v14691_v29, %v24417_v18  ;;  %v18035_v31 = vpop.f32.mrb[226].mxu0 }
0x16a9   : > { %14778 = vst.msk [vmem:[%s24493_s7 + $0xd8] sm:$0xff] %vm1236_vm0, %v14746_v39  ;;  %v14706_v34 = vadd.f32 %v18035_v31, %v24485_v4  ;;  %v14700_v20 = vpop.f32.mrb[227].mxu0 }
0x16aa   : > { %14777 = vst.msk [vmem:[%s24493_s7 + $0xd0] sm:$0xff] %vm1236_vm0, %v14745_v14  ;;  %v14701_v61 = vadd.f32 %v24485_v4, %v14700_v20 }
0x16ab   : > { %v14748_v28 = vadd.f32 %v14706_v34, %v24432_v59 }
0x16ac   : > { %v14747_v3 = vadd.f32 %v14701_v61, %v24429_v0  ;;  %v18038_v10 = vpop.f32.mrb[228].mxu0 }
0x16ad   : > { %14780 = vst.msk [vmem:[%s24493_s7 + $0xe8] sm:$0xff] %vm1236_vm0, %v14748_v28  ;;  %v14716_v18 = vadd.f32 %v18038_v10, %v24485_v4  ;;  %v14710_v42 = vpop.f32.mrb[229].mxu0 }
0x16ae   : > { %14779 = vst.msk [vmem:[%s24493_s7 + $0xe0] sm:$0xff] %vm1236_vm0, %v14747_v3  ;;  %v14711_v43 = vadd.f32 %v24485_v4, %v14710_v42 }
0x16af   : > { %v14750_v30 = vadd.f32 %v14716_v18, %v24442_v47 }
0x16b0   : > { %v14749_v0 = vadd.f32 %v14711_v43, %v24439_v8 }
0x16b1   : > { %14782 = vst.msk [vmem:[%s24493_s7 + $0xf8] sm:$0xff] %vm1236_vm0, %v14750_v30 }
0x16b2   : > { %14781 = vst.msk [vmem:[%s24493_s7 + $0xf0] sm:$0xff] %vm1236_vm0, %v14749_v0 }
0x16b3   : > { %19915 = shalt.err (!%p19912_p11)
}
0x16b4   : > { %s19916_s7 = scalar_lea.hbm %s24617_s3, 4096  ;;  %s19920_s0 = scalar_lea.hbm %s20227_s13, 8192 }
0x16b5   : > { %p19917_p13 = scmp.ne.s32.totalorder %s24617_s3, %s19916_s7  ;;  %p19921_p0 = scmp.lt.u32.totalorder %s24617_s3, %s20227_s13 }
0x16b6   : > { %p19922_p9 = scmp.lt.u32.totalorder %s19920_s0, %s19916_s7  ;;  %p19924_p12 = scmp.lt.u32.totalorder %s19916_s7, %s24617_s3 }
0x16b7   : > { %p19918_p6 = pnand %p19917_p13, %p25120_p1 }
0x16b8   : > { %p19923_p10 = por %p19922_p9, %p19921_p0 }
0x16b9   : > { %p19919_p5 = pneg %p19918_p6 }
0x16ba   : > { %p19925_p2 = por %p19924_p12, %p19923_p10 }
0x16bc   : > { %p19926_p3 = pnand %p19925_p2, %p19919_p5 }
0x16be   : > { %19929 = shalt.err (!%p19926_p3)
}
0x16bf   : > { %s20057_s5 = smov 128   ;;  %s20058_s6 = smov 8  }
0x16c0   : > { %19007 = dma.vmem_to_hbm [thread:$0]  (%p25120_p1), %s24619_s11, 4096, %s24617_s3, %s24628_s4, %s20057_s5, %s20057_s5, %s20058_s6  }
0x16c1 PF: > { %s25121_s8 = sld [smem:[#allocation64_spill]]  ;;  %s25122_s28 = sld [smem:[#allocation62_spill]] }
0x16c2   : > { %s25123_s9 = sld [smem:[#allocation68_spill]] }
0x16c7   : > { %p19099_p4 = scmp.ge.s32.totalorder %s25121_s8, 2  ;;  %s14812_s10 = sand.u32 1, %s25122_s28  }
0x16c8   : > { %p25124_p7 = scmp.ne.s32.totalorder %s25123_s9, 0  ;;  %s14813_s7 = scalar_lea.sflag [#allocation5], %s14812_s10 }
0x16ca   : > { %p19062_p8 = pnand %p19099_p4, %p25124_p7 }
0x16cc   : > { %19983 = dma.done.wait (!%p19062_p8), %s14813_s7, 4096  }
0x16cd   : > { %19985 = vsyncadd (!%p19062_p8), %s14813_s7, 4294963200  ;;  %s25125_s7 = sld [smem:[#allocation65_spill]]  ;;  %s25126_s0 = sld [smem:[#allocation63_spill]] }
0x16ce   : > { %s25127_s2 = sld [smem:[#allocation66_spill]]  ;;  %s25128_s28 = smov %s19992_s1 }
0x16d3   : > { %p84_p11 = scmp.ge.s32.totalorder %s25125_s7, 4   ;;  %s25129_s1 = smov %s25126_s0 }
0x16d5   :  { %86 = sbr.rel (!%p84_p11) target bundleno = 70 (0x46), region = 287 }
0x16dc   :  { %14818 = vsyncpa [#allocation4], 1 }
0x16dd   :  { %14820 = vsyncpa [#allocation4 + $0x1], 1 }
0x16de   :  { %14821 = vsyncpa [#allocation7], 1 }
0x16df   :  { %14822 = vsyncpa [#allocation10], 1 }
0x16e0   :  { %14823 = vsyncpa [#allocation13], 1 }
0x16e1   :  { %14824 = vsyncpa [#allocation16], 1 }
0x16e2   :  { %14825 = vsyncpa [#allocation19], 1 }
0x16e3   :  { %14826 = vsyncpa [#allocation22], 1 }
0x16e4   :  { %14827 = vsyncpa [#allocation25], 1 }
0x16e5   :  { %14828 = vsyncpa [#allocation28], 1 }
0x16e6   :  { %14829 = vsyncpa [#allocation5], 1 }
0x16e7   :  { %14831 = vsyncpa [#allocation5 + $0x1], 1 }

</bundles_post_ra>
